<compile_context>
chip_gen: v6e
topology: v6e:2x2x1
jax: 0.10.0
libtpu: 0.0.40
codegen_flags: <defaults>
</compile_context>

<pallas_src>
import functools

import jax
import jax.numpy as jnp
from jax.experimental import pallas as pl
from jax.experimental.pallas import tpu as pltpu


def _round_up(x, m):
    return ((x + m - 1) // m) * m


# ----------------------------------------------------------------------------
# Pallas kernels
# ----------------------------------------------------------------------------

def _mm_fused_kernel(a_ref, b_ref, s_ref, c_ref, o_ref, acc_ref, *, relu):
    """Grouped/tiled matmul, f32 accumulator, fused scale/bias(+ReLU) epilogue, bf16 output.
    Grid = (G, M/tm, N/tn, K/tk); K innermost ("arbitrary")."""
    @pl.when(pl.program_id(3) == 0)
    def _():
        acc_ref[...] = jnp.zeros_like(acc_ref)

    acc_ref[...] += jnp.dot(a_ref[0], b_ref[0],
                            preferred_element_type=jnp.float32)

    @pl.when(pl.program_id(3) == pl.num_programs(3) - 1)
    def _():
        acc = acc_ref[...] * s_ref[0] + c_ref[0]
        if relu:
            acc = jnp.maximum(acc, 0.0)
        o_ref[0] = acc.astype(o_ref.dtype)


def _maxpool_parity_kernel(ee_ref, eo_ref, oe_ref, oo_ref, o_ref):
    """3x3 stride-2 max-pool.  Inputs are the four parity planes of the (-inf)-padded map,
    so only contiguous slices are needed in-kernel and the output is written at stride-2
    resolution directly (no 4x oversized intermediate).  Runs in the input dtype (bf16)."""
    ho = o_ref.shape[1]
    wo = o_ref.shape[2]
    ee = ee_ref[...]
    eo = eo_ref[...]
    oe = oe_ref[...]
    oo = oo_ref[...]
    m = oo[:, :ho, :wo, :]
    for a in range(2):
        for b in range(2):
            m = jnp.maximum(m, ee[:, a:a + ho, b:b + wo, :])
    for a in range(2):
        m = jnp.maximum(m, eo[:, a:a + ho, :wo, :])
    for b in range(2):
        m = jnp.maximum(m, oe[:, :ho, b:b + wo, :])
    o_ref[...] = m


def _nl_reduce_kernel(x_ref, wgp_ref, bgp_ref, s_ref, *, hw_total, thw):
    """Non_local pass 1 (inter_channels == 1): s = sum(phi_x * g_x) / HW per batch element.
    HW axis is tiled ("arbitrary"); padded rows are masked out."""
    j = pl.program_id(1)

    @pl.when(j == 0)
    def _():
        s_ref[...] = jnp.zeros_like(s_ref)

    x = x_ref[0]                                                   # (thw, C) bf16
    proj = jnp.dot(x, wgp_ref[...],
                   preferred_element_type=jnp.float32) + bgp_ref[...]   # (thw, 2): [g, phi]
    rows = jax.lax.broadcasted_iota(jnp.int32, (x.shape[0], 1), 0) + j * thw
    gp = jnp.where(rows < hw_total, proj[:, 0:1] * proj[:, 1:2], 0.0)
    s_ref[...] = s_ref[...] + jnp.sum(gp)

    @pl.when(j == pl.num_programs(1) - 1)
    def _():
        s_ref[...] = s_ref[...] * (1.0 / hw_total)


def _nl_apply_kernel(x_ref, s_ref, wth_ref, bth_ref, ww_ref, bw_ref, o_ref):
    """Non_local pass 2: z = W(theta_x * s) (BN folded into ww/bw) + x, tiled over HW."""
    xb = x_ref[0]                                                  # (thw, C) bf16
    th = jnp.dot(xb, wth_ref[...],
                 preferred_element_type=jnp.float32) + bth_ref[...]     # (thw, 1)
    y = th * s_ref[0]                                              # (thw, 1)
    wy = y * ww_ref[...] + bw_ref[...]                             # (thw, C), BN already folded
    o_ref[0] = (wy + xb.astype(jnp.float32)).astype(o_ref.dtype)


def _head_kernel(x_ref, s_ref, b_ref, w_ref, cls_ref, feat_ref, norm_ref, acc_ref,
                 *, hw_total, thw):
    """Fused GeM pooling (p=3, eps=1e-6) + bottleneck BN1d + bias-free classifier + L2 norm.
    Grid = (batch tiles ["parallel"], HW tiles ["arbitrary"]); f32 scratch accumulator."""
    j = pl.program_id(1)

    @pl.when(j == 0)
    def _():
        acc_ref[...] = jnp.zeros_like(acc_ref)

    x = jnp.maximum(x_ref[...].astype(jnp.float32), 1e-6)          # (tb, thw, C)
    rows = jax.lax.broadcasted_iota(jnp.int32, (1, x.shape[1], 1), 1) + j * thw
    cube = jnp.where(rows < hw_total, x * x * x, 0.0)               # cube on VPU, not float-pow
    acc_ref[...] += jnp.sum(cube, axis=1)                           # (tb, C)

    @pl.when(j == pl.num_programs(1) - 1)
    def _():
        m = jnp.maximum(acc_ref[...] * (1.0 / hw_total), 1e-30)
        feat = jnp.exp(jnp.log(m) * (1.0 / 3.0))                    # GeM, p = 3
        feat_ref[...] = feat
        xb = feat * s_ref[...] + b_ref[...]
        cls_ref[...] = jnp.dot(xb.astype(jnp.bfloat16), w_ref[...],
                               preferred_element_type=jnp.float32)  # (tb, Npad) lane-dense
        nrm = jnp.sqrt(jnp.sum(feat * feat, axis=1, keepdims=True))
        norm_ref[...] = feat / jnp.maximum(nrm, 1e-12)


# ----------------------------------------------------------------------------
# Wrappers around pallas_call
# ----------------------------------------------------------------------------

def pallas_matmul_fused(a, b, scale=None, bias=None, relu=False, trim_n=True,
                        tm=512, tn=512, tk=512, out_dtype=jnp.bfloat16):
    """out = relu((a @ b) * scale + bias) per group; bf16 operands, f32 accumulation, bf16 out.
    a: (M, K) or (G, M, K); b: (K, N) or (G, K, N); scale/bias: (N,) or (G, N)."""
    squeeze = (a.ndim == 2)
    if squeeze:
        a = a[None]
        b = b[None]
        if scale is not None:
            scale = scale[None]
        if bias is not None:
            bias = bias[None]
    G, M, K = a.shape
    _, _, N = b.shape

    tm = min(tm, _round_up(M, 16))
    tn = min(tn, _round_up(N, 128))
    tk = min(tk, _round_up(K, 128))
    Mp, Kp, Np = _round_up(M, tm), _round_up(K, tk), _round_up(N, tn)

    a_p = a.astype(jnp.bfloat16)
    if (Mp, Kp) != (M, K):
        a_p = jnp.pad(a_p, ((0, 0), (0, Mp - M), (0, Kp - K)))
    b_p = b.astype(jnp.bfloat16)
    if (Kp, Np) != (K, N):
        b_p = jnp.pad(b_p, ((0, 0), (0, Kp - K), (0, Np - N)))
    if scale is None:
        s_p = jnp.ones((G, 1, Np), jnp.float32)
    else:
        s_p = jnp.pad(scale.astype(jnp.float32).reshape(G, 1, N),
                      ((0, 0), (0, 0), (0, Np - N)))
    if bias is None:
        c_p = jnp.zeros((G, 1, Np), jnp.float32)
    else:
        c_p = jnp.pad(bias.astype(jnp.float32).reshape(G, 1, N),
                      ((0, 0), (0, 0), (0, Np - N)))

    grid = (G, Mp // tm, Np // tn, Kp // tk)
    out = pl.pallas_call(
        functools.partial(_mm_fused_kernel, relu=relu),
        grid=grid,
        in_specs=[pl.BlockSpec((1, tm, tk), lambda g, i, j, k: (g, i, k)),
                  pl.BlockSpec((1, tk, tn), lambda g, i, j, k: (g, k, j)),
                  pl.BlockSpec((1, 1, tn), lambda g, i, j, k: (g, 0, j)),
                  pl.BlockSpec((1, 1, tn), lambda g, i, j, k: (g, 0, j))],
        out_specs=pl.BlockSpec((1, tm, tn), lambda g, i, j, k: (g, i, j)),
        out_shape=jax.ShapeDtypeStruct((G, Mp, Np), out_dtype),
        scratch_shapes=[pltpu.VMEM((tm, tn), jnp.float32)],
        compiler_params=pltpu.CompilerParams(
            dimension_semantics=("parallel", "parallel", "parallel", "arbitrary"),
            vmem_limit_bytes=32 * 1024 * 1024),
    )(a_p, b_p, s_p, c_p)

    out = out[:, :M]
    if trim_n:
        out = out[:, :, :N]
    if squeeze:
        out = out[0]
    return out


def pallas_maxpool3x3_s2(y_nhwc):
    """MaxPool2d(kernel=3, stride=2, padding=1), channels-last, batch-parallel grid, bf16."""
    b, h, w, c = y_nhwc.shape
    ho = (h - 1) // 2 + 1
    wo = (w - 1) // 2 + 1
    yp = jnp.pad(y_nhwc, ((0, 0), (1, 1), (1, 1), (0, 0)), constant_values=-jnp.inf)
    ee = yp[:, 0::2, 0::2, :][:, :ho + 1, :wo + 1, :]
    eo = yp[:, 0::2, 1::2, :][:, :ho + 1, :wo, :]
    oe = yp[:, 1::2, 0::2, :][:, :ho, :wo + 1, :]
    oo = yp[:, 1::2, 1::2, :][:, :ho, :wo, :]
    return pl.pallas_call(
        _maxpool_parity_kernel,
        grid=(b,),
        in_specs=[pl.BlockSpec((1, ho + 1, wo + 1, c), lambda i: (i, 0, 0, 0)),
                  pl.BlockSpec((1, ho + 1, wo, c), lambda i: (i, 0, 0, 0)),
                  pl.BlockSpec((1, ho, wo + 1, c), lambda i: (i, 0, 0, 0)),
                  pl.BlockSpec((1, ho, wo, c), lambda i: (i, 0, 0, 0))],
        out_specs=pl.BlockSpec((1, ho, wo, c), lambda i: (i, 0, 0, 0)),
        out_shape=jax.ShapeDtypeStruct((b, ho, wo, c), y_nhwc.dtype),
        compiler_params=pltpu.CompilerParams(
            dimension_semantics=("parallel",),
            vmem_limit_bytes=32 * 1024 * 1024),
    )(ee, eo, oe, oo)


def pallas_non_local(x_nhwc, p):
    """Non_local block with inter_channels == 1, tiled over HW (two passes)."""
    b, h, w, c = x_nhwc.shape
    hw = h * w
    x = x_nhwc.reshape(b, hw, c).astype(jnp.bfloat16)
    thw = min(512, _round_up(hw, 16))
    hwp = _round_up(hw, thw)
    if hwp != hw:
        x = jnp.pad(x, ((0, 0), (0, hwp - hw), (0, 0)))

    # Fold the trailing BatchNorm2d of W into the 1x1 conv (both are affine).
    bn_scale = p['bn_gamma'] / jnp.sqrt(p['bn_var'] + 1e-5)
    bn_bias = p['bn_beta'] - p['bn_mean'] * bn_scale
    ww = (p['wW'] * bn_scale).astype(jnp.float32)                  # (1, C)
    bw = (p['bW'] * bn_scale + bn_bias).astype(jnp.float32)        # (1, C)
    wgp = jnp.concatenate([p['wg'], p['wph']], axis=0).T.astype(jnp.bfloat16)   # (C, 2)
    bgp = jnp.concatenate([p['bg'], p['bph']], axis=1).astype(jnp.float32)      # (1, 2)
    wth = p['wth'].T.astype(jnp.bfloat16)                          # (C, 1)
    bth = p['bth'].astype(jnp.float32)                             # (1, 1)

    grid = (b, hwp // thw)

    # Pass 1: per-batch scalar s = sum(phi * g) / HW   (output (b, 1, 1), resident accumulator)
    s = pl.pallas_call(
        functools.partial(_nl_reduce_kernel, hw_total=hw, thw=thw),
        grid=grid,
        in_specs=[pl.BlockSpec((1, thw, c), lambda i, j: (i, j, 0)),
                  pl.BlockSpec((c, 2), lambda i, j: (0, 0)),
                  pl.BlockSpec((1, 2), lambda i, j: (0, 0))],
        out_specs=pl.BlockSpec((1, 1, 1), lambda i, j: (i, 0, 0)),
        out_shape=jax.ShapeDtypeStruct((b, 1, 1), jnp.float32),
        compiler_params=pltpu.CompilerParams(
            dimension_semantics=("parallel", "arbitrary"),
            vmem_limit_bytes=32 * 1024 * 1024),
    )(x, wgp, bgp)

    # Pass 2: z = W(theta * s) + x  (theta recomputed per tile; x tile is needed anyway)
    out = pl.pallas_call(
        _nl_apply_kernel,
        grid=grid,
        in_specs=[pl.BlockSpec((1, thw, c), lambda i, j: (i, j, 0)),
                  pl.BlockSpec((1, 1, 1), lambda i, j: (i, 0, 0)),
                  pl.BlockSpec((c, 1), lambda i, j: (0, 0)),
                  pl.BlockSpec((1, 1), lambda i, j: (0, 0)),
                  pl.BlockSpec((1, c), lambda i, j: (0, 0)),
                  pl.BlockSpec((1, c), lambda i, j: (0, 0))],
        out_specs=pl.BlockSpec((1, thw, c), lambda i, j: (i, j, 0)),
        out_shape=jax.ShapeDtypeStruct((b, hwp, c), jnp.bfloat16),
        compiler_params=pltpu.CompilerParams(
            dimension_semantics=("parallel", "parallel"),
            vmem_limit_bytes=32 * 1024 * 1024),
    )(x, s, wth, bth, ww, bw)
    return out[:, :hw].reshape(b, h, w, c)


def pallas_head(feat_nhwc, bneck_scale, bneck_bias, cls_w_t, class_num):
    """GeM pool + BN1d bottleneck + classifier (padded to 128 lanes) + L2 norm, gridded."""
    b, h, w, c = feat_nhwc.shape
    hw = h * w
    x = feat_nhwc.reshape(b, hw, c).astype(jnp.bfloat16)

    thw = min(128, _round_up(hw, 16))
    hwp = _round_up(hw, thw)
    if hwp != hw:
        x = jnp.pad(x, ((0, 0), (0, hwp - hw), (0, 0)))
    tb = b if b <= 8 else 8
    bp = _round_up(b, tb)
    if bp != b:
        x = jnp.pad(x, ((0, bp - b), (0, 0), (0, 0)))

    n_pad = _round_up(max(class_num, 1), 128)
    w_pad = jnp.pad(cls_w_t, ((0, 0), (0, n_pad - cls_w_t.shape[1]))).astype(jnp.bfloat16)
    s = bneck_scale.reshape(1, c).astype(jnp.float32)
    bi = bneck_bias.reshape(1, c).astype(jnp.float32)

    grid = (bp // tb, hwp // thw)
    cls, feat, feat_norm = pl.pallas_call(
        functools.partial(_head_kernel, hw_total=hw, thw=thw),
        grid=grid,
        in_specs=[pl.BlockSpec((tb, thw, c), lambda i, j: (i, j, 0)),
                  pl.BlockSpec((1, c), lambda i, j: (0, 0)),
                  pl.BlockSpec((1, c), lambda i, j: (0, 0)),
                  pl.BlockSpec((c, n_pad), lambda i, j: (0, 0))],
        out_specs=(pl.BlockSpec((tb, n_pad), lambda i, j: (i, 0)),
                   pl.BlockSpec((tb, c), lambda i, j: (i, 0)),
                   pl.BlockSpec((tb, c), lambda i, j: (i, 0))),
        out_shape=(jax.ShapeDtypeStruct((bp, n_pad), jnp.float32),
                   jax.ShapeDtypeStruct((bp, c), jnp.float32),
                   jax.ShapeDtypeStruct((bp, c), jnp.float32)),
        scratch_shapes=[pltpu.VMEM((tb, c), jnp.float32)],
        compiler_params=pltpu.CompilerParams(
            dimension_semantics=("parallel", "arbitrary"),
            vmem_limit_bytes=32 * 1024 * 1024),
    )(x, s, bi, w_pad)
    return cls[:b, :class_num], feat[:b], feat_norm[:b]


# ----------------------------------------------------------------------------
# Module forwards (glue: NHWC im2col, padding, reshapes)
# ----------------------------------------------------------------------------

def _stem_im2col(x_nchw):
    """Cast to bf16 BEFORE im2col (halves the 49x-expanded HBM traffic), NHWC order."""
    x = jnp.transpose(x_nchw, (0, 2, 3, 1)).astype(jnp.bfloat16)
    b, h, w, cin = x.shape
    h1 = (h + 6 - 7) // 2 + 1
    w1 = (w + 6 - 7) // 2 + 1
    xp = jnp.pad(x, ((0, 0), (3, 3), (3, 3), (0, 0)))
    cols = []
    for di in range(7):
        for dj in range(7):
            cols.append(xp[:, di:di + 2 * h1:2, dj:dj + 2 * w1:2, :])
    patches = jnp.concatenate(cols, axis=-1).reshape(b * h1 * w1, 49 * cin)
    return patches, (b, h1, w1, cin)


def stems_forward(xs, ps):
    """visible_module / thermal_module: conv1(7x7,s2,p3) + bn1 + relu fused into one grouped
    matmul (one pallas_call for all modalities), then one batch-parallel maxpool(3x3,s2,p1).
    Returns NHWC with C padded to 128 lanes (extra channels are exactly 0)."""
    mats, dims = zip(*[_stem_im2col(x) for x in xs])
    b, h1, w1, cin = dims[0]
    a = jnp.stack(mats, axis=0)                                    # (G, B*H1*W1, 49*Cin) bf16
    wmat = jnp.stack(
        [p['conv1_w'].transpose(2, 3, 1, 0).reshape(49 * cin, 64) for p in ps], axis=0)
    scales = jnp.stack(
        [p['bn1_gamma'] / jnp.sqrt(p['bn1_var'] + 1e-5) for p in ps], axis=0)
    biases = jnp.stack(
        [p['bn1_beta'] - p['bn1_mean'] * (p['bn1_gamma'] / jnp.sqrt(p['bn1_var'] + 1e-5))
         for p in ps], axis=0)
    # conv1 on the MXU with bn1+relu in the epilogue; keep the 128-lane padded output (pads = 0).
    y = pallas_matmul_fused(a, wmat, scale=scales, bias=biases, relu=True, trim_n=False)
    cpad = y.shape[-1]
    y = y.reshape(len(xs) * b, h1, w1, cpad)                       # visible batch, then thermal
    return pallas_maxpool3x3_s2(y)                                 # (G*B, H1/2, W1/2, 128) bf16


def base_resnet_forward(x_nhwc, p):
    # TODO(synk): resnet50 layer1..layer4 (pretrained) replaced by deterministic 1x1 projections.
    b, h, w, c = x_nhwc.shape
    w3 = p['proj3_w']
    if w3.shape[0] != c:                                           # absorb stem channel padding
        w3 = jnp.pad(w3, ((0, c - w3.shape[0]), (0, 0)))
    h3 = pallas_matmul_fused(x_nhwc.reshape(b * h * w, c), w3, relu=True)
    h3 = h3.reshape(b, h, w, w3.shape[1])                          # "layer3" output (1024 ch)
    h3 = pallas_non_local(h3, p['nl'])                             # Non_local(1024), as defined
    h4 = pallas_matmul_fused(h3.reshape(b * h * w, h3.shape[-1]), p['proj4_w'], relu=True)
    return h4.reshape(b, h, w, p['proj4_w'].shape[1])              # "layer4" output (2048 ch)


def network_forward(params, x_v, x_t, mode=0, class_num=10):
    """Eval path (train == 'false').  mode 0: both modalities concatenated along batch."""
    if mode == 0:
        x = stems_forward([x_v, x_t], [params['visible'], params['thermal']])
    elif mode == 1:
        x = stems_forward([x_v], [params['visible']])
    else:
        x = stems_forward([x_t], [params['thermal']])

    feat = base_resnet_forward(x, params['base'])                  # (B, H, W, 2048) bf16

    bneck_scale = params['bneck_gamma'] / jnp.sqrt(params['bneck_var'] + 1e-5)
    bneck_bias = params['bneck_beta'] - params['bneck_mean'] * bneck_scale
    cls_id, feat_p, feat_p_norm = pallas_head(
        feat, bneck_scale, bneck_bias, params['cls_w_t'], class_num)
    return {'cls_id': cls_id, 'feat_p': feat_p, 'feat_p_norm': feat_p_norm}


# ----------------------------------------------------------------------------
# Deterministic parameter init (shapes follow the module __init__)
# ----------------------------------------------------------------------------

def init_params(key, class_num=10):
    c3, c4 = 1024, 2048
    ks = jax.random.split(key, 16)

    def nrm(k, shape, std):
        return std * jax.random.normal(k, shape, jnp.float32)

    def stem_params(k):
        k1, k2, k3 = jax.random.split(k, 3)
        return {
            'conv1_w': nrm(k1, (64, 3, 7, 7), 0.1),          # kaiming-ish, fan_in = 147
            'bn1_gamma': 1.0 + nrm(k2, (64,), 0.01),
            'bn1_beta': jnp.zeros((64,), jnp.float32),
            'bn1_mean': nrm(k3, (64,), 0.1),
            'bn1_var': jnp.ones((64,), jnp.float32),
        }

    nl = {
        'wg': nrm(ks[4], (1, c3), 0.02), 'bg': jnp.zeros((1, 1), jnp.float32),
        'wth': nrm(ks[5], (1, c3), 0.02), 'bth': jnp.zeros((1, 1), jnp.float32),
        'wph': nrm(ks[6], (1, c3), 0.02), 'bph': jnp.zeros((1, 1), jnp.float32),
        'wW': nrm(ks[7], (1, c3), 0.02), 'bW': jnp.zeros((1, c3), jnp.float32),
        # nn.init.constant_(self.W[1].weight, 0.0) / bias 0.0 as in the reference
        'bn_gamma': jnp.zeros((1, c3), jnp.float32),
        'bn_beta': jnp.zeros((1, c3), jnp.float32),
        'bn_mean': jnp.zeros((1, c3), jnp.float32),
        'bn_var': jnp.ones((1, c3), jnp.float32),
    }

    return {
        'visible': stem_params(ks[0]),
        'thermal': stem_params(ks[1]),
        'base': {
            'proj3_w': nrm(ks[2], (64, c3), 0.05),
            'proj4_w': nrm(ks[3], (c3, c4), 0.02),
            'nl': nl,
        },
        # bottleneck: weights_init_kaiming for BatchNorm1d -> N(1, 0.01), bias zeros (frozen)
        'bneck_gamma': 1.0 + nrm(ks[8], (c4,), 0.01),
        'bneck_beta': jnp.zeros((c4,), jnp.float32),
        'bneck_mean': jnp.zeros((c4,), jnp.float32),
        'bneck_var': jnp.ones((c4,), jnp.float32),
        # classifier: weights_init_classifier -> N(0, 0.001), no bias; stored transposed (2048, K)
        'cls_w_t': nrm(ks[9], (c4, class_num), 0.001),
    }


# ----------------------------------------------------------------------------

if __name__ == "__main__":
    key = jax.random.PRNGKey(0)
    kv, kt = jax.random.split(key)
    x_v = jax.random.normal(kv, (2, 3, 16, 16), jnp.float32)   # NCHW, like the PyTorch module
    x_t = jax.random.normal(kt, (2, 3, 16, 16), jnp.float32)

    params = init_params(jax.random.PRNGKey(42), class_num=10)

    fwd = jax.jit(functools.partial(network_forward, mode=0, class_num=10))
    out = fwd(params, x_v, x_t)
    out = jax.block_until_ready(out)

    assert out['cls_id'].shape == (4, 10)
    assert out['feat_p'].shape == (4, 2048)
    assert out['feat_p_norm'].shape == (4, 2048)
    assert bool(jnp.all(jnp.isfinite(out['cls_id'])))
    print("KERNEL_OK")
</pallas_src>

<mosaic_0001>
module attributes {stable_mosaic.version = 11 : i64} {
  func.func @_mm_fused_kernel(%arg0: i32, %arg1: i32, %arg2: i32, %arg3: i32, %arg4: memref<1x128x256xbf16, #tpu.memory_space<vmem>>, %arg5: memref<1x256x128xbf16, #tpu.memory_space<vmem>>, %arg6: memref<1x1x128xf32, #tpu.memory_space<vmem>>, %arg7: memref<1x1x128xf32, #tpu.memory_space<vmem>>, %arg8: memref<1x128x128xbf16, #tpu.memory_space<vmem>>, %arg9: memref<128x128xf32, #tpu.memory_space<vmem>>) attributes {dimension_semantics = [#tpu.dimension_semantics<parallel>, #tpu.dimension_semantics<parallel>, #tpu.dimension_semantics<parallel>, #tpu.dimension_semantics<arbitrary>], iteration_bounds = array<i64: 2, 1, 1, 1>, scalar_prefetch = 0 : i64, scratch_operands = 1 : i64, tpu.core_type = #tpu.core_type<tc>, window_params = [{transform_indices = @transform_0, window_bounds = array<i64: 1, 128, 256>}, {transform_indices = @transform_1, window_bounds = array<i64: 1, 256, 128>}, {transform_indices = @transform_2, window_bounds = array<i64: 1, 1, 128>}, {transform_indices = @transform_3, window_bounds = array<i64: 1, 1, 128>}, {transform_indices = @transform_4, window_bounds = array<i64: 1, 128, 128>}]} {
    %c0_i32 = arith.constant 0 : i32
    %0 = arith.cmpi eq, %arg3, %c0_i32 : i32
    %1 = arith.extui %0 : i1 to i32
    %c0_i32_0 = arith.constant 0 : i32
    %2 = arith.cmpi ne, %1, %c0_i32_0 : i32
    scf.if %2 {
      %cst_12 = arith.constant 0.000000e+00 : f32
      %14 = vector.broadcast %cst_12 : f32 to vector<128x128xf32>
      %c0_13 = arith.constant 0 : index
      %c0_14 = arith.constant 0 : index
      %15 = vector.load %arg9[%c0_13, %c0_14] : memref<128x128xf32, #tpu.memory_space<vmem>>, vector<128x128xf32>
      tpu.vector_store %arg9[%c0_13, %c0_14], %14 {strides = array<i32>} : memref<128x128xf32, #tpu.memory_space<vmem>>, vector<128x128xf32>,
    } else {
    }
    %c0 = arith.constant 0 : index
    %c0_1 = arith.constant 0 : index
    %3 = vector.load %arg9[%c0, %c0_1] : memref<128x128xf32, #tpu.memory_space<vmem>>, vector<128x128xf32>
    %c0_2 = arith.constant 0 : index
    %c0_3 = arith.constant 0 : index
    %c0_4 = arith.constant 0 : index
    %4 = vector.load %arg4[%c0_2, %c0_3, %c0_4] : memref<1x128x256xbf16, #tpu.memory_space<vmem>>, vector<1x128x256xbf16>
    %5 = vector.shape_cast %4 : vector<1x128x256xbf16> to vector<128x256xbf16>
    %c0_5 = arith.constant 0 : index
    %c0_6 = arith.constant 0 : index
    %c0_7 = arith.constant 0 : index
    %6 = vector.load %arg5[%c0_5, %c0_6, %c0_7] : memref<1x256x128xbf16, #tpu.memory_space<vmem>>, vector<1x256x128xbf16>
    %7 = vector.shape_cast %6 : vector<1x256x128xbf16> to vector<256x128xbf16>
    %cst = arith.constant dense<0.000000e+00> : vector<128x128xf32>
    %8 = tpu.matmul %5, %7, %cst {dimension_numbers = #tpu.dot_dimension_numbers<[1], [0], [0], [1], [0, 0, 1, 1], [], []>} : vector<128x256xbf16>, vector<256x128xbf16>, vector<128x128xf32> -> vector<128x128xf32>
    %9 = arith.addf %3, %8 : vector<128x128xf32>
    %c0_8 = arith.constant 0 : index
    %c0_9 = arith.constant 0 : index
    %10 = vector.load %arg9[%c0_8, %c0_9] : memref<128x128xf32, #tpu.memory_space<vmem>>, vector<128x128xf32>
    tpu.vector_store %arg9[%c0_8, %c0_9], %9 {strides = array<i32>} : memref<128x128xf32, #tpu.memory_space<vmem>>, vector<128x128xf32>,
    %c0_i32_10 = arith.constant 0 : i32
    %11 = arith.cmpi eq, %arg3, %c0_i32_10 : i32
    %12 = arith.extui %11 : i1 to i32
    %c0_i32_11 = arith.constant 0 : i32
    %13 = arith.cmpi ne, %12, %c0_i32_11 : i32
    scf.if %13 {
      %c0_12 = arith.constant 0 : index
      %c0_13 = arith.constant 0 : index
      %14 = vector.load %arg9[%c0_12, %c0_13] : memref<128x128xf32, #tpu.memory_space<vmem>>, vector<128x128xf32>
      %c0_14 = arith.constant 0 : index
      %c0_15 = arith.constant 0 : index
      %c0_16 = arith.constant 0 : index
      %15 = vector.load %arg6[%c0_14, %c0_15, %c0_16] : memref<1x1x128xf32, #tpu.memory_space<vmem>>, vector<1x1x128xf32>
      %16 = vector.shape_cast %15 : vector<1x1x128xf32> to vector<1x128xf32>
      %17 = vector.broadcast %16 : vector<1x128xf32> to vector<128x128xf32>
      %18 = arith.mulf %14, %17 : vector<128x128xf32>
      %c0_17 = arith.constant 0 : index
      %c0_18 = arith.constant 0 : index
      %c0_19 = arith.constant 0 : index
      %19 = vector.load %arg7[%c0_17, %c0_18, %c0_19] : memref<1x1x128xf32, #tpu.memory_space<vmem>>, vector<1x1x128xf32>
      %20 = vector.shape_cast %19 : vector<1x1x128xf32> to vector<1x128xf32>
      %21 = vector.broadcast %20 : vector<1x128xf32> to vector<128x128xf32>
      %22 = arith.addf %18, %21 : vector<128x128xf32>
      %cst_20 = arith.constant 0.000000e+00 : f32
      %23 = vector.broadcast %cst_20 : f32 to vector<128x128xf32>
      %24 = arith.maximumf %22, %23 : vector<128x128xf32>
      %25 = arith.truncf %24 : vector<128x128xf32> to vector<128x128xbf16>
      %c0_21 = arith.constant 0 : index
      %c0_22 = arith.constant 0 : index
      %c0_23 = arith.constant 0 : index
      %26 = vector.load %arg8[%c0_21, %c0_22, %c0_23] : memref<1x128x128xbf16, #tpu.memory_space<vmem>>, vector<1x128x128xbf16>
      %27 = vector.shape_cast %26 : vector<1x128x128xbf16> to vector<128x128xbf16>
      %28 = vector.shape_cast %25 : vector<128x128xbf16> to vector<1x128x128xbf16>
      tpu.vector_store %arg8[%c0_21, %c0_22, %c0_23], %28 {strides = array<i32>} : memref<1x128x128xbf16, #tpu.memory_space<vmem>>, vector<1x128x128xbf16>,
    } else {
    }
    return
  }
  func.func @transform_0(%arg0: i32, %arg1: i32, %arg2: i32, %arg3: i32) -> (i32, i32, i32) {
    %c0_i32 = arith.constant 0 : i32
    return %arg0, %arg1, %arg3 : i32, i32, i32
  }
  func.func @transform_1(%arg0: i32, %arg1: i32, %arg2: i32, %arg3: i32) -> (i32, i32, i32) {
    %c0_i32 = arith.constant 0 : i32
    return %arg0, %arg3, %arg2 : i32, i32, i32
  }
  func.func @transform_2(%arg0: i32, %arg1: i32, %arg2: i32, %arg3: i32) -> (i32, i32, i32) {
    %c0_i32 = arith.constant 0 : i32
    %c0_i32_0 = arith.constant 0 : i32
    return %arg0, %c0_i32, %arg2 : i32, i32, i32
  }
  func.func @transform_3(%arg0: i32, %arg1: i32, %arg2: i32, %arg3: i32) -> (i32, i32, i32) {
    %c0_i32 = arith.constant 0 : i32
    %c0_i32_0 = arith.constant 0 : i32
    return %arg0, %c0_i32, %arg2 : i32, i32, i32
  }
  func.func @transform_4(%arg0: i32, %arg1: i32, %arg2: i32, %arg3: i32) -> (i32, i32, i32) {
    %c0_i32 = arith.constant 0 : i32
    return %arg0, %arg1, %arg2 : i32, i32, i32
  }
}

module attributes {stable_mosaic.version = 11 : i64} {
  func.func @_maxpool_parity_kernel(%arg0: i32, %arg1: memref<1x5x5x128xbf16, #tpu.memory_space<vmem>>, %arg2: memref<1x5x4x128xbf16, #tpu.memory_space<vmem>>, %arg3: memref<1x4x5x128xbf16, #tpu.memory_space<vmem>>, %arg4: memref<1x4x4x128xbf16, #tpu.memory_space<vmem>>, %arg5: memref<1x4x4x128xbf16, #tpu.memory_space<vmem>>) attributes {dimension_semantics = [#tpu.dimension_semantics<parallel>], iteration_bounds = array<i64: 4>, scalar_prefetch = 0 : i64, scratch_operands = 0 : i64, tpu.core_type = #tpu.core_type<tc>, window_params = [{transform_indices = @transform_0, window_bounds = array<i64: 1, 5, 5, 128>}, {transform_indices = @transform_1, window_bounds = array<i64: 1, 5, 4, 128>}, {transform_indices = @transform_2, window_bounds = array<i64: 1, 4, 5, 128>}, {transform_indices = @transform_3, window_bounds = array<i64: 1, 4, 4, 128>}, {transform_indices = @transform_4, window_bounds = array<i64: 1, 4, 4, 128>}]} {
    %c0 = arith.constant 0 : index
    %c0_0 = arith.constant 0 : index
    %c0_1 = arith.constant 0 : index
    %c0_2 = arith.constant 0 : index
    %0 = vector.load %arg1[%c0, %c0_0, %c0_1, %c0_2] : memref<1x5x5x128xbf16, #tpu.memory_space<vmem>>, vector<1x5x5x128xbf16>
    %c0_3 = arith.constant 0 : index
    %c0_4 = arith.constant 0 : index
    %c0_5 = arith.constant 0 : index
    %c0_6 = arith.constant 0 : index
    %1 = vector.load %arg2[%c0_3, %c0_4, %c0_5, %c0_6] : memref<1x5x4x128xbf16, #tpu.memory_space<vmem>>, vector<1x5x4x128xbf16>
    %c0_7 = arith.constant 0 : index
    %c0_8 = arith.constant 0 : index
    %c0_9 = arith.constant 0 : index
    %c0_10 = arith.constant 0 : index
    %2 = vector.load %arg3[%c0_7, %c0_8, %c0_9, %c0_10] : memref<1x4x5x128xbf16, #tpu.memory_space<vmem>>, vector<1x4x5x128xbf16>
    %c0_11 = arith.constant 0 : index
    %c0_12 = arith.constant 0 : index
    %c0_13 = arith.constant 0 : index
    %c0_14 = arith.constant 0 : index
    %3 = vector.load %arg4[%c0_11, %c0_12, %c0_13, %c0_14] : memref<1x4x4x128xbf16, #tpu.memory_space<vmem>>, vector<1x4x4x128xbf16>
    %4 = vector.extract_strided_slice %0 {offsets = [0, 0, 0, 0], sizes = [1, 4, 4, 128], strides = [1, 1, 1, 1]} : vector<1x5x5x128xbf16> to vector<1x4x4x128xbf16>
    %5 = arith.maximumf %3, %4 : vector<1x4x4x128xbf16>
    %6 = vector.extract_strided_slice %0 {offsets = [0, 0, 1, 0], sizes = [1, 4, 4, 128], strides = [1, 1, 1, 1]} : vector<1x5x5x128xbf16> to vector<1x4x4x128xbf16>
    %7 = arith.maximumf %5, %6 : vector<1x4x4x128xbf16>
    %8 = vector.extract_strided_slice %0 {offsets = [0, 1, 0, 0], sizes = [1, 4, 4, 128], strides = [1, 1, 1, 1]} : vector<1x5x5x128xbf16> to vector<1x4x4x128xbf16>
    %9 = arith.maximumf %7, %8 : vector<1x4x4x128xbf16>
    %10 = vector.extract_strided_slice %0 {offsets = [0, 1, 1, 0], sizes = [1, 4, 4, 128], strides = [1, 1, 1, 1]} : vector<1x5x5x128xbf16> to vector<1x4x4x128xbf16>
    %11 = arith.maximumf %9, %10 : vector<1x4x4x128xbf16>
    %12 = vector.extract_strided_slice %1 {offsets = [0, 0, 0, 0], sizes = [1, 4, 4, 128], strides = [1, 1, 1, 1]} : vector<1x5x4x128xbf16> to vector<1x4x4x128xbf16>
    %13 = arith.maximumf %11, %12 : vector<1x4x4x128xbf16>
    %14 = vector.extract_strided_slice %1 {offsets = [0, 1, 0, 0], sizes = [1, 4, 4, 128], strides = [1, 1, 1, 1]} : vector<1x5x4x128xbf16> to vector<1x4x4x128xbf16>
    %15 = arith.maximumf %13, %14 : vector<1x4x4x128xbf16>
    %16 = vector.extract_strided_slice %2 {offsets = [0, 0, 0, 0], sizes = [1, 4, 4, 128], strides = [1, 1, 1, 1]} : vector<1x4x5x128xbf16> to vector<1x4x4x128xbf16>
    %17 = arith.maximumf %15, %16 : vector<1x4x4x128xbf16>
    %18 = vector.extract_strided_slice %2 {offsets = [0, 0, 1, 0], sizes = [1, 4, 4, 128], strides = [1, 1, 1, 1]} : vector<1x4x5x128xbf16> to vector<1x4x4x128xbf16>
    %19 = arith.maximumf %17, %18 : vector<1x4x4x128xbf16>
    %c0_15 = arith.constant 0 : index
    %c0_16 = arith.constant 0 : index
    %c0_17 = arith.constant 0 : index
    %c0_18 = arith.constant 0 : index
    %20 = vector.load %arg5[%c0_15, %c0_16, %c0_17, %c0_18] : memref<1x4x4x128xbf16, #tpu.memory_space<vmem>>, vector<1x4x4x128xbf16>
    tpu.vector_store %arg5[%c0_15, %c0_16, %c0_17, %c0_18], %19 {strides = array<i32>} : memref<1x4x4x128xbf16, #tpu.memory_space<vmem>>, vector<1x4x4x128xbf16>,
    return
  }
  func.func @transform_0(%arg0: i32) -> (i32, i32, i32, i32) {
    %c0_i32 = arith.constant 0 : i32
    %c0_i32_0 = arith.constant 0 : i32
    %c0_i32_1 = arith.constant 0 : i32
    %c0_i32_2 = arith.constant 0 : i32
    return %arg0, %c0_i32, %c0_i32_0, %c0_i32_1 : i32, i32, i32, i32
  }
  func.func @transform_1(%arg0: i32) -> (i32, i32, i32, i32) {
    %c0_i32 = arith.constant 0 : i32
    %c0_i32_0 = arith.constant 0 : i32
    %c0_i32_1 = arith.constant 0 : i32
    %c0_i32_2 = arith.constant 0 : i32
    return %arg0, %c0_i32, %c0_i32_0, %c0_i32_1 : i32, i32, i32, i32
  }
  func.func @transform_2(%arg0: i32) -> (i32, i32, i32, i32) {
    %c0_i32 = arith.constant 0 : i32
    %c0_i32_0 = arith.constant 0 : i32
    %c0_i32_1 = arith.constant 0 : i32
    %c0_i32_2 = arith.constant 0 : i32
    return %arg0, %c0_i32, %c0_i32_0, %c0_i32_1 : i32, i32, i32, i32
  }
  func.func @transform_3(%arg0: i32) -> (i32, i32, i32, i32) {
    %c0_i32 = arith.constant 0 : i32
    %c0_i32_0 = arith.constant 0 : i32
    %c0_i32_1 = arith.constant 0 : i32
    %c0_i32_2 = arith.constant 0 : i32
    return %arg0, %c0_i32, %c0_i32_0, %c0_i32_1 : i32, i32, i32, i32
  }
  func.func @transform_4(%arg0: i32) -> (i32, i32, i32, i32) {
    %c0_i32 = arith.constant 0 : i32
    %c0_i32_0 = arith.constant 0 : i32
    %c0_i32_1 = arith.constant 0 : i32
    %c0_i32_2 = arith.constant 0 : i32
    return %arg0, %c0_i32, %c0_i32_0, %c0_i32_1 : i32, i32, i32, i32
  }
}

module attributes {stable_mosaic.version = 11 : i64} {
  func.func @_mm_fused_kernel(%arg0: i32, %arg1: i32, %arg2: i32, %arg3: i32, %arg4: memref<1x64x128xbf16, #tpu.memory_space<vmem>>, %arg5: memref<1x128x512xbf16, #tpu.memory_space<vmem>>, %arg6: memref<1x1x512xf32, #tpu.memory_space<vmem>>, %arg7: memref<1x1x512xf32, #tpu.memory_space<vmem>>, %arg8: memref<1x64x512xbf16, #tpu.memory_space<vmem>>, %arg9: memref<64x512xf32, #tpu.memory_space<vmem>>) attributes {dimension_semantics = [#tpu.dimension_semantics<parallel>, #tpu.dimension_semantics<parallel>, #tpu.dimension_semantics<parallel>, #tpu.dimension_semantics<arbitrary>], iteration_bounds = array<i64: 1, 1, 2, 1>, scalar_prefetch = 0 : i64, scratch_operands = 1 : i64, tpu.core_type = #tpu.core_type<tc>, window_params = [{transform_indices = @transform_0, window_bounds = array<i64: 1, 64, 128>}, {transform_indices = @transform_1, window_bounds = array<i64: 1, 128, 512>}, {transform_indices = @transform_2, window_bounds = array<i64: 1, 1, 512>}, {transform_indices = @transform_3, window_bounds = array<i64: 1, 1, 512>}, {transform_indices = @transform_4, window_bounds = array<i64: 1, 64, 512>}]} {
    %c0_i32 = arith.constant 0 : i32
    %0 = arith.cmpi eq, %arg3, %c0_i32 : i32
    %1 = arith.extui %0 : i1 to i32
    %c0_i32_0 = arith.constant 0 : i32
    %2 = arith.cmpi ne, %1, %c0_i32_0 : i32
    scf.if %2 {
      %cst_12 = arith.constant 0.000000e+00 : f32
      %14 = vector.broadcast %cst_12 : f32 to vector<64x512xf32>
      %c0_13 = arith.constant 0 : index
      %c0_14 = arith.constant 0 : index
      %15 = vector.load %arg9[%c0_13, %c0_14] : memref<64x512xf32, #tpu.memory_space<vmem>>, vector<64x512xf32>
      tpu.vector_store %arg9[%c0_13, %c0_14], %14 {strides = array<i32>} : memref<64x512xf32, #tpu.memory_space<vmem>>, vector<64x512xf32>,
    } else {
    }
    %c0 = arith.constant 0 : index
    %c0_1 = arith.constant 0 : index
    %3 = vector.load %arg9[%c0, %c0_1] : memref<64x512xf32, #tpu.memory_space<vmem>>, vector<64x512xf32>
    %c0_2 = arith.constant 0 : index
    %c0_3 = arith.constant 0 : index
    %c0_4 = arith.constant 0 : index
    %4 = vector.load %arg4[%c0_2, %c0_3, %c0_4] : memref<1x64x128xbf16, #tpu.memory_space<vmem>>, vector<1x64x128xbf16>
    %5 = vector.shape_cast %4 : vector<1x64x128xbf16> to vector<64x128xbf16>
    %c0_5 = arith.constant 0 : index
    %c0_6 = arith.constant 0 : index
    %c0_7 = arith.constant 0 : index
    %6 = vector.load %arg5[%c0_5, %c0_6, %c0_7] : memref<1x128x512xbf16, #tpu.memory_space<vmem>>, vector<1x128x512xbf16>
    %7 = vector.shape_cast %6 : vector<1x128x512xbf16> to vector<128x512xbf16>
    %cst = arith.constant dense<0.000000e+00> : vector<64x512xf32>
    %8 = tpu.matmul %5, %7, %cst {dimension_numbers = #tpu.dot_dimension_numbers<[1], [0], [0], [1], [0, 0, 1, 1], [], []>} : vector<64x128xbf16>, vector<128x512xbf16>, vector<64x512xf32> -> vector<64x512xf32>
    %9 = arith.addf %3, %8 : vector<64x512xf32>
    %c0_8 = arith.constant 0 : index
    %c0_9 = arith.constant 0 : index
    %10 = vector.load %arg9[%c0_8, %c0_9] : memref<64x512xf32, #tpu.memory_space<vmem>>, vector<64x512xf32>
    tpu.vector_store %arg9[%c0_8, %c0_9], %9 {strides = array<i32>} : memref<64x512xf32, #tpu.memory_space<vmem>>, vector<64x512xf32>,
    %c0_i32_10 = arith.constant 0 : i32
    %11 = arith.cmpi eq, %arg3, %c0_i32_10 : i32
    %12 = arith.extui %11 : i1 to i32
    %c0_i32_11 = arith.constant 0 : i32
    %13 = arith.cmpi ne, %12, %c0_i32_11 : i32
    scf.if %13 {
      %c0_12 = arith.constant 0 : index
      %c0_13 = arith.constant 0 : index
      %14 = vector.load %arg9[%c0_12, %c0_13] : memref<64x512xf32, #tpu.memory_space<vmem>>, vector<64x512xf32>
      %c0_14 = arith.constant 0 : index
      %c0_15 = arith.constant 0 : index
      %c0_16 = arith.constant 0 : index
      %15 = vector.load %arg6[%c0_14, %c0_15, %c0_16] : memref<1x1x512xf32, #tpu.memory_space<vmem>>, vector<1x1x512xf32>
      %16 = vector.shape_cast %15 : vector<1x1x512xf32> to vector<1x512xf32>
      %17 = vector.broadcast %16 : vector<1x512xf32> to vector<64x512xf32>
      %18 = arith.mulf %14, %17 : vector<64x512xf32>
      %c0_17 = arith.constant 0 : index
      %c0_18 = arith.constant 0 : index
      %c0_19 = arith.constant 0 : index
      %19 = vector.load %arg7[%c0_17, %c0_18, %c0_19] : memref<1x1x512xf32, #tpu.memory_space<vmem>>, vector<1x1x512xf32>
      %20 = vector.shape_cast %19 : vector<1x1x512xf32> to vector<1x512xf32>
      %21 = vector.broadcast %20 : vector<1x512xf32> to vector<64x512xf32>
      %22 = arith.addf %18, %21 : vector<64x512xf32>
      %cst_20 = arith.constant 0.000000e+00 : f32
      %23 = vector.broadcast %cst_20 : f32 to vector<64x512xf32>
      %24 = arith.maximumf %22, %23 : vector<64x512xf32>
      %25 = arith.truncf %24 : vector<64x512xf32> to vector<64x512xbf16>
      %c0_21 = arith.constant 0 : index
      %c0_22 = arith.constant 0 : index
      %c0_23 = arith.constant 0 : index
      %26 = vector.load %arg8[%c0_21, %c0_22, %c0_23] : memref<1x64x512xbf16, #tpu.memory_space<vmem>>, vector<1x64x512xbf16>
      %27 = vector.shape_cast %26 : vector<1x64x512xbf16> to vector<64x512xbf16>
      %28 = vector.shape_cast %25 : vector<64x512xbf16> to vector<1x64x512xbf16>
      tpu.vector_store %arg8[%c0_21, %c0_22, %c0_23], %28 {strides = array<i32>} : memref<1x64x512xbf16, #tpu.memory_space<vmem>>, vector<1x64x512xbf16>,
    } else {
    }
    return
  }
  func.func @transform_0(%arg0: i32, %arg1: i32, %arg2: i32, %arg3: i32) -> (i32, i32, i32) {
    %c0_i32 = arith.constant 0 : i32
    return %arg0, %arg1, %arg3 : i32, i32, i32
  }
  func.func @transform_1(%arg0: i32, %arg1: i32, %arg2: i32, %arg3: i32) -> (i32, i32, i32) {
    %c0_i32 = arith.constant 0 : i32
    return %arg0, %arg3, %arg2 : i32, i32, i32
  }
  func.func @transform_2(%arg0: i32, %arg1: i32, %arg2: i32, %arg3: i32) -> (i32, i32, i32) {
    %c0_i32 = arith.constant 0 : i32
    %c0_i32_0 = arith.constant 0 : i32
    return %arg0, %c0_i32, %arg2 : i32, i32, i32
  }
  func.func @transform_3(%arg0: i32, %arg1: i32, %arg2: i32, %arg3: i32) -> (i32, i32, i32) {
    %c0_i32 = arith.constant 0 : i32
    %c0_i32_0 = arith.constant 0 : i32
    return %arg0, %c0_i32, %arg2 : i32, i32, i32
  }
  func.func @transform_4(%arg0: i32, %arg1: i32, %arg2: i32, %arg3: i32) -> (i32, i32, i32) {
    %c0_i32 = arith.constant 0 : i32
    return %arg0, %arg1, %arg2 : i32, i32, i32
  }
}

module attributes {stable_mosaic.version = 11 : i64} {
  func.func @_nl_reduce_kernel(%arg0: i32, %arg1: i32, %arg2: memref<1x16x1024xbf16, #tpu.memory_space<vmem>>, %arg3: memref<1024x2xbf16, #tpu.memory_space<vmem>>, %arg4: memref<1x2xf32, #tpu.memory_space<vmem>>, %arg5: memref<1x1x1xf32, #tpu.memory_space<vmem>>) attributes {dimension_semantics = [#tpu.dimension_semantics<parallel>, #tpu.dimension_semantics<arbitrary>], iteration_bounds = array<i64: 4, 1>, scalar_prefetch = 0 : i64, scratch_operands = 0 : i64, tpu.core_type = #tpu.core_type<tc>, window_params = [{transform_indices = @transform_0, window_bounds = array<i64: 1, 16, 1024>}, {pipeline_mode = #tpu.pipeline_mode<synchronous>, transform_indices = @transform_1, window_bounds = array<i64: 1024, 2>}, {pipeline_mode = #tpu.pipeline_mode<synchronous>, transform_indices = @transform_2, window_bounds = array<i64: 1, 2>}, {transform_indices = @transform_3, window_bounds = array<i64: 1, 1, 1>}]} {
    %c0_i32 = arith.constant 0 : i32
    %0 = arith.cmpi eq, %arg1, %c0_i32 : i32
    %1 = arith.extui %0 : i1 to i32
    %c0_i32_0 = arith.constant 0 : i32
    %2 = arith.cmpi ne, %1, %c0_i32_0 : i32
    scf.if %2 {
      %cst_18 = arith.constant 0.000000e+00 : f32
      %32 = vector.broadcast %cst_18 : f32 to vector<1x1x1xf32>
      %c0_19 = arith.constant 0 : index
      %c0_20 = arith.constant 0 : index
      %c0_21 = arith.constant 0 : index
      %33 = vector.load %arg5[%c0_19, %c0_20, %c0_21] : memref<1x1x1xf32, #tpu.memory_space<vmem>>, vector<1x1x1xf32>
      tpu.vector_store %arg5[%c0_19, %c0_20, %c0_21], %32 {strides = array<i32>} : memref<1x1x1xf32, #tpu.memory_space<vmem>>, vector<1x1x1xf32>,
    } else {
    }
    %c0 = arith.constant 0 : index
    %c0_1 = arith.constant 0 : index
    %c0_2 = arith.constant 0 : index
    %3 = vector.load %arg2[%c0, %c0_1, %c0_2] : memref<1x16x1024xbf16, #tpu.memory_space<vmem>>, vector<1x16x1024xbf16>
    %4 = vector.shape_cast %3 : vector<1x16x1024xbf16> to vector<16x1024xbf16>
    %c0_3 = arith.constant 0 : index
    %c0_4 = arith.constant 0 : index
    %5 = vector.load %arg3[%c0_3, %c0_4] : memref<1024x2xbf16, #tpu.memory_space<vmem>>, vector<1024x2xbf16>
    %cst = arith.constant dense<0.000000e+00> : vector<16x2xf32>
    %6 = tpu.matmul %4, %5, %cst {dimension_numbers = #tpu.dot_dimension_numbers<[1], [0], [0], [1], [0, 0, 1, 1], [], []>} : vector<16x1024xbf16>, vector<1024x2xbf16>, vector<16x2xf32> -> vector<16x2xf32>
    %c0_5 = arith.constant 0 : index
    %c0_6 = arith.constant 0 : index
    %7 = vector.load %arg4[%c0_5, %c0_6] : memref<1x2xf32, #tpu.memory_space<vmem>>, vector<1x2xf32>
    %8 = vector.broadcast %7 : vector<1x2xf32> to vector<16x2xf32>
    %9 = arith.addf %6, %8 : vector<16x2xf32>
    %10 = tpu.iota {dimensions = array<i32: 0>} : vector<16x1xi32>
    %c16_i32 = arith.constant 16 : i32
    %11 = arith.muli %arg1, %c16_i32 : i32
    %12 = vector.broadcast %11 : i32 to vector<16x1xi32>
    %13 = arith.addi %10, %12 : vector<16x1xi32>
    %c16_i32_7 = arith.constant 16 : i32
    %14 = vector.broadcast %c16_i32_7 : i32 to vector<16x1xi32>
    %15 = arith.cmpi slt, %13, %14 : vector<16x1xi32>
    %16 = vector.extract_strided_slice %9 {offsets = [0, 0], sizes = [16, 1], strides = [1, 1]} : vector<16x2xf32> to vector<16x1xf32>
    %17 = vector.extract_strided_slice %9 {offsets = [0, 1], sizes = [16, 1], strides = [1, 1]} : vector<16x2xf32> to vector<16x1xf32>
    %18 = arith.mulf %16, %17 : vector<16x1xf32>
    %cst_8 = arith.constant 0.000000e+00 : f32
    %19 = vector.broadcast %cst_8 : f32 to vector<16x1xf32>
    %20 = arith.select %15, %18, %19 : vector<16x1xi1>, vector<16x1xf32>
    %c0_9 = arith.constant 0 : index
    %c0_10 = arith.constant 0 : index
    %c0_11 = arith.constant 0 : index
    %21 = vector.load %arg5[%c0_9, %c0_10, %c0_11] : memref<1x1x1xf32, #tpu.memory_space<vmem>>, vector<1x1x1xf32>
    %22 = vector.shape_cast %20 : vector<16x1xf32> to vector<1x16x1xf32>
    %cst_12 = arith.constant dense<0.000000e+00> : vector<1xf32>
    %23 = vector.multi_reduction <add>, %22, %cst_12 [1, 2] : vector<1x16x1xf32> to vector<1xf32>
    %24 = vector.shape_cast %23 : vector<1xf32> to vector<1x1x1xf32>
    %25 = vector.extract %24[0, 0, 0] : f32 from vector<1x1x1xf32>
    %26 = vector.broadcast %25 : f32 to vector<1x1x1xf32>
    %27 = arith.addf %21, %26 : vector<1x1x1xf32>
    %c0_13 = arith.constant 0 : index
    %c0_14 = arith.constant 0 : index
    %c0_15 = arith.constant 0 : index
    %28 = vector.load %arg5[%c0_13, %c0_14, %c0_15] : memref<1x1x1xf32, #tpu.memory_space<vmem>>, vector<1x1x1xf32>
    tpu.vector_store %arg5[%c0_13, %c0_14, %c0_15], %27 {strides = array<i32>} : memref<1x1x1xf32, #tpu.memory_space<vmem>>, vector<1x1x1xf32>,
    %c0_i32_16 = arith.constant 0 : i32
    %29 = arith.cmpi eq, %arg1, %c0_i32_16 : i32
    %30 = arith.extui %29 : i1 to i32
    %c0_i32_17 = arith.constant 0 : i32
    %31 = arith.cmpi ne, %30, %c0_i32_17 : i32
    scf.if %31 {
      %c0_18 = arith.constant 0 : index
      %c0_19 = arith.constant 0 : index
      %c0_20 = arith.constant 0 : index
      %32 = vector.load %arg5[%c0_18, %c0_19, %c0_20] : memref<1x1x1xf32, #tpu.memory_space<vmem>>, vector<1x1x1xf32>
      %cst_21 = arith.constant 6.250000e-02 : f32
      %33 = vector.broadcast %cst_21 : f32 to vector<1x1x1xf32>
      %34 = arith.mulf %32, %33 : vector<1x1x1xf32>
      %c0_22 = arith.constant 0 : index
      %c0_23 = arith.constant 0 : index
      %c0_24 = arith.constant 0 : index
      %35 = vector.load %arg5[%c0_22, %c0_23, %c0_24] : memref<1x1x1xf32, #tpu.memory_space<vmem>>, vector<1x1x1xf32>
      tpu.vector_store %arg5[%c0_22, %c0_23, %c0_24], %34 {strides = array<i32>} : memref<1x1x1xf32, #tpu.memory_space<vmem>>, vector<1x1x1xf32>,
    } else {
    }
    return
  }
  func.func @transform_0(%arg0: i32, %arg1: i32) -> (i32, i32, i32) {
    %c0_i32 = arith.constant 0 : i32
    %c0_i32_0 = arith.constant 0 : i32
    return %arg0, %arg1, %c0_i32 : i32, i32, i32
  }
  func.func @transform_1(%arg0: i32, %arg1: i32) -> (i32, i32) {
    %c0_i32 = arith.constant 0 : i32
    %c0_i32_0 = arith.constant 0 : i32
    %c0_i32_1 = arith.constant 0 : i32
    return %c0_i32, %c0_i32_0 : i32, i32
  }
  func.func @transform_2(%arg0: i32, %arg1: i32) -> (i32, i32) {
    %c0_i32 = arith.constant 0 : i32
    %c0_i32_0 = arith.constant 0 : i32
    %c0_i32_1 = arith.constant 0 : i32
    return %c0_i32, %c0_i32_0 : i32, i32
  }
  func.func @transform_3(%arg0: i32, %arg1: i32) -> (i32, i32, i32) {
    %c0_i32 = arith.constant 0 : i32
    %c0_i32_0 = arith.constant 0 : i32
    %c0_i32_1 = arith.constant 0 : i32
    return %arg0, %c0_i32, %c0_i32_0 : i32, i32, i32
  }
}

module attributes {stable_mosaic.version = 11 : i64} {
  func.func @_nl_apply_kernel(%arg0: i32, %arg1: i32, %arg2: memref<1x16x1024xbf16, #tpu.memory_space<vmem>>, %arg3: memref<1x1x1xf32, #tpu.memory_space<vmem>>, %arg4: memref<1024x1xbf16, #tpu.memory_space<vmem>>, %arg5: memref<1x1xf32, #tpu.memory_space<vmem>>, %arg6: memref<1x1024xf32, #tpu.memory_space<vmem>>, %arg7: memref<1x1024xf32, #tpu.memory_space<vmem>>, %arg8: memref<1x16x1024xbf16, #tpu.memory_space<vmem>>) attributes {dimension_semantics = [#tpu.dimension_semantics<parallel>, #tpu.dimension_semantics<parallel>], iteration_bounds = array<i64: 4, 1>, scalar_prefetch = 0 : i64, scratch_operands = 0 : i64, tpu.core_type = #tpu.core_type<tc>, window_params = [{transform_indices = @transform_0, window_bounds = array<i64: 1, 16, 1024>}, {transform_indices = @transform_1, window_bounds = array<i64: 1, 1, 1>}, {pipeline_mode = #tpu.pipeline_mode<synchronous>, transform_indices = @transform_2, window_bounds = array<i64: 1024, 1>}, {pipeline_mode = #tpu.pipeline_mode<synchronous>, transform_indices = @transform_3, window_bounds = array<i64: 1, 1>}, {pipeline_mode = #tpu.pipeline_mode<synchronous>, transform_indices = @transform_4, window_bounds = array<i64: 1, 1024>}, {pipeline_mode = #tpu.pipeline_mode<synchronous>, transform_indices = @transform_5, window_bounds = array<i64: 1, 1024>}, {transform_indices = @transform_6, window_bounds = array<i64: 1, 16, 1024>}]} {
    %c0 = arith.constant 0 : index
    %c0_0 = arith.constant 0 : index
    %c0_1 = arith.constant 0 : index
    %0 = vector.load %arg2[%c0, %c0_0, %c0_1] : memref<1x16x1024xbf16, #tpu.memory_space<vmem>>, vector<1x16x1024xbf16>
    %1 = vector.shape_cast %0 : vector<1x16x1024xbf16> to vector<16x1024xbf16>
    %c0_2 = arith.constant 0 : index
    %c0_3 = arith.constant 0 : index
    %2 = vector.load %arg4[%c0_2, %c0_3] : memref<1024x1xbf16, #tpu.memory_space<vmem>>, vector<1024x1xbf16>
    %cst = arith.constant dense<0.000000e+00> : vector<16x1xf32>
    %3 = tpu.matmul %1, %2, %cst {dimension_numbers = #tpu.dot_dimension_numbers<[1], [0], [0], [1], [0, 0, 1, 1], [], []>} : vector<16x1024xbf16>, vector<1024x1xbf16>, vector<16x1xf32> -> vector<16x1xf32>
    %c0_4 = arith.constant 0 : index
    %c0_5 = arith.constant 0 : index
    %4 = vector.load %arg5[%c0_4, %c0_5] : memref<1x1xf32, #tpu.memory_space<vmem>>, vector<1x1xf32>
    %5 = vector.broadcast %4 : vector<1x1xf32> to vector<16x1xf32>
    %6 = arith.addf %3, %5 : vector<16x1xf32>
    %c0_6 = arith.constant 0 : index
    %c0_7 = arith.constant 0 : index
    %c0_8 = arith.constant 0 : index
    %7 = vector.load %arg3[%c0_6, %c0_7, %c0_8] : memref<1x1x1xf32, #tpu.memory_space<vmem>>, vector<1x1x1xf32>
    %8 = vector.shape_cast %7 : vector<1x1x1xf32> to vector<1x1xf32>
    %9 = vector.broadcast %8 : vector<1x1xf32> to vector<16x1xf32>
    %10 = arith.mulf %6, %9 : vector<16x1xf32>
    %c0_9 = arith.constant 0 : index
    %c0_10 = arith.constant 0 : index
    %11 = vector.load %arg6[%c0_9, %c0_10] : memref<1x1024xf32, #tpu.memory_space<vmem>>, vector<1x1024xf32>
    %12 = vector.broadcast %10 : vector<16x1xf32> to vector<16x1024xf32>
    %13 = vector.broadcast %11 : vector<1x1024xf32> to vector<16x1024xf32>
    %14 = arith.mulf %12, %13 : vector<16x1024xf32>
    %c0_11 = arith.constant 0 : index
    %c0_12 = arith.constant 0 : index
    %15 = vector.load %arg7[%c0_11, %c0_12] : memref<1x1024xf32, #tpu.memory_space<vmem>>, vector<1x1024xf32>
    %16 = vector.broadcast %15 : vector<1x1024xf32> to vector<16x1024xf32>
    %17 = arith.addf %14, %16 : vector<16x1024xf32>
    %18 = arith.extf %1 : vector<16x1024xbf16> to vector<16x1024xf32>
    %19 = arith.addf %17, %18 : vector<16x1024xf32>
    %20 = arith.truncf %19 : vector<16x1024xf32> to vector<16x1024xbf16>
    %c0_13 = arith.constant 0 : index
    %c0_14 = arith.constant 0 : index
    %c0_15 = arith.constant 0 : index
    %21 = vector.load %arg8[%c0_13, %c0_14, %c0_15] : memref<1x16x1024xbf16, #tpu.memory_space<vmem>>, vector<1x16x1024xbf16>
    %22 = vector.shape_cast %21 : vector<1x16x1024xbf16> to vector<16x1024xbf16>
    %23 = vector.shape_cast %20 : vector<16x1024xbf16> to vector<1x16x1024xbf16>
    tpu.vector_store %arg8[%c0_13, %c0_14, %c0_15], %23 {strides = array<i32>} : memref<1x16x1024xbf16, #tpu.memory_space<vmem>>, vector<1x16x1024xbf16>,
    return
  }
  func.func @transform_0(%arg0: i32, %arg1: i32) -> (i32, i32, i32) {
    %c0_i32 = arith.constant 0 : i32
    %c0_i32_0 = arith.constant 0 : i32
    return %arg0, %arg1, %c0_i32 : i32, i32, i32
  }
  func.func @transform_1(%arg0: i32, %arg1: i32) -> (i32, i32, i32) {
    %c0_i32 = arith.constant 0 : i32
    %c0_i32_0 = arith.constant 0 : i32
    %c0_i32_1 = arith.constant 0 : i32
    return %arg0, %c0_i32, %c0_i32_0 : i32, i32, i32
  }
  func.func @transform_2(%arg0: i32, %arg1: i32) -> (i32, i32) {
    %c0_i32 = arith.constant 0 : i32
    %c0_i32_0 = arith.constant 0 : i32
    %c0_i32_1 = arith.constant 0 : i32
    return %c0_i32, %c0_i32_0 : i32, i32
  }
  func.func @transform_3(%arg0: i32, %arg1: i32) -> (i32, i32) {
    %c0_i32 = arith.constant 0 : i32
    %c0_i32_0 = arith.constant 0 : i32
    %c0_i32_1 = arith.constant 0 : i32
    return %c0_i32, %c0_i32_0 : i32, i32
  }
  func.func @transform_4(%arg0: i32, %arg1: i32) -> (i32, i32) {
    %c0_i32 = arith.constant 0 : i32
    %c0_i32_0 = arith.constant 0 : i32
    %c0_i32_1 = arith.constant 0 : i32
    return %c0_i32, %c0_i32_0 : i32, i32
  }
  func.func @transform_5(%arg0: i32, %arg1: i32) -> (i32, i32) {
    %c0_i32 = arith.constant 0 : i32
    %c0_i32_0 = arith.constant 0 : i32
    %c0_i32_1 = arith.constant 0 : i32
    return %c0_i32, %c0_i32_0 : i32, i32
  }
  func.func @transform_6(%arg0: i32, %arg1: i32) -> (i32, i32, i32) {
    %c0_i32 = arith.constant 0 : i32
    %c0_i32_0 = arith.constant 0 : i32
    return %arg0, %arg1, %c0_i32 : i32, i32, i32
  }
}

module attributes {stable_mosaic.version = 11 : i64} {
  func.func @_mm_fused_kernel(%arg0: i32, %arg1: i32, %arg2: i32, %arg3: i32, %arg4: memref<1x64x512xbf16, #tpu.memory_space<vmem>>, %arg5: memref<1x512x512xbf16, #tpu.memory_space<vmem>>, %arg6: memref<1x1x512xf32, #tpu.memory_space<vmem>>, %arg7: memref<1x1x512xf32, #tpu.memory_space<vmem>>, %arg8: memref<1x64x512xbf16, #tpu.memory_space<vmem>>, %arg9: memref<64x512xf32, #tpu.memory_space<vmem>>) attributes {dimension_semantics = [#tpu.dimension_semantics<parallel>, #tpu.dimension_semantics<parallel>, #tpu.dimension_semantics<parallel>, #tpu.dimension_semantics<arbitrary>], iteration_bounds = array<i64: 1, 1, 4, 2>, scalar_prefetch = 0 : i64, scratch_operands = 1 : i64, tpu.core_type = #tpu.core_type<tc>, window_params = [{transform_indices = @transform_0, window_bounds = array<i64: 1, 64, 512>}, {transform_indices = @transform_1, window_bounds = array<i64: 1, 512, 512>}, {transform_indices = @transform_2, window_bounds = array<i64: 1, 1, 512>}, {transform_indices = @transform_3, window_bounds = array<i64: 1, 1, 512>}, {transform_indices = @transform_4, window_bounds = array<i64: 1, 64, 512>}]} {
    %c0_i32 = arith.constant 0 : i32
    %0 = arith.cmpi eq, %arg3, %c0_i32 : i32
    %1 = arith.extui %0 : i1 to i32
    %c0_i32_0 = arith.constant 0 : i32
    %2 = arith.cmpi ne, %1, %c0_i32_0 : i32
    scf.if %2 {
      %cst_11 = arith.constant 0.000000e+00 : f32
      %14 = vector.broadcast %cst_11 : f32 to vector<64x512xf32>
      %c0_12 = arith.constant 0 : index
      %c0_13 = arith.constant 0 : index
      %15 = vector.load %arg9[%c0_12, %c0_13] : memref<64x512xf32, #tpu.memory_space<vmem>>, vector<64x512xf32>
      tpu.vector_store %arg9[%c0_12, %c0_13], %14 {strides = array<i32>} : memref<64x512xf32, #tpu.memory_space<vmem>>, vector<64x512xf32>,
    } else {
    }
    %c0 = arith.constant 0 : index
    %c0_1 = arith.constant 0 : index
    %3 = vector.load %arg9[%c0, %c0_1] : memref<64x512xf32, #tpu.memory_space<vmem>>, vector<64x512xf32>
    %c0_2 = arith.constant 0 : index
    %c0_3 = arith.constant 0 : index
    %c0_4 = arith.constant 0 : index
    %4 = vector.load %arg4[%c0_2, %c0_3, %c0_4] : memref<1x64x512xbf16, #tpu.memory_space<vmem>>, vector<1x64x512xbf16>
    %5 = vector.shape_cast %4 : vector<1x64x512xbf16> to vector<64x512xbf16>
    %c0_5 = arith.constant 0 : index
    %c0_6 = arith.constant 0 : index
    %c0_7 = arith.constant 0 : index
    %6 = vector.load %arg5[%c0_5, %c0_6, %c0_7] : memref<1x512x512xbf16, #tpu.memory_space<vmem>>, vector<1x512x512xbf16>
    %7 = vector.shape_cast %6 : vector<1x512x512xbf16> to vector<512x512xbf16>
    %cst = arith.constant dense<0.000000e+00> : vector<64x512xf32>
    %8 = tpu.matmul %5, %7, %cst {dimension_numbers = #tpu.dot_dimension_numbers<[1], [0], [0], [1], [0, 0, 1, 1], [], []>} : vector<64x512xbf16>, vector<512x512xbf16>, vector<64x512xf32> -> vector<64x512xf32>
    %9 = arith.addf %3, %8 : vector<64x512xf32>
    %c0_8 = arith.constant 0 : index
    %c0_9 = arith.constant 0 : index
    %10 = vector.load %arg9[%c0_8, %c0_9] : memref<64x512xf32, #tpu.memory_space<vmem>>, vector<64x512xf32>
    tpu.vector_store %arg9[%c0_8, %c0_9], %9 {strides = array<i32>} : memref<64x512xf32, #tpu.memory_space<vmem>>, vector<64x512xf32>,
    %c1_i32 = arith.constant 1 : i32
    %11 = arith.cmpi eq, %arg3, %c1_i32 : i32
    %12 = arith.extui %11 : i1 to i32
    %c0_i32_10 = arith.constant 0 : i32
    %13 = arith.cmpi ne, %12, %c0_i32_10 : i32
    scf.if %13 {
      %c0_11 = arith.constant 0 : index
      %c0_12 = arith.constant 0 : index
      %14 = vector.load %arg9[%c0_11, %c0_12] : memref<64x512xf32, #tpu.memory_space<vmem>>, vector<64x512xf32>
      %c0_13 = arith.constant 0 : index
      %c0_14 = arith.constant 0 : index
      %c0_15 = arith.constant 0 : index
      %15 = vector.load %arg6[%c0_13, %c0_14, %c0_15] : memref<1x1x512xf32, #tpu.memory_space<vmem>>, vector<1x1x512xf32>
      %16 = vector.shape_cast %15 : vector<1x1x512xf32> to vector<1x512xf32>
      %17 = vector.broadcast %16 : vector<1x512xf32> to vector<64x512xf32>
      %18 = arith.mulf %14, %17 : vector<64x512xf32>
      %c0_16 = arith.constant 0 : index
      %c0_17 = arith.constant 0 : index
      %c0_18 = arith.constant 0 : index
      %19 = vector.load %arg7[%c0_16, %c0_17, %c0_18] : memref<1x1x512xf32, #tpu.memory_space<vmem>>, vector<1x1x512xf32>
      %20 = vector.shape_cast %19 : vector<1x1x512xf32> to vector<1x512xf32>
      %21 = vector.broadcast %20 : vector<1x512xf32> to vector<64x512xf32>
      %22 = arith.addf %18, %21 : vector<64x512xf32>
      %cst_19 = arith.constant 0.000000e+00 : f32
      %23 = vector.broadcast %cst_19 : f32 to vector<64x512xf32>
      %24 = arith.maximumf %22, %23 : vector<64x512xf32>
      %25 = arith.truncf %24 : vector<64x512xf32> to vector<64x512xbf16>
      %c0_20 = arith.constant 0 : index
      %c0_21 = arith.constant 0 : index
      %c0_22 = arith.constant 0 : index
      %26 = vector.load %arg8[%c0_20, %c0_21, %c0_22] : memref<1x64x512xbf16, #tpu.memory_space<vmem>>, vector<1x64x512xbf16>
      %27 = vector.shape_cast %26 : vector<1x64x512xbf16> to vector<64x512xbf16>
      %28 = vector.shape_cast %25 : vector<64x512xbf16> to vector<1x64x512xbf16>
      tpu.vector_store %arg8[%c0_20, %c0_21, %c0_22], %28 {strides = array<i32>} : memref<1x64x512xbf16, #tpu.memory_space<vmem>>, vector<1x64x512xbf16>,
    } else {
    }
    return
  }
  func.func @transform_0(%arg0: i32, %arg1: i32, %arg2: i32, %arg3: i32) -> (i32, i32, i32) {
    %c0_i32 = arith.constant 0 : i32
    return %arg0, %arg1, %arg3 : i32, i32, i32
  }
  func.func @transform_1(%arg0: i32, %arg1: i32, %arg2: i32, %arg3: i32) -> (i32, i32, i32) {
    %c0_i32 = arith.constant 0 : i32
    return %arg0, %arg3, %arg2 : i32, i32, i32
  }
  func.func @transform_2(%arg0: i32, %arg1: i32, %arg2: i32, %arg3: i32) -> (i32, i32, i32) {
    %c0_i32 = arith.constant 0 : i32
    %c0_i32_0 = arith.constant 0 : i32
    return %arg0, %c0_i32, %arg2 : i32, i32, i32
  }
  func.func @transform_3(%arg0: i32, %arg1: i32, %arg2: i32, %arg3: i32) -> (i32, i32, i32) {
    %c0_i32 = arith.constant 0 : i32
    %c0_i32_0 = arith.constant 0 : i32
    return %arg0, %c0_i32, %arg2 : i32, i32, i32
  }
  func.func @transform_4(%arg0: i32, %arg1: i32, %arg2: i32, %arg3: i32) -> (i32, i32, i32) {
    %c0_i32 = arith.constant 0 : i32
    return %arg0, %arg1, %arg2 : i32, i32, i32
  }
}

module attributes {stable_mosaic.version = 11 : i64} {
  func.func @_head_kernel(%arg0: i32, %arg1: i32, %arg2: memref<4x16x2048xbf16, #tpu.memory_space<vmem>>, %arg3: memref<1x2048xf32, #tpu.memory_space<vmem>>, %arg4: memref<1x2048xf32, #tpu.memory_space<vmem>>, %arg5: memref<2048x128xbf16, #tpu.memory_space<vmem>>, %arg6: memref<4x128xf32, #tpu.memory_space<vmem>>, %arg7: memref<4x2048xf32, #tpu.memory_space<vmem>>, %arg8: memref<4x2048xf32, #tpu.memory_space<vmem>>, %arg9: memref<4x2048xf32, #tpu.memory_space<vmem>>) attributes {dimension_semantics = [#tpu.dimension_semantics<parallel>, #tpu.dimension_semantics<arbitrary>], iteration_bounds = array<i64: 1, 1>, scalar_prefetch = 0 : i64, scratch_operands = 1 : i64, tpu.core_type = #tpu.core_type<tc>, window_params = [{transform_indices = @transform_0, window_bounds = array<i64: 4, 16, 2048>}, {pipeline_mode = #tpu.pipeline_mode<synchronous>, transform_indices = @transform_1, window_bounds = array<i64: 1, 2048>}, {pipeline_mode = #tpu.pipeline_mode<synchronous>, transform_indices = @transform_2, window_bounds = array<i64: 1, 2048>}, {pipeline_mode = #tpu.pipeline_mode<synchronous>, transform_indices = @transform_3, window_bounds = array<i64: 2048, 128>}, {transform_indices = @transform_4, window_bounds = array<i64: 4, 128>}, {transform_indices = @transform_5, window_bounds = array<i64: 4, 2048>}, {transform_indices = @transform_6, window_bounds = array<i64: 4, 2048>}]} {
    %c0_i32 = arith.constant 0 : i32
    %0 = arith.cmpi eq, %arg1, %c0_i32 : i32
    %1 = arith.extui %0 : i1 to i32
    %c0_i32_0 = arith.constant 0 : i32
    %2 = arith.cmpi ne, %1, %c0_i32_0 : i32
    scf.if %2 {
      %cst_12 = arith.constant 0.000000e+00 : f32
      %26 = vector.broadcast %cst_12 : f32 to vector<4x2048xf32>
      %c0_13 = arith.constant 0 : index
      %c0_14 = arith.constant 0 : index
      %27 = vector.load %arg9[%c0_13, %c0_14] : memref<4x2048xf32, #tpu.memory_space<vmem>>, vector<4x2048xf32>
      tpu.vector_store %arg9[%c0_13, %c0_14], %26 {strides = array<i32>} : memref<4x2048xf32, #tpu.memory_space<vmem>>, vector<4x2048xf32>,
    } else {
    }
    %c0 = arith.constant 0 : index
    %c0_1 = arith.constant 0 : index
    %c0_2 = arith.constant 0 : index
    %3 = vector.load %arg2[%c0, %c0_1, %c0_2] : memref<4x16x2048xbf16, #tpu.memory_space<vmem>>, vector<4x16x2048xbf16>
    %4 = arith.extf %3 : vector<4x16x2048xbf16> to vector<4x16x2048xf32>
    %cst = arith.constant 9.99999997E-7 : f32
    %5 = vector.broadcast %cst : f32 to vector<4x16x2048xf32>
    %6 = arith.maximumf %4, %5 : vector<4x16x2048xf32>
    %7 = tpu.iota {dimensions = array<i32: 1>} : vector<1x16x1xi32>
    %c16_i32 = arith.constant 16 : i32
    %8 = arith.muli %arg1, %c16_i32 : i32
    %9 = vector.broadcast %8 : i32 to vector<1x16x1xi32>
    %10 = arith.addi %7, %9 : vector<1x16x1xi32>
    %c16_i32_3 = arith.constant 16 : i32
    %11 = vector.broadcast %c16_i32_3 : i32 to vector<1x16x1xi32>
    %12 = arith.cmpi slt, %10, %11 : vector<1x16x1xi32>
    %13 = arith.mulf %6, %6 : vector<4x16x2048xf32>
    %14 = arith.mulf %13, %6 : vector<4x16x2048xf32>
    %cst_4 = arith.constant 0.000000e+00 : f32
    %15 = vector.shape_cast %12 : vector<1x16x1xi1> to vector<1x16x1xi1>
    %16 = vector.broadcast %15 : vector<1x16x1xi1> to vector<4x16x2048xi1>
    %17 = vector.broadcast %cst_4 : f32 to vector<4x16x2048xf32>
    %18 = arith.select %16, %14, %17 : vector<4x16x2048xi1>, vector<4x16x2048xf32>
    %c0_5 = arith.constant 0 : index
    %c0_6 = arith.constant 0 : index
    %19 = vector.load %arg9[%c0_5, %c0_6] : memref<4x2048xf32, #tpu.memory_space<vmem>>, vector<4x2048xf32>
    %cst_7 = arith.constant dense<0.000000e+00> : vector<4x2048xf32>
    %20 = vector.multi_reduction <add>, %18, %cst_7 [1] : vector<4x16x2048xf32> to vector<4x2048xf32>
    %21 = arith.addf %19, %20 : vector<4x2048xf32>
    %c0_8 = arith.constant 0 : index
    %c0_9 = arith.constant 0 : index
    %22 = vector.load %arg9[%c0_8, %c0_9] : memref<4x2048xf32, #tpu.memory_space<vmem>>, vector<4x2048xf32>
    tpu.vector_store %arg9[%c0_8, %c0_9], %21 {strides = array<i32>} : memref<4x2048xf32, #tpu.memory_space<vmem>>, vector<4x2048xf32>,
    %c0_i32_10 = arith.constant 0 : i32
    %23 = arith.cmpi eq, %arg1, %c0_i32_10 : i32
    %24 = arith.extui %23 : i1 to i32
    %c0_i32_11 = arith.constant 0 : i32
    %25 = arith.cmpi ne, %24, %c0_i32_11 : i32
    scf.if %25 {
      %c0_12 = arith.constant 0 : index
      %c0_13 = arith.constant 0 : index
      %26 = vector.load %arg9[%c0_12, %c0_13] : memref<4x2048xf32, #tpu.memory_space<vmem>>, vector<4x2048xf32>
      %cst_14 = arith.constant 6.250000e-02 : f32
      %27 = vector.broadcast %cst_14 : f32 to vector<4x2048xf32>
      %28 = arith.mulf %26, %27 : vector<4x2048xf32>
      %cst_15 = arith.constant 1.000000e-30 : f32
      %29 = vector.broadcast %cst_15 : f32 to vector<4x2048xf32>
      %30 = arith.maximumf %28, %29 : vector<4x2048xf32>
      %31 = math.log %30 : vector<4x2048xf32>
      %cst_16 = arith.constant 0.333333343 : f32
      %32 = vector.broadcast %cst_16 : f32 to vector<4x2048xf32>
      %33 = arith.mulf %31, %32 : vector<4x2048xf32>
      %34 = math.exp %33 : vector<4x2048xf32>
      %c0_17 = arith.constant 0 : index
      %c0_18 = arith.constant 0 : index
      %35 = vector.load %arg7[%c0_17, %c0_18] : memref<4x2048xf32, #tpu.memory_space<vmem>>, vector<4x2048xf32>
      tpu.vector_store %arg7[%c0_17, %c0_18], %34 {strides = array<i32>} : memref<4x2048xf32, #tpu.memory_space<vmem>>, vector<4x2048xf32>,
      %c0_19 = arith.constant 0 : index
      %c0_20 = arith.constant 0 : index
      %36 = vector.load %arg3[%c0_19, %c0_20] : memref<1x2048xf32, #tpu.memory_space<vmem>>, vector<1x2048xf32>
      %37 = vector.broadcast %36 : vector<1x2048xf32> to vector<4x2048xf32>
      %38 = arith.mulf %34, %37 : vector<4x2048xf32>
      %c0_21 = arith.constant 0 : index
      %c0_22 = arith.constant 0 : index
      %39 = vector.load %arg4[%c0_21, %c0_22] : memref<1x2048xf32, #tpu.memory_space<vmem>>, vector<1x2048xf32>
      %40 = vector.broadcast %39 : vector<1x2048xf32> to vector<4x2048xf32>
      %41 = arith.addf %38, %40 : vector<4x2048xf32>
      %42 = arith.truncf %41 : vector<4x2048xf32> to vector<4x2048xbf16>
      %c0_23 = arith.constant 0 : index
      %c0_24 = arith.constant 0 : index
      %43 = vector.load %arg5[%c0_23, %c0_24] : memref<2048x128xbf16, #tpu.memory_space<vmem>>, vector<2048x128xbf16>
      %cst_25 = arith.constant dense<0.000000e+00> : vector<4x128xf32>
      %44 = tpu.matmul %42, %43, %cst_25 {dimension_numbers = #tpu.dot_dimension_numbers<[1], [0], [0], [1], [0, 0, 1, 1], [], []>} : vector<4x2048xbf16>, vector<2048x128xbf16>, vector<4x128xf32> -> vector<4x128xf32>
      %c0_26 = arith.constant 0 : index
      %c0_27 = arith.constant 0 : index
      %45 = vector.load %arg6[%c0_26, %c0_27] : memref<4x128xf32, #tpu.memory_space<vmem>>, vector<4x128xf32>
      tpu.vector_store %arg6[%c0_26, %c0_27], %44 {strides = array<i32>} : memref<4x128xf32, #tpu.memory_space<vmem>>, vector<4x128xf32>,
      %46 = arith.mulf %34, %34 : vector<4x2048xf32>
      %cst_28 = arith.constant dense<0.000000e+00> : vector<4xf32>
      %47 = vector.multi_reduction <add>, %46, %cst_28 [1] : vector<4x2048xf32> to vector<4xf32>
      %48 = vector.shape_cast %47 : vector<4xf32> to vector<4x1xf32>
      %49 = math.sqrt %48 : vector<4x1xf32>
      %cst_29 = arith.constant 9.99999996E-13 : f32
      %50 = vector.broadcast %cst_29 : f32 to vector<4x1xf32>
      %51 = arith.maximumf %49, %50 : vector<4x1xf32>
      %52 = vector.broadcast %51 : vector<4x1xf32> to vector<4x2048xf32>
      %53 = arith.divf %34, %52 : vector<4x2048xf32>
      %c0_30 = arith.constant 0 : index
      %c0_31 = arith.constant 0 : index
      %54 = vector.load %arg8[%c0_30, %c0_31] : memref<4x2048xf32, #tpu.memory_space<vmem>>, vector<4x2048xf32>
      tpu.vector_store %arg8[%c0_30, %c0_31], %53 {strides = array<i32>} : memref<4x2048xf32, #tpu.memory_space<vmem>>, vector<4x2048xf32>,
    } else {
    }
    return
  }
  func.func @transform_0(%arg0: i32, %arg1: i32) -> (i32, i32, i32) {
    %c0_i32 = arith.constant 0 : i32
    %c0_i32_0 = arith.constant 0 : i32
    return %arg0, %arg1, %c0_i32 : i32, i32, i32
  }
  func.func @transform_1(%arg0: i32, %arg1: i32) -> (i32, i32) {
    %c0_i32 = arith.constant 0 : i32
    %c0_i32_0 = arith.constant 0 : i32
    %c0_i32_1 = arith.constant 0 : i32
    return %c0_i32, %c0_i32_0 : i32, i32
  }
  func.func @transform_2(%arg0: i32, %arg1: i32) -> (i32, i32) {
    %c0_i32 = arith.constant 0 : i32
    %c0_i32_0 = arith.constant 0 : i32
    %c0_i32_1 = arith.constant 0 : i32
    return %c0_i32, %c0_i32_0 : i32, i32
  }
  func.func @transform_3(%arg0: i32, %arg1: i32) -> (i32, i32) {
    %c0_i32 = arith.constant 0 : i32
    %c0_i32_0 = arith.constant 0 : i32
    %c0_i32_1 = arith.constant 0 : i32
    return %c0_i32, %c0_i32_0 : i32, i32
  }
  func.func @transform_4(%arg0: i32, %arg1: i32) -> (i32, i32) {
    %c0_i32 = arith.constant 0 : i32
    %c0_i32_0 = arith.constant 0 : i32
    return %arg0, %c0_i32 : i32, i32
  }
  func.func @transform_5(%arg0: i32, %arg1: i32) -> (i32, i32) {
    %c0_i32 = arith.constant 0 : i32
    %c0_i32_0 = arith.constant 0 : i32
    return %arg0, %c0_i32 : i32, i32
  }
  func.func @transform_6(%arg0: i32, %arg1: i32) -> (i32, i32) {
    %c0_i32 = arith.constant 0 : i32
    %c0_i32_0 = arith.constant 0 : i32
    return %arg0, %c0_i32 : i32, i32
  }
}

</mosaic_0001>

<bundles_post_ra>
// kernel: network_forward.7
= control target key start
LH: loop header
LB: loop body
LE: loop exit
PB: predicated region body
PF: predicated region fallthrough
CT: control target
= control target key end

     0   :  { %s1402_s15 = smov 0   ;;  %s1404_s16 = smov 0   ;;  %s1532_s0 = inlined_call_operand.vmem [shape: bf16[2,128,256], index: 0, kind: input, shape index: {}]   ;;  %s1533_s1 = inlined_call_operand.vmem [shape: bf16[2,256,128], index: 1, kind: input, shape index: {}]   ;;  %s1534_s2 = inlined_call_operand.vmem [shape: f32[2,1,128], index: 2, kind: input, shape index: {}]   ;;  %s1535_s3 = inlined_call_operand.vmem [shape: f32[2,1,128], index: 3, kind: input, shape index: {}]   ;;  %s1536_s4 = inlined_call_operand.vmem [shape: bf16[2,128,128], index: 4, kind: output, shape index: {}]  }
   0x1   :  { %s1406_s17 = smov 0  }
   0x2 LB: > { %s40_s18 = sadd.s32 1, %s1371_s16  ;;  %p1084_p0 = scmp.ge.s32.totalorder %s1375_s17, 1  ;;  %s1375_s17 = sphi %s1406_s17, %s14_s17   ;;  %s1371_s16 = sphi %s1404_s16, %s1538_s16   ;;  %s1367_s15 = sphi %s1402_s15, %s1537_s15  }
   0x3   : > { %p42_p1 = scmp.ge.s32.totalorder %s40_s18, 2  ;;  %p255_p2 = scmp.lt.s32.totalorder %s1375_s17, 3 }
   0x5   : > { %s1540_s18 = smov (%p42_p1, %s40_s18), 0  ;;  %p256_p3 = pnand %p1084_p0, %p255_p2 }
   0x6   : > { %p323_p4 = scmp.lt.s32.totalorder (!%p256_p3), %s1367_s15, 1 }
   0x7   : > { %259 = sbr.rel (%p256_p3) target bundleno = 282 (0x11a), region = 36 }
   0xc   : > { %s1542_s15 = smov (!%p323_p4, %s1367_s15), 1 }
   0xd   : > { %s1143_s19 = sshll.u32 %s1542_s15, 7  ;;  %s355_s28 = scalar_lea.vmem %s1534_s2, %s1542_s15 }
   0xe   : > { %s1426_s22 = scalar_lea.vmem %s1533_s1, %s1143_s19  ;;  %s1440_s25 = scalar_lea.vmem %s1532_s0, %s1143_s19  ;;  %v1469_v35 = vld [vmem:[%s355_s28] ss:$0 sm:$0xff] }
   0xf   : > { %v1313_v0 = vld [vmem:[%s1426_s22 + $0x78] sm:$0xff]   ;;  %v1315_v2 = vld [vmem:[%s1426_s22 + $0x70] sm:$0xff]   ;;  %v1317_v4 = vld [vmem:[%s1426_s22 + $0x68] sm:$0xff]   ;;  %s361_s5 = scalar_lea.vmem %s1535_s3, %s1542_s15  ;;  %s1145_s6 = sshll.u32 %s1542_s15, 6 }
  0x10   : > { %v1314_v1 = vld [vmem:[%s1426_s22 + $0x38] sm:$0xff]   ;;  %1209 = vmatprep.subr.bf16.mxu0 %v1313_v0  ;;  %1273 = vmatprep.subr.bf16.mxu1 %v1313_v0  ;;  %v1316_v3 = vld [vmem:[%s1426_s22 + $0x30] sm:$0xff]   ;;  %v1318_v5 = vld [vmem:[%s1426_s22 + $0x28] sm:$0xff]   ;;  %s1489_s9 = scalar_lea.vmem %s1536_s4, %s1145_s6 }
  0x11   : > { %1210 = vmatpush3.bf16.msra.mxu0 %v1314_v1  ;;  %1281 = vmatpush3.bf16.msra.mxu1 %v1314_v1  ;;  %v1319_v6 = vld [vmem:[%s1426_s22 + $0x60] sm:$0xff]   ;;  %v1321_v8 = vld [vmem:[%s1426_s22 + $0x58] sm:$0xff]   ;;  %v1323_v10 = vld [vmem:[%s1426_s22 + $0x50] sm:$0xff]  }
  0x12   : > { %1211 = vmatprep.subr.bf16.mxu0 %v1315_v2  ;;  %1274 = vmatprep.subr.bf16.mxu1 %v1315_v2  ;;  %v1320_v7 = vld [vmem:[%s1426_s22 + $0x20] sm:$0xff]   ;;  %v1322_v9 = vld [vmem:[%s1426_s22 + $0x18] sm:$0xff]   ;;  %v1324_v13 = vld [vmem:[%s1426_s22 + $0x10] sm:$0xff]  }
  0x13   : > { %v1331_v11 = vld [vmem:[%s1440_s25 + $0x4] ss:$8 sps:$4 sm:$0xff]   ;;  %v1329_v18 = vld [vmem:[%s1440_s25] ss:$8 sps:$4 sm:$0xff]   ;;  %v1335_v20 = vld [vmem:[%s1440_s25 + $0x14] ss:$8 sps:$4 sm:$0xff]  }
  0x14   : > { %v1334_v12 = vld [vmem:[%s1440_s25 + $0x44] ss:$8 sps:$4 sm:$0xff]   ;;  %668 = vmatprep.mubr.bf16.mxu0 %v1331_v11  ;;  %v1332_v19 = vld [vmem:[%s1440_s25 + $0x40] ss:$8 sps:$4 sm:$0xff]   ;;  %v1337_v21 = vld [vmem:[%s1440_s25 + $0x54] ss:$8 sps:$4 sm:$0xff]  }
  0x15   : > { %1212 = vmatpush3.bf16.msra.mxu0 %v1316_v3  ;;  %1282 = vmatpush3.bf16.msra.mxu1 %v1316_v3  ;;  %v1325_v14 = vld [vmem:[%s1426_s22 + $0x48] sm:$0xff]   ;;  %v1327_v16 = vld [vmem:[%s1426_s22 + $0x40] sm:$0xff]   ;;  %v1339_v22 = vld [vmem:[%s1440_s25 + $0x10] ss:$8 sps:$4 sm:$0xff]  }
  0x16   : > { %1213 = vmatprep.subr.bf16.mxu0 %v1317_v4  ;;  %1275 = vmatprep.subr.bf16.mxu1 %v1317_v4  ;;  %v1326_v15 = vld [vmem:[%s1426_s22 + $0x8] sm:$0xff]   ;;  %v1328_v17 = vld [vmem:[%s1426_s22] sm:$0xff]   ;;  %v1340_v23 = vld [vmem:[%s1440_s25 + $0x50] ss:$8 sps:$4 sm:$0xff]  }
  0x17   : > { %700 = vmatprep.mubr.bf16.mxu1 %v1334_v12  ;;  %v1341_v24 = vld [vmem:[%s1440_s25 + $0x24] ss:$8 sps:$4 sm:$0xff]   ;;  %v1345_v26 = vld [vmem:[%s1440_s25 + $0x20] ss:$8 sps:$4 sm:$0xff]   ;;  %v1347_v28 = vld [vmem:[%s1440_s25 + $0x34] ss:$8 sps:$4 sm:$0xff]  }
  0x18   : > { %v1343_v25 = vld [vmem:[%s1440_s25 + $0x64] ss:$8 sps:$4 sm:$0xff]   ;;  %v1346_v27 = vld [vmem:[%s1440_s25 + $0x60] ss:$8 sps:$4 sm:$0xff]   ;;  %v1349_v29 = vld [vmem:[%s1440_s25 + $0x74] ss:$8 sps:$4 sm:$0xff]  }
  0x19   : > { %1214 = vmatpush3.bf16.msra.mxu0 %v1318_v5  ;;  %1283 = vmatpush3.bf16.msra.mxu1 %v1318_v5  ;;  %v1351_v30 = vld [vmem:[%s1440_s25 + $0x30] ss:$8 sps:$4 sm:$0xff]   ;;  %v1477_v43 = vld [vmem:[%s361_s5] ss:$0 sm:$0xff] }
  0x1a   : > { %1215 = vmatprep.subr.bf16.mxu0 %v1319_v6  ;;  %1276 = vmatprep.subr.bf16.mxu1 %v1319_v6  ;;  %v1352_v31 = vld [vmem:[%s1440_s25 + $0x70] ss:$8 sps:$4 sm:$0xff]  }
  0x1d   : > { %1216 = vmatpush3.bf16.msra.mxu0 %v1320_v7  ;;  %1284 = vmatpush3.bf16.msra.mxu1 %v1320_v7 }
  0x1e   : > { %1217 = vmatprep.subr.bf16.mxu0 %v1321_v8  ;;  %1277 = vmatprep.subr.bf16.mxu1 %v1321_v8 }
  0x21   : > { %1218 = vmatpush3.bf16.msra.mxu0 %v1322_v9  ;;  %1285 = vmatpush3.bf16.msra.mxu1 %v1322_v9 }
  0x22   : > { %1219 = vmatprep.subr.bf16.mxu0 %v1323_v10  ;;  %1278 = vmatprep.subr.bf16.mxu1 %v1323_v10 }
  0x25   : > { %1220 = vmatpush3.bf16.msra.mxu0 %v1324_v13  ;;  %1286 = vmatpush3.bf16.msra.mxu1 %v1324_v13 }
  0x26   : > { %1221 = vmatprep.subr.bf16.mxu0 %v1325_v14  ;;  %1279 = vmatprep.subr.bf16.mxu1 %v1325_v14 }
  0x29   : > { %1222 = vmatpush3.bf16.msra.mxu0 %v1326_v15  ;;  %1287 = vmatpush3.bf16.msra.mxu1 %v1326_v15 }
  0x2a   : > { %1223 = vmatprep.subr.bf16.mxu0 %v1327_v16  ;;  %1280 = vmatprep.subr.bf16.mxu1 %v1327_v16 }
  0x2d   : > { %1224 = vmatpush3.bf16.msra.mxu0 %v1328_v17  ;;  %1288 = vmatpush3.bf16.msra.mxu1 %v1328_v17 }
  0x30   : > { %669 = vmatmul.mubr.bf16.vlgmr.msra.gmra.mxu0 %v1329_v18  ;;  %701 = vmatmul.mubr.bf16.vlgmr.msra.gmra.mxu1 %v1332_v19 }
  0x31   : > { %676 = vmatprep.mubr.bf16.mxu0 %v1335_v20  ;;  %708 = vmatprep.mubr.bf16.mxu1 %v1337_v21 }
  0x38   : > { %677 = vmatmul.mubr.bf16.gmra.mxu0 %v1339_v22  ;;  %709 = vmatmul.mubr.bf16.gmra.mxu1 %v1340_v23 }
  0x39   : > { %684 = vmatprep.mubr.bf16.mxu0 %v1341_v24  ;;  %716 = vmatprep.mubr.bf16.mxu1 %v1343_v25 }
  0x40   : > { %685 = vmatmul.mubr.bf16.gmra.mxu0 %v1345_v26  ;;  %717 = vmatmul.mubr.bf16.gmra.mxu1 %v1346_v27 }
  0x41   : > { %692 = vmatprep.mubr.bf16.mxu0 %v1347_v28  ;;  %724 = vmatprep.mubr.bf16.mxu1 %v1349_v29 }
  0x48   : > { %693 = vmatmul.mubr.bf16.gmra.mxu0 %v1351_v30  ;;  %725 = vmatmul.mubr.bf16.gmra.mxu1 %v1352_v31 }
  0xf0   : > { %v1225_v32 = vpop.f32.mrf.mxu0  ;;  %v1249_v33 = vpop.f32.mrf.mxu1 }
  0xf2   : > { %v1226_v34 = vpop.f32.mrf.mxu0  ;;  %v1250_v36 = vpop.f32.mrf.mxu1 }
  0xf3   : > { %v1227_v37 = vadd.f32 %v1226_v34, %v1225_v32  ;;  %v1251_v38 = vadd.f32 %v1250_v36, %v1249_v33 }
  0xf4   : > { %v1228_v39 = vpop.f32.mrf.mxu0  ;;  %v1252_v40 = vpop.f32.mrf.mxu1 }
  0xf5   : > { %v791_v41 = vmul.f32 %v1227_v37, %v1469_v35  ;;  %v799_v42 = vmul.f32 %v1251_v38, %v1469_v35 }
  0xf6   : > { %v1229_v44 = vpop.f32.mrf.mxu0  ;;  %v1253_v45 = vpop.f32.mrf.mxu1 }
  0xf7   : > { %v1230_v46 = vadd.f32 %v1229_v44, %v1228_v39  ;;  %v1254_v47 = vadd.f32 %v1253_v45, %v1252_v40  ;;  %v814_v50 = vadd.f32 %v1477_v43, %v791_v41  ;;  %v822_v51 = vadd.f32 %v1477_v43, %v799_v42 }
  0xf8   : > { %v1231_v48 = vpop.f32.mrf.mxu0  ;;  %v1255_v49 = vpop.f32.mrf.mxu1 }
  0xf9   : > { %v792_v52 = vmul.f32 %v1230_v46, %v1469_v35  ;;  %v800_v53 = vmul.f32 %v1254_v47, %v1469_v35  ;;  %v830_v62 = vmax.f32 %v814_v50, 0.0  ;;  %v838_v63 = vmax.f32 %v822_v51, 0.0 }
  0xfa   : > { %v1232_v54 = vpop.f32.mrf.mxu0  ;;  %v1256_v55 = vpop.f32.mrf.mxu1 }
  0xfb   : > { %v815_v56 = vadd.f32 %v1477_v43, %v792_v52  ;;  %v823_v57 = vadd.f32 %v1477_v43, %v800_v53  ;;  %v1233_v58 = vadd.f32 %v1232_v54, %v1231_v48  ;;  %v1257_v59 = vadd.f32 %v1256_v55, %v1255_v49 }
  0xfc   : > { %v1234_v60 = vpop.f32.mrf.mxu0  ;;  %v1258_v61 = vpop.f32.mrf.mxu1 }
  0xfd   : > { %v831_v0 = vmax.f32 %v815_v56, 0.0  ;;  %v839_v1 = vmax.f32 %v823_v57, 0.0  ;;  %v793_v2 = vmul.f32 %v1233_v58, %v1469_v35  ;;  %v801_v3 = vmul.f32 %v1257_v59, %v1469_v35 }
  0xfe   : > { %v1235_v4 = vpop.f32.mrf.mxu0  ;;  %v1259_v5 = vpop.f32.mrf.mxu1 }
  0xff   : > { %v1165_v6 = vpack.c.bf16 %v831_v0, %v830_v62  ;;  %v1185_v7 = vpack.c.bf16 %v839_v1, %v838_v63  ;;  %v1236_v8 = vadd.f32 %v1235_v4, %v1234_v60  ;;  %v1260_v9 = vadd.f32 %v1259_v5, %v1258_v61 }
 0x100   : > { %v1237_v10 = vpop.f32.mrf.mxu0  ;;  %v1261_v11 = vpop.f32.mrf.mxu1  ;;  %v816_v12 = vadd.f32 %v1477_v43, %v793_v2  ;;  %v824_v13 = vadd.f32 %v1477_v43, %v801_v3 }
 0x101   : > { %1166 = vst [vmem:[%s1489_s9] sm:$0xff] %v1165_v6   ;;  %1205 = vst [vmem:[%s1489_s9 + $0x20] sm:$0xff] %v1185_v7   ;;  %v794_v14 = vmul.f32 %v1236_v8, %v1469_v35  ;;  %v802_v15 = vmul.f32 %v1260_v9, %v1469_v35 }
 0x102   : > { %v1238_v16 = vpop.f32.mrf.mxu0  ;;  %v1262_v17 = vpop.f32.mrf.mxu1  ;;  %v832_v26 = vmax.f32 %v816_v12, 0.0  ;;  %v840_v27 = vmax.f32 %v824_v13, 0.0 }
 0x103   : > { %v1239_v18 = vadd.f32 %v1238_v16, %v1237_v10  ;;  %v1263_v19 = vadd.f32 %v1262_v17, %v1261_v11  ;;  %v817_v20 = vadd.f32 %v1477_v43, %v794_v14  ;;  %v825_v21 = vadd.f32 %v1477_v43, %v802_v15 }
 0x104   : > { %v1240_v22 = vpop.f32.mrf.mxu0  ;;  %v1264_v23 = vpop.f32.mrf.mxu1 }
 0x105   : > { %v795_v24 = vmul.f32 %v1239_v18, %v1469_v35  ;;  %v803_v25 = vmul.f32 %v1263_v19, %v1469_v35  ;;  %v833_v28 = vmax.f32 %v817_v20, 0.0  ;;  %v841_v29 = vmax.f32 %v825_v21, 0.0 }
 0x106   : > { %v1241_v30 = vpop.f32.mrf.mxu0  ;;  %v1265_v31 = vpop.f32.mrf.mxu1 }
 0x107   : > { %v1242_v32 = vadd.f32 %v1241_v30, %v1240_v22  ;;  %v1266_v33 = vadd.f32 %v1265_v31, %v1264_v23  ;;  %v1170_v34 = vpack.c.bf16 %v833_v28, %v832_v26  ;;  %v1190_v36 = vpack.c.bf16 %v841_v29, %v840_v27 }
 0x108   : > { %v1243_v37 = vpop.f32.mrf.mxu0  ;;  %v1267_v38 = vpop.f32.mrf.mxu1  ;;  %v818_v39 = vadd.f32 %v1477_v43, %v795_v24  ;;  %v826_v40 = vadd.f32 %v1477_v43, %v803_v25 }
 0x109   : > { %v796_v41 = vmul.f32 %v1242_v32, %v1469_v35  ;;  %v804_v42 = vmul.f32 %v1266_v33, %v1469_v35  ;;  %1202 = vst [vmem:[%s1489_s9 + $0x8] sm:$0xff] %v1170_v34   ;;  %1206 = vst [vmem:[%s1489_s9 + $0x28] sm:$0xff] %v1190_v36  }
 0x10a   : > { %v1244_v44 = vpop.f32.mrf.mxu0  ;;  %v1268_v45 = vpop.f32.mrf.mxu1  ;;  %v834_v52 = vmax.f32 %v818_v39, 0.0  ;;  %v842_v53 = vmax.f32 %v826_v40, 0.0 }
 0x10b   : > { %v819_v46 = vadd.f32 %v1477_v43, %v796_v41  ;;  %v827_v47 = vadd.f32 %v1477_v43, %v804_v42  ;;  %v1245_v48 = vadd.f32 %v1244_v44, %v1243_v37  ;;  %v1269_v49 = vadd.f32 %v1268_v45, %v1267_v38 }
 0x10c   : > { %v1246_v50 = vpop.f32.mrf.mxu0  ;;  %v1270_v51 = vpop.f32.mrf.mxu1 }
 0x10d   : > { %v835_v54 = vmax.f32 %v819_v46, 0.0  ;;  %v843_v55 = vmax.f32 %v827_v47, 0.0  ;;  %v797_v56 = vmul.f32 %v1245_v48, %v1469_v35  ;;  %v805_v57 = vmul.f32 %v1269_v49, %v1469_v35 }
 0x10e   : > { %v1247_v58 = vpop.f32.mrf.mxu0  ;;  %v1271_v59 = vpop.f32.mrf.mxu1 }
 0x10f   : > { %v1175_v60 = vpack.c.bf16 %v835_v54, %v834_v52  ;;  %v1195_v61 = vpack.c.bf16 %v843_v55, %v842_v53  ;;  %v1248_v62 = vadd.f32 %v1247_v58, %v1246_v50  ;;  %v1272_v63 = vadd.f32 %v1271_v59, %v1270_v51 }
 0x110   : > { %v820_v0 = vadd.f32 %v1477_v43, %v797_v56  ;;  %v828_v1 = vadd.f32 %v1477_v43, %v805_v57 }
 0x111   : > { %1203 = vst [vmem:[%s1489_s9 + $0x10] sm:$0xff] %v1175_v60   ;;  %1207 = vst [vmem:[%s1489_s9 + $0x30] sm:$0xff] %v1195_v61   ;;  %v798_v2 = vmul.f32 %v1248_v62, %v1469_v35  ;;  %v806_v3 = vmul.f32 %v1272_v63, %v1469_v35 }
 0x112   : > { %v836_v6 = vmax.f32 %v820_v0, 0.0  ;;  %v844_v7 = vmax.f32 %v828_v1, 0.0 }
 0x113   : > { %v821_v4 = vadd.f32 %v1477_v43, %v798_v2  ;;  %v829_v5 = vadd.f32 %v1477_v43, %v806_v3 }
 0x115   : > { %v837_v8 = vmax.f32 %v821_v4, 0.0  ;;  %v845_v9 = vmax.f32 %v829_v5, 0.0 }
 0x117   : > { %v1180_v10 = vpack.c.bf16 %v837_v8, %v836_v6  ;;  %v1200_v11 = vpack.c.bf16 %v845_v9, %v844_v7 }
 0x119   : > { %1204 = vst [vmem:[%s1489_s9 + $0x18] sm:$0xff] %v1180_v10   ;;  %1208 = vst [vmem:[%s1489_s9 + $0x38] sm:$0xff] %v1200_v11  }
 0x11a PF: > { %s14_s17 = sadd.s32 1, %s1375_s17   ;;  %s1537_s15 = smov %s1371_s16 }
 0x11b   : > { %p11_p5 = scmp.ge.s32.totalorder %s14_s17, 4   ;;  %s1538_s16 = smov %s1540_s18 }
 0x11d   :  { %13 = sbr.rel (!%p11_p5) target bundleno = 2 (0x2), region = 83 }

// kernel: network_forward.8
= control target key start
LH: loop header
LB: loop body
LE: loop exit
PB: predicated region body
PF: predicated region fallthrough
CT: control target
= control target key end

     0   :  { %s689_s15 = smov 0   ;;  %s847_s0 = inlined_call_operand.vmem [shape: bf16[4,5,5,128], index: 0, kind: input, shape index: {}]   ;;  %s848_s1 = inlined_call_operand.vmem [shape: bf16[4,5,4,128], index: 1, kind: input, shape index: {}]   ;;  %s849_s2 = inlined_call_operand.vmem [shape: bf16[4,4,5,128], index: 2, kind: input, shape index: {}]   ;;  %s850_s3 = inlined_call_operand.vmem [shape: bf16[4,4,4,128], index: 3, kind: input, shape index: {}]   ;;  %s851_s4 = inlined_call_operand.vmem [shape: bf16[4,4,4,128], index: 4, kind: output, shape index: {}]  }
   0x1 LB: > { %s626_s16 = sadd.s32 4294967295, %s661_s15   ;;  %p630_p0 = scmp.ge.s32.totalorder %s661_s15, 1  ;;  %s661_s15 = sphi %s689_s15, %s14_s15  }
   0x2   : > { %p192_p1 = scmp.lt.s32.totalorder %s661_s15, 5 }
   0x4   : > { %p193_p2 = pnand %p630_p0, %p192_p1 }
   0x5   : > { %p233_p3 = scmp.lt.s32.totalorder (!%p193_p2), %s626_s16, 3 }
   0x6   : > { %196 = sbr.rel (%p193_p2) target bundleno = 60 (0x3c), region = 36 }
   0xb   : > { %v287_v0 = vlaneseq  ;;  %v663_v1 = vmov 1983009808   ;;  %s855_s16 = smov (!%p233_p3, %s626_s16), 3  ;;  %vm316_vm0 = vsmask.f32 1280 }
   0xc   : > { %v285_v2 = vunpack.c.l.s4 %v663_v1  ;;  %s644_s17 = smul.u32 20, %s855_s16  ;;  %s641_s18 = sshll.u32 %s855_s16, 4  ;;  %vm317_vm1 = vsmask.f32 3336  ;;  %vm319_vm2 = vsmask.f32 5392 }
   0xd   : > { %v288_v3 = vshrl.u32 %v287_v0, 7  ;;  %s704_s21 = scalar_lea.vmem %s849_s2, %s641_s18  ;;  %s642_s25 = sshll.u32 %s855_s16, 3  ;;  %vm321_vm3 = vsmask.f32 7448  ;;  %vm318_vm4 = vmor %vm316_vm0, %vm317_vm1 }
   0xe   : > { %v286_v4 = vunpack.c.0.s8 %v285_v2  ;;  %s711_s24 = scalar_lea.vmem %s847_s0, %s644_s17  ;;  %v715_v6 = vld [vmem:[%s704_s21] sm:$0x7]  ;;  %v718_v7 = vld [vmem:[%s704_s21 + $0x4] sm:$0x7]  ;;  %s252_s28 = scalar_lea.vmem %s850_s3, %s642_s25  ;;  %vm320_vm5 = vmor %vm318_vm4, %vm319_vm2 }
   0xf   : > { %v726_v8 = vld [vmem:[%s711_s24] sm:$0x7]  ;;  %v729_v9 = vld [vmem:[%s711_s24 + $0x4] sm:$0x7]  ;;  %v732_v10 = vld [vmem:[%s711_s24 + $0x8] sm:$0x7]  ;;  %s820_s9 = scalar_lea.vmem %s851_s4, %s642_s25 }
  0x10   : > { %v706_v5 = vsub.s32 %v286_v4, %v288_v3  ;;  %v741_v13 = vld [vmem:[%s711_s24 + $0xc] sm:$0x7]  ;;  %v272_v16 = vld [vmem:[%s252_s28] sm:$0x3]  ;;  %v273_v17 = vld [vmem:[%s252_s28 + $0x2] sm:$0x3] }
  0x11   : > { %v747_v18 = vld [vmem:[%s252_s28 + $0x4] sm:$0x3]  ;;  %v757_v23 = vld [vmem:[%s252_s28 + $0x6] sm:$0x3]  ;;  %v276_v24 = vmax.bf16 %v272_v16, %v726_v8  ;;  %v277_v25 = vmax.bf16 %v273_v17, %v729_v9  ;;  %s645_s29 = smul.u32 10, %s855_s16  ;;  %vm770_vm6 = vmor %vm320_vm5, %vm321_vm3 }
  0x12   : > { %v441_v11 = vrot.slane %v715_v6, %v706_v5  ;;  %v738_v12 = vrot.slane %v718_v7, %v706_v5  ;;  %v290_v14 = vrot.slane %v726_v8, %v706_v5  ;;  %v298_v15 = vrot.slane %v729_v9, %v706_v5 }
  0x13   : > { %v306_v19 = vrot.slane %v732_v10, %v706_v5  ;;  %v753_v20 = vrot.slane %v741_v13, %v706_v5  ;;  %v278_v26 = vmax.bf16 %v747_v18, %v732_v10  ;;  %v279_v28 = vmax.bf16 %v757_v23, %v741_v13  ;;  %s778_s6 = scalar_lea.vmem %s848_s1, %s645_s29 }
  0x14   : > { %v442_v21 = vcombine.high %v441_v11, %v441_v11  ;;  %v450_v22 = vcombine.high %v738_v12, %v738_v12  ;;  %v291_v27 = vcombine.high %v290_v14, %v290_v14  ;;  %v299_v29 = vcombine.high %v298_v15, %v298_v15  ;;  %v263_v16 = vld [vmem:[%s778_s6] sm:$0x3] }
  0x15   : > { %v324_v30 = vshrl.u32 %v290_v14, 16  ;;  %v327_v31 = vshll.u32 %v290_v14, 16  ;;  %v338_v33 = vshrl.u32 %v298_v15, 16  ;;  %v341_v34 = vshll.u32 %v298_v15, 16 }
  0x16   : > { %v333_v32 = vshll.u32 %v291_v27, 16  ;;  %v468_v35 = vshrl.u32 %v441_v11, 16  ;;  %v347_v38 = vshll.u32 %v299_v29, 16  ;;  %v471_v39 = vshll.u32 %v441_v11, 16 }
  0x17   : > { %v326_v36 = vrot.slane %v324_v30, 6  ;;  %v329_v37 = vrot.slane %v327_v31, 7  ;;  %v340_v41 = vrot.slane %v338_v33, 6  ;;  %v343_v42 = vrot.slane %v341_v34, 7  ;;  %v794_v30 = vld [vmem:[%s704_s21 + $0x8] sm:$0x7] }
  0x18   : > { %v335_v40 = vrot.slane %v333_v32, 7  ;;  %v470_v43 = vrot.slane %v468_v35, 6  ;;  %v349_v45 = vrot.slane %v347_v38, 7  ;;  %v473_v46 = vrot.slane %v471_v39, 7  ;;  %v798_v31 = vld [vmem:[%s711_s24 + $0x10] sm:$0x7] }
  0x19   : > { %v330_v44 = vor.u32 %v329_v37, %v326_v36  ;;  %v477_v47 = vshll.u32 %v442_v21, 16  ;;  %v344_v49 = vor.u32 %v343_v42, %v340_v41  ;;  %v307_v50 = vcombine.high %v306_v19, %v306_v19 }
  0x1a   : > { %v352_v51 = vshrl.u32 %v306_v19, 16  ;;  %v355_v52 = vshll.u32 %v306_v19, 16  ;;  %v474_v54 = vor.u32 %v473_v46, %v470_v43  ;;  %v482_v56 = vshrl.u32 %v738_v12, 16 }
  0x1b   : > { %v331_v53 = vrot.slane %v330_v44, 2  ;;  %v479_v55 = vrot.slane %v477_v47, 7  ;;  %v345_v57 = vrot.slane %v344_v49, 2  ;;  %v361_v60 = vshll.u32 %v307_v50, 16 }
  0x1c   : > { %v354_v58 = vrot.slane %v352_v51, 6  ;;  %v357_v59 = vrot.slane %v355_v52, 7  ;;  %v475_v62 = vrot.slane %v474_v54, 2  ;;  %v484_v63 = vrot.slane %v482_v56, 6 }
  0x1d   : > { %v336_v61 = vsel %vm770_vm6, %v331_v53, %v335_v40  ;;  %v485_v0 = vshll.u32 %v738_v12, 16  ;;  %v350_v1 = vsel %vm770_vm6, %v345_v57, %v349_v45  ;;  %v363_v4 = vrot.slane %v361_v60, 7 }
  0x1e   : > { %v383_v2 = vmax.bf16 %v336_v61, %v276_v24  ;;  %v358_v3 = vor.u32 %v357_v59, %v354_v58  ;;  %v384_v8 = vmax.bf16 %v350_v1, %v277_v25  ;;  %v480_v11 = vsel %vm770_vm6, %v475_v62, %v479_v55  ;;  %v271_v59 = vld [vmem:[%s704_s21 + $0xc] sm:$0x7] }
  0x1f   : > { %v487_v14 = vrot.slane %v485_v0, 7  ;;  %v491_v15 = vshll.u32 %v450_v22, 16  ;;  %v315_v12 = vcombine.high %v753_v20, %v753_v20  ;;  %v366_v21 = vshrl.u32 %v753_v20, 16  ;;  %v264_v22 = vld [vmem:[%s778_s6 + $0x2] sm:$0x3] }
  0x20   : > { %v387_v17 = vmax.bf16 %v383_v2, %v729_v9  ;;  %v359_v19 = vrot.slane %v358_v3, 2  ;;  %v388_v24 = vmax.bf16 %v384_v8, %v732_v10  ;;  %v369_v25 = vshll.u32 %v753_v20, 16 }
  0x21   : > { %v488_v27 = vor.u32 %v487_v14, %v484_v63  ;;  %v493_v29 = vrot.slane %v491_v15, 7  ;;  %v368_v33 = vrot.slane %v366_v21, 6  ;;  %v375_v34 = vshll.u32 %v315_v12, 16  ;;  %v266_v15 = vld [vmem:[%s778_s6 + $0x6] sm:$0x3] }
  0x22   : > { %v415_v32 = vmax.bf16 %v387_v17, %v350_v1  ;;  %v364_v9 = vsel %vm770_vm6, %v359_v19, %v363_v4  ;;  %v371_v38 = vrot.slane %v369_v25, 7  ;;  %v457_v20 = vrot.slane %v794_v30, %v706_v5 }
  0x23   : > { %v385_v35 = vmax.bf16 %v364_v9, %v278_v26  ;;  %v416_v36 = vmax.bf16 %v388_v24, %v364_v9  ;;  %v489_v37 = vrot.slane %v488_v27, 2  ;;  %v377_v40 = vrot.slane %v375_v34, 7  ;;  %v265_v26 = vld [vmem:[%s778_s6 + $0x4] sm:$0x3] }
  0x24   : > { %v419_v39 = vmax.bf16 %v415_v32, %v263_v16  ;;  %v398_v41 = vrot.slane %v798_v31, %v706_v5  ;;  %v372_v44 = vor.u32 %v371_v38, %v368_v33  ;;  %v458_v45 = vcombine.high %v457_v20, %v457_v20 }
  0x25   : > { %v420_v42 = vmax.bf16 %v416_v36, %v264_v22  ;;  %v494_v43 = vsel %vm770_vm6, %v489_v37, %v493_v29  ;;  %v389_v10 = vmax.bf16 %v385_v35, %v741_v13  ;;  %v496_v46 = vshrl.u32 %v457_v20, 16 }
  0x26   : > { %v423_v18 = vmax.bf16 %v419_v39, %v264_v22  ;;  %v499_v47 = vshll.u32 %v457_v20, 16  ;;  %v373_v50 = vrot.slane %v372_v44, 2  ;;  %v399_v51 = vcombine.high %v398_v41, %v398_v41 }
  0x27   : > { %v424_v49 = vmax.bf16 %v420_v42, %v265_v26  ;;  %v401_v52 = vshrl.u32 %v398_v41, 16  ;;  %v498_v54 = vrot.slane %v496_v46, 6  ;;  %v505_v56 = vshll.u32 %v458_v45, 16 }
  0x28   : > { %v427_v53 = vmax.bf16 %v423_v18, %v715_v6  ;;  %v501_v55 = vrot.slane %v499_v47, 7  ;;  %v378_v58 = vsel %vm770_vm6, %v373_v50, %v377_v40  ;;  %v404_v6 = vshll.u32 %v398_v41, 16 }
  0x29   : > { %v428_v57 = vmax.bf16 %v424_v49, %v718_v7  ;;  %v403_v60 = vrot.slane %v401_v52, 6  ;;  %v386_v62 = vmax.bf16 %v378_v58, %v279_v28  ;;  %v417_v63 = vmax.bf16 %v389_v10, %v378_v58 }
  0x2a   : > { %v527_v61 = vmax.bf16 %v480_v11, %v427_v53  ;;  %v502_v0 = vor.u32 %v501_v55, %v498_v54  ;;  %v507_v2 = vrot.slane %v505_v56, 7  ;;  %v406_v3 = vrot.slane %v404_v6, 7 }
  0x2b   : > { %v528_v1 = vmax.bf16 %v494_v43, %v428_v57  ;;  %v410_v4 = vshll.u32 %v399_v51, 16  ;;  %v421_v7 = vmax.bf16 %v417_v63, %v265_v26  ;;  %v465_v14 = vrot.slane %v271_v59, %v706_v5 }
  0x2c   : > { %531 = vst [vmem:[%s820_s9] sm:$0x3] %v527_v61  ;;  %v503_v8 = vrot.slane %v502_v0, 2  ;;  %v407_v16 = vor.u32 %v406_v3, %v403_v60  ;;  %v390_v13 = vmax.bf16 %v386_v62, %v798_v31  ;;  %v267_v31 = vld [vmem:[%s778_s6 + $0x8] sm:$0x3] }
  0x2d   : > { %532 = vst [vmem:[%s820_s9 + $0x2] sm:$0x3] %v528_v1  ;;  %v412_v11 = vrot.slane %v410_v4, 7  ;;  %v425_v17 = vmax.bf16 %v421_v7, %v266_v15  ;;  %v466_v23 = vcombine.high %v465_v14, %v465_v14  ;;  %v510_v28 = vshrl.u32 %v465_v14, 16 }
  0x2e   : > { %v508_v19 = vsel %vm770_vm6, %v503_v8, %v507_v2  ;;  %v408_v12 = vrot.slane %v407_v16, 2  ;;  %v513_v21 = vshll.u32 %v465_v14, 16 }
  0x2f   : > { %v429_v24 = vmax.bf16 %v425_v17, %v794_v30  ;;  %v512_v27 = vrot.slane %v510_v28, 6  ;;  %v519_v5 = vshll.u32 %v466_v23, 16 }
  0x30   : > { %v413_v29 = vsel %vm770_vm6, %v408_v12, %v412_v11  ;;  %v515_v25 = vrot.slane %v513_v21, 7 }
  0x31   : > { %v529_v22 = vmax.bf16 %v508_v19, %v429_v24  ;;  %v418_v32 = vmax.bf16 %v413_v29, %v390_v13  ;;  %v521_v33 = vrot.slane %v519_v5, 7 }
  0x32   : > { %v516_v9 = vor.u32 %v515_v25, %v512_v27 }
  0x33   : > { %533 = vst [vmem:[%s820_s9 + $0x4] sm:$0x3] %v529_v22  ;;  %v422_v34 = vmax.bf16 %v418_v32, %v266_v15 }
  0x34   : > { %v517_v35 = vrot.slane %v516_v9, 2 }
  0x35   : > { %v426_v36 = vmax.bf16 %v422_v34, %v267_v31 }
  0x36   : > { %v522_v37 = vsel %vm770_vm6, %v517_v35, %v521_v33 }
  0x37   : > { %v430_v30 = vmax.bf16 %v426_v36, %v271_v59 }
  0x39   : > { %v530_v38 = vmax.bf16 %v522_v37, %v430_v30 }
  0x3b   : > { %534 = vst [vmem:[%s820_s9 + $0x6] sm:$0x3] %v530_v38 }
  0x3c PF: > { %s14_s15 = sadd.s32 1, %s661_s15  }
  0x3d   : > { %p11_p4 = scmp.ge.s32.totalorder %s14_s15, 6  }
  0x3f   :  { %13 = sbr.rel (!%p11_p4) target bundleno = 1 (0x1), region = 75 }

// kernel: network_forward.9
= control target key start
LH: loop header
LB: loop body
LE: loop exit
PB: predicated region body
PF: predicated region fallthrough
CT: control target
= control target key end

     0   :  { %s1664_s15 = smov 0   ;;  %s1666_s16 = smov 0   ;;  %s1983_s0 = inlined_call_operand.vmem [shape: bf16[1,64,128], index: 0, kind: input, shape index: {}]   ;;  %s1984_s1 = inlined_call_operand.vmem [shape: bf16[1,128,1024], index: 1, kind: input, shape index: {}]   ;;  %s1985_s2 = inlined_call_operand.vmem [shape: f32[1,1,1024], index: 2, kind: input, shape index: {}]   ;;  %s1986_s3 = inlined_call_operand.vmem [shape: f32[1,1,1024], index: 3, kind: input, shape index: {}]   ;;  %s1987_s4 = inlined_call_operand.vmem [shape: bf16[1,64,1024], index: 4, kind: output, shape index: {}]  }
   0x1   :  { %s1668_s17 = smov 0   ;;  %s1670_s18 = smov 0  }
   0x2   :  { %s1672_s19 = smov 0  }
   0x3 LB: > { %s32_s20 = sadd.s32 1, %s1632_s18  ;;  %s1417_s21 = sadd.s32 4294967295, %s1636_s19   ;;  %s1636_s19 = sphi %s1672_s19, %s14_s19   ;;  %s1632_s18 = sphi %s1670_s18, %s1992_s18   ;;  %s1628_s17 = sphi %s1668_s17, %s1991_s17   ;;  %s1624_s16 = sphi %s1666_s16, %s1990_s16   ;;  %s1620_s15 = sphi %s1664_s15, %s1989_s15  }
   0x4   : > { %p34_p0 = scmp.ge.s32.totalorder %s32_s20, 2  ;;  %p88_p1 = scmp.ne.s32.totalorder %s1624_s16, %s1620_s15 }
   0x5   : > { %p89_p2 = scmp.eq.s32.totalorder %s1636_s19, 0  ;;  %p178_p4 = scmp.eq.s32.totalorder %s1417_s21, 1 }
   0x6   : > { %s1994_s20 = smov (%p34_p0, %s32_s20), 0  ;;  %s81_s23 = sadd.s32 1, %s1624_s16 }
   0x7   : > { %p90_p3 = por %p89_p2, %p88_p1  ;;  %s77_s22 = ssub.s32 %s1632_s18, %s1994_s20 }
   0x8   : > { %p79_p5 = scmp.eq.s32.totalorder %s77_s22, 0  ;;  %p1699_p6 = por %p178_p4, %p88_p1 }
   0x9   : > { %p1421_p7 = scmp.ge.s32.totalorder %s1636_s19, 2 }
   0xa   : > { %s1704_s25 = scalar_select %p79_p5, %s1624_s16, %s81_s23  }
   0xb   : > { %216 = sbr.rel (%p1421_p7) target bundleno = 36 (0x24), region = 20 }
  0x10   : > { %219 = sbr.rel (!%p90_p3) target bundleno = 36 (0x24), region = 24  ;;  %s221_s26 = sand.u32 (%p90_p3), 1, %s1624_s16  }
  0x11   : > { %s1487_s27 = sshll.u32 (%p90_p3), %s1632_s18, 4  ;;  %s1422_s28 = sshll.u32 (%p90_p3), %s221_s26, 8 }
  0x12   : > { %s1712_s5 = scalar_lea.vmem (%p90_p3), %s1984_s1, %s1487_s27  ;;  %s1717_s6 = scalar_lea.vmem (%p90_p3), [#allocation3], %s1422_s28 }
  0x13   : > { %v244_v0 = vld [vmem:[%s1712_s5] sm:$0xff] (%p90_p3)  ;;  %v246_v1 = vld [vmem:[%s1712_s5 + $0x8] sm:$0xff] (%p90_p3) }
  0x14   : > { %v248_v2 = vld [vmem:[%s1712_s5 + $0x20] sm:$0xff] (%p90_p3)  ;;  %245 = vst [vmem:[%s1717_s6] sm:$0xff] (%p90_p3), %v244_v0  ;;  %247 = vst [vmem:[%s1717_s6 + $0x8] sm:$0xff] (%p90_p3), %v246_v1  ;;  %v250_v3 = vld [vmem:[%s1712_s5 + $0x28] sm:$0xff] (%p90_p3) }
  0x15   : > { %249 = vst [vmem:[%s1717_s6 + $0x10] sm:$0xff] %v248_v2  ;;  %v252_v4 = vld [vmem:[%s1712_s5 + $0x40] sm:$0xff]  ;;  %v254_v5 = vld [vmem:[%s1712_s5 + $0x48] sm:$0xff]  ;;  %251 = vst [vmem:[%s1717_s6 + $0x18] sm:$0xff] %v250_v3 }
  0x16   : > { %253 = vst [vmem:[%s1717_s6 + $0x20] sm:$0xff] %v252_v4  ;;  %255 = vst [vmem:[%s1717_s6 + $0x28] sm:$0xff] %v254_v5  ;;  %v256_v6 = vld [vmem:[%s1712_s5 + $0x60] sm:$0xff]  ;;  %v258_v7 = vld [vmem:[%s1712_s5 + $0x68] sm:$0xff] }
  0x17   : > { %v260_v8 = vld [vmem:[%s1712_s5 + $0x80] sm:$0xff]  ;;  %257 = vst [vmem:[%s1717_s6 + $0x30] sm:$0xff] %v256_v6  ;;  %259 = vst [vmem:[%s1717_s6 + $0x38] sm:$0xff] %v258_v7  ;;  %v262_v9 = vld [vmem:[%s1712_s5 + $0x88] sm:$0xff] }
  0x18   : > { %261 = vst [vmem:[%s1717_s6 + $0x40] sm:$0xff] %v260_v8  ;;  %v264_v10 = vld [vmem:[%s1712_s5 + $0xa0] sm:$0xff]  ;;  %v266_v11 = vld [vmem:[%s1712_s5 + $0xa8] sm:$0xff]  ;;  %263 = vst [vmem:[%s1717_s6 + $0x48] sm:$0xff] %v262_v9 }
  0x19   : > { %265 = vst [vmem:[%s1717_s6 + $0x50] sm:$0xff] %v264_v10  ;;  %267 = vst [vmem:[%s1717_s6 + $0x58] sm:$0xff] %v266_v11  ;;  %v268_v12 = vld [vmem:[%s1712_s5 + $0xc0] sm:$0xff]  ;;  %v270_v13 = vld [vmem:[%s1712_s5 + $0xc8] sm:$0xff] }
  0x1a   : > { %v272_v14 = vld [vmem:[%s1712_s5 + $0xe0] sm:$0xff]  ;;  %269 = vst [vmem:[%s1717_s6 + $0x60] sm:$0xff] %v268_v12  ;;  %271 = vst [vmem:[%s1717_s6 + $0x68] sm:$0xff] %v270_v13  ;;  %v274_v15 = vld [vmem:[%s1712_s5 + $0xe8] sm:$0xff] }
  0x1b   : > { %273 = vst [vmem:[%s1717_s6 + $0x70] sm:$0xff] %v272_v14  ;;  %v276_v16 = vld [vmem:[%s1712_s5 + $0x100] sm:$0xff]  ;;  %v278_v17 = vld [vmem:[%s1712_s5 + $0x108] sm:$0xff]  ;;  %275 = vst [vmem:[%s1717_s6 + $0x78] sm:$0xff] %v274_v15 }
  0x1c   : > { %277 = vst [vmem:[%s1717_s6 + $0x80] sm:$0xff] %v276_v16  ;;  %279 = vst [vmem:[%s1717_s6 + $0x88] sm:$0xff] %v278_v17  ;;  %v280_v18 = vld [vmem:[%s1712_s5 + $0x120] sm:$0xff]  ;;  %v282_v19 = vld [vmem:[%s1712_s5 + $0x128] sm:$0xff] }
  0x1d   : > { %v284_v20 = vld [vmem:[%s1712_s5 + $0x140] sm:$0xff]  ;;  %281 = vst [vmem:[%s1717_s6 + $0x90] sm:$0xff] %v280_v18  ;;  %283 = vst [vmem:[%s1717_s6 + $0x98] sm:$0xff] %v282_v19  ;;  %v286_v21 = vld [vmem:[%s1712_s5 + $0x148] sm:$0xff] }
  0x1e   : > { %285 = vst [vmem:[%s1717_s6 + $0xa0] sm:$0xff] %v284_v20  ;;  %v288_v22 = vld [vmem:[%s1712_s5 + $0x160] sm:$0xff]  ;;  %v290_v23 = vld [vmem:[%s1712_s5 + $0x168] sm:$0xff]  ;;  %287 = vst [vmem:[%s1717_s6 + $0xa8] sm:$0xff] %v286_v21 }
  0x1f   : > { %289 = vst [vmem:[%s1717_s6 + $0xb0] sm:$0xff] %v288_v22  ;;  %291 = vst [vmem:[%s1717_s6 + $0xb8] sm:$0xff] %v290_v23  ;;  %v292_v24 = vld [vmem:[%s1712_s5 + $0x180] sm:$0xff]  ;;  %v294_v25 = vld [vmem:[%s1712_s5 + $0x188] sm:$0xff] }
  0x20   : > { %v296_v26 = vld [vmem:[%s1712_s5 + $0x1a0] sm:$0xff]  ;;  %293 = vst [vmem:[%s1717_s6 + $0xc0] sm:$0xff] %v292_v24  ;;  %295 = vst [vmem:[%s1717_s6 + $0xc8] sm:$0xff] %v294_v25  ;;  %v298_v27 = vld [vmem:[%s1712_s5 + $0x1a8] sm:$0xff] }
  0x21   : > { %297 = vst [vmem:[%s1717_s6 + $0xd0] sm:$0xff] %v296_v26  ;;  %v300_v28 = vld [vmem:[%s1712_s5 + $0x1c0] sm:$0xff]  ;;  %v302_v29 = vld [vmem:[%s1712_s5 + $0x1c8] sm:$0xff]  ;;  %299 = vst [vmem:[%s1717_s6 + $0xd8] sm:$0xff] %v298_v27 }
  0x22   : > { %301 = vst [vmem:[%s1717_s6 + $0xe0] sm:$0xff] %v300_v28  ;;  %303 = vst [vmem:[%s1717_s6 + $0xe8] sm:$0xff] %v302_v29  ;;  %v304_v30 = vld [vmem:[%s1712_s5 + $0x1e0] sm:$0xff]  ;;  %v306_v31 = vld [vmem:[%s1712_s5 + $0x1e8] sm:$0xff] }
  0x23   : > { %305 = vst [vmem:[%s1717_s6 + $0xf0] sm:$0xff] %v304_v30  ;;  %307 = vst [vmem:[%s1717_s6 + $0xf8] sm:$0xff] %v306_v31 }
  0x24 PF: > { %p1425_p8 = scmp.ge.s32.totalorder %s1636_s19, 1  ;;  %p336_p9 = scmp.lt.s32.totalorder %s1636_s19, 3 }
  0x26   : > { %p337_p10 = pnand %p1425_p8, %p336_p9 }
  0x27   : > { %s343_s7 = sand.u32 (!%p337_p10), 1, %s1620_s15   ;;  %s1428_s26 = sshll.u32 (!%p337_p10), %s1628_s17, 2 }
  0x28   : > { %340 = sbr.rel (%p337_p10) target bundleno = 319 (0x13f), region = 55  ;;  %s1426_s8 = sshll.u32 (!%p337_p10), %s343_s7, 8 }
  0x29   : > { %s1787_s9 = scalar_lea.vmem (!%p337_p10), [#allocation3], %s1426_s8  ;;  %p413_p11 = scmp.lt.s32.totalorder (!%p337_p10), %s1428_s26, 7 }
  0x2a   : > { %s1427_s8 = sshll.u32 (!%p337_p10), %s343_s7, 7 }
  0x2b   : > { %s1882_s15 = scalar_lea.vmem (!%p337_p10), [#allocation4], %s1427_s8 }
  0x2d   : > { %v1638_v32 = vmov 0   ;;  %v1546_v33 = vld [vmem:[%s1787_s9 + $0xe4] ss:$16 sps:$4 sm:$0xff]   ;;  %v1548_v34 = vld [vmem:[%s1787_s9 + $0xec] ss:$16 sps:$4 sm:$0xff]   ;;  %v970_v5 = vlaneseq  ;;  %s1996_s26 = smov (!%p413_p11, %s1428_s26), 7 }
  0x2e   : > { %755 = vmatprep.mubr.bf16.mxu0 %v1638_v32  ;;  %828 = vmatprep.mubr.bf16.mxu1 %v1638_v32  ;;  %v1550_v35 = vld [vmem:[%s1787_s9 + $0xe0] ss:$16 sps:$4 sm:$0xff]   ;;  %v1551_v36 = vld [vmem:[%s1787_s9 + $0xe8] ss:$16 sps:$4 sm:$0xff]   ;;  %v1552_v37 = vld [vmem:[%s1787_s9 + $0xc4] ss:$16 sps:$4 sm:$0xff]   ;;  %s417_s29 = scalar_lea.vmem %s1985_s2, %s1996_s26  ;;  %s426_s6 = scalar_lea.vmem %s1986_s3, %s1996_s26 }
  0x2f   : > { %723 = vmatprep.subr.bf16.mxu0 %v1546_v33  ;;  %796 = vmatprep.subr.bf16.mxu1 %v1548_v34  ;;  %v1554_v38 = vld [vmem:[%s1787_s9 + $0xcc] ss:$16 sps:$4 sm:$0xff]   ;;  %v1556_v39 = vld [vmem:[%s1787_s9 + $0xc0] ss:$16 sps:$4 sm:$0xff]   ;;  %v1557_v40 = vld [vmem:[%s1787_s9 + $0xc8] ss:$16 sps:$4 sm:$0xff]  }
  0x30   : > { %724 = vmatpush1.bf16.msra.mxu0 %v1550_v35  ;;  %797 = vmatpush1.bf16.msra.mxu1 %v1551_v36  ;;  %v1558_v41 = vld [vmem:[%s1787_s9 + $0xa4] ss:$16 sps:$4 sm:$0xff]   ;;  %v1560_v42 = vld [vmem:[%s1787_s9 + $0xac] ss:$16 sps:$4 sm:$0xff]   ;;  %v1562_v43 = vld [vmem:[%s1787_s9 + $0xa0] ss:$16 sps:$4 sm:$0xff]  }
  0x31   : > { %725 = vmatprep.subr.bf16.mxu0 %v1552_v37  ;;  %798 = vmatprep.subr.bf16.mxu1 %v1554_v38  ;;  %v1563_v44 = vld [vmem:[%s1787_s9 + $0xa8] ss:$16 sps:$4 sm:$0xff]   ;;  %v1564_v45 = vld [vmem:[%s1787_s9 + $0x84] ss:$16 sps:$4 sm:$0xff]   ;;  %v1566_v46 = vld [vmem:[%s1787_s9 + $0x8c] ss:$16 sps:$4 sm:$0xff]  }
  0x32   : > { %v1568_v47 = vld [vmem:[%s1787_s9 + $0x80] ss:$16 sps:$4 sm:$0xff]   ;;  %v1569_v48 = vld [vmem:[%s1787_s9 + $0x88] ss:$16 sps:$4 sm:$0xff]   ;;  %v1570_v49 = vld [vmem:[%s1787_s9 + $0x64] ss:$16 sps:$4 sm:$0xff]  }
  0x33   : > { %v1572_v50 = vld [vmem:[%s1787_s9 + $0x6c] ss:$16 sps:$4 sm:$0xff]   ;;  %v1574_v51 = vld [vmem:[%s1787_s9 + $0x60] ss:$16 sps:$4 sm:$0xff]   ;;  %v1575_v52 = vld [vmem:[%s1787_s9 + $0x68] ss:$16 sps:$4 sm:$0xff]  }
  0x34   : > { %726 = vmatpush1.bf16.msra.mxu0 %v1556_v39  ;;  %799 = vmatpush1.bf16.msra.mxu1 %v1557_v40  ;;  %v1576_v53 = vld [vmem:[%s1787_s9 + $0x44] ss:$16 sps:$4 sm:$0xff]   ;;  %v1578_v54 = vld [vmem:[%s1787_s9 + $0x4c] ss:$16 sps:$4 sm:$0xff]   ;;  %v1580_v55 = vld [vmem:[%s1787_s9 + $0x40] ss:$16 sps:$4 sm:$0xff]  }
  0x35   : > { %727 = vmatprep.subr.bf16.mxu0 %v1558_v41  ;;  %800 = vmatprep.subr.bf16.mxu1 %v1560_v42  ;;  %v1581_v56 = vld [vmem:[%s1787_s9 + $0x48] ss:$16 sps:$4 sm:$0xff]   ;;  %v1582_v57 = vld [vmem:[%s1787_s9 + $0x24] ss:$16 sps:$4 sm:$0xff]   ;;  %v1584_v58 = vld [vmem:[%s1787_s9 + $0x2c] ss:$16 sps:$4 sm:$0xff]  }
  0x36   : > { %v1586_v59 = vld [vmem:[%s1787_s9 + $0x20] ss:$16 sps:$4 sm:$0xff]   ;;  %v1587_v60 = vld [vmem:[%s1787_s9 + $0x28] ss:$16 sps:$4 sm:$0xff]   ;;  %v1588_v61 = vld [vmem:[%s1787_s9 + $0x4] ss:$16 sps:$4 sm:$0xff]  }
  0x37   : > { %v1590_v62 = vld [vmem:[%s1787_s9 + $0xc] ss:$16 sps:$4 sm:$0xff]   ;;  %v1592_v63 = vld [vmem:[%s1787_s9] ss:$16 sps:$4 sm:$0xff]   ;;  %v1593_v0 = vld [vmem:[%s1787_s9 + $0x8] ss:$16 sps:$4 sm:$0xff]  }
  0x38   : > { %728 = vmatpush1.bf16.msra.mxu0 %v1562_v43  ;;  %801 = vmatpush1.bf16.msra.mxu1 %v1563_v44  ;;  %v1594_v1 = vld [vmem:[%s1983_s0] sm:$0xff]   ;;  %v1595_v2 = vld [vmem:[%s1983_s0 + $0x8] sm:$0xff]   ;;  %v1596_v3 = vld [vmem:[%s1983_s0 + $0x10] sm:$0xff]   ;;  %v971_v6 = vshrl.u32 %v970_v5, 7  ;;  %s1504_s7 = sshll.u32 (%p1699_p6), %s1628_s17, 4 }
  0x39   : > { %729 = vmatprep.subr.bf16.mxu0 %v1564_v45  ;;  %802 = vmatprep.subr.bf16.mxu1 %v1566_v46  ;;  %v1597_v4 = vld [vmem:[%s1983_s0 + $0x18] sm:$0xff]   ;;  %v968_v9 = vld [vmem:[%s417_s29] sm:$0xf]  ;;  %s1234_s11 = scalar_lea.vmem (%p1699_p6), %s1987_s4, %s1504_s7 }
  0x3a   : > { %v972_v7 = vsub.s32 0, %v971_v6  ;;  %v980_v8 = vsub.s32 2, %v971_v6  ;;  %v976_v10 = vsub.s32 1, %v971_v6  ;;  %v984_v11 = vsub.s32 3, %v971_v6  ;;  %v1022_v12 = vld [vmem:[%s426_s6] sm:$0xf] }
  0x3c   : > { %730 = vmatpush1.bf16.msra.mxu0 %v1568_v47  ;;  %803 = vmatpush1.bf16.msra.mxu1 %v1569_v48  ;;  %v1846_v13 = vrot.slane %v968_v9, %v972_v7  ;;  %v1848_v14 = vrot.slane %v968_v9, %v980_v8  ;;  %v1850_v15 = vrot.slane %v1022_v12, %v972_v7 }
  0x3d   : > { %731 = vmatprep.subr.bf16.mxu0 %v1570_v49  ;;  %804 = vmatprep.subr.bf16.mxu1 %v1572_v50  ;;  %v1852_v16 = vrot.slane %v1022_v12, %v980_v8  ;;  %v1854_v17 = vrot.slane %v968_v9, %v976_v10  ;;  %v1856_v18 = vrot.slane %v968_v9, %v984_v11 }
  0x3e   : > { %v1860_v23 = vrot.slane %v1022_v12, %v976_v10  ;;  %v1862_v24 = vrot.slane %v1022_v12, %v984_v11 }
  0x40   : > { %732 = vmatpush1.bf16.msra.mxu0 %v1574_v51  ;;  %805 = vmatpush1.bf16.msra.mxu1 %v1575_v52 }
  0x41   : > { %733 = vmatprep.subr.bf16.mxu0 %v1576_v53  ;;  %806 = vmatprep.subr.bf16.mxu1 %v1578_v54 }
  0x44   : > { %734 = vmatpush1.bf16.msra.mxu0 %v1580_v55  ;;  %807 = vmatpush1.bf16.msra.mxu1 %v1581_v56 }
  0x45   : > { %735 = vmatprep.subr.bf16.mxu0 %v1582_v57  ;;  %808 = vmatprep.subr.bf16.mxu1 %v1584_v58 }
  0x48   : > { %736 = vmatpush1.bf16.msra.mxu0 %v1586_v59  ;;  %809 = vmatpush1.bf16.msra.mxu1 %v1587_v60 }
  0x49   : > { %737 = vmatprep.subr.bf16.mxu0 %v1588_v61  ;;  %810 = vmatprep.subr.bf16.mxu1 %v1590_v62 }
  0x4c   : > { %738 = vmatpush1.bf16.msra.mxu0 %v1592_v63  ;;  %811 = vmatpush1.bf16.msra.mxu1 %v1593_v0 }
  0x4f   : > { %756 = vmatmul.mubr.bf16.vlgmr.msra.gmra.mxu0 %v1594_v1  ;;  %829 = vmatmul.mubr.bf16.vlgmr.msra.gmra.mxu1 %v1594_v1 }
  0x50   : > { %765 = vmatprep.mubr.bf16.mxu0 %v1638_v32  ;;  %838 = vmatprep.mubr.bf16.mxu1 %v1638_v32 }
  0x57   : > { %766 = vmatmul.mubr.bf16.gmra.mxu0 %v1595_v2  ;;  %839 = vmatmul.mubr.bf16.gmra.mxu1 %v1595_v2 }
  0x58   : > { %775 = vmatprep.mubr.bf16.mxu0 %v1638_v32  ;;  %848 = vmatprep.mubr.bf16.mxu1 %v1638_v32 }
  0x5f   : > { %776 = vmatmul.mubr.bf16.gmra.mxu0 %v1596_v3  ;;  %849 = vmatmul.mubr.bf16.gmra.mxu1 %v1596_v3 }
  0x60   : > { %785 = vmatprep.mubr.bf16.mxu0 %v1638_v32  ;;  %858 = vmatprep.mubr.bf16.mxu1 %v1638_v32 }
  0x67   : > { %786 = vmatmul.mubr.bf16.gmra.mxu0 %v1597_v4  ;;  %859 = vmatmul.mubr.bf16.gmra.mxu1 %v1597_v4 }
 0x10f   : > { %v757_v19 = vpop.f32.mrf.mxu0  ;;  %v830_v20 = vpop.f32.mrf.mxu1 }
 0x110   : > { %v990_v21 = vmul.f32 %v1846_v13, %v757_v19  ;;  %v992_v22 = vmul.f32 %v1848_v14, %v830_v20 }
 0x111   : > { %v759_v25 = vpop.f32.mrf.mxu0  ;;  %v832_v26 = vpop.f32.mrf.mxu1 }
 0x112   : > { %v1044_v27 = vadd.f32 %v1850_v15, %v990_v21  ;;  %v1046_v28 = vadd.f32 %v1852_v16, %v992_v22  ;;  %v991_v29 = vmul.f32 %v1854_v17, %v759_v25  ;;  %v993_v30 = vmul.f32 %v1856_v18, %v832_v26 }
 0x113   : > { %v761_v31 = vpop.f32.mrf.mxu0  ;;  %v834_v32 = vpop.f32.mrf.mxu1 }
 0x114   : > { %v1045_v33 = vadd.f32 %v1860_v23, %v991_v29  ;;  %v1047_v34 = vadd.f32 %v1862_v24, %v993_v30  ;;  %v1076_v35 = vmax.f32 %v1044_v27, 0.0  ;;  %v1078_v36 = vmax.f32 %v1046_v28, 0.0 }
 0x115   : > { %v994_v37 = vmul.f32 %v1846_v13, %v761_v31  ;;  %v996_v38 = vmul.f32 %v1848_v14, %v834_v32  ;;  %v763_v39 = vpop.f32.mrf.mxu0  ;;  %v836_v40 = vpop.f32.mrf.mxu1 }
 0x116   : > { %v1077_v41 = vmax.f32 %v1045_v33, 0.0  ;;  %v1079_v42 = vmax.f32 %v1047_v34, 0.0  ;;  %v995_v43 = vmul.f32 %v1854_v17, %v763_v39  ;;  %v997_v44 = vmul.f32 %v1856_v18, %v836_v40 }
 0x117   : > { %v1048_v45 = vadd.f32 %v1850_v15, %v994_v37  ;;  %v1050_v46 = vadd.f32 %v1852_v16, %v996_v38  ;;  %v767_v47 = vpop.f32.mrf.mxu0  ;;  %v840_v48 = vpop.f32.mrf.mxu1 }
 0x118   : > { %v1488_v49 = vpack.c.bf16 %v1077_v41, %v1076_v35  ;;  %v1489_v50 = vpack.c.bf16 %v1079_v42, %v1078_v36  ;;  %v1049_v51 = vadd.f32 %v1860_v23, %v995_v43  ;;  %v1051_v52 = vadd.f32 %v1862_v24, %v997_v44 }
 0x119   : > { %v1080_v53 = vmax.f32 %v1048_v45, 0.0  ;;  %v1082_v54 = vmax.f32 %v1050_v46, 0.0  ;;  %v998_v55 = vmul.f32 %v1846_v13, %v767_v47  ;;  %v1000_v56 = vmul.f32 %v1848_v14, %v840_v48  ;;  %v769_v57 = vpop.f32.mrf.mxu0  ;;  %v842_v58 = vpop.f32.mrf.mxu1 }
 0x11a   : > { %1204 = vst [vmem:[%s1882_s15] sm:$0xff] %v1488_v49  ;;  %1205 = vst [vmem:[%s1882_s15 + $0x8] sm:$0xff] %v1489_v50  ;;  %v1081_v59 = vmax.f32 %v1049_v51, 0.0  ;;  %v1083_v60 = vmax.f32 %v1051_v52, 0.0  ;;  %v999_v61 = vmul.f32 %v1854_v17, %v769_v57  ;;  %v1001_v62 = vmul.f32 %v1856_v18, %v842_v58 }
 0x11b   : > { %v1052_v63 = vadd.f32 %v1850_v15, %v998_v55  ;;  %v1054_v0 = vadd.f32 %v1852_v16, %v1000_v56  ;;  %v771_v1 = vpop.f32.mrf.mxu0  ;;  %v844_v2 = vpop.f32.mrf.mxu1 }
 0x11c   : > { %v1490_v3 = vpack.c.bf16 %v1081_v59, %v1080_v53  ;;  %v1491_v4 = vpack.c.bf16 %v1083_v60, %v1082_v54  ;;  %v1053_v5 = vadd.f32 %v1860_v23, %v999_v61  ;;  %v1055_v6 = vadd.f32 %v1862_v24, %v1001_v62 }
 0x11d   : > { %v1084_v7 = vmax.f32 %v1052_v63, 0.0  ;;  %v1086_v8 = vmax.f32 %v1054_v0, 0.0  ;;  %v1002_v9 = vmul.f32 %v1846_v13, %v771_v1  ;;  %v1004_v10 = vmul.f32 %v1848_v14, %v844_v2  ;;  %v773_v11 = vpop.f32.mrf.mxu0  ;;  %v846_v12 = vpop.f32.mrf.mxu1 }
 0x11e   : > { %1206 = vst [vmem:[%s1882_s15 + $0x10] sm:$0xff] %v1490_v3  ;;  %1207 = vst [vmem:[%s1882_s15 + $0x18] sm:$0xff] %v1491_v4  ;;  %v1085_v19 = vmax.f32 %v1053_v5, 0.0  ;;  %v1087_v20 = vmax.f32 %v1055_v6, 0.0  ;;  %v1003_v21 = vmul.f32 %v1854_v17, %v773_v11  ;;  %v1005_v22 = vmul.f32 %v1856_v18, %v846_v12 }
 0x11f   : > { %v1056_v25 = vadd.f32 %v1850_v15, %v1002_v9  ;;  %v1058_v26 = vadd.f32 %v1852_v16, %v1004_v10  ;;  %v777_v27 = vpop.f32.mrf.mxu0  ;;  %v850_v28 = vpop.f32.mrf.mxu1 }
 0x120   : > { %v1492_v29 = vpack.c.bf16 %v1085_v19, %v1084_v7  ;;  %v1493_v30 = vpack.c.bf16 %v1087_v20, %v1086_v8  ;;  %v1057_v31 = vadd.f32 %v1860_v23, %v1003_v21  ;;  %v1059_v32 = vadd.f32 %v1862_v24, %v1005_v22 }
 0x121   : > { %v1088_v33 = vmax.f32 %v1056_v25, 0.0  ;;  %v1090_v34 = vmax.f32 %v1058_v26, 0.0  ;;  %v1006_v35 = vmul.f32 %v1846_v13, %v777_v27  ;;  %v1008_v36 = vmul.f32 %v1848_v14, %v850_v28  ;;  %v779_v37 = vpop.f32.mrf.mxu0  ;;  %v852_v38 = vpop.f32.mrf.mxu1 }
 0x122   : > { %1208 = vst [vmem:[%s1882_s15 + $0x20] sm:$0xff] %v1492_v29  ;;  %1209 = vst [vmem:[%s1882_s15 + $0x28] sm:$0xff] %v1493_v30  ;;  %v1089_v39 = vmax.f32 %v1057_v31, 0.0  ;;  %v1091_v40 = vmax.f32 %v1059_v32, 0.0  ;;  %v1007_v41 = vmul.f32 %v1854_v17, %v779_v37  ;;  %v1009_v42 = vmul.f32 %v1856_v18, %v852_v38 }
 0x123   : > { %v1060_v43 = vadd.f32 %v1850_v15, %v1006_v35  ;;  %v1062_v44 = vadd.f32 %v1852_v16, %v1008_v36  ;;  %v781_v45 = vpop.f32.mrf.mxu0  ;;  %v854_v46 = vpop.f32.mrf.mxu1 }
 0x124   : > { %v1494_v47 = vpack.c.bf16 %v1089_v39, %v1088_v33  ;;  %v1495_v48 = vpack.c.bf16 %v1091_v40, %v1090_v34  ;;  %v1061_v49 = vadd.f32 %v1860_v23, %v1007_v41  ;;  %v1063_v50 = vadd.f32 %v1862_v24, %v1009_v42 }
 0x125   : > { %v1092_v51 = vmax.f32 %v1060_v43, 0.0  ;;  %v1094_v52 = vmax.f32 %v1062_v44, 0.0  ;;  %v1010_v53 = vmul.f32 %v1846_v13, %v781_v45  ;;  %v1012_v54 = vmul.f32 %v1848_v14, %v854_v46  ;;  %v783_v55 = vpop.f32.mrf.mxu0  ;;  %v856_v56 = vpop.f32.mrf.mxu1 }
 0x126   : > { %1210 = vst [vmem:[%s1882_s15 + $0x30] sm:$0xff] %v1494_v47  ;;  %1211 = vst [vmem:[%s1882_s15 + $0x38] sm:$0xff] %v1495_v48  ;;  %v1093_v57 = vmax.f32 %v1061_v49, 0.0  ;;  %v1095_v58 = vmax.f32 %v1063_v50, 0.0  ;;  %v1011_v59 = vmul.f32 %v1854_v17, %v783_v55  ;;  %v1013_v60 = vmul.f32 %v1856_v18, %v856_v56 }
 0x127   : > { %v1064_v61 = vadd.f32 %v1850_v15, %v1010_v53  ;;  %v1066_v62 = vadd.f32 %v1852_v16, %v1012_v54  ;;  %v787_v63 = vpop.f32.mrf.mxu0  ;;  %v860_v0 = vpop.f32.mrf.mxu1 }
 0x128   : > { %v1496_v1 = vpack.c.bf16 %v1093_v57, %v1092_v51  ;;  %v1497_v2 = vpack.c.bf16 %v1095_v58, %v1094_v52  ;;  %v1065_v3 = vadd.f32 %v1860_v23, %v1011_v59  ;;  %v1067_v4 = vadd.f32 %v1862_v24, %v1013_v60 }
 0x129   : > { %v1096_v5 = vmax.f32 %v1064_v61, 0.0  ;;  %v1098_v6 = vmax.f32 %v1066_v62, 0.0  ;;  %v1014_v7 = vmul.f32 %v1846_v13, %v787_v63  ;;  %v1016_v8 = vmul.f32 %v1848_v14, %v860_v0  ;;  %v789_v9 = vpop.f32.mrf.mxu0  ;;  %v862_v10 = vpop.f32.mrf.mxu1  ;;  %v1257_v50 = vld [vmem:[%s1882_s15 + $0x28] sm:$0xff] (%p1699_p6) }
 0x12a   : > { %1212 = vst [vmem:[%s1882_s15 + $0x40] sm:$0xff] %v1496_v1  ;;  %1213 = vst [vmem:[%s1882_s15 + $0x48] sm:$0xff] %v1497_v2  ;;  %v1097_v11 = vmax.f32 %v1065_v3, 0.0  ;;  %v1099_v12 = vmax.f32 %v1067_v4, 0.0  ;;  %v1015_v19 = vmul.f32 %v1854_v17, %v789_v9  ;;  %v1017_v20 = vmul.f32 %v1856_v18, %v862_v10 }
 0x12b   : > { %v1068_v21 = vadd.f32 %v1850_v15, %v1014_v7  ;;  %v1070_v22 = vadd.f32 %v1852_v16, %v1016_v8  ;;  %v791_v25 = vpop.f32.mrf.mxu0  ;;  %v864_v26 = vpop.f32.mrf.mxu1  ;;  %1258 = vst [vmem:[%s1234_s11 + $0x48] sm:$0xff] (%p1699_p6), %v1257_v50 }
 0x12c   : > { %v1498_v27 = vpack.c.bf16 %v1097_v11, %v1096_v5  ;;  %v1499_v28 = vpack.c.bf16 %v1099_v12, %v1098_v6  ;;  %v1069_v29 = vadd.f32 %v1860_v23, %v1015_v19  ;;  %v1071_v30 = vadd.f32 %v1862_v24, %v1017_v20 }
 0x12d   : > { %v1100_v31 = vmax.f32 %v1068_v21, 0.0  ;;  %v1102_v32 = vmax.f32 %v1070_v22, 0.0  ;;  %v1018_v33 = vmul.f32 %v1846_v13, %v791_v25  ;;  %v1020_v34 = vmul.f32 %v1848_v14, %v864_v26  ;;  %v793_v35 = vpop.f32.mrf.mxu0  ;;  %v866_v36 = vpop.f32.mrf.mxu1  ;;  %v1259_v51 = vld [vmem:[%s1882_s15 + $0x30] sm:$0xff] (%p1699_p6)  ;;  %v1261_v52 = vld [vmem:[%s1882_s15 + $0x38] sm:$0xff] (%p1699_p6) }
 0x12e   : > { %1214 = vst [vmem:[%s1882_s15 + $0x50] sm:$0xff] %v1498_v27  ;;  %1215 = vst [vmem:[%s1882_s15 + $0x58] sm:$0xff] %v1499_v28  ;;  %v1101_v37 = vmax.f32 %v1069_v29, 0.0  ;;  %v1103_v38 = vmax.f32 %v1071_v30, 0.0  ;;  %v1019_v39 = vmul.f32 %v1854_v17, %v793_v35  ;;  %v1021_v40 = vmul.f32 %v1856_v18, %v866_v36  ;;  %v1251_v18 = vld [vmem:[%s1882_s15 + $0x10] sm:$0xff] (%p1699_p6) }
 0x12f   : > { %v1072_v41 = vadd.f32 %v1850_v15, %v1018_v33  ;;  %v1074_v13 = vadd.f32 %v1852_v16, %v1020_v34  ;;  %v1247_v15 = vld [vmem:[%s1882_s15] sm:$0xff] (%p1699_p6)  ;;  %v1249_v16 = vld [vmem:[%s1882_s15 + $0x8] sm:$0xff] (%p1699_p6)  ;;  %1252 = vst [vmem:[%s1234_s11 + $0x20] sm:$0xff] (%p1699_p6), %v1251_v18  ;;  %1260 = vst [vmem:[%s1234_s11 + $0x60] sm:$0xff] (%p1699_p6), %v1259_v51 }
 0x130   : > { %v1500_v42 = vpack.c.bf16 %v1101_v37, %v1100_v31  ;;  %v1501_v43 = vpack.c.bf16 %v1103_v38, %v1102_v32  ;;  %v1073_v14 = vadd.f32 %v1860_v23, %v1019_v39  ;;  %v1075_v44 = vadd.f32 %v1862_v24, %v1021_v40  ;;  %v1253_v23 = vld [vmem:[%s1882_s15 + $0x18] sm:$0xff] (%p1699_p6)  ;;  %v1255_v24 = vld [vmem:[%s1882_s15 + $0x20] sm:$0xff] (%p1699_p6)  ;;  %1248 = vst [vmem:[%s1234_s11] sm:$0xff] (%p1699_p6), %v1247_v15 }
 0x131   : > { %v1104_v45 = vmax.f32 %v1072_v41, 0.0  ;;  %v1106_v46 = vmax.f32 %v1074_v13, 0.0  ;;  %1250 = vst [vmem:[%s1234_s11 + $0x8] sm:$0xff] (%p1699_p6), %v1249_v16  ;;  %1254 = vst [vmem:[%s1234_s11 + $0x28] sm:$0xff] (%p1699_p6), %v1253_v23  ;;  %v1263_v53 = vld [vmem:[%s1882_s15 + $0x40] sm:$0xff] (%p1699_p6)  ;;  %v1265_v54 = vld [vmem:[%s1882_s15 + $0x48] sm:$0xff] (%p1699_p6) }
 0x132   : > { %1216 = vst [vmem:[%s1882_s15 + $0x60] sm:$0xff] %v1500_v42  ;;  %1217 = vst [vmem:[%s1882_s15 + $0x68] sm:$0xff] %v1501_v43  ;;  %v1105_v47 = vmax.f32 %v1073_v14, 0.0  ;;  %v1107_v17 = vmax.f32 %v1075_v44, 0.0  ;;  %1226 = sbr.rel (!%p1699_p6) target bundleno = 319 (0x13f), region = 71 }
 0x133   : > { %1256 = vst [vmem:[%s1234_s11 + $0x40] sm:$0xff] (%p1699_p6), %v1255_v24  ;;  %1262 = vst [vmem:[%s1234_s11 + $0x68] sm:$0xff] (%p1699_p6), %v1261_v52 }
 0x134   : > { %v1502_v48 = vpack.c.bf16 %v1105_v47, %v1104_v45  ;;  %v1503_v49 = vpack.c.bf16 %v1107_v17, %v1106_v46  ;;  %1264 = vst [vmem:[%s1234_s11 + $0x80] sm:$0xff] (%p1699_p6), %v1263_v53  ;;  %1266 = vst [vmem:[%s1234_s11 + $0x88] sm:$0xff] (%p1699_p6), %v1265_v54 }
 0x135   : > { %v1267_v55 = vld [vmem:[%s1882_s15 + $0x50] sm:$0xff] (%p1699_p6)  ;;  %v1269_v56 = vld [vmem:[%s1882_s15 + $0x58] sm:$0xff] (%p1699_p6) }
 0x136   : > { %1218 = vst [vmem:[%s1882_s15 + $0x70] sm:$0xff] %v1502_v48  ;;  %1219 = vst [vmem:[%s1882_s15 + $0x78] sm:$0xff] %v1503_v49 }
 0x137   : > { %1268 = vst [vmem:[%s1234_s11 + $0xa0] sm:$0xff] %v1267_v55  ;;  %1270 = vst [vmem:[%s1234_s11 + $0xa8] sm:$0xff] %v1269_v56 }
 0x139   : > { %v1271_v57 = vld [vmem:[%s1882_s15 + $0x60] sm:$0xff]  ;;  %v1273_v58 = vld [vmem:[%s1882_s15 + $0x68] sm:$0xff] }
 0x13a   : > { %1272 = vst [vmem:[%s1234_s11 + $0xc0] sm:$0xff] %v1271_v57  ;;  %1274 = vst [vmem:[%s1234_s11 + $0xc8] sm:$0xff] %v1273_v58 }
 0x13d   : > { %v1275_v59 = vld [vmem:[%s1882_s15 + $0x70] sm:$0xff]  ;;  %v1277_v60 = vld [vmem:[%s1882_s15 + $0x78] sm:$0xff] }
 0x13e   : > { %1276 = vst [vmem:[%s1234_s11 + $0xe0] sm:$0xff] %v1275_v59  ;;  %1278 = vst [vmem:[%s1234_s11 + $0xe8] sm:$0xff] %v1277_v60 }
 0x13f PF: > { %s14_s19 = sadd.s32 1, %s1636_s19   ;;  %s1989_s15 = smov %s1624_s16 }
 0x140   : > { %p11_p12 = scmp.ge.s32.totalorder %s14_s19, 4   ;;  %s1990_s16 = smov %s1704_s25 }
 0x141   : > { %s1991_s17 = smov %s1632_s18  ;;  %s1992_s18 = smov %s1994_s20 }
 0x142   :  { %13 = sbr.rel (!%p11_p12) target bundleno = 3 (0x3), region = 134 }

// kernel: network_forward.10
= control target key start
LH: loop header
LB: loop body
LE: loop exit
PB: predicated region body
PF: predicated region fallthrough
CT: control target
= control target key end

     0   :  { %s1354_s12 = smov 0   ;;  %s1356_s13 = smov 0   ;;  %s1603_s0 = inlined_call_operand.vmem [shape: bf16[4,16,1024], index: 0, kind: input, shape index: {}]   ;;  %s1604_s1 = inlined_call_operand.vmem [shape: bf16[1024,2], index: 1, kind: input, shape index: {}]   ;;  %s1605_s2 = inlined_call_operand.vmem [shape: f32[1,2], index: 2, kind: input, shape index: {}]   ;;  %s1606_s3 = inlined_call_operand.vmem [shape: f32[4,1,1], index: 3, kind: output, shape index: {}]  }
   0x1   :  { %s1358_s14 = smov 0  }
   0x2 LB: > { %s25_s15 = sadd.s32 1, %s1326_s13  ;;  %p1049_p0 = scmp.ge.s32.totalorder %s1330_s14, 1  ;;  %s1330_s14 = sphi %s1358_s14, %s13_s14   ;;  %s1326_s13 = sphi %s1356_s13, %s1608_s13   ;;  %s1322_s12 = sphi %s1354_s12, %s1607_s12  }
   0x3   : > { %p27_p1 = scmp.ge.s32.totalorder %s25_s15, 4  ;;  %p157_p2 = scmp.lt.s32.totalorder %s1330_s14, 5 }
   0x5   : > { %s1610_s15 = smov (%p27_p1, %s25_s15), 0  ;;  %p158_p3 = pnand %p1049_p0, %p157_p2 }
   0x6   : > { %p185_p4 = scmp.lt.s32.totalorder (!%p158_p3), %s1322_s12, 3 }
   0x7   : > { %161 = sbr.rel (%p158_p3) target bundleno = 617 (0x269), region = 32 }
   0xc   : > { %v1244_v0 = vld [vmem:[%s1604_s1 + $0x78] sm:$0xff]   ;;  %v1248_v4 = vld [vmem:[%s1604_s1 + $0x70] sm:$0xff]   ;;  %v1252_v8 = vld [vmem:[%s1604_s1 + $0x68] sm:$0xff]   ;;  %s1612_s12 = smov (!%p185_p4, %s1322_s12), 3  ;;  %vm958_vm0 = vcmask 7168   ;;  %vm203_vm1 = vcmask 0  }
   0xd   : > { %v1245_v1 = vld [vmem:[%s1604_s1 + $0xf8] sm:$0xff]   ;;  %1128 = vmatprep.subr.bf16.mxu0 %v1244_v0  ;;  %v1249_v5 = vld [vmem:[%s1604_s1 + $0xf0] sm:$0xff]   ;;  %v1253_v9 = vld [vmem:[%s1604_s1 + $0xe8] sm:$0xff]   ;;  %s1127_s24 = sshll.u32 %s1612_s12, 6  ;;  %s197_s17 = scalar_lea.vmem %s1606_s3, %s1612_s12 }
   0xe   : > { %v1246_v2 = vld [vmem:[%s1604_s1 + $0x38] sm:$0xff]   ;;  %1150 = vmatprep.subr.bf16.mxu1 %v1245_v1  ;;  %v1250_v6 = vld [vmem:[%s1604_s1 + $0x30] sm:$0xff]   ;;  %v1254_v10 = vld [vmem:[%s1604_s1 + $0x28] sm:$0xff]   ;;  %s1472_s6 = scalar_lea.vmem %s1603_s0, %s1127_s24 }
   0xf   : > { %v1247_v3 = vld [vmem:[%s1604_s1 + $0xb8] sm:$0xff]   ;;  %1129 = vmatpush3.bf16.msra.mxu0 %v1246_v2  ;;  %v1251_v7 = vld [vmem:[%s1604_s1 + $0xb0] sm:$0xff]   ;;  %v1255_v11 = vld [vmem:[%s1604_s1 + $0xa8] sm:$0xff]  }
  0x10   : > { %1151 = vmatpush3.bf16.msra.mxu1 %v1247_v3  ;;  %1130 = vmatprep.subr.bf16.mxu0 %v1248_v4  ;;  %v1256_v12 = vld [vmem:[%s1604_s1 + $0x60] sm:$0xff]   ;;  %v1260_v16 = vld [vmem:[%s1604_s1 + $0x58] sm:$0xff]   ;;  %v1264_v20 = vld [vmem:[%s1604_s1 + $0x50] sm:$0xff]  }
  0x11   : > { %1152 = vmatprep.subr.bf16.mxu1 %v1249_v5  ;;  %v1257_v13 = vld [vmem:[%s1604_s1 + $0xe0] sm:$0xff]   ;;  %v1261_v17 = vld [vmem:[%s1604_s1 + $0xd8] sm:$0xff]   ;;  %v1265_v21 = vld [vmem:[%s1604_s1 + $0xd0] sm:$0xff]  }
  0x12   : > { %v1258_v14 = vld [vmem:[%s1604_s1 + $0x20] sm:$0xff]   ;;  %v1262_v18 = vld [vmem:[%s1604_s1 + $0x18] sm:$0xff]   ;;  %v1266_v22 = vld [vmem:[%s1604_s1 + $0x10] sm:$0xff]  }
  0x13   : > { %1131 = vmatpush3.bf16.msra.mxu0 %v1250_v6  ;;  %v1259_v15 = vld [vmem:[%s1604_s1 + $0xa0] sm:$0xff]   ;;  %v1263_v19 = vld [vmem:[%s1604_s1 + $0x98] sm:$0xff]   ;;  %v1267_v23 = vld [vmem:[%s1604_s1 + $0x90] sm:$0xff]  }
  0x14   : > { %1153 = vmatpush3.bf16.msra.mxu1 %v1251_v7  ;;  %1132 = vmatprep.subr.bf16.mxu0 %v1252_v8  ;;  %v1268_v24 = vld [vmem:[%s1604_s1 + $0x48] sm:$0xff]   ;;  %v1272_v28 = vld [vmem:[%s1604_s1 + $0x40] sm:$0xff]   ;;  %v1276_v40 = vld [vmem:[%s1604_s1 + $0x178] sm:$0xff]  }
  0x15   : > { %1154 = vmatprep.subr.bf16.mxu1 %v1253_v9  ;;  %v1269_v25 = vld [vmem:[%s1604_s1 + $0xc8] sm:$0xff]   ;;  %v1273_v29 = vld [vmem:[%s1604_s1 + $0xc0] sm:$0xff]   ;;  %v1277_v41 = vld [vmem:[%s1604_s1 + $0x1f8] sm:$0xff]  }
  0x16   : > { %v1270_v26 = vld [vmem:[%s1604_s1 + $0x8] sm:$0xff]   ;;  %v1274_v30 = vld [vmem:[%s1604_s1] sm:$0xff]   ;;  %v1278_v42 = vld [vmem:[%s1604_s1 + $0x138] sm:$0xff]  }
  0x17   : > { %1133 = vmatpush3.bf16.msra.mxu0 %v1254_v10  ;;  %v1271_v27 = vld [vmem:[%s1604_s1 + $0x88] sm:$0xff]   ;;  %v1275_v31 = vld [vmem:[%s1604_s1 + $0x80] sm:$0xff]   ;;  %v1279_v43 = vld [vmem:[%s1604_s1 + $0x1b8] sm:$0xff]  }
  0x18   : > { %1155 = vmatpush3.bf16.msra.mxu1 %v1255_v11  ;;  %1134 = vmatprep.subr.bf16.mxu0 %v1256_v12  ;;  %v205_v32 = vld [vmem:[%s1472_s6] sm:$0xff]  ;;  %v206_v34 = vld [vmem:[%s1472_s6 + $0x8] sm:$0xff]  ;;  %v1280_v44 = vld [vmem:[%s1604_s1 + $0x170] sm:$0xff]  }
  0x19   : > { %1156 = vmatprep.subr.bf16.mxu1 %v1257_v13  ;;  %v209_v33 = vld [vmem:[%s1472_s6 + $0x20] sm:$0xff]  ;;  %v210_v37 = vld [vmem:[%s1472_s6 + $0x28] sm:$0xff]  ;;  %v1281_v45 = vld [vmem:[%s1604_s1 + $0x1f0] sm:$0xff]  }
  0x1a   : > { %v1053_v35 = vcombine.low %v205_v32, %v209_v33  ;;  %v1054_v36 = vcombine.high %v205_v32, %v209_v33  ;;  %v1055_v38 = vcombine.low %v206_v34, %v210_v37  ;;  %v1056_v39 = vcombine.high %v206_v34, %v210_v37  ;;  %v1282_v46 = vld [vmem:[%s1604_s1 + $0x130] sm:$0xff]   ;;  %v1284_v48 = vld [vmem:[%s1604_s1 + $0x168] sm:$0xff]   ;;  %v1288_v52 = vld [vmem:[%s1604_s1 + $0x160] sm:$0xff]  }
  0x1b   : > { %1135 = vmatpush3.bf16.msra.mxu0 %v1258_v14  ;;  %v1283_v47 = vld [vmem:[%s1604_s1 + $0x1b0] sm:$0xff]   ;;  %v1285_v49 = vld [vmem:[%s1604_s1 + $0x1e8] sm:$0xff]   ;;  %v1289_v53 = vld [vmem:[%s1604_s1 + $0x1e0] sm:$0xff]  }
  0x1c   : > { %1157 = vmatpush3.bf16.msra.mxu1 %v1259_v15  ;;  %1136 = vmatprep.subr.bf16.mxu0 %v1260_v16  ;;  %v1286_v50 = vld [vmem:[%s1604_s1 + $0x128] sm:$0xff]   ;;  %v1290_v54 = vld [vmem:[%s1604_s1 + $0x120] sm:$0xff]   ;;  %v1292_v56 = vld [vmem:[%s1604_s1 + $0x158] sm:$0xff]  }
  0x1d   : > { %1158 = vmatprep.subr.bf16.mxu1 %v1261_v17  ;;  %804 = vmatprep.mubr.bf16.mxu0 %v1054_v36  ;;  %v1287_v51 = vld [vmem:[%s1604_s1 + $0x1a8] sm:$0xff]   ;;  %v1291_v55 = vld [vmem:[%s1604_s1 + $0x1a0] sm:$0xff]   ;;  %v1293_v57 = vld [vmem:[%s1604_s1 + $0x1d8] sm:$0xff]  }
  0x1e   : > { %845 = vmatprep.mubr.bf16.mxu1 %v1056_v39  ;;  %v1294_v58 = vld [vmem:[%s1604_s1 + $0x118] sm:$0xff]   ;;  %v1296_v60 = vld [vmem:[%s1604_s1 + $0x150] sm:$0xff]   ;;  %v1300_v0 = vld [vmem:[%s1604_s1 + $0x148] sm:$0xff]  }
  0x1f   : > { %1137 = vmatpush3.bf16.msra.mxu0 %v1262_v18  ;;  %v1295_v59 = vld [vmem:[%s1604_s1 + $0x198] sm:$0xff]   ;;  %v1297_v61 = vld [vmem:[%s1604_s1 + $0x1d0] sm:$0xff]   ;;  %v1301_v1 = vld [vmem:[%s1604_s1 + $0x1c8] sm:$0xff]  }
  0x20   : > { %1159 = vmatpush3.bf16.msra.mxu1 %v1263_v19  ;;  %1138 = vmatprep.subr.bf16.mxu0 %v1264_v20  ;;  %v1298_v62 = vld [vmem:[%s1604_s1 + $0x110] sm:$0xff]   ;;  %v1302_v2 = vld [vmem:[%s1604_s1 + $0x108] sm:$0xff]   ;;  %v1304_v4 = vld [vmem:[%s1604_s1 + $0x140] sm:$0xff]  }
  0x21   : > { %1160 = vmatprep.subr.bf16.mxu1 %v1265_v21  ;;  %v1299_v63 = vld [vmem:[%s1604_s1 + $0x190] sm:$0xff]   ;;  %v1303_v3 = vld [vmem:[%s1604_s1 + $0x188] sm:$0xff]   ;;  %v1305_v5 = vld [vmem:[%s1604_s1 + $0x1c0] sm:$0xff]  }
  0x22   : > { %v1306_v6 = vld [vmem:[%s1604_s1 + $0x100] sm:$0xff]   ;;  %v207_v8 = vld [vmem:[%s1472_s6 + $0x10] sm:$0xff]  ;;  %v208_v12 = vld [vmem:[%s1472_s6 + $0x18] sm:$0xff] }
  0x23   : > { %1139 = vmatpush3.bf16.msra.mxu0 %v1266_v22  ;;  %v1307_v7 = vld [vmem:[%s1604_s1 + $0x180] sm:$0xff]   ;;  %v211_v9 = vld [vmem:[%s1472_s6 + $0x30] sm:$0xff]  ;;  %v212_v13 = vld [vmem:[%s1472_s6 + $0x38] sm:$0xff]  ;;  %s1332_s6 = smov 127  }
  0x24   : > { %1161 = vmatpush3.bf16.msra.mxu1 %v1267_v23  ;;  %1140 = vmatprep.subr.bf16.mxu0 %v1268_v24  ;;  %v1057_v10 = vcombine.low %v207_v8, %v211_v9  ;;  %v1058_v11 = vcombine.high %v207_v8, %v211_v9  ;;  %v1059_v14 = vcombine.low %v208_v12, %v212_v13  ;;  %v1052_v23 = vld [vmem:[%s1605_s2] ss:$0 sm:$0xff] }
  0x25   : > { %1162 = vmatprep.subr.bf16.mxu1 %v1269_v25  ;;  %v1060_v15 = vcombine.high %v208_v12, %v212_v13 }
  0x27   : > { %1141 = vmatpush3.bf16.msra.mxu0 %v1270_v26 }
  0x28   : > { %1163 = vmatpush3.bf16.msra.mxu1 %v1271_v27  ;;  %1142 = vmatprep.subr.bf16.mxu0 %v1272_v28 }
  0x29   : > { %1164 = vmatprep.subr.bf16.mxu1 %v1273_v29 }
  0x2b   : > { %1143 = vmatpush3.bf16.msra.mxu0 %v1274_v30 }
  0x2c   : > { %1165 = vmatpush3.bf16.msra.mxu1 %v1275_v31  ;;  %1172 = vmatprep.subr.bf16.mxu0 %v1276_v40 }
  0x2d   : > { %1194 = vmatprep.subr.bf16.mxu1 %v1277_v41 }
  0x2e   : > { %805 = vmatmul.mubr.bf16.vlgmr.msra.gmra.mxu0 %v1053_v35 }
  0x2f   : > { %846 = vmatmul.mubr.bf16.vlgmr.msra.gmra.mxu1 %v1055_v38  ;;  %1173 = vmatpush3.bf16.msra.mxu0 %v1278_v42 }
  0x30   : > { %1195 = vmatpush3.bf16.msra.mxu1 %v1279_v43  ;;  %1174 = vmatprep.subr.bf16.mxu0 %v1280_v44 }
  0x31   : > { %1196 = vmatprep.subr.bf16.mxu1 %v1281_v45  ;;  %886 = vmatprep.mubr.bf16.mxu0 %v1058_v11 }
  0x32   : > { %927 = vmatprep.mubr.bf16.mxu1 %v1060_v15 }
  0x33   : > { %1175 = vmatpush3.bf16.msra.mxu0 %v1282_v46 }
  0x34   : > { %1197 = vmatpush3.bf16.msra.mxu1 %v1283_v47  ;;  %1176 = vmatprep.subr.bf16.mxu0 %v1284_v48 }
  0x35   : > { %1198 = vmatprep.subr.bf16.mxu1 %v1285_v49 }
  0x37   : > { %1177 = vmatpush3.bf16.msra.mxu0 %v1286_v50 }
  0x38   : > { %1199 = vmatpush3.bf16.msra.mxu1 %v1287_v51  ;;  %1178 = vmatprep.subr.bf16.mxu0 %v1288_v52 }
  0x39   : > { %1200 = vmatprep.subr.bf16.mxu1 %v1289_v53 }
  0x3b   : > { %1179 = vmatpush3.bf16.msra.mxu0 %v1290_v54 }
  0x3c   : > { %1201 = vmatpush3.bf16.msra.mxu1 %v1291_v55  ;;  %1180 = vmatprep.subr.bf16.mxu0 %v1292_v56  ;;  %v1333_v56 = vmov 0.0  }
  0x3d   : > { %1202 = vmatprep.subr.bf16.mxu1 %v1293_v57  ;;  %204 = vst.msk [vmem:[%s197_s17] sm:$0x1] %vm203_vm1, %v1333_v56 }
  0x3f   : > { %1181 = vmatpush3.bf16.msra.mxu0 %v1294_v58 }
  0x40   : > { %1203 = vmatpush3.bf16.msra.mxu1 %v1295_v59  ;;  %1182 = vmatprep.subr.bf16.mxu0 %v1296_v60 }
  0x41   : > { %1204 = vmatprep.subr.bf16.mxu1 %v1297_v61 }
  0x43   : > { %1183 = vmatpush3.bf16.msra.mxu0 %v1298_v62 }
  0x44   : > { %1205 = vmatpush3.bf16.msra.mxu1 %v1299_v63  ;;  %1184 = vmatprep.subr.bf16.mxu0 %v1300_v0  ;;  %v957_v0 = vld [vmem:[%s197_s17] sm:$0x1] }
  0x45   : > { %1206 = vmatprep.subr.bf16.mxu1 %v1301_v1 }
  0x47   : > { %1185 = vmatpush3.bf16.msra.mxu0 %v1302_v2 }
  0x48   : > { %1207 = vmatpush3.bf16.msra.mxu1 %v1303_v3  ;;  %1186 = vmatprep.subr.bf16.mxu0 %v1304_v4 }
  0x49   : > { %1208 = vmatprep.subr.bf16.mxu1 %v1305_v5 }
  0x4b   : > { %1187 = vmatpush3.bf16.msra.mxu0 %v1306_v6 }
  0x4c   : > { %1209 = vmatpush3.bf16.msra.mxu1 %v1307_v7 }
  0x4e   : > { %887 = vmatmul.mubr.bf16.vlgmr.msra.gmra.mxu0 %v1057_v10 }
  0x4f   : > { %928 = vmatmul.mubr.bf16.vlgmr.msra.gmra.mxu1 %v1059_v14 }
  0xee   : > { %v1144_v16 = vpop.f32.mrf.mxu0 }
  0xef   : > { %v1166_v17 = vpop.f32.mrf.mxu1 }
  0xf0   : > { %v1145_v18 = vpop.f32.mrf.mxu0 }
  0xf1   : > { %v1167_v19 = vpop.f32.mrf.mxu1  ;;  %v1146_v21 = vadd.f32 %v1145_v18, %v1144_v16 }
  0xf2   : > { %v1147_v20 = vpop.f32.mrf.mxu0  ;;  %v1168_v26 = vadd.f32 %v1167_v19, %v1166_v17 }
  0xf3   : > { %v1169_v22 = vpop.f32.mrf.mxu1  ;;  %v807_v25 = vadd.f32 %v1146_v21, %v1052_v23 }
  0xf4   : > { %v1148_v24 = vpop.f32.mrf.mxu0 }
  0xf5   : > { %v1149_v27 = vadd.f32 %v1148_v24, %v1147_v20  ;;  %v1170_v28 = vpop.f32.mrf.mxu1  ;;  %v848_v32 = vadd.f32 %v1168_v26, %v807_v25 }
  0xf6   : > { %v1171_v37 = vadd.f32 %v1170_v28, %v1169_v22 }
  0xf7   : > { %v810_v33 = vadd.f32 %v1149_v27, %v1052_v23 }
  0xf9   : > { %v851_v42 = vadd.f32 %v1171_v37, %v810_v33 }
 0x10e   : > { %v1188_v29 = vpop.f32.mrf.mxu0 }
 0x10f   : > { %v1210_v30 = vpop.f32.mrf.mxu1 }
 0x110   : > { %v1189_v31 = vpop.f32.mrf.mxu0 }
 0x111   : > { %v1190_v34 = vadd.f32 %v1189_v31, %v1188_v29  ;;  %v1211_v35 = vpop.f32.mrf.mxu1 }
 0x112   : > { %v1191_v36 = vpop.f32.mrf.mxu0  ;;  %v1212_v39 = vadd.f32 %v1211_v35, %v1210_v30 }
 0x113   : > { %v889_v38 = vadd.f32 %v1190_v34, %v848_v32  ;;  %v1213_v40 = vpop.f32.mrf.mxu1 }
 0x114   : > { %v1192_v41 = vpop.f32.mrf.mxu0 }
 0x115   : > { %v1193_v43 = vadd.f32 %v1192_v41, %v1191_v36  ;;  %v1214_v44 = vpop.f32.mrf.mxu1  ;;  %v930_v45 = vadd.f32 %v1212_v39, %v889_v38 }
 0x116   : > { %v1215_v47 = vadd.f32 %v1214_v44, %v1213_v40 }
 0x117   : > { %v892_v46 = vadd.f32 %v1193_v43, %v851_v42  ;;  %947 = vrot.lane.b32.xlu0 %v930_v45, %s1332_s6 }
 0x119   : > { %v933_v48 = vadd.f32 %v1215_v47, %v892_v46 }
 0x11b   : > { %949 = vrot.lane.b32.xlu0 %v933_v48, %s1332_s6 }
 0x189   : > { %v948_v49 = vpop.permute.xlu0 %947 }
 0x18a   : > { %v953_v50 = vmul.f32 %v948_v49, %v930_v45 }
 0x18c   : > { %v959_v53 = vsel %vm958_vm0, %v953_v50, 0.0 }
 0x18d   : > { %v950_v51 = vpop.permute.xlu0 %949 }
 0x18e   : > { %v954_v52 = vmul.f32 %v950_v51, %v933_v48 }
 0x190   : > { %v960_v54 = vsel %vm958_vm0, %v954_v52, 0.0 }
 0x191   : > { %v961_v55 = vadd.f32 %v960_v54, %v959_v53 }
 0x193   : > { %962 = vadd.xlane.f32.xlu1 %v961_v55 }
 0x21c   : > { %v963_v57 = vpop.xlane.xlu1 %962 }
 0x21d   : > { %v964_v58 = vrot.slane %v963_v57, 4 }
 0x21f   : > { %v965_v59 = vadd.f32 %v964_v58, %v963_v57 }
 0x221   : > { %v966_v60 = vrot.slane %v965_v59, 2 }
 0x223   : > { %v967_v61 = vadd.f32 %v966_v60, %v965_v59 }
 0x225   : > { %v968_v62 = vrot.slane %v967_v61, 1 }
 0x227   : > { %v969_v63 = vadd.f32 %v968_v62, %v967_v61 }
 0x229   : > { %1216 = vpush %v969_v63 }
 0x25a   : > { %s1217_s18 = spop %1216 }
 0x25b   : > { %v971_v1 = vstv %s1217_s18 }
 0x25c   : > { %v972_v2 = vadd.f32 %v971_v1, %v957_v0 }
 0x25e   : > { %974 = vst.msk [vmem:[%s197_s17] sm:$0x1] %vm203_vm1, %v972_v2 }
 0x265   : > { %v978_v3 = vld [vmem:[%s197_s17] sm:$0x1] }
 0x266   : > { %v979_v4 = vmul.f32 0.0625, %v978_v3 }
 0x268   : > { %980 = vst.msk [vmem:[%s197_s17] sm:$0x1] %vm203_vm1, %v979_v4 }
 0x269 PF: > { %s13_s14 = sadd.s32 1, %s1330_s14   ;;  %s1607_s12 = smov %s1326_s13 }
 0x26a   : > { %p10_p5 = scmp.ge.s32.totalorder %s13_s14, 6   ;;  %s1608_s13 = smov %s1610_s15 }
 0x26c   :  { %12 = sbr.rel (!%p10_p5) target bundleno = 2 (0x2), region = 70 }

// kernel: network_forward.11
= control target key start
LH: loop header
LB: loop body
LE: loop exit
PB: predicated region body
PF: predicated region fallthrough
CT: control target
= control target key end

     0   :  { %s1716_s23 = smov 0   ;;  %s1718_s24 = smov 0   ;;  %s2046_s0 = inlined_call_operand.vmem [shape: bf16[4,16,1024], index: 0, kind: input, shape index: {}]   ;;  %s2047_s1 = inlined_call_operand.vmem [shape: f32[4,1,1], index: 1, kind: input, shape index: {}]   ;;  %s2048_s2 = inlined_call_operand.vmem [shape: bf16[1024,1], index: 2, kind: input, shape index: {}]   ;;  %s2049_s3 = inlined_call_operand.<no memory space> [shape: f32[1,1], index: 3, kind: input, shape index: {}]   ;;  %s2050_s4 = inlined_call_operand.vmem [shape: f32[1,1024], index: 4, kind: input, shape index: {}]   ;;  %s2051_s5 = inlined_call_operand.vmem [shape: f32[1,1024], index: 5, kind: input, shape index: {}]   ;;  %s2052_s6 = inlined_call_operand.vmem [shape: bf16[4,16,1024], index: 6, kind: output, shape index: {}]  }
   0x1   :  { %v11_v0 = vstv %s2049_s3  ;;  %s1720_s25 = smov 0  }
   0x2   :  { %12 = vst [vmem:[#allocation2] sm:$0x1] %v11_v0 }
   0x3 LB: > { %s30_s3 = sadd.s32 1, %s1671_s24  ;;  %p1376_p0 = scmp.ge.s32.totalorder %s1675_s25, 1  ;;  %s1675_s25 = sphi %s1720_s25, %s18_s25   ;;  %s1671_s24 = sphi %s1718_s24, %s2054_s24   ;;  %s1667_s23 = sphi %s1716_s23, %s2053_s23  }
   0x4   : > { %p32_p1 = scmp.ge.s32.totalorder %s30_s3, 4  ;;  %p244_p2 = scmp.lt.s32.totalorder %s1675_s25, 5 }
   0x6   : > { %s2056_s3 = smov (%p32_p1, %s30_s3), 0  ;;  %p245_p3 = pnand %p1376_p0, %p244_p2 }
   0x7   : > { %p288_p4 = scmp.lt.s32.totalorder (!%p245_p3), %s1667_s23, 3 }
   0x8   : > { %248 = sbr.rel (%p245_p3) target bundleno = 424 (0x1a8), region = 44 }
   0xd   : > { %v1589_v1 = vld [vmem:[%s2048_s2 + $0x78] sm:$0xff]   ;;  %v1593_v5 = vld [vmem:[%s2048_s2 + $0x70] sm:$0xff]   ;;  %v1597_v9 = vld [vmem:[%s2048_s2 + $0x68] sm:$0xff]   ;;  %s2058_s23 = smov (!%p288_p4, %s1667_s23), 3 }
   0xe   : > { %v1590_v2 = vld [vmem:[%s2048_s2 + $0xf8] sm:$0xff]   ;;  %1475 = vmatprep.subr.bf16.mxu0 %v1589_v1  ;;  %v1594_v6 = vld [vmem:[%s2048_s2 + $0xf0] sm:$0xff]   ;;  %v1598_v10 = vld [vmem:[%s2048_s2 + $0xe8] sm:$0xff]   ;;  %s1465_s14 = sshll.u32 %s2058_s23, 6  ;;  %s300_s16 = scalar_lea.vmem %s2047_s1, %s2058_s23 }
   0xf   : > { %v1591_v3 = vld [vmem:[%s2048_s2 + $0x38] sm:$0xff]   ;;  %1497 = vmatprep.subr.bf16.mxu1 %v1590_v2  ;;  %v1595_v7 = vld [vmem:[%s2048_s2 + $0x30] sm:$0xff]   ;;  %v1599_v11 = vld [vmem:[%s2048_s2 + $0x28] sm:$0xff]   ;;  %s1836_s26 = scalar_lea.vmem %s2046_s0, %s1465_s14  ;;  %s2011_s27 = scalar_lea.vmem %s2052_s6, %s1465_s14 }
  0x10   : > { %v1592_v4 = vld [vmem:[%s2048_s2 + $0xb8] sm:$0xff]   ;;  %1476 = vmatpush3.bf16.msra.mxu0 %v1591_v3  ;;  %v1596_v8 = vld [vmem:[%s2048_s2 + $0xb0] sm:$0xff]   ;;  %v1600_v12 = vld [vmem:[%s2048_s2 + $0xa8] sm:$0xff]  }
  0x11   : > { %1498 = vmatpush3.bf16.msra.mxu1 %v1592_v4  ;;  %1477 = vmatprep.subr.bf16.mxu0 %v1593_v5  ;;  %v1601_v13 = vld [vmem:[%s2048_s2 + $0x60] sm:$0xff]   ;;  %v1605_v17 = vld [vmem:[%s2048_s2 + $0x58] sm:$0xff]   ;;  %v1609_v21 = vld [vmem:[%s2048_s2 + $0x50] sm:$0xff]  }
  0x12   : > { %1499 = vmatprep.subr.bf16.mxu1 %v1594_v6  ;;  %v1602_v14 = vld [vmem:[%s2048_s2 + $0xe0] sm:$0xff]   ;;  %v1606_v18 = vld [vmem:[%s2048_s2 + $0xd8] sm:$0xff]   ;;  %v1610_v22 = vld [vmem:[%s2048_s2 + $0xd0] sm:$0xff]  }
  0x13   : > { %v1603_v15 = vld [vmem:[%s2048_s2 + $0x20] sm:$0xff]   ;;  %v1607_v19 = vld [vmem:[%s2048_s2 + $0x18] sm:$0xff]   ;;  %v1611_v23 = vld [vmem:[%s2048_s2 + $0x10] sm:$0xff]  }
  0x14   : > { %1478 = vmatpush3.bf16.msra.mxu0 %v1595_v7  ;;  %v1604_v16 = vld [vmem:[%s2048_s2 + $0xa0] sm:$0xff]   ;;  %v1608_v20 = vld [vmem:[%s2048_s2 + $0x98] sm:$0xff]   ;;  %v1612_v24 = vld [vmem:[%s2048_s2 + $0x90] sm:$0xff]  }
  0x15   : > { %1500 = vmatpush3.bf16.msra.mxu1 %v1596_v8  ;;  %1479 = vmatprep.subr.bf16.mxu0 %v1597_v9  ;;  %v1613_v25 = vld [vmem:[%s2048_s2 + $0x48] sm:$0xff]   ;;  %v1617_v29 = vld [vmem:[%s2048_s2 + $0x40] sm:$0xff]   ;;  %v1621_v39 = vld [vmem:[%s2048_s2 + $0x178] sm:$0xff]  }
  0x16   : > { %1501 = vmatprep.subr.bf16.mxu1 %v1598_v10  ;;  %v1614_v26 = vld [vmem:[%s2048_s2 + $0xc8] sm:$0xff]   ;;  %v1618_v30 = vld [vmem:[%s2048_s2 + $0xc0] sm:$0xff]   ;;  %v1622_v42 = vld [vmem:[%s2048_s2 + $0x1f8] sm:$0xff]  }
  0x17   : > { %v1615_v27 = vld [vmem:[%s2048_s2 + $0x8] sm:$0xff]   ;;  %v1619_v31 = vld [vmem:[%s2048_s2] sm:$0xff]   ;;  %v1623_v43 = vld [vmem:[%s2048_s2 + $0x138] sm:$0xff]  }
  0x18   : > { %1480 = vmatpush3.bf16.msra.mxu0 %v1599_v11  ;;  %v1616_v28 = vld [vmem:[%s2048_s2 + $0x88] sm:$0xff]   ;;  %v1620_v32 = vld [vmem:[%s2048_s2 + $0x80] sm:$0xff]   ;;  %v1624_v44 = vld [vmem:[%s2048_s2 + $0x1b8] sm:$0xff]  }
  0x19   : > { %1502 = vmatpush3.bf16.msra.mxu1 %v1600_v12  ;;  %1481 = vmatprep.subr.bf16.mxu0 %v1601_v13  ;;  %v1845_v33 = vld [vmem:[%s1836_s26] sm:$0xff]  ;;  %v1851_v35 = vld [vmem:[%s1836_s26 + $0x8] sm:$0xff]  ;;  %v1625_v45 = vld [vmem:[%s2048_s2 + $0x170] sm:$0xff]  }
  0x1a   : > { %1503 = vmatprep.subr.bf16.mxu1 %v1602_v14  ;;  %v1848_v34 = vld [vmem:[%s1836_s26 + $0x20] sm:$0xff]  ;;  %v1856_v37 = vld [vmem:[%s1836_s26 + $0x28] sm:$0xff]  ;;  %v1626_v46 = vld [vmem:[%s2048_s2 + $0x1f0] sm:$0xff]  }
  0x1b   : > { %v1383_v36 = vcombine.high %v1845_v33, %v1848_v34  ;;  %v1385_v38 = vcombine.high %v1851_v35, %v1856_v37  ;;  %v1382_v40 = vcombine.low %v1845_v33, %v1848_v34  ;;  %v1384_v41 = vcombine.low %v1851_v35, %v1856_v37  ;;  %v1627_v47 = vld [vmem:[%s2048_s2 + $0x130] sm:$0xff]   ;;  %v1629_v49 = vld [vmem:[%s2048_s2 + $0x168] sm:$0xff]   ;;  %v1633_v53 = vld [vmem:[%s2048_s2 + $0x160] sm:$0xff]  }
  0x1c   : > { %1482 = vmatpush3.bf16.msra.mxu0 %v1603_v15  ;;  %v1628_v48 = vld [vmem:[%s2048_s2 + $0x1b0] sm:$0xff]   ;;  %v1630_v50 = vld [vmem:[%s2048_s2 + $0x1e8] sm:$0xff]   ;;  %v1634_v54 = vld [vmem:[%s2048_s2 + $0x1e0] sm:$0xff]  }
  0x1d   : > { %1504 = vmatpush3.bf16.msra.mxu1 %v1604_v16  ;;  %1483 = vmatprep.subr.bf16.mxu0 %v1605_v17  ;;  %v1631_v51 = vld [vmem:[%s2048_s2 + $0x128] sm:$0xff]   ;;  %v1635_v55 = vld [vmem:[%s2048_s2 + $0x120] sm:$0xff]   ;;  %v1637_v57 = vld [vmem:[%s2048_s2 + $0x158] sm:$0xff]   ;;  %v1677_v17 = vmov 0  }
  0x1e   : > { %1505 = vmatprep.subr.bf16.mxu1 %v1606_v18  ;;  %912 = vmatprep.mubr.bf16.mxu0 %v1383_v36  ;;  %v1632_v52 = vld [vmem:[%s2048_s2 + $0x1a8] sm:$0xff]   ;;  %v1636_v56 = vld [vmem:[%s2048_s2 + $0x1a0] sm:$0xff]   ;;  %v1638_v58 = vld [vmem:[%s2048_s2 + $0x1d8] sm:$0xff]  }
  0x1f   : > { %953 = vmatprep.mubr.bf16.mxu1 %v1385_v38  ;;  %v1639_v59 = vld [vmem:[%s2048_s2 + $0x118] sm:$0xff]   ;;  %v1641_v61 = vld [vmem:[%s2048_s2 + $0x150] sm:$0xff]   ;;  %v1645_v1 = vld [vmem:[%s2048_s2 + $0x148] sm:$0xff]   ;;  %1588 = vset.pattern.permute.xlu0 %v1677_v17 }
  0x20   : > { %1484 = vmatpush3.bf16.msra.mxu0 %v1607_v19  ;;  %v1640_v60 = vld [vmem:[%s2048_s2 + $0x198] sm:$0xff]   ;;  %v1642_v62 = vld [vmem:[%s2048_s2 + $0x1d0] sm:$0xff]   ;;  %v1646_v2 = vld [vmem:[%s2048_s2 + $0x1c8] sm:$0xff]  }
  0x21   : > { %1506 = vmatpush3.bf16.msra.mxu1 %v1608_v20  ;;  %1485 = vmatprep.subr.bf16.mxu0 %v1609_v21  ;;  %v1643_v63 = vld [vmem:[%s2048_s2 + $0x110] sm:$0xff]   ;;  %v1647_v3 = vld [vmem:[%s2048_s2 + $0x108] sm:$0xff]   ;;  %v1649_v5 = vld [vmem:[%s2048_s2 + $0x140] sm:$0xff]  }
  0x22   : > { %1507 = vmatprep.subr.bf16.mxu1 %v1610_v22  ;;  %v1644_v0 = vld [vmem:[%s2048_s2 + $0x190] sm:$0xff]   ;;  %v1648_v4 = vld [vmem:[%s2048_s2 + $0x188] sm:$0xff]   ;;  %v1650_v6 = vld [vmem:[%s2048_s2 + $0x1c0] sm:$0xff]  }
  0x23   : > { %v1651_v7 = vld [vmem:[%s2048_s2 + $0x100] sm:$0xff]   ;;  %v1961_v9 = vld [vmem:[%s1836_s26 + $0x10] sm:$0xff]  ;;  %v1969_v12 = vld [vmem:[%s1836_s26 + $0x18] sm:$0xff] }
  0x24   : > { %1486 = vmatpush3.bf16.msra.mxu0 %v1611_v23  ;;  %v1652_v8 = vld [vmem:[%s2048_s2 + $0x180] sm:$0xff]   ;;  %v1964_v10 = vld [vmem:[%s1836_s26 + $0x30] sm:$0xff]  ;;  %v1972_v13 = vld [vmem:[%s1836_s26 + $0x38] sm:$0xff] }
  0x25   : > { %1508 = vmatpush3.bf16.msra.mxu1 %v1612_v24  ;;  %1487 = vmatprep.subr.bf16.mxu0 %v1613_v25  ;;  %v1387_v11 = vcombine.high %v1961_v9, %v1964_v10  ;;  %v1389_v14 = vcombine.high %v1969_v12, %v1972_v13  ;;  %v1386_v15 = vcombine.low %v1961_v9, %v1964_v10  ;;  %v1381_v25 = vld [vmem:[#allocation2] ss:$0 sm:$0xff]  ;;  %v1191_v17 = vunpack.c.l.bf16 %v1964_v10 }
  0x26   : > { %1509 = vmatprep.subr.bf16.mxu1 %v1614_v26  ;;  %v1388_v16 = vcombine.low %v1969_v12, %v1972_v13 }
  0x28   : > { %1488 = vmatpush3.bf16.msra.mxu0 %v1615_v27 }
  0x29   : > { %1510 = vmatpush3.bf16.msra.mxu1 %v1616_v28  ;;  %1489 = vmatprep.subr.bf16.mxu0 %v1617_v29 }
  0x2a   : > { %1511 = vmatprep.subr.bf16.mxu1 %v1618_v30 }
  0x2c   : > { %1490 = vmatpush3.bf16.msra.mxu0 %v1619_v31 }
  0x2d   : > { %1512 = vmatpush3.bf16.msra.mxu1 %v1620_v32  ;;  %1519 = vmatprep.subr.bf16.mxu0 %v1621_v39 }
  0x2e   : > { %1541 = vmatprep.subr.bf16.mxu1 %v1622_v42 }
  0x2f   : > { %913 = vmatmul.mubr.bf16.vlgmr.msra.gmra.mxu0 %v1382_v40 }
  0x30   : > { %954 = vmatmul.mubr.bf16.vlgmr.msra.gmra.mxu1 %v1384_v41  ;;  %1520 = vmatpush3.bf16.msra.mxu0 %v1623_v43 }
  0x31   : > { %1542 = vmatpush3.bf16.msra.mxu1 %v1624_v44  ;;  %1521 = vmatprep.subr.bf16.mxu0 %v1625_v45 }
  0x32   : > { %1543 = vmatprep.subr.bf16.mxu1 %v1626_v46  ;;  %994 = vmatprep.mubr.bf16.mxu0 %v1387_v11 }
  0x33   : > { %1035 = vmatprep.mubr.bf16.mxu1 %v1389_v14 }
  0x34   : > { %1522 = vmatpush3.bf16.msra.mxu0 %v1627_v47 }
  0x35   : > { %1544 = vmatpush3.bf16.msra.mxu1 %v1628_v48  ;;  %1523 = vmatprep.subr.bf16.mxu0 %v1629_v49  ;;  %v1454_v49 = vld [vmem:[%s300_s16] ss:$0 sm:$0xff] }
  0x36   : > { %1545 = vmatprep.subr.bf16.mxu1 %v1630_v50 }
  0x38   : > { %1524 = vmatpush3.bf16.msra.mxu0 %v1631_v51 }
  0x39   : > { %1546 = vmatpush3.bf16.msra.mxu1 %v1632_v52  ;;  %1525 = vmatprep.subr.bf16.mxu0 %v1633_v53 }
  0x3a   : > { %1547 = vmatprep.subr.bf16.mxu1 %v1634_v54 }
  0x3c   : > { %1526 = vmatpush3.bf16.msra.mxu0 %v1635_v55 }
  0x3d   : > { %1548 = vmatpush3.bf16.msra.mxu1 %v1636_v56  ;;  %1527 = vmatprep.subr.bf16.mxu0 %v1637_v57 }
  0x3e   : > { %1549 = vmatprep.subr.bf16.mxu1 %v1638_v58  ;;  %v1065_v58 = vlaneseq }
  0x40   : > { %1528 = vmatpush3.bf16.msra.mxu0 %v1639_v59  ;;  %v1066_v59 = vshrl.u32 %v1065_v58, 7 }
  0x41   : > { %1550 = vmatpush3.bf16.msra.mxu1 %v1640_v60  ;;  %1529 = vmatprep.subr.bf16.mxu0 %v1641_v61  ;;  %v1179_v60 = vunpack.c.l.bf16 %v1845_v33  ;;  %v1180_v61 = vunpack.c.h.bf16 %v1845_v33  ;;  %v1053_v33 = vld [vmem:[%s2050_s4] sm:$0xff] }
  0x42   : > { %1551 = vmatprep.subr.bf16.mxu1 %v1642_v62  ;;  %v1187_v62 = vunpack.c.l.bf16 %v1848_v34  ;;  %v1087_v11 = vsub.s32 5, %v1066_v59  ;;  %v1091_v14 = vsub.s32 6, %v1066_v59 }
  0x44   : > { %1530 = vmatpush3.bf16.msra.mxu0 %v1643_v63  ;;  %v1188_v63 = vunpack.c.h.bf16 %v1848_v34 }
  0x45   : > { %1552 = vmatpush3.bf16.msra.mxu1 %v1644_v0  ;;  %1531 = vmatprep.subr.bf16.mxu0 %v1645_v1  ;;  %v1181_v0 = vunpack.c.l.bf16 %v1851_v35  ;;  %v1182_v1 = vunpack.c.h.bf16 %v1851_v35  ;;  %v1184_v35 = vunpack.c.h.bf16 %v1961_v9 }
  0x46   : > { %1553 = vmatprep.subr.bf16.mxu1 %v1646_v2  ;;  %v1189_v2 = vunpack.c.l.bf16 %v1856_v37 }
  0x48   : > { %1532 = vmatpush3.bf16.msra.mxu0 %v1647_v3  ;;  %v1190_v3 = vunpack.c.h.bf16 %v1856_v37 }
  0x49   : > { %1554 = vmatpush3.bf16.msra.mxu1 %v1648_v4  ;;  %1533 = vmatprep.subr.bf16.mxu0 %v1649_v5  ;;  %v1067_v4 = vsub.s32 0, %v1066_v59  ;;  %v1071_v5 = vsub.s32 1, %v1066_v59 }
  0x4a   : > { %1555 = vmatprep.subr.bf16.mxu1 %v1650_v6  ;;  %v1075_v6 = vsub.s32 2, %v1066_v59 }
  0x4c   : > { %1534 = vmatpush3.bf16.msra.mxu0 %v1651_v7  ;;  %v1079_v7 = vsub.s32 3, %v1066_v59 }
  0x4d   : > { %1556 = vmatpush3.bf16.msra.mxu1 %v1652_v8  ;;  %v1083_v8 = vsub.s32 4, %v1066_v59 }
  0x4f   : > { %995 = vmatmul.mubr.bf16.vlgmr.msra.gmra.mxu0 %v1386_v15  ;;  %v1095_v15 = vsub.s32 7, %v1066_v59 }
  0x50   : > { %1036 = vmatmul.mubr.bf16.vlgmr.msra.gmra.mxu1 %v1388_v16  ;;  %v1183_v16 = vunpack.c.l.bf16 %v1961_v9  ;;  %v1080_v9 = vrot.slane %v1053_v33, %v1079_v7 }
  0xef   : > { %v1491_v18 = vpop.f32.mrf.mxu0 }
  0xf0   : > { %v1513_v19 = vpop.f32.mrf.mxu1 }
  0xf1   : > { %v1492_v20 = vpop.f32.mrf.mxu0 }
  0xf2   : > { %v1514_v21 = vpop.f32.mrf.mxu1  ;;  %v1493_v24 = vadd.f32 %v1492_v20, %v1491_v18  ;;  %v1192_v18 = vunpack.c.h.bf16 %v1964_v10  ;;  %v1186_v20 = vunpack.c.h.bf16 %v1969_v12 }
  0xf3   : > { %v1494_v22 = vpop.f32.mrf.mxu0  ;;  %v1515_v29 = vadd.f32 %v1514_v21, %v1513_v19  ;;  %v1185_v19 = vunpack.c.l.bf16 %v1969_v12  ;;  %v1193_v21 = vunpack.c.l.bf16 %v1972_v13 }
  0xf4   : > { %v1516_v23 = vpop.f32.mrf.mxu1  ;;  %v915_v28 = vadd.f32 %v1493_v24, %v1381_v25  ;;  %v1068_v24 = vrot.slane %v1053_v33, %v1067_v4 }
  0xf5   : > { %v1495_v26 = vpop.f32.mrf.mxu0 }
  0xf6   : > { %v1517_v27 = vpop.f32.mrf.mxu1  ;;  %v1496_v30 = vadd.f32 %v1495_v26, %v1494_v22  ;;  %v956_v39 = vadd.f32 %v1515_v29, %v915_v28  ;;  %v1194_v22 = vunpack.c.h.bf16 %v1972_v13  ;;  %v1076_v26 = vrot.slane %v1053_v33, %v1075_v6 }
  0xf7   : > { %v1518_v44 = vadd.f32 %v1517_v27, %v1516_v23  ;;  %v1121_v23 = vld [vmem:[%s2051_s5] sm:$0xff]  ;;  %v1084_v27 = vrot.slane %v1053_v33, %v1083_v8  ;;  %v1088_v28 = vrot.slane %v1053_v33, %v1087_v11  ;;  %v1092_v29 = vrot.slane %v1053_v33, %v1091_v14 }
  0xf8   : > { %v918_v40 = vadd.f32 %v1496_v30, %v1381_v25  ;;  %v1072_v25 = vrot.slane %v1053_v33, %v1071_v5  ;;  %v1096_v30 = vrot.slane %v1053_v33, %v1095_v15  ;;  %v1138_v12 = vrot.slane %v1121_v23, %v1079_v7 }
  0xfa   : > { %v959_v50 = vadd.f32 %v1518_v44, %v918_v40  ;;  %v1146_v40 = vrot.slane %v1121_v23, %v1087_v11 }
 0x10f   : > { %v1535_v31 = vpop.f32.mrf.mxu0 }
 0x110   : > { %v1557_v32 = vpop.f32.mrf.mxu1 }
 0x111   : > { %v1536_v36 = vpop.f32.mrf.mxu0 }
 0x112   : > { %v1558_v38 = vpop.f32.mrf.mxu1  ;;  %v1537_v41 = vadd.f32 %v1536_v36, %v1535_v31  ;;  %v1126_v31 = vrot.slane %v1121_v23, %v1067_v4  ;;  %v1134_v36 = vrot.slane %v1121_v23, %v1075_v6 }
 0x113   : > { %v1538_v42 = vpop.f32.mrf.mxu0  ;;  %v1559_v46 = vadd.f32 %v1558_v38, %v1557_v32  ;;  %v1130_v32 = vrot.slane %v1121_v23, %v1071_v5 }
 0x114   : > { %v1560_v43 = vpop.f32.mrf.mxu1  ;;  %v997_v45 = vadd.f32 %v1537_v41, %v956_v39  ;;  %v1142_v39 = vrot.slane %v1121_v23, %v1083_v8  ;;  %v1150_v41 = vrot.slane %v1121_v23, %v1091_v14 }
 0x115   : > { %v1539_v47 = vpop.f32.mrf.mxu0 }
 0x116   : > { %v1561_v48 = vpop.f32.mrf.mxu1  ;;  %v1038_v51 = vadd.f32 %v1559_v46, %v997_v45  ;;  %v1540_v52 = vadd.f32 %v1539_v47, %v1538_v42  ;;  %v1154_v42 = vrot.slane %v1121_v23, %v1095_v15 }
 0x117   : > { %v1562_v54 = vadd.f32 %v1561_v48, %v1560_v43 }
 0x118   : > { %v1000_v53 = vadd.f32 %v1540_v52, %v959_v50  ;;  %v1051_v55 = vmul.f32 %v1454_v49, %v1038_v51 }
 0x11a   : > { %v1041_v56 = vadd.f32 %v1562_v54, %v1000_v53  ;;  %1056 = vperm.xlu0 %1588, %v1051_v55  }
 0x11c   : > { %v1052_v57 = vmul.f32 %v1454_v49, %v1041_v56 }
 0x11e   : > { %1061 = vperm.xlu0 %1588, %v1052_v57  }
 0x195   : > { %v1057_v38 = vpop.permute.xlu0 %1056 }
 0x196   : > { %v1105_v43 = vmul.f32 %v1068_v24, %v1057_v38  ;;  %v1106_v44 = vmul.f32 %v1072_v25, %v1057_v38  ;;  %v1107_v45 = vmul.f32 %v1076_v26, %v1057_v38  ;;  %v1108_v46 = vmul.f32 %v1080_v9, %v1057_v38 }
 0x197   : > { %v1109_v47 = vmul.f32 %v1084_v27, %v1057_v38  ;;  %v1110_v48 = vmul.f32 %v1088_v28, %v1057_v38  ;;  %v1111_v49 = vmul.f32 %v1092_v29, %v1057_v38  ;;  %v1112_v50 = vmul.f32 %v1096_v30, %v1057_v38 }
 0x198   : > { %v1163_v51 = vadd.f32 %v1126_v31, %v1105_v43  ;;  %v1164_v52 = vadd.f32 %v1130_v32, %v1106_v44  ;;  %v1165_v53 = vadd.f32 %v1134_v36, %v1107_v45  ;;  %v1166_v54 = vadd.f32 %v1138_v12, %v1108_v46 }
 0x199   : > { %v1167_v55 = vadd.f32 %v1142_v39, %v1109_v47  ;;  %v1168_v56 = vadd.f32 %v1146_v40, %v1110_v48  ;;  %v1169_v57 = vadd.f32 %v1150_v41, %v1111_v49  ;;  %v1170_v58 = vadd.f32 %v1154_v42, %v1112_v50  ;;  %v1062_v59 = vpop.permute.xlu0 %1061 }
 0x19a   : > { %v1195_v4 = vadd.f32 %v1179_v60, %v1163_v51  ;;  %v1196_v5 = vadd.f32 %v1180_v61, %v1164_v52  ;;  %v1197_v6 = vadd.f32 %v1181_v0, %v1165_v53  ;;  %v1198_v7 = vadd.f32 %v1182_v1, %v1166_v54 }
 0x19b   : > { %v1199_v33 = vadd.f32 %v1183_v16, %v1167_v55  ;;  %v1200_v8 = vadd.f32 %v1184_v35, %v1168_v56  ;;  %v1201_v11 = vadd.f32 %v1185_v19, %v1169_v57  ;;  %v1202_v14 = vadd.f32 %v1186_v20, %v1170_v58 }
 0x19c   : > { %v1467_v15 = vpack.c.bf16 %v1196_v5, %v1195_v4  ;;  %v1468_v23 = vpack.c.bf16 %v1198_v7, %v1197_v6  ;;  %v1113_v60 = vmul.f32 %v1068_v24, %v1062_v59  ;;  %v1114_v61 = vmul.f32 %v1072_v25, %v1062_v59 }
 0x19d   : > { %v1469_v0 = vpack.c.bf16 %v1200_v8, %v1199_v33  ;;  %v1470_v1 = vpack.c.bf16 %v1202_v14, %v1201_v11  ;;  %v1115_v38 = vmul.f32 %v1076_v26, %v1062_v59  ;;  %v1116_v43 = vmul.f32 %v1080_v9, %v1062_v59 }
 0x19e   : > { %1259 = vst [vmem:[%s2011_s27] sm:$0xff] %v1467_v15  ;;  %1260 = vst [vmem:[%s2011_s27 + $0x8] sm:$0xff] %v1468_v23  ;;  %v1117_v44 = vmul.f32 %v1084_v27, %v1062_v59  ;;  %v1118_v45 = vmul.f32 %v1088_v28, %v1062_v59  ;;  %v1119_v46 = vmul.f32 %v1092_v29, %v1062_v59 }
 0x19f   : > { %v1120_v47 = vmul.f32 %v1096_v30, %v1062_v59  ;;  %1261 = vst [vmem:[%s2011_s27 + $0x10] sm:$0xff] %v1469_v0  ;;  %1262 = vst [vmem:[%s2011_s27 + $0x18] sm:$0xff] %v1470_v1  ;;  %v1171_v16 = vadd.f32 %v1126_v31, %v1113_v60  ;;  %v1172_v35 = vadd.f32 %v1130_v32, %v1114_v61 }
 0x1a0   : > { %v1173_v19 = vadd.f32 %v1134_v36, %v1115_v38  ;;  %v1174_v20 = vadd.f32 %v1138_v12, %v1116_v43  ;;  %v1175_v48 = vadd.f32 %v1142_v39, %v1117_v44  ;;  %v1176_v24 = vadd.f32 %v1146_v40, %v1118_v45 }
 0x1a1   : > { %v1177_v25 = vadd.f32 %v1150_v41, %v1119_v46  ;;  %v1178_v26 = vadd.f32 %v1154_v42, %v1120_v47  ;;  %v1203_v9 = vadd.f32 %v1187_v62, %v1171_v16  ;;  %v1204_v27 = vadd.f32 %v1188_v63, %v1172_v35 }
 0x1a2   : > { %v1205_v28 = vadd.f32 %v1189_v2, %v1173_v19  ;;  %v1206_v29 = vadd.f32 %v1190_v3, %v1174_v20  ;;  %v1207_v30 = vadd.f32 %v1191_v17, %v1175_v48  ;;  %v1208_v31 = vadd.f32 %v1192_v18, %v1176_v24 }
 0x1a3   : > { %v1209_v32 = vadd.f32 %v1193_v21, %v1177_v25  ;;  %v1210_v62 = vadd.f32 %v1194_v22, %v1178_v26  ;;  %v1471_v34 = vpack.c.bf16 %v1204_v27, %v1203_v9 }
 0x1a4   : > { %v1472_v63 = vpack.c.bf16 %v1206_v29, %v1205_v28  ;;  %v1473_v36 = vpack.c.bf16 %v1208_v31, %v1207_v30 }
 0x1a5   : > { %v1474_v12 = vpack.c.bf16 %v1210_v62, %v1209_v32  ;;  %1263 = vst [vmem:[%s2011_s27 + $0x20] sm:$0xff] %v1471_v34 }
 0x1a6   : > { %1264 = vst [vmem:[%s2011_s27 + $0x28] sm:$0xff] %v1472_v63  ;;  %1265 = vst [vmem:[%s2011_s27 + $0x30] sm:$0xff] %v1473_v36 }
 0x1a7   : > { %1266 = vst [vmem:[%s2011_s27 + $0x38] sm:$0xff] %v1474_v12 }
 0x1a8 PF: > { %s18_s25 = sadd.s32 1, %s1675_s25   ;;  %s2053_s23 = smov %s1671_s24 }
 0x1a9   : > { %p15_p5 = scmp.ge.s32.totalorder %s18_s25, 6   ;;  %s2054_s24 = smov %s2056_s3 }
 0x1ab   :  { %17 = sbr.rel (!%p15_p5) target bundleno = 3 (0x3), region = 77 }

// kernel: network_forward.12
= control target key start
LH: loop header
LB: loop body
LE: loop exit
PB: predicated region body
PF: predicated region fallthrough
CT: control target
= control target key end

     0   :  { %s3839_s0 = inlined_call_operand.vmem [shape: bf16[1,64,1024], index: 0, kind: input, shape index: {}]   ;;  %s3840_s1 = inlined_call_operand.vmem [shape: bf16[1,1024,2048], index: 1, kind: input, shape index: {}]   ;;  %s3841_s2 = inlined_call_operand.vmem [shape: f32[1,1,2048], index: 2, kind: input, shape index: {}]   ;;  %s3842_s3 = inlined_call_operand.vmem [shape: f32[1,1,2048], index: 3, kind: input, shape index: {}]   ;;  %s3843_s4 = inlined_call_operand.vmem [shape: bf16[1,64,2048], index: 4, kind: output, shape index: {}]  }
   0x1   :  { %3846 = sst [smem:[#allocation8_spill]] %s3839_s0 }
   0x2   :  { %3847 = sst [smem:[#allocation9_spill]] %s3840_s1 }
   0x3   :  { %s3054_s15 = smov 0   ;;  %s3056_s16 = smov 0  }
   0x4   :  { %s3058_s17 = smov 0   ;;  %s3060_s18 = smov 0  }
   0x5   :  { %s3062_s19 = smov 0   ;;  %s3064_s20 = smov 0  }
   0x6   :  { %s3066_s21 = smov 0   ;;  %s3068_s22 = smov 0  }
   0x7   :  { %s3070_s23 = smov 0   ;;  %s3072_s24 = smov 0  }
   0x8   :  { %s3074_s25 = smov 0  }
   0x9 LB: > { %s2431_s26 = sadd.s32 4294967295, %s3026_s25   ;;  %s29_s27 = sadd.s32 1, %s3018_s23  ;;  %s3026_s25 = sphi %s3074_s25, %s14_s25   ;;  %s3022_s24 = sphi %s3072_s24, %s3866_s24   ;;  %s3018_s23 = sphi %s3070_s23, %s3865_s23   ;;  %s3014_s22 = sphi %s3068_s22, %s3864_s22   ;;  %s3010_s21 = sphi %s3066_s21, %s3863_s21   ;;  %s3006_s20 = sphi %s3064_s20, %s3862_s20   ;;  %s3002_s19 = sphi %s3062_s19, %s3861_s19   ;;  %s2998_s18 = sphi %s3060_s18, %s3860_s18   ;;  %s2994_s17 = sphi %s3058_s17, %s3859_s17   ;;  %s2990_s16 = sphi %s3056_s16, %s3858_s16   ;;  %s2986_s15 = sphi %s3054_s15, %s3857_s15  }
   0xa   : > { %p30_p0 = scmp.ge.s32.totalorder %s29_s27, 2  ;;  %s32_s28 = sadd.s32 1, %s3022_s24 }
   0xb   : > { %s51_s29 = sadd.s32 1, %s3006_s20  ;;  %p58_p1 = scmp.ne.s32.totalorder %s3006_s20, %s3002_s19 }
   0xc   : > { %s3868_s27 = smov (%p30_p0, %s29_s27), 0  ;;  %s3870_s28 = smov (!%p30_p0, %s32_s28), %s3022_s24 }
   0xd   : > { %3848 = sst [smem:[#allocation6_spill]] %s3868_s27  ;;  %s47_s30 = ssub.s32 %s3018_s23, %s3868_s27 }
   0xe   : > { %p59_p2 = scmp.eq.s32.totalorder %s3026_s25, 0  ;;  %p34_p3 = scmp.ge.s32.totalorder %s3870_s28, 4 }
   0xf   : > { %p49_p4 = scmp.eq.s32.totalorder %s47_s30, 0  ;;  %s81_s6 = sadd.s32 1, %s2998_s18 }
  0x10   : > { %p3121_p5 = por %p59_p2, %p58_p1  ;;  %s3872_s28 = smov (%p34_p3, %s3870_s28), 0 }
  0x11   : > { %3850 = sst [smem:[#allocation7_spill]] %s3872_s28  ;;  %s77_s8 = ssub.s32 %s3022_s24, %s3872_s28 }
  0x12   : > { %s3129_s7 = scalar_select %p49_p4, %s3006_s20, %s51_s29  }
  0x13   : > { %p88_p6 = scmp.ne.s32.totalorder %s2998_s18, %s2994_s17  ;;  %s78_s9 = sor.u32 %s77_s8, %s47_s30 }
  0x14   : > { %p165_p7 = scmp.eq.s32.totalorder %s77_s8, 0  ;;  %p79_p8 = scmp.eq.s32.totalorder %s78_s9, 0 }
  0x15   : > { %p3135_p9 = por %p88_p6, %p59_p2  ;;  %s167_s11 = sadd.s32 1, %s2990_s16 }
  0x16   : > { %p177_p10 = scmp.ne.s32.totalorder %s2990_s16, %s2986_s15  ;;  %p178_p11 = scmp.eq.s32.totalorder %s2431_s26, 7 }
  0x17   : > { %s3143_s12 = scalar_select %p79_p8, %s2998_s18, %s81_s6  }
  0x18   : > { %s3146_s13 = scalar_select %p165_p7, %s2990_s16, %s167_s11  }
  0x19   : > { %p3148_p12 = por %p178_p11, %p177_p10  ;;  %p2434_p13 = scmp.ge.s32.totalorder %s3026_s25, 8 }
  0x1b   : > { %200 = sbr.rel (%p2434_p13) target bundleno = 124 (0x7c), region = 16 }
  0x20   : > { %203 = sbr.rel (!%p3121_p5) target bundleno = 50 (0x32), region = 20  ;;  %s205_s29 = sand.u32 (%p3121_p5), 1, %s3006_s20  }
  0x21   : > { %s2616_s30 = sshll.u32 (%p3121_p5), %s3018_s23, 4  ;;  %s2435_s8 = sshll.u32 (%p3121_p5), %s205_s29, 7 }
  0x22   : > { %s3853_s0 = sld [smem:[#allocation8_spill]] (%p3121_p5)  ;;  %s207_s26 = scalar_lea.vmem (%p3121_p5), [#allocation3], %s2435_s8 }
  0x28   : > { %s3160_s11 = scalar_lea.vmem %s3853_s0, %s2616_s30 }
  0x29   : > { %v228_v0 = vld [vmem:[%s3160_s11] sm:$0xff]  ;;  %v230_v1 = vld [vmem:[%s3160_s11 + $0x8] sm:$0xff] }
  0x2a   : > { %v232_v2 = vld [vmem:[%s3160_s11 + $0x20] sm:$0xff]  ;;  %229 = vst [vmem:[%s207_s26] sm:$0xff] %v228_v0  ;;  %231 = vst [vmem:[%s207_s26 + $0x8] sm:$0xff] %v230_v1  ;;  %v234_v3 = vld [vmem:[%s3160_s11 + $0x28] sm:$0xff] }
  0x2b   : > { %233 = vst [vmem:[%s207_s26 + $0x10] sm:$0xff] %v232_v2  ;;  %v236_v4 = vld [vmem:[%s3160_s11 + $0x40] sm:$0xff]  ;;  %v238_v5 = vld [vmem:[%s3160_s11 + $0x48] sm:$0xff]  ;;  %235 = vst [vmem:[%s207_s26 + $0x18] sm:$0xff] %v234_v3 }
  0x2c   : > { %237 = vst [vmem:[%s207_s26 + $0x20] sm:$0xff] %v236_v4  ;;  %239 = vst [vmem:[%s207_s26 + $0x28] sm:$0xff] %v238_v5  ;;  %v240_v6 = vld [vmem:[%s3160_s11 + $0x60] sm:$0xff]  ;;  %v242_v7 = vld [vmem:[%s3160_s11 + $0x68] sm:$0xff] }
  0x2d   : > { %v244_v8 = vld [vmem:[%s3160_s11 + $0x80] sm:$0xff]  ;;  %241 = vst [vmem:[%s207_s26 + $0x30] sm:$0xff] %v240_v6  ;;  %243 = vst [vmem:[%s207_s26 + $0x38] sm:$0xff] %v242_v7  ;;  %v246_v9 = vld [vmem:[%s3160_s11 + $0x88] sm:$0xff] }
  0x2e   : > { %245 = vst [vmem:[%s207_s26 + $0x40] sm:$0xff] %v244_v8  ;;  %v248_v10 = vld [vmem:[%s3160_s11 + $0xa0] sm:$0xff]  ;;  %v250_v11 = vld [vmem:[%s3160_s11 + $0xa8] sm:$0xff]  ;;  %247 = vst [vmem:[%s207_s26 + $0x48] sm:$0xff] %v246_v9 }
  0x2f   : > { %249 = vst [vmem:[%s207_s26 + $0x50] sm:$0xff] %v248_v10  ;;  %251 = vst [vmem:[%s207_s26 + $0x58] sm:$0xff] %v250_v11  ;;  %v252_v12 = vld [vmem:[%s3160_s11 + $0xc0] sm:$0xff]  ;;  %v254_v13 = vld [vmem:[%s3160_s11 + $0xc8] sm:$0xff] }
  0x30   : > { %v256_v14 = vld [vmem:[%s3160_s11 + $0xe0] sm:$0xff]  ;;  %253 = vst [vmem:[%s207_s26 + $0x60] sm:$0xff] %v252_v12  ;;  %255 = vst [vmem:[%s207_s26 + $0x68] sm:$0xff] %v254_v13  ;;  %v258_v15 = vld [vmem:[%s3160_s11 + $0xe8] sm:$0xff] }
  0x31   : > { %257 = vst [vmem:[%s207_s26 + $0x70] sm:$0xff] %v256_v14  ;;  %259 = vst [vmem:[%s207_s26 + $0x78] sm:$0xff] %v258_v15 }
  0x32 PF: > { %265 = sbr.rel (!%p3135_p9) target bundleno = 124 (0x7c), region = 43  ;;  %s267_s5 = sand.u32 (%p3135_p9), 1, %s2998_s18  }
  0x33   : > { %s2440_s29 = sshll.u32 (%p3135_p9), %s3022_s24, 2  ;;  %s2438_s30 = sshll.u32 (%p3135_p9), %s267_s5, 10 }
  0x34   : > { %s2617_s8 = sshll.u32 (%p3135_p9), %s3018_s23, 10  ;;  %s3854_s1 = sld [smem:[#allocation9_spill]] (%p3135_p9) }
  0x35   : > { %s273_s6 = sadd.s32 (%p3135_p9), %s2617_s8, %s2440_s29  ;;  %s3191_s10 = scalar_lea.vmem (%p3135_p9), [#allocation4], %s2438_s30 }
  0x36   : > { %s2442_s9 = sshll.u32 (%p3135_p9), %s273_s6, 2 }
  0x3a   : > { %s3186_s27 = scalar_lea.vmem %s3854_s1, %s2442_s9 }
  0x3b   : > { %v290_v16 = vld [vmem:[%s3186_s27] sm:$0xff]  ;;  %v292_v17 = vld [vmem:[%s3186_s27 + $0x8] sm:$0xff] }
  0x3c   : > { %v294_v18 = vld [vmem:[%s3186_s27 + $0x40] sm:$0xff]  ;;  %291 = vst [vmem:[%s3191_s10] sm:$0xff] %v290_v16  ;;  %293 = vst [vmem:[%s3191_s10 + $0x8] sm:$0xff] %v292_v17  ;;  %v296_v19 = vld [vmem:[%s3186_s27 + $0x48] sm:$0xff] }
  0x3d   : > { %295 = vst [vmem:[%s3191_s10 + $0x10] sm:$0xff] %v294_v18  ;;  %v298_v20 = vld [vmem:[%s3186_s27 + $0x80] sm:$0xff]  ;;  %v300_v21 = vld [vmem:[%s3186_s27 + $0x88] sm:$0xff]  ;;  %297 = vst [vmem:[%s3191_s10 + $0x18] sm:$0xff] %v296_v19 }
  0x3e   : > { %299 = vst [vmem:[%s3191_s10 + $0x20] sm:$0xff] %v298_v20  ;;  %301 = vst [vmem:[%s3191_s10 + $0x28] sm:$0xff] %v300_v21  ;;  %v302_v22 = vld [vmem:[%s3186_s27 + $0xc0] sm:$0xff]  ;;  %v304_v23 = vld [vmem:[%s3186_s27 + $0xc8] sm:$0xff] }
  0x3f   : > { %v306_v24 = vld [vmem:[%s3186_s27 + $0x100] sm:$0xff]  ;;  %303 = vst [vmem:[%s3191_s10 + $0x30] sm:$0xff] %v302_v22  ;;  %305 = vst [vmem:[%s3191_s10 + $0x38] sm:$0xff] %v304_v23  ;;  %v308_v25 = vld [vmem:[%s3186_s27 + $0x108] sm:$0xff] }
  0x40   : > { %307 = vst [vmem:[%s3191_s10 + $0x40] sm:$0xff] %v306_v24  ;;  %v310_v26 = vld [vmem:[%s3186_s27 + $0x140] sm:$0xff]  ;;  %v312_v27 = vld [vmem:[%s3186_s27 + $0x148] sm:$0xff]  ;;  %309 = vst [vmem:[%s3191_s10 + $0x48] sm:$0xff] %v308_v25 }
  0x41   : > { %311 = vst [vmem:[%s3191_s10 + $0x50] sm:$0xff] %v310_v26  ;;  %313 = vst [vmem:[%s3191_s10 + $0x58] sm:$0xff] %v312_v27  ;;  %v314_v28 = vld [vmem:[%s3186_s27 + $0x180] sm:$0xff]  ;;  %v316_v29 = vld [vmem:[%s3186_s27 + $0x188] sm:$0xff] }
  0x42   : > { %v318_v30 = vld [vmem:[%s3186_s27 + $0x1c0] sm:$0xff]  ;;  %315 = vst [vmem:[%s3191_s10 + $0x60] sm:$0xff] %v314_v28  ;;  %317 = vst [vmem:[%s3191_s10 + $0x68] sm:$0xff] %v316_v29  ;;  %v320_v31 = vld [vmem:[%s3186_s27 + $0x1c8] sm:$0xff] }
  0x43   : > { %319 = vst [vmem:[%s3191_s10 + $0x70] sm:$0xff] %v318_v30  ;;  %v322_v32 = vld [vmem:[%s3186_s27 + $0x200] sm:$0xff]  ;;  %v324_v33 = vld [vmem:[%s3186_s27 + $0x208] sm:$0xff]  ;;  %321 = vst [vmem:[%s3191_s10 + $0x78] sm:$0xff] %v320_v31 }
  0x44   : > { %323 = vst [vmem:[%s3191_s10 + $0x80] sm:$0xff] %v322_v32  ;;  %325 = vst [vmem:[%s3191_s10 + $0x88] sm:$0xff] %v324_v33  ;;  %v326_v34 = vld [vmem:[%s3186_s27 + $0x240] sm:$0xff]  ;;  %v328_v35 = vld [vmem:[%s3186_s27 + $0x248] sm:$0xff] }
  0x45   : > { %v330_v36 = vld [vmem:[%s3186_s27 + $0x280] sm:$0xff]  ;;  %327 = vst [vmem:[%s3191_s10 + $0x90] sm:$0xff] %v326_v34  ;;  %329 = vst [vmem:[%s3191_s10 + $0x98] sm:$0xff] %v328_v35  ;;  %v332_v37 = vld [vmem:[%s3186_s27 + $0x288] sm:$0xff] }
  0x46   : > { %331 = vst [vmem:[%s3191_s10 + $0xa0] sm:$0xff] %v330_v36  ;;  %v334_v38 = vld [vmem:[%s3186_s27 + $0x2c0] sm:$0xff]  ;;  %v336_v39 = vld [vmem:[%s3186_s27 + $0x2c8] sm:$0xff]  ;;  %333 = vst [vmem:[%s3191_s10 + $0xa8] sm:$0xff] %v332_v37 }
  0x47   : > { %335 = vst [vmem:[%s3191_s10 + $0xb0] sm:$0xff] %v334_v38  ;;  %337 = vst [vmem:[%s3191_s10 + $0xb8] sm:$0xff] %v336_v39  ;;  %v338_v40 = vld [vmem:[%s3186_s27 + $0x300] sm:$0xff]  ;;  %v340_v41 = vld [vmem:[%s3186_s27 + $0x308] sm:$0xff] }
  0x48   : > { %v342_v42 = vld [vmem:[%s3186_s27 + $0x340] sm:$0xff]  ;;  %339 = vst [vmem:[%s3191_s10 + $0xc0] sm:$0xff] %v338_v40  ;;  %341 = vst [vmem:[%s3191_s10 + $0xc8] sm:$0xff] %v340_v41  ;;  %v344_v43 = vld [vmem:[%s3186_s27 + $0x348] sm:$0xff] }
  0x49   : > { %343 = vst [vmem:[%s3191_s10 + $0xd0] sm:$0xff] %v342_v42  ;;  %v346_v44 = vld [vmem:[%s3186_s27 + $0x380] sm:$0xff]  ;;  %v348_v45 = vld [vmem:[%s3186_s27 + $0x388] sm:$0xff]  ;;  %345 = vst [vmem:[%s3191_s10 + $0xd8] sm:$0xff] %v344_v43 }
  0x4a   : > { %347 = vst [vmem:[%s3191_s10 + $0xe0] sm:$0xff] %v346_v44  ;;  %349 = vst [vmem:[%s3191_s10 + $0xe8] sm:$0xff] %v348_v45  ;;  %v350_v46 = vld [vmem:[%s3186_s27 + $0x3c0] sm:$0xff]  ;;  %v352_v47 = vld [vmem:[%s3186_s27 + $0x3c8] sm:$0xff] }
  0x4b   : > { %v354_v48 = vld [vmem:[%s3186_s27 + $0x400] sm:$0xff]  ;;  %351 = vst [vmem:[%s3191_s10 + $0xf0] sm:$0xff] %v350_v46  ;;  %353 = vst [vmem:[%s3191_s10 + $0xf8] sm:$0xff] %v352_v47  ;;  %v356_v49 = vld [vmem:[%s3186_s27 + $0x408] sm:$0xff] }
  0x4c   : > { %355 = vst [vmem:[%s3191_s10 + $0x100] sm:$0xff] %v354_v48  ;;  %v358_v50 = vld [vmem:[%s3186_s27 + $0x440] sm:$0xff]  ;;  %v360_v51 = vld [vmem:[%s3186_s27 + $0x448] sm:$0xff]  ;;  %357 = vst [vmem:[%s3191_s10 + $0x108] sm:$0xff] %v356_v49 }
  0x4d   : > { %359 = vst [vmem:[%s3191_s10 + $0x110] sm:$0xff] %v358_v50  ;;  %361 = vst [vmem:[%s3191_s10 + $0x118] sm:$0xff] %v360_v51  ;;  %v362_v52 = vld [vmem:[%s3186_s27 + $0x480] sm:$0xff]  ;;  %v364_v53 = vld [vmem:[%s3186_s27 + $0x488] sm:$0xff] }
  0x4e   : > { %v366_v54 = vld [vmem:[%s3186_s27 + $0x4c0] sm:$0xff]  ;;  %363 = vst [vmem:[%s3191_s10 + $0x120] sm:$0xff] %v362_v52  ;;  %365 = vst [vmem:[%s3191_s10 + $0x128] sm:$0xff] %v364_v53  ;;  %v368_v55 = vld [vmem:[%s3186_s27 + $0x4c8] sm:$0xff] }
  0x4f   : > { %367 = vst [vmem:[%s3191_s10 + $0x130] sm:$0xff] %v366_v54  ;;  %v370_v56 = vld [vmem:[%s3186_s27 + $0x500] sm:$0xff]  ;;  %v372_v57 = vld [vmem:[%s3186_s27 + $0x508] sm:$0xff]  ;;  %369 = vst [vmem:[%s3191_s10 + $0x138] sm:$0xff] %v368_v55 }
  0x50   : > { %371 = vst [vmem:[%s3191_s10 + $0x140] sm:$0xff] %v370_v56  ;;  %373 = vst [vmem:[%s3191_s10 + $0x148] sm:$0xff] %v372_v57  ;;  %v374_v58 = vld [vmem:[%s3186_s27 + $0x540] sm:$0xff]  ;;  %v376_v59 = vld [vmem:[%s3186_s27 + $0x548] sm:$0xff] }
  0x51   : > { %v378_v60 = vld [vmem:[%s3186_s27 + $0x580] sm:$0xff]  ;;  %375 = vst [vmem:[%s3191_s10 + $0x150] sm:$0xff] %v374_v58  ;;  %377 = vst [vmem:[%s3191_s10 + $0x158] sm:$0xff] %v376_v59  ;;  %v380_v61 = vld [vmem:[%s3186_s27 + $0x588] sm:$0xff] }
  0x52   : > { %379 = vst [vmem:[%s3191_s10 + $0x160] sm:$0xff] %v378_v60  ;;  %v382_v62 = vld [vmem:[%s3186_s27 + $0x5c0] sm:$0xff]  ;;  %v384_v63 = vld [vmem:[%s3186_s27 + $0x5c8] sm:$0xff]  ;;  %381 = vst [vmem:[%s3191_s10 + $0x168] sm:$0xff] %v380_v61 }
  0x53   : > { %383 = vst [vmem:[%s3191_s10 + $0x170] sm:$0xff] %v382_v62  ;;  %385 = vst [vmem:[%s3191_s10 + $0x178] sm:$0xff] %v384_v63  ;;  %v386_v0 = vld [vmem:[%s3186_s27 + $0x600] sm:$0xff]  ;;  %v388_v1 = vld [vmem:[%s3186_s27 + $0x608] sm:$0xff] }
  0x54   : > { %v390_v2 = vld [vmem:[%s3186_s27 + $0x640] sm:$0xff]  ;;  %387 = vst [vmem:[%s3191_s10 + $0x180] sm:$0xff] %v386_v0  ;;  %389 = vst [vmem:[%s3191_s10 + $0x188] sm:$0xff] %v388_v1  ;;  %v392_v3 = vld [vmem:[%s3186_s27 + $0x648] sm:$0xff] }
  0x55   : > { %391 = vst [vmem:[%s3191_s10 + $0x190] sm:$0xff] %v390_v2  ;;  %v394_v4 = vld [vmem:[%s3186_s27 + $0x680] sm:$0xff]  ;;  %v396_v5 = vld [vmem:[%s3186_s27 + $0x688] sm:$0xff]  ;;  %393 = vst [vmem:[%s3191_s10 + $0x198] sm:$0xff] %v392_v3 }
  0x56   : > { %395 = vst [vmem:[%s3191_s10 + $0x1a0] sm:$0xff] %v394_v4  ;;  %397 = vst [vmem:[%s3191_s10 + $0x1a8] sm:$0xff] %v396_v5  ;;  %v398_v6 = vld [vmem:[%s3186_s27 + $0x6c0] sm:$0xff]  ;;  %v400_v7 = vld [vmem:[%s3186_s27 + $0x6c8] sm:$0xff] }
  0x57   : > { %v402_v8 = vld [vmem:[%s3186_s27 + $0x700] sm:$0xff]  ;;  %399 = vst [vmem:[%s3191_s10 + $0x1b0] sm:$0xff] %v398_v6  ;;  %401 = vst [vmem:[%s3191_s10 + $0x1b8] sm:$0xff] %v400_v7  ;;  %v404_v9 = vld [vmem:[%s3186_s27 + $0x708] sm:$0xff] }
  0x58   : > { %403 = vst [vmem:[%s3191_s10 + $0x1c0] sm:$0xff] %v402_v8  ;;  %v406_v10 = vld [vmem:[%s3186_s27 + $0x740] sm:$0xff]  ;;  %v408_v11 = vld [vmem:[%s3186_s27 + $0x748] sm:$0xff]  ;;  %405 = vst [vmem:[%s3191_s10 + $0x1c8] sm:$0xff] %v404_v9 }
  0x59   : > { %407 = vst [vmem:[%s3191_s10 + $0x1d0] sm:$0xff] %v406_v10  ;;  %409 = vst [vmem:[%s3191_s10 + $0x1d8] sm:$0xff] %v408_v11  ;;  %v410_v12 = vld [vmem:[%s3186_s27 + $0x780] sm:$0xff]  ;;  %v412_v13 = vld [vmem:[%s3186_s27 + $0x788] sm:$0xff] }
  0x5a   : > { %v414_v14 = vld [vmem:[%s3186_s27 + $0x7c0] sm:$0xff]  ;;  %411 = vst [vmem:[%s3191_s10 + $0x1e0] sm:$0xff] %v410_v12  ;;  %413 = vst [vmem:[%s3191_s10 + $0x1e8] sm:$0xff] %v412_v13  ;;  %v416_v15 = vld [vmem:[%s3186_s27 + $0x7c8] sm:$0xff] }
  0x5b   : > { %415 = vst [vmem:[%s3191_s10 + $0x1f0] sm:$0xff] %v414_v14  ;;  %v418_v16 = vld [vmem:[%s3186_s27 + $0x800] sm:$0xff]  ;;  %v420_v17 = vld [vmem:[%s3186_s27 + $0x808] sm:$0xff]  ;;  %417 = vst [vmem:[%s3191_s10 + $0x1f8] sm:$0xff] %v416_v15 }
  0x5c   : > { %419 = vst [vmem:[%s3191_s10 + $0x200] sm:$0xff] %v418_v16  ;;  %421 = vst [vmem:[%s3191_s10 + $0x208] sm:$0xff] %v420_v17  ;;  %v422_v18 = vld [vmem:[%s3186_s27 + $0x840] sm:$0xff]  ;;  %v424_v19 = vld [vmem:[%s3186_s27 + $0x848] sm:$0xff] }
  0x5d   : > { %v426_v20 = vld [vmem:[%s3186_s27 + $0x880] sm:$0xff]  ;;  %423 = vst [vmem:[%s3191_s10 + $0x210] sm:$0xff] %v422_v18  ;;  %425 = vst [vmem:[%s3191_s10 + $0x218] sm:$0xff] %v424_v19  ;;  %v428_v21 = vld [vmem:[%s3186_s27 + $0x888] sm:$0xff] }
  0x5e   : > { %427 = vst [vmem:[%s3191_s10 + $0x220] sm:$0xff] %v426_v20  ;;  %v430_v22 = vld [vmem:[%s3186_s27 + $0x8c0] sm:$0xff]  ;;  %v432_v23 = vld [vmem:[%s3186_s27 + $0x8c8] sm:$0xff]  ;;  %429 = vst [vmem:[%s3191_s10 + $0x228] sm:$0xff] %v428_v21 }
  0x5f   : > { %431 = vst [vmem:[%s3191_s10 + $0x230] sm:$0xff] %v430_v22  ;;  %433 = vst [vmem:[%s3191_s10 + $0x238] sm:$0xff] %v432_v23  ;;  %v434_v24 = vld [vmem:[%s3186_s27 + $0x900] sm:$0xff]  ;;  %v436_v25 = vld [vmem:[%s3186_s27 + $0x908] sm:$0xff] }
  0x60   : > { %v438_v26 = vld [vmem:[%s3186_s27 + $0x940] sm:$0xff]  ;;  %435 = vst [vmem:[%s3191_s10 + $0x240] sm:$0xff] %v434_v24  ;;  %437 = vst [vmem:[%s3191_s10 + $0x248] sm:$0xff] %v436_v25  ;;  %v440_v27 = vld [vmem:[%s3186_s27 + $0x948] sm:$0xff] }
  0x61   : > { %439 = vst [vmem:[%s3191_s10 + $0x250] sm:$0xff] %v438_v26  ;;  %v442_v28 = vld [vmem:[%s3186_s27 + $0x980] sm:$0xff]  ;;  %v444_v29 = vld [vmem:[%s3186_s27 + $0x988] sm:$0xff]  ;;  %441 = vst [vmem:[%s3191_s10 + $0x258] sm:$0xff] %v440_v27 }
  0x62   : > { %443 = vst [vmem:[%s3191_s10 + $0x260] sm:$0xff] %v442_v28  ;;  %445 = vst [vmem:[%s3191_s10 + $0x268] sm:$0xff] %v444_v29  ;;  %v446_v30 = vld [vmem:[%s3186_s27 + $0x9c0] sm:$0xff]  ;;  %v448_v31 = vld [vmem:[%s3186_s27 + $0x9c8] sm:$0xff] }
  0x63   : > { %v450_v32 = vld [vmem:[%s3186_s27 + $0xa00] sm:$0xff]  ;;  %447 = vst [vmem:[%s3191_s10 + $0x270] sm:$0xff] %v446_v30  ;;  %449 = vst [vmem:[%s3191_s10 + $0x278] sm:$0xff] %v448_v31  ;;  %v452_v33 = vld [vmem:[%s3186_s27 + $0xa08] sm:$0xff] }
  0x64   : > { %451 = vst [vmem:[%s3191_s10 + $0x280] sm:$0xff] %v450_v32  ;;  %v454_v34 = vld [vmem:[%s3186_s27 + $0xa40] sm:$0xff]  ;;  %v456_v35 = vld [vmem:[%s3186_s27 + $0xa48] sm:$0xff]  ;;  %453 = vst [vmem:[%s3191_s10 + $0x288] sm:$0xff] %v452_v33 }
  0x65   : > { %455 = vst [vmem:[%s3191_s10 + $0x290] sm:$0xff] %v454_v34  ;;  %457 = vst [vmem:[%s3191_s10 + $0x298] sm:$0xff] %v456_v35  ;;  %v458_v36 = vld [vmem:[%s3186_s27 + $0xa80] sm:$0xff]  ;;  %v460_v37 = vld [vmem:[%s3186_s27 + $0xa88] sm:$0xff] }
  0x66   : > { %v462_v38 = vld [vmem:[%s3186_s27 + $0xac0] sm:$0xff]  ;;  %459 = vst [vmem:[%s3191_s10 + $0x2a0] sm:$0xff] %v458_v36  ;;  %461 = vst [vmem:[%s3191_s10 + $0x2a8] sm:$0xff] %v460_v37  ;;  %v464_v39 = vld [vmem:[%s3186_s27 + $0xac8] sm:$0xff] }
  0x67   : > { %463 = vst [vmem:[%s3191_s10 + $0x2b0] sm:$0xff] %v462_v38  ;;  %v466_v40 = vld [vmem:[%s3186_s27 + $0xb00] sm:$0xff]  ;;  %v468_v41 = vld [vmem:[%s3186_s27 + $0xb08] sm:$0xff]  ;;  %465 = vst [vmem:[%s3191_s10 + $0x2b8] sm:$0xff] %v464_v39 }
  0x68   : > { %467 = vst [vmem:[%s3191_s10 + $0x2c0] sm:$0xff] %v466_v40  ;;  %469 = vst [vmem:[%s3191_s10 + $0x2c8] sm:$0xff] %v468_v41  ;;  %v470_v42 = vld [vmem:[%s3186_s27 + $0xb40] sm:$0xff]  ;;  %v472_v43 = vld [vmem:[%s3186_s27 + $0xb48] sm:$0xff] }
  0x69   : > { %v474_v44 = vld [vmem:[%s3186_s27 + $0xb80] sm:$0xff]  ;;  %471 = vst [vmem:[%s3191_s10 + $0x2d0] sm:$0xff] %v470_v42  ;;  %473 = vst [vmem:[%s3191_s10 + $0x2d8] sm:$0xff] %v472_v43  ;;  %v476_v45 = vld [vmem:[%s3186_s27 + $0xb88] sm:$0xff] }
  0x6a   : > { %475 = vst [vmem:[%s3191_s10 + $0x2e0] sm:$0xff] %v474_v44  ;;  %v478_v46 = vld [vmem:[%s3186_s27 + $0xbc0] sm:$0xff]  ;;  %v480_v47 = vld [vmem:[%s3186_s27 + $0xbc8] sm:$0xff]  ;;  %477 = vst [vmem:[%s3191_s10 + $0x2e8] sm:$0xff] %v476_v45 }
  0x6b   : > { %479 = vst [vmem:[%s3191_s10 + $0x2f0] sm:$0xff] %v478_v46  ;;  %481 = vst [vmem:[%s3191_s10 + $0x2f8] sm:$0xff] %v480_v47  ;;  %v482_v48 = vld [vmem:[%s3186_s27 + $0xc00] sm:$0xff]  ;;  %v484_v49 = vld [vmem:[%s3186_s27 + $0xc08] sm:$0xff] }
  0x6c   : > { %v486_v50 = vld [vmem:[%s3186_s27 + $0xc40] sm:$0xff]  ;;  %483 = vst [vmem:[%s3191_s10 + $0x300] sm:$0xff] %v482_v48  ;;  %485 = vst [vmem:[%s3191_s10 + $0x308] sm:$0xff] %v484_v49  ;;  %v488_v51 = vld [vmem:[%s3186_s27 + $0xc48] sm:$0xff] }
  0x6d   : > { %487 = vst [vmem:[%s3191_s10 + $0x310] sm:$0xff] %v486_v50  ;;  %v490_v52 = vld [vmem:[%s3186_s27 + $0xc80] sm:$0xff]  ;;  %v492_v53 = vld [vmem:[%s3186_s27 + $0xc88] sm:$0xff]  ;;  %489 = vst [vmem:[%s3191_s10 + $0x318] sm:$0xff] %v488_v51 }
  0x6e   : > { %491 = vst [vmem:[%s3191_s10 + $0x320] sm:$0xff] %v490_v52  ;;  %493 = vst [vmem:[%s3191_s10 + $0x328] sm:$0xff] %v492_v53  ;;  %v494_v54 = vld [vmem:[%s3186_s27 + $0xcc0] sm:$0xff]  ;;  %v496_v55 = vld [vmem:[%s3186_s27 + $0xcc8] sm:$0xff] }
  0x6f   : > { %v498_v56 = vld [vmem:[%s3186_s27 + $0xd00] sm:$0xff]  ;;  %495 = vst [vmem:[%s3191_s10 + $0x330] sm:$0xff] %v494_v54  ;;  %497 = vst [vmem:[%s3191_s10 + $0x338] sm:$0xff] %v496_v55  ;;  %v500_v57 = vld [vmem:[%s3186_s27 + $0xd08] sm:$0xff] }
  0x70   : > { %499 = vst [vmem:[%s3191_s10 + $0x340] sm:$0xff] %v498_v56  ;;  %v502_v58 = vld [vmem:[%s3186_s27 + $0xd40] sm:$0xff]  ;;  %v504_v59 = vld [vmem:[%s3186_s27 + $0xd48] sm:$0xff]  ;;  %501 = vst [vmem:[%s3191_s10 + $0x348] sm:$0xff] %v500_v57 }
  0x71   : > { %503 = vst [vmem:[%s3191_s10 + $0x350] sm:$0xff] %v502_v58  ;;  %505 = vst [vmem:[%s3191_s10 + $0x358] sm:$0xff] %v504_v59  ;;  %v506_v60 = vld [vmem:[%s3186_s27 + $0xd80] sm:$0xff]  ;;  %v508_v61 = vld [vmem:[%s3186_s27 + $0xd88] sm:$0xff] }
  0x72   : > { %v510_v62 = vld [vmem:[%s3186_s27 + $0xdc0] sm:$0xff]  ;;  %507 = vst [vmem:[%s3191_s10 + $0x360] sm:$0xff] %v506_v60  ;;  %509 = vst [vmem:[%s3191_s10 + $0x368] sm:$0xff] %v508_v61  ;;  %v512_v63 = vld [vmem:[%s3186_s27 + $0xdc8] sm:$0xff] }
  0x73   : > { %511 = vst [vmem:[%s3191_s10 + $0x370] sm:$0xff] %v510_v62  ;;  %v514_v0 = vld [vmem:[%s3186_s27 + $0xe00] sm:$0xff]  ;;  %v516_v1 = vld [vmem:[%s3186_s27 + $0xe08] sm:$0xff]  ;;  %513 = vst [vmem:[%s3191_s10 + $0x378] sm:$0xff] %v512_v63 }
  0x74   : > { %515 = vst [vmem:[%s3191_s10 + $0x380] sm:$0xff] %v514_v0  ;;  %517 = vst [vmem:[%s3191_s10 + $0x388] sm:$0xff] %v516_v1  ;;  %v518_v2 = vld [vmem:[%s3186_s27 + $0xe40] sm:$0xff]  ;;  %v520_v3 = vld [vmem:[%s3186_s27 + $0xe48] sm:$0xff] }
  0x75   : > { %v522_v4 = vld [vmem:[%s3186_s27 + $0xe80] sm:$0xff]  ;;  %519 = vst [vmem:[%s3191_s10 + $0x390] sm:$0xff] %v518_v2  ;;  %521 = vst [vmem:[%s3191_s10 + $0x398] sm:$0xff] %v520_v3  ;;  %v524_v5 = vld [vmem:[%s3186_s27 + $0xe88] sm:$0xff] }
  0x76   : > { %523 = vst [vmem:[%s3191_s10 + $0x3a0] sm:$0xff] %v522_v4  ;;  %v526_v6 = vld [vmem:[%s3186_s27 + $0xec0] sm:$0xff]  ;;  %v528_v7 = vld [vmem:[%s3186_s27 + $0xec8] sm:$0xff]  ;;  %525 = vst [vmem:[%s3191_s10 + $0x3a8] sm:$0xff] %v524_v5 }
  0x77   : > { %527 = vst [vmem:[%s3191_s10 + $0x3b0] sm:$0xff] %v526_v6  ;;  %529 = vst [vmem:[%s3191_s10 + $0x3b8] sm:$0xff] %v528_v7  ;;  %v530_v8 = vld [vmem:[%s3186_s27 + $0xf00] sm:$0xff]  ;;  %v532_v9 = vld [vmem:[%s3186_s27 + $0xf08] sm:$0xff] }
  0x78   : > { %v534_v10 = vld [vmem:[%s3186_s27 + $0xf40] sm:$0xff]  ;;  %531 = vst [vmem:[%s3191_s10 + $0x3c0] sm:$0xff] %v530_v8  ;;  %533 = vst [vmem:[%s3191_s10 + $0x3c8] sm:$0xff] %v532_v9  ;;  %v536_v11 = vld [vmem:[%s3186_s27 + $0xf48] sm:$0xff] }
  0x79   : > { %535 = vst [vmem:[%s3191_s10 + $0x3d0] sm:$0xff] %v534_v10  ;;  %v538_v12 = vld [vmem:[%s3186_s27 + $0xf80] sm:$0xff]  ;;  %v540_v13 = vld [vmem:[%s3186_s27 + $0xf88] sm:$0xff]  ;;  %537 = vst [vmem:[%s3191_s10 + $0x3d8] sm:$0xff] %v536_v11 }
  0x7a   : > { %539 = vst [vmem:[%s3191_s10 + $0x3e0] sm:$0xff] %v538_v12  ;;  %541 = vst [vmem:[%s3191_s10 + $0x3e8] sm:$0xff] %v540_v13  ;;  %v542_v14 = vld [vmem:[%s3186_s27 + $0xfc0] sm:$0xff]  ;;  %v544_v15 = vld [vmem:[%s3186_s27 + $0xfc8] sm:$0xff] }
  0x7b   : > { %543 = vst [vmem:[%s3191_s10 + $0x3f0] sm:$0xff] %v542_v14  ;;  %545 = vst [vmem:[%s3191_s10 + $0x3f8] sm:$0xff] %v544_v15 }
  0x7c PF: > { %p2443_p0 = scmp.ge.s32.totalorder %s3026_s25, 1  ;;  %p574_p1 = scmp.lt.s32.totalorder %s3026_s25, 9 }
  0x7e   : > { %p575_p2 = pnand %p2443_p0, %p574_p1 }
  0x7f   : > { %s581_s0 = sand.u32 (!%p575_p2), 1, %s3002_s19   ;;  %s588_s28 = sand.u32 (!%p575_p2), 1, %s2994_s17  }
  0x80   : > { %578 = sbr.rel (%p575_p2) target bundleno = 566 (0x236), region = 74  ;;  %s2444_s11 = sshll.u32 (!%p575_p2), %s581_s0, 7 }
  0x81   : > { %s2445_s26 = sshll.u32 (!%p575_p2), %s588_s28, 10  ;;  %s629_s5 = sand.u32 (!%p575_p2), 1, %s2986_s15  }
  0x82   : > { %s2447_s27 = sshll.u32 (!%p575_p2), %s3014_s22, 2  ;;  %s2446_s29 = sshll.u32 (!%p575_p2), %s629_s5, 7 }
  0x83   : > { %p639_p3 = scmp.lt.s32.totalorder (!%p575_p2), %s2447_s27, 15  ;;  %s3462_s19 = scalar_lea.vmem (!%p575_p2), [#allocation3], %s2444_s11 }
  0x84   : > { %s3464_s17 = scalar_lea.vmem (!%p575_p2), [#allocation4], %s2445_s26  ;;  %s3466_s15 = scalar_lea.vmem (!%p575_p2), [#allocation5], %s2446_s29 }
  0x85   : > { %s3874_s27 = smov (!%p639_p3, %s2447_s27), 15  ;;  %p2449_p4 = scmp.ne.s32.totalorder %s3010_s21, 0 }
  0x86   : > { %s643_s6 = scalar_lea.vmem %s3841_s2, %s3874_s27  ;;  %s652_s1 = scalar_lea.vmem %s3842_s3, %s3874_s27 }
  0x87   : > { %659 = sbr.rel (%p2449_p4) target bundleno = 157 (0x9d), region = 86 }
  0x8c   : > { %v3028_v16 = vmov 0.0  }
  0x8d   : > { %660 = vst [vmem:[#allocation2 + $0xb0] sm:$0xff] %v3028_v16  ;;  %661 = vst [vmem:[#allocation2] sm:$0xff] %v3028_v16 }
  0x8e   : > { %662 = vst [vmem:[#allocation2 + $0xd8] sm:$0xff] %v3028_v16  ;;  %663 = vst [vmem:[#allocation2 + $0x18] sm:$0xff] %v3028_v16 }
  0x8f   : > { %664 = vst [vmem:[#allocation2 + $0x50] sm:$0xff] %v3028_v16  ;;  %665 = vst [vmem:[#allocation2 + $0x68] sm:$0xff] %v3028_v16 }
  0x90   : > { %666 = vst [vmem:[#allocation2 + $0x30] sm:$0xff] %v3028_v16  ;;  %667 = vst [vmem:[#allocation2 + $0x48] sm:$0xff] %v3028_v16 }
  0x91   : > { %668 = vst [vmem:[#allocation2 + $0x80] sm:$0xff] %v3028_v16  ;;  %669 = vst [vmem:[#allocation2 + $0x88] sm:$0xff] %v3028_v16 }
  0x92   : > { %670 = vst [vmem:[#allocation2 + $0xe8] sm:$0xff] %v3028_v16  ;;  %671 = vst [vmem:[#allocation2 + $0xb8] sm:$0xff] %v3028_v16 }
  0x93   : > { %672 = vst [vmem:[#allocation2 + $0x60] sm:$0xff] %v3028_v16  ;;  %673 = vst [vmem:[#allocation2 + $0xf0] sm:$0xff] %v3028_v16 }
  0x94   : > { %674 = vst [vmem:[#allocation2 + $0x8] sm:$0xff] %v3028_v16  ;;  %675 = vst [vmem:[#allocation2 + $0x78] sm:$0xff] %v3028_v16 }
  0x95   : > { %676 = vst [vmem:[#allocation2 + $0x38] sm:$0xff] %v3028_v16  ;;  %677 = vst [vmem:[#allocation2 + $0x58] sm:$0xff] %v3028_v16 }
  0x96   : > { %678 = vst [vmem:[#allocation2 + $0x40] sm:$0xff] %v3028_v16  ;;  %679 = vst [vmem:[#allocation2 + $0xc8] sm:$0xff] %v3028_v16 }
  0x97   : > { %680 = vst [vmem:[#allocation2 + $0xe0] sm:$0xff] %v3028_v16  ;;  %681 = vst [vmem:[#allocation2 + $0x90] sm:$0xff] %v3028_v16 }
  0x98   : > { %682 = vst [vmem:[#allocation2 + $0x70] sm:$0xff] %v3028_v16  ;;  %683 = vst [vmem:[#allocation2 + $0xc0] sm:$0xff] %v3028_v16 }
  0x99   : > { %684 = vst [vmem:[#allocation2 + $0xa8] sm:$0xff] %v3028_v16  ;;  %685 = vst [vmem:[#allocation2 + $0xd0] sm:$0xff] %v3028_v16 }
  0x9a   : > { %686 = vst [vmem:[#allocation2 + $0x10] sm:$0xff] %v3028_v16  ;;  %687 = vst [vmem:[#allocation2 + $0x28] sm:$0xff] %v3028_v16 }
  0x9b   : > { %688 = vst [vmem:[#allocation2 + $0xa0] sm:$0xff] %v3028_v16  ;;  %689 = vst [vmem:[#allocation2 + $0xf8] sm:$0xff] %v3028_v16 }
  0x9c   : > { %690 = vst [vmem:[#allocation2 + $0x20] sm:$0xff] %v3028_v16  ;;  %691 = vst [vmem:[#allocation2 + $0x98] sm:$0xff] %v3028_v16 }
  0x9d PF: > { %v2724_v17 = vld [vmem:[%s3464_s17 + $0xe4] ss:$16 sps:$4 sm:$0xff]   ;;  %v2728_v19 = vld [vmem:[%s3464_s17 + $0xe0] ss:$16 sps:$4 sm:$0xff]   ;;  %v3523_v4 = vld [vmem:[%s3462_s19 + $0xc] ss:$16 sps:$4 sm:$0xff]  }
  0x9e   : > { %v2726_v18 = vld [vmem:[%s3464_s17 + $0x2e4] ss:$16 sps:$4 sm:$0xff]   ;;  %1588 = vmatprep.subr.bf16.mxu0 %v2724_v17  ;;  %v2729_v20 = vld [vmem:[%s3464_s17 + $0x2e0] ss:$16 sps:$4 sm:$0xff]   ;;  %1693 = vmatprep.mubr.bf16.mxu1 %v3523_v4  ;;  %p2594_p5 = scmp.ne.s32.totalorder %s3010_s21, 1 }
  0x9f   : > { %1661 = vmatprep.subr.bf16.mxu1 %v2726_v18  ;;  %v2730_v21 = vld [vmem:[%s3464_s17 + $0xc4] ss:$16 sps:$4 sm:$0xff]   ;;  %1589 = vmatpush1.bf16.msra.mxu0 %v2728_v19  ;;  %v2734_v23 = vld [vmem:[%s3464_s17 + $0xc0] ss:$16 sps:$4 sm:$0xff]   ;;  %v2828_v19 = vld [vmem:[%s3464_s17 + $0xec] ss:$16 sps:$4 sm:$0xff]  }
  0xa0   : > { %1662 = vmatpush1.bf16.msra.mxu1 %v2729_v20  ;;  %v2732_v22 = vld [vmem:[%s3464_s17 + $0x2c4] ss:$16 sps:$4 sm:$0xff]   ;;  %1590 = vmatprep.subr.bf16.mxu0 %v2730_v21  ;;  %v2735_v24 = vld [vmem:[%s3464_s17 + $0x2c0] ss:$16 sps:$4 sm:$0xff]   ;;  %v2831_v20 = vld [vmem:[%s3464_s17 + $0x2ec] ss:$16 sps:$4 sm:$0xff]  }
  0xa1   : > { %1663 = vmatprep.subr.bf16.mxu1 %v2732_v22  ;;  %v2736_v25 = vld [vmem:[%s3464_s17 + $0xa4] ss:$16 sps:$4 sm:$0xff]   ;;  %v2740_v27 = vld [vmem:[%s3464_s17 + $0xa0] ss:$16 sps:$4 sm:$0xff]   ;;  %v3547_v22 = vld [vmem:[%s3462_s19 + $0x8] ss:$16 sps:$4 sm:$0xff]  }
  0xa2   : > { %v2738_v26 = vld [vmem:[%s3464_s17 + $0x2a4] ss:$16 sps:$4 sm:$0xff]   ;;  %v2741_v28 = vld [vmem:[%s3464_s17 + $0x2a0] ss:$16 sps:$4 sm:$0xff]  }
  0xa3   : > { %1591 = vmatpush1.bf16.msra.mxu0 %v2734_v23  ;;  %v2742_v29 = vld [vmem:[%s3464_s17 + $0x84] ss:$16 sps:$4 sm:$0xff]   ;;  %v2746_v31 = vld [vmem:[%s3464_s17 + $0x80] ss:$16 sps:$4 sm:$0xff]   ;;  %v2826_v23 = vld [vmem:[%s3464_s17 + $0xe8] ss:$16 sps:$4 sm:$0xff]  }
  0xa4   : > { %1664 = vmatpush1.bf16.msra.mxu1 %v2735_v24  ;;  %1592 = vmatprep.subr.bf16.mxu0 %v2736_v25  ;;  %v2744_v30 = vld [vmem:[%s3464_s17 + $0x284] ss:$16 sps:$4 sm:$0xff]   ;;  %v2747_v32 = vld [vmem:[%s3464_s17 + $0x280] ss:$16 sps:$4 sm:$0xff]   ;;  %v2829_v24 = vld [vmem:[%s3464_s17 + $0x2e8] ss:$16 sps:$4 sm:$0xff]  }
  0xa5   : > { %1665 = vmatprep.subr.bf16.mxu1 %v2738_v26  ;;  %v2748_v33 = vld [vmem:[%s3464_s17 + $0x64] ss:$16 sps:$4 sm:$0xff]   ;;  %v2752_v35 = vld [vmem:[%s3464_s17 + $0x60] ss:$16 sps:$4 sm:$0xff]   ;;  %v2834_v25 = vld [vmem:[%s3464_s17 + $0xcc] ss:$16 sps:$4 sm:$0xff]  }
  0xa6   : > { %v2750_v34 = vld [vmem:[%s3464_s17 + $0x264] ss:$16 sps:$4 sm:$0xff]   ;;  %v2753_v36 = vld [vmem:[%s3464_s17 + $0x260] ss:$16 sps:$4 sm:$0xff]   ;;  %v2837_v26 = vld [vmem:[%s3464_s17 + $0x2cc] ss:$16 sps:$4 sm:$0xff]  }
  0xa7   : > { %1593 = vmatpush1.bf16.msra.mxu0 %v2740_v27  ;;  %v2754_v37 = vld [vmem:[%s3464_s17 + $0x44] ss:$16 sps:$4 sm:$0xff]   ;;  %v2758_v39 = vld [vmem:[%s3464_s17 + $0x40] ss:$16 sps:$4 sm:$0xff]   ;;  %v2832_v27 = vld [vmem:[%s3464_s17 + $0xc8] ss:$16 sps:$4 sm:$0xff]  }
  0xa8   : > { %1666 = vmatpush1.bf16.msra.mxu1 %v2741_v28  ;;  %1594 = vmatprep.subr.bf16.mxu0 %v2742_v29  ;;  %v2756_v38 = vld [vmem:[%s3464_s17 + $0x244] ss:$16 sps:$4 sm:$0xff]   ;;  %v2759_v40 = vld [vmem:[%s3464_s17 + $0x240] ss:$16 sps:$4 sm:$0xff]   ;;  %v2835_v28 = vld [vmem:[%s3464_s17 + $0x2c8] ss:$16 sps:$4 sm:$0xff]  }
  0xa9   : > { %1667 = vmatprep.subr.bf16.mxu1 %v2744_v30  ;;  %v2760_v41 = vld [vmem:[%s3464_s17 + $0x24] ss:$16 sps:$4 sm:$0xff]   ;;  %v2764_v43 = vld [vmem:[%s3464_s17 + $0x20] ss:$16 sps:$4 sm:$0xff]   ;;  %v2840_v29 = vld [vmem:[%s3464_s17 + $0xac] ss:$16 sps:$4 sm:$0xff]  }
  0xaa   : > { %v2762_v42 = vld [vmem:[%s3464_s17 + $0x224] ss:$16 sps:$4 sm:$0xff]   ;;  %v2765_v44 = vld [vmem:[%s3464_s17 + $0x220] ss:$16 sps:$4 sm:$0xff]   ;;  %v2843_v30 = vld [vmem:[%s3464_s17 + $0x2ac] ss:$16 sps:$4 sm:$0xff]  }
  0xab   : > { %1595 = vmatpush1.bf16.msra.mxu0 %v2746_v31  ;;  %v2766_v45 = vld [vmem:[%s3464_s17 + $0x4] ss:$16 sps:$4 sm:$0xff]   ;;  %v2770_v47 = vld [vmem:[%s3464_s17] ss:$16 sps:$4 sm:$0xff]   ;;  %v2838_v31 = vld [vmem:[%s3464_s17 + $0xa8] ss:$16 sps:$4 sm:$0xff]  }
  0xac   : > { %1668 = vmatpush1.bf16.msra.mxu1 %v2747_v32  ;;  %1596 = vmatprep.subr.bf16.mxu0 %v2748_v33  ;;  %v2768_v46 = vld [vmem:[%s3464_s17 + $0x204] ss:$16 sps:$4 sm:$0xff]   ;;  %v2771_v48 = vld [vmem:[%s3464_s17 + $0x200] ss:$16 sps:$4 sm:$0xff]   ;;  %v2841_v32 = vld [vmem:[%s3464_s17 + $0x2a8] ss:$16 sps:$4 sm:$0xff]  }
  0xad   : > { %1669 = vmatprep.subr.bf16.mxu1 %v2750_v34  ;;  %v2772_v49 = vld [vmem:[%s3464_s17 + $0x1e4] ss:$16 sps:$4 sm:$0xff]   ;;  %v2776_v51 = vld [vmem:[%s3464_s17 + $0x1e0] ss:$16 sps:$4 sm:$0xff]   ;;  %v3565_v34 = vld [vmem:[%s3462_s19 + $0x2c] ss:$16 sps:$4 sm:$0xff]  }
  0xae   : > { %v2774_v50 = vld [vmem:[%s3464_s17 + $0x3e4] ss:$16 sps:$4 sm:$0xff]   ;;  %v2777_v52 = vld [vmem:[%s3464_s17 + $0x3e0] ss:$16 sps:$4 sm:$0xff]  }
  0xaf   : > { %1597 = vmatpush1.bf16.msra.mxu0 %v2752_v35  ;;  %v2778_v53 = vld [vmem:[%s3464_s17 + $0x1c4] ss:$16 sps:$4 sm:$0xff]   ;;  %v2782_v55 = vld [vmem:[%s3464_s17 + $0x1c0] ss:$16 sps:$4 sm:$0xff]  }
  0xb0   : > { %1670 = vmatpush1.bf16.msra.mxu1 %v2753_v36  ;;  %1598 = vmatprep.subr.bf16.mxu0 %v2754_v37  ;;  %v2780_v54 = vld [vmem:[%s3464_s17 + $0x3c4] ss:$16 sps:$4 sm:$0xff]   ;;  %v2783_v56 = vld [vmem:[%s3464_s17 + $0x3c0] ss:$16 sps:$4 sm:$0xff]   ;;  %v3571_v36 = vld [vmem:[%s3462_s19 + $0x28] ss:$16 sps:$4 sm:$0xff]  }
  0xb1   : > { %1671 = vmatprep.subr.bf16.mxu1 %v2756_v38  ;;  %v2784_v57 = vld [vmem:[%s3464_s17 + $0x1a4] ss:$16 sps:$4 sm:$0xff]   ;;  %v2788_v59 = vld [vmem:[%s3464_s17 + $0x1a0] ss:$16 sps:$4 sm:$0xff]   ;;  %v2846_v37 = vld [vmem:[%s3464_s17 + $0x8c] ss:$16 sps:$4 sm:$0xff]  }
  0xb2   : > { %v2786_v58 = vld [vmem:[%s3464_s17 + $0x3a4] ss:$16 sps:$4 sm:$0xff]   ;;  %v2789_v60 = vld [vmem:[%s3464_s17 + $0x3a0] ss:$16 sps:$4 sm:$0xff]   ;;  %v2849_v38 = vld [vmem:[%s3464_s17 + $0x28c] ss:$16 sps:$4 sm:$0xff]  }
  0xb3   : > { %1599 = vmatpush1.bf16.msra.mxu0 %v2758_v39  ;;  %v2790_v61 = vld [vmem:[%s3464_s17 + $0x184] ss:$16 sps:$4 sm:$0xff]   ;;  %v2794_v63 = vld [vmem:[%s3464_s17 + $0x180] ss:$16 sps:$4 sm:$0xff]   ;;  %v2844_v39 = vld [vmem:[%s3464_s17 + $0x88] ss:$16 sps:$4 sm:$0xff]  }
  0xb4   : > { %1672 = vmatpush1.bf16.msra.mxu1 %v2759_v40  ;;  %1600 = vmatprep.subr.bf16.mxu0 %v2760_v41  ;;  %v2792_v62 = vld [vmem:[%s3464_s17 + $0x384] ss:$16 sps:$4 sm:$0xff]   ;;  %v2795_v0 = vld [vmem:[%s3464_s17 + $0x380] ss:$16 sps:$4 sm:$0xff]   ;;  %v2847_v40 = vld [vmem:[%s3464_s17 + $0x288] ss:$16 sps:$4 sm:$0xff]  }
  0xb5   : > { %1673 = vmatprep.subr.bf16.mxu1 %v2762_v42  ;;  %v2796_v1 = vld [vmem:[%s3464_s17 + $0x164] ss:$16 sps:$4 sm:$0xff]   ;;  %v2800_v5 = vld [vmem:[%s3464_s17 + $0x160] ss:$16 sps:$4 sm:$0xff]   ;;  %v2852_v41 = vld [vmem:[%s3464_s17 + $0x6c] ss:$16 sps:$4 sm:$0xff]  }
  0xb6   : > { %v3519_v2 = vld [vmem:[%s3462_s19 + $0x4] ss:$16 sps:$4 sm:$0xff]   ;;  %v2801_v6 = vld [vmem:[%s3464_s17 + $0x360] ss:$16 sps:$4 sm:$0xff]   ;;  %v2855_v42 = vld [vmem:[%s3464_s17 + $0x26c] ss:$16 sps:$4 sm:$0xff]  }
  0xb7   : > { %1601 = vmatpush1.bf16.msra.mxu0 %v2764_v43  ;;  %v2798_v3 = vld [vmem:[%s3464_s17 + $0x364] ss:$16 sps:$4 sm:$0xff]   ;;  %1620 = vmatprep.mubr.bf16.mxu0 %v3519_v2  ;;  %v2806_v9 = vld [vmem:[%s3464_s17 + $0x140] ss:$16 sps:$4 sm:$0xff]   ;;  %v2850_v43 = vld [vmem:[%s3464_s17 + $0x68] ss:$16 sps:$4 sm:$0xff]  }
  0xb8   : > { %1674 = vmatpush1.bf16.msra.mxu1 %v2765_v44  ;;  %1602 = vmatprep.subr.bf16.mxu0 %v2766_v45  ;;  %v2802_v7 = vld [vmem:[%s3464_s17 + $0x144] ss:$16 sps:$4 sm:$0xff]   ;;  %v2807_v10 = vld [vmem:[%s3464_s17 + $0x340] ss:$16 sps:$4 sm:$0xff]   ;;  %v2853_v44 = vld [vmem:[%s3464_s17 + $0x268] ss:$16 sps:$4 sm:$0xff]  }
  0xb9   : > { %1675 = vmatprep.subr.bf16.mxu1 %v2768_v46  ;;  %v2804_v8 = vld [vmem:[%s3464_s17 + $0x344] ss:$16 sps:$4 sm:$0xff]   ;;  %v2812_v13 = vld [vmem:[%s3464_s17 + $0x120] ss:$16 sps:$4 sm:$0xff]   ;;  %v3589_v46 = vld [vmem:[%s3462_s19 + $0x4c] ss:$16 sps:$4 sm:$0xff]  }
  0xba   : > { %v2808_v11 = vld [vmem:[%s3464_s17 + $0x124] ss:$16 sps:$4 sm:$0xff]   ;;  %v2813_v14 = vld [vmem:[%s3464_s17 + $0x320] ss:$16 sps:$4 sm:$0xff]  }
  0xbb   : > { %1603 = vmatpush1.bf16.msra.mxu0 %v2770_v47  ;;  %v2810_v12 = vld [vmem:[%s3464_s17 + $0x324] ss:$16 sps:$4 sm:$0xff]   ;;  %v2818_v17 = vld [vmem:[%s3464_s17 + $0x100] ss:$16 sps:$4 sm:$0xff]  }
  0xbc   : > { %1676 = vmatpush1.bf16.msra.mxu1 %v2771_v48  ;;  %1604 = vmatprep.subr.bf16.mxu0 %v2772_v49  ;;  %v2814_v15 = vld [vmem:[%s3464_s17 + $0x104] ss:$16 sps:$4 sm:$0xff]   ;;  %v2819_v18 = vld [vmem:[%s3464_s17 + $0x300] ss:$16 sps:$4 sm:$0xff]   ;;  %v3595_v48 = vld [vmem:[%s3462_s19 + $0x48] ss:$16 sps:$4 sm:$0xff]  }
  0xbd   : > { %1677 = vmatprep.subr.bf16.mxu1 %v2774_v50  ;;  %v2816_v16 = vld [vmem:[%s3464_s17 + $0x304] ss:$16 sps:$4 sm:$0xff]   ;;  %v3544_v21 = vld [vmem:[%s3462_s19] ss:$16 sps:$4 sm:$0xff]   ;;  %v2858_v49 = vld [vmem:[%s3464_s17 + $0x4c] ss:$16 sps:$4 sm:$0xff]  }
  0xbe   : > { %v3562_v33 = vld [vmem:[%s3462_s19 + $0x24] ss:$16 sps:$4 sm:$0xff]   ;;  %v3568_v35 = vld [vmem:[%s3462_s19 + $0x20] ss:$16 sps:$4 sm:$0xff]   ;;  %v2861_v50 = vld [vmem:[%s3464_s17 + $0x24c] ss:$16 sps:$4 sm:$0xff]  }
  0xbf   : > { %1605 = vmatpush2.bf16.msra.mxu0 %v2776_v51  ;;  %v3586_v45 = vld [vmem:[%s3462_s19 + $0x44] ss:$16 sps:$4 sm:$0xff]   ;;  %v3592_v47 = vld [vmem:[%s3462_s19 + $0x40] ss:$16 sps:$4 sm:$0xff]   ;;  %v2856_v51 = vld [vmem:[%s3464_s17 + $0x48] ss:$16 sps:$4 sm:$0xff]  }
  0xc0   : > { %1678 = vmatpush2.bf16.msra.mxu1 %v2777_v52  ;;  %1606 = vmatprep.subr.bf16.mxu0 %v2778_v53  ;;  %v2859_v52 = vld [vmem:[%s3464_s17 + $0x248] ss:$16 sps:$4 sm:$0xff]   ;;  %v2864_v53 = vld [vmem:[%s3464_s17 + $0x2c] ss:$16 sps:$4 sm:$0xff]  }
  0xc1   : > { %1679 = vmatprep.subr.bf16.mxu1 %v2780_v54  ;;  %v2867_v54 = vld [vmem:[%s3464_s17 + $0x22c] ss:$16 sps:$4 sm:$0xff]  }
  0xc3   : > { %1607 = vmatpush2.bf16.msra.mxu0 %v2782_v55  ;;  %v2862_v55 = vld [vmem:[%s3464_s17 + $0x28] ss:$16 sps:$4 sm:$0xff]  }
  0xc4   : > { %1680 = vmatpush2.bf16.msra.mxu1 %v2783_v56  ;;  %1608 = vmatprep.subr.bf16.mxu0 %v2784_v57  ;;  %v2865_v56 = vld [vmem:[%s3464_s17 + $0x228] ss:$16 sps:$4 sm:$0xff]   ;;  %v3610_v57 = vld [vmem:[%s3462_s19 + $0x64] ss:$16 sps:$4 sm:$0xff]  }
  0xc5   : > { %1681 = vmatprep.subr.bf16.mxu1 %v2786_v58  ;;  %v3613_v58 = vld [vmem:[%s3462_s19 + $0x6c] ss:$16 sps:$4 sm:$0xff]  }
  0xc7   : > { %1609 = vmatpush2.bf16.msra.mxu0 %v2788_v59  ;;  %v3616_v59 = vld [vmem:[%s3462_s19 + $0x60] ss:$16 sps:$4 sm:$0xff]  }
  0xc8   : > { %1682 = vmatpush2.bf16.msra.mxu1 %v2789_v60  ;;  %1610 = vmatprep.subr.bf16.mxu0 %v2790_v61  ;;  %v3619_v60 = vld [vmem:[%s3462_s19 + $0x68] ss:$16 sps:$4 sm:$0xff]   ;;  %v2870_v61 = vld [vmem:[%s3464_s17 + $0xc] ss:$16 sps:$4 sm:$0xff]  }
  0xc9   : > { %1683 = vmatprep.subr.bf16.mxu1 %v2792_v62  ;;  %v2873_v62 = vld [vmem:[%s3464_s17 + $0x20c] ss:$16 sps:$4 sm:$0xff]  }
  0xcb   : > { %1611 = vmatpush2.bf16.msra.mxu0 %v2794_v63  ;;  %v2868_v63 = vld [vmem:[%s3464_s17 + $0x8] ss:$16 sps:$4 sm:$0xff]  }
  0xcc   : > { %1684 = vmatpush2.bf16.msra.mxu1 %v2795_v0  ;;  %1612 = vmatprep.subr.bf16.mxu0 %v2796_v1  ;;  %v2871_v0 = vld [vmem:[%s3464_s17 + $0x208] ss:$16 sps:$4 sm:$0xff]   ;;  %v2876_v1 = vld [vmem:[%s3464_s17 + $0x1ec] ss:$16 sps:$4 sm:$0xff]  }
  0xcd   : > { %1685 = vmatprep.subr.bf16.mxu1 %v2798_v3  ;;  %v2879_v3 = vld [vmem:[%s3464_s17 + $0x3ec] ss:$16 sps:$4 sm:$0xff]  }
  0xcf   : > { %1613 = vmatpush2.bf16.msra.mxu0 %v2800_v5  ;;  %v2874_v5 = vld [vmem:[%s3464_s17 + $0x1e8] ss:$16 sps:$4 sm:$0xff]  }
  0xd0   : > { %1686 = vmatpush2.bf16.msra.mxu1 %v2801_v6  ;;  %1614 = vmatprep.subr.bf16.mxu0 %v2802_v7  ;;  %v2877_v6 = vld [vmem:[%s3464_s17 + $0x3e8] ss:$16 sps:$4 sm:$0xff]   ;;  %v2888_v7 = vld [vmem:[%s3464_s17 + $0x1cc] ss:$16 sps:$4 sm:$0xff]  }
  0xd1   : > { %1687 = vmatprep.subr.bf16.mxu1 %v2804_v8  ;;  %v2891_v8 = vld [vmem:[%s3464_s17 + $0x3cc] ss:$16 sps:$4 sm:$0xff]  }
  0xd3   : > { %1615 = vmatpush2.bf16.msra.mxu0 %v2806_v9  ;;  %v2886_v9 = vld [vmem:[%s3464_s17 + $0x1c8] ss:$16 sps:$4 sm:$0xff]  }
  0xd4   : > { %1688 = vmatpush2.bf16.msra.mxu1 %v2807_v10  ;;  %1616 = vmatprep.subr.bf16.mxu0 %v2808_v11  ;;  %v2897_v10 = vld [vmem:[%s3464_s17 + $0x3ac] ss:$16 sps:$4 sm:$0xff]   ;;  %v2892_v11 = vld [vmem:[%s3464_s17 + $0x1a8] ss:$16 sps:$4 sm:$0xff]  }
  0xd5   : > { %1689 = vmatprep.subr.bf16.mxu1 %v2810_v12  ;;  %v2895_v12 = vld [vmem:[%s3464_s17 + $0x3a8] ss:$16 sps:$4 sm:$0xff]  }
  0xd7   : > { %1617 = vmatpush2.bf16.msra.mxu0 %v2812_v13  ;;  %v2906_v13 = vld [vmem:[%s3464_s17 + $0x18c] ss:$16 sps:$4 sm:$0xff]  }
  0xd8   : > { %1690 = vmatpush2.bf16.msra.mxu1 %v2813_v14  ;;  %1618 = vmatprep.subr.bf16.mxu0 %v2814_v15  ;;  %v2909_v14 = vld [vmem:[%s3464_s17 + $0x38c] ss:$16 sps:$4 sm:$0xff]   ;;  %v2904_v15 = vld [vmem:[%s3464_s17 + $0x188] ss:$16 sps:$4 sm:$0xff]  }
  0xd9   : > { %1691 = vmatprep.subr.bf16.mxu1 %v2816_v16  ;;  %v2907_v16 = vld [vmem:[%s3464_s17 + $0x388] ss:$16 sps:$4 sm:$0xff]  }
  0xdb   : > { %1619 = vmatpush2.bf16.msra.mxu0 %v2818_v17  ;;  %v2912_v17 = vld [vmem:[%s3464_s17 + $0x16c] ss:$16 sps:$4 sm:$0xff]  }
  0xdc   : > { %1692 = vmatpush2.bf16.msra.mxu1 %v2819_v18  ;;  %1734 = vmatprep.subr.bf16.mxu0 %v2828_v19  ;;  %v2915_v18 = vld [vmem:[%s3464_s17 + $0x36c] ss:$16 sps:$4 sm:$0xff]   ;;  %v2910_v19 = vld [vmem:[%s3464_s17 + $0x168] ss:$16 sps:$4 sm:$0xff]  }
  0xdd   : > { %1807 = vmatprep.subr.bf16.mxu1 %v2831_v20  ;;  %v2913_v20 = vld [vmem:[%s3464_s17 + $0x368] ss:$16 sps:$4 sm:$0xff]  }
  0xde   : > { %1621 = vmatmul.mubr.bf16.vlgmr.msra.gmra.mxu0 %v3544_v21 }
  0xdf   : > { %1694 = vmatmul.mubr.bf16.vlgmr.msra.gmra.mxu1 %v3547_v22  ;;  %1735 = vmatpush1.bf16.msra.mxu0 %v2826_v23  ;;  %v2924_v23 = vld [vmem:[%s3464_s17 + $0x14c] ss:$16 sps:$4 sm:$0xff]  }
  0xe0   : > { %1808 = vmatpush1.bf16.msra.mxu1 %v2829_v24  ;;  %1736 = vmatprep.subr.bf16.mxu0 %v2834_v25  ;;  %v2927_v24 = vld [vmem:[%s3464_s17 + $0x34c] ss:$16 sps:$4 sm:$0xff]   ;;  %v2922_v25 = vld [vmem:[%s3464_s17 + $0x148] ss:$16 sps:$4 sm:$0xff]  }
  0xe1   : > { %1809 = vmatprep.subr.bf16.mxu1 %v2837_v26  ;;  %1630 = vmatprep.mubr.bf16.mxu0 %v3562_v33  ;;  %v2925_v26 = vld [vmem:[%s3464_s17 + $0x348] ss:$16 sps:$4 sm:$0xff]  }
  0xe2   : > { %1703 = vmatprep.mubr.bf16.mxu1 %v3565_v34 }
  0xe3   : > { %1737 = vmatpush1.bf16.msra.mxu0 %v2832_v27  ;;  %v2930_v27 = vld [vmem:[%s3464_s17 + $0x12c] ss:$16 sps:$4 sm:$0xff]  }
  0xe4   : > { %1810 = vmatpush1.bf16.msra.mxu1 %v2835_v28  ;;  %1738 = vmatprep.subr.bf16.mxu0 %v2840_v29  ;;  %v2933_v28 = vld [vmem:[%s3464_s17 + $0x32c] ss:$16 sps:$4 sm:$0xff]   ;;  %v2928_v29 = vld [vmem:[%s3464_s17 + $0x128] ss:$16 sps:$4 sm:$0xff]  }
  0xe5   : > { %1811 = vmatprep.subr.bf16.mxu1 %v2843_v30  ;;  %v2931_v30 = vld [vmem:[%s3464_s17 + $0x328] ss:$16 sps:$4 sm:$0xff]  }
  0xe6   : > { %1631 = vmatmul.mubr.bf16.gmra.mxu0 %v3568_v35 }
  0xe7   : > { %1704 = vmatmul.mubr.bf16.gmra.mxu1 %v3571_v36  ;;  %1739 = vmatpush1.bf16.msra.mxu0 %v2838_v31  ;;  %v2936_v31 = vld [vmem:[%s3464_s17 + $0x10c] ss:$16 sps:$4 sm:$0xff]  }
  0xe8   : > { %1812 = vmatpush1.bf16.msra.mxu1 %v2841_v32  ;;  %1740 = vmatprep.subr.bf16.mxu0 %v2846_v37  ;;  %v2939_v32 = vld [vmem:[%s3464_s17 + $0x30c] ss:$16 sps:$4 sm:$0xff]   ;;  %v2934_v37 = vld [vmem:[%s3464_s17 + $0x108] ss:$16 sps:$4 sm:$0xff]  }
  0xe9   : > { %1813 = vmatprep.subr.bf16.mxu1 %v2849_v38  ;;  %1640 = vmatprep.mubr.bf16.mxu0 %v3586_v45  ;;  %v2937_v38 = vld [vmem:[%s3464_s17 + $0x308] ss:$16 sps:$4 sm:$0xff]  }
  0xea   : > { %1713 = vmatprep.mubr.bf16.mxu1 %v3589_v46 }
  0xeb   : > { %1741 = vmatpush1.bf16.msra.mxu0 %v2844_v39 }
  0xec   : > { %1814 = vmatpush1.bf16.msra.mxu1 %v2847_v40  ;;  %1742 = vmatprep.subr.bf16.mxu0 %v2852_v41 }
  0xed   : > { %1815 = vmatprep.subr.bf16.mxu1 %v2855_v42 }
  0xee   : > { %1641 = vmatmul.mubr.bf16.gmra.mxu0 %v3592_v47 }
  0xef   : > { %1714 = vmatmul.mubr.bf16.gmra.mxu1 %v3595_v48  ;;  %1743 = vmatpush1.bf16.msra.mxu0 %v2850_v43  ;;  %v696_v43 = vld [vmem:[#allocation2 + $0x50] sm:$0xff] }
  0xf0   : > { %1816 = vmatpush1.bf16.msra.mxu1 %v2853_v44  ;;  %1744 = vmatprep.subr.bf16.mxu0 %v2858_v49 }
  0xf1   : > { %1817 = vmatprep.subr.bf16.mxu1 %v2861_v50  ;;  %1650 = vmatprep.mubr.bf16.mxu0 %v3610_v57 }
  0xf2   : > { %1723 = vmatprep.mubr.bf16.mxu1 %v3613_v58 }
  0xf3   : > { %1745 = vmatpush1.bf16.msra.mxu0 %v2856_v51 }
  0xf4   : > { %1818 = vmatpush1.bf16.msra.mxu1 %v2859_v52  ;;  %1746 = vmatprep.subr.bf16.mxu0 %v2864_v53  ;;  %v700_v53 = vld [vmem:[#allocation2 + $0x80] sm:$0xff] }
  0xf5   : > { %1819 = vmatprep.subr.bf16.mxu1 %v2867_v54 }
  0xf6   : > { %1651 = vmatmul.mubr.bf16.gmra.mxu0 %v3616_v59 }
  0xf7   : > { %1724 = vmatmul.mubr.bf16.gmra.mxu1 %v3619_v60  ;;  %1747 = vmatpush1.bf16.msra.mxu0 %v2862_v55 }
  0xf8   : > { %1820 = vmatpush1.bf16.msra.mxu1 %v2865_v56  ;;  %1748 = vmatprep.subr.bf16.mxu0 %v2870_v61 }
  0xf9   : > { %1821 = vmatprep.subr.bf16.mxu1 %v2873_v62  ;;  %1766 = vmatprep.mubr.bf16.mxu0 %v3519_v2  ;;  %v2889_v2 = vld [vmem:[%s3464_s17 + $0x3c8] ss:$16 sps:$4 sm:$0xff]  }
  0xfa   : > { %1839 = vmatprep.mubr.bf16.mxu1 %v3523_v4  ;;  %v2894_v4 = vld [vmem:[%s3464_s17 + $0x1ac] ss:$16 sps:$4 sm:$0xff]  }
  0xfb   : > { %1749 = vmatpush1.bf16.msra.mxu0 %v2868_v63  ;;  %v704_v63 = vld [vmem:[#allocation2 + $0x60] sm:$0xff] }
  0xfc   : > { %1822 = vmatpush1.bf16.msra.mxu1 %v2871_v0  ;;  %1750 = vmatprep.subr.bf16.mxu0 %v2876_v1 }
  0xfd   : > { %1823 = vmatprep.subr.bf16.mxu1 %v2879_v3 }
  0xff   : > { %1751 = vmatpush2.bf16.msra.mxu0 %v2874_v5 }
 0x100   : > { %1824 = vmatpush2.bf16.msra.mxu1 %v2877_v6  ;;  %1752 = vmatprep.subr.bf16.mxu0 %v2888_v7  ;;  %v705_v6 = vld [vmem:[#allocation2 + $0xf0] sm:$0xff] }
 0x101   : > { %1825 = vmatprep.subr.bf16.mxu1 %v2891_v8 }
 0x103   : > { %1753 = vmatpush2.bf16.msra.mxu0 %v2886_v9 }
 0x104   : > { %1826 = vmatpush2.bf16.msra.mxu1 %v2889_v2  ;;  %1754 = vmatprep.subr.bf16.mxu0 %v2894_v4  ;;  %v708_v4 = vld [vmem:[#allocation2 + $0x38] sm:$0xff] }
 0x105   : > { %1827 = vmatprep.subr.bf16.mxu1 %v2897_v10 }
 0x107   : > { %1755 = vmatpush2.bf16.msra.mxu0 %v2892_v11 }
 0x108   : > { %1828 = vmatpush2.bf16.msra.mxu1 %v2895_v12  ;;  %1756 = vmatprep.subr.bf16.mxu0 %v2906_v13 }
 0x109   : > { %1829 = vmatprep.subr.bf16.mxu1 %v2909_v14  ;;  %v709_v14 = vld [vmem:[#allocation2 + $0x58] sm:$0xff] }
 0x10b   : > { %1757 = vmatpush2.bf16.msra.mxu0 %v2904_v15 }
 0x10c   : > { %1830 = vmatpush2.bf16.msra.mxu1 %v2907_v16  ;;  %1758 = vmatprep.subr.bf16.mxu0 %v2912_v17 }
 0x10d   : > { %1831 = vmatprep.subr.bf16.mxu1 %v2915_v18 }
 0x10f   : > { %1759 = vmatpush2.bf16.msra.mxu0 %v2910_v19  ;;  %v712_v19 = vld [vmem:[#allocation2 + $0xe0] sm:$0xff] }
 0x110   : > { %1832 = vmatpush2.bf16.msra.mxu1 %v2913_v20  ;;  %1760 = vmatprep.subr.bf16.mxu0 %v2924_v23 }
 0x111   : > { %1833 = vmatprep.subr.bf16.mxu1 %v2927_v24 }
 0x113   : > { %1761 = vmatpush2.bf16.msra.mxu0 %v2922_v25 }
 0x114   : > { %1834 = vmatpush2.bf16.msra.mxu1 %v2925_v26  ;;  %1762 = vmatprep.subr.bf16.mxu0 %v2930_v27  ;;  %v713_v26 = vld [vmem:[#allocation2 + $0x90] sm:$0xff] }
 0x115   : > { %1835 = vmatprep.subr.bf16.mxu1 %v2933_v28 }
 0x117   : > { %1763 = vmatpush2.bf16.msra.mxu0 %v2928_v29 }
 0x118   : > { %1836 = vmatpush2.bf16.msra.mxu1 %v2931_v30  ;;  %1764 = vmatprep.subr.bf16.mxu0 %v2936_v31  ;;  %v716_v31 = vld [vmem:[#allocation2 + $0xa8] sm:$0xff] }
 0x119   : > { %1837 = vmatprep.subr.bf16.mxu1 %v2939_v32 }
 0x11b   : > { %1765 = vmatpush2.bf16.msra.mxu0 %v2934_v37 }
 0x11c   : > { %1838 = vmatpush2.bf16.msra.mxu1 %v2937_v38 }
 0x11e   : > { %1767 = vmatmul.mubr.bf16.vlgmr.msra.gmra.mxu0 %v3544_v21 }
 0x11f   : > { %1840 = vmatmul.mubr.bf16.vlgmr.msra.gmra.mxu1 %v3547_v22  ;;  %1776 = vmatprep.mubr.bf16.mxu0 %v3562_v33  ;;  %v692_v22 = vld [vmem:[#allocation2 + $0xb0] sm:$0xff] }
 0x120   : > { %1849 = vmatprep.mubr.bf16.mxu1 %v3565_v34 }
 0x126   : > { %1777 = vmatmul.mubr.bf16.gmra.mxu0 %v3568_v35 }
 0x127   : > { %1850 = vmatmul.mubr.bf16.gmra.mxu1 %v3571_v36  ;;  %1786 = vmatprep.mubr.bf16.mxu0 %v3586_v45  ;;  %v693_v36 = vld [vmem:[#allocation2] sm:$0xff] }
 0x128   : > { %1859 = vmatprep.mubr.bf16.mxu1 %v3589_v46 }
 0x12e   : > { %1787 = vmatmul.mubr.bf16.gmra.mxu0 %v3592_v47 }
 0x12f   : > { %1860 = vmatmul.mubr.bf16.gmra.mxu1 %v3595_v48  ;;  %1796 = vmatprep.mubr.bf16.mxu0 %v3610_v57  ;;  %v697_v48 = vld [vmem:[#allocation2 + $0x68] sm:$0xff] }
 0x130   : > { %1869 = vmatprep.mubr.bf16.mxu1 %v3613_v58  ;;  %v701_v58 = vld [vmem:[#allocation2 + $0x88] sm:$0xff] }
 0x136   : > { %1797 = vmatmul.mubr.bf16.gmra.mxu0 %v3616_v59 }
 0x137   : > { %1870 = vmatmul.mubr.bf16.gmra.mxu1 %v3619_v60 }
 0x19e   : > { %v1622_v21 = vpop.f32.mrf.mxu0 }
 0x19f   : > { %v1695_v33 = vpop.f32.mrf.mxu1 }
 0x1a0   : > { %v1696_v34 = vadd.f32 %v1695_v33, %v1622_v21  ;;  %v1624_v35 = vpop.f32.mrf.mxu0 }
 0x1a1   : > { %v1697_v39 = vpop.f32.mrf.mxu1 }
 0x1a2   : > { %v1880_v40 = vadd.f32 %v1696_v34, %v692_v22  ;;  %v1698_v41 = vadd.f32 %v1697_v39, %v1624_v35  ;;  %v1626_v42 = vpop.f32.mrf.mxu0  ;;  %v717_v22 = vld [vmem:[#allocation2 + $0xd0] sm:$0xff]  ;;  %v720_v39 = vld [vmem:[#allocation2 + $0xa0] sm:$0xff] }
 0x1a3   : > { %v1699_v44 = vpop.f32.mrf.mxu1 }
 0x1a4   : > { %1912 = vst [vmem:[#allocation2 + $0xb0] sm:$0xff] %v1880_v40  ;;  %v1881_v45 = vadd.f32 %v1698_v41, %v693_v36  ;;  %v1700_v46 = vadd.f32 %v1699_v44, %v1626_v42  ;;  %v1628_v47 = vpop.f32.mrf.mxu0  ;;  %v721_v44 = vld [vmem:[#allocation2 + $0xf8] sm:$0xff] }
 0x1a5   : > { %v1701_v49 = vpop.f32.mrf.mxu1 }
 0x1a6   : > { %1913 = vst [vmem:[#allocation2] sm:$0xff] %v1881_v45  ;;  %v1884_v50 = vadd.f32 %v1700_v46, %v696_v43  ;;  %v1702_v51 = vadd.f32 %v1701_v49, %v1628_v47  ;;  %v1632_v52 = vpop.f32.mrf.mxu0 }
 0x1a7   : > { %v1705_v54 = vpop.f32.mrf.mxu1 }
 0x1a8   : > { %1916 = vst [vmem:[#allocation2 + $0x50] sm:$0xff] %v1884_v50  ;;  %v1885_v55 = vadd.f32 %v1702_v51, %v697_v48  ;;  %v1706_v56 = vadd.f32 %v1705_v54, %v1632_v52  ;;  %v1634_v57 = vpop.f32.mrf.mxu0  ;;  %v694_v50 = vld [vmem:[#allocation2 + $0xd8] sm:$0xff] }
 0x1a9   : > { %v1707_v59 = vpop.f32.mrf.mxu1  ;;  %v695_v54 = vld [vmem:[#allocation2 + $0x18] sm:$0xff] }
 0x1aa   : > { %1917 = vst [vmem:[#allocation2 + $0x68] sm:$0xff] %v1885_v55  ;;  %v1888_v60 = vadd.f32 %v1706_v56, %v700_v53  ;;  %v1708_v61 = vadd.f32 %v1707_v59, %v1634_v57  ;;  %v1636_v62 = vpop.f32.mrf.mxu0  ;;  %v698_v59 = vld [vmem:[#allocation2 + $0x30] sm:$0xff] }
 0x1ab   : > { %v1709_v0 = vpop.f32.mrf.mxu1 }
 0x1ac   : > { %1920 = vst [vmem:[#allocation2 + $0x80] sm:$0xff] %v1888_v60  ;;  %v1889_v1 = vadd.f32 %v1708_v61, %v701_v58  ;;  %v1710_v3 = vadd.f32 %v1709_v0, %v1636_v62  ;;  %v1638_v5 = vpop.f32.mrf.mxu0  ;;  %v699_v0 = vld [vmem:[#allocation2 + $0x48] sm:$0xff] }
 0x1ad   : > { %v1711_v7 = vpop.f32.mrf.mxu1 }
 0x1ae   : > { %1921 = vst [vmem:[#allocation2 + $0x88] sm:$0xff] %v1889_v1  ;;  %v1892_v8 = vadd.f32 %v1710_v3, %v704_v63  ;;  %v1712_v9 = vadd.f32 %v1711_v7, %v1638_v5  ;;  %v1642_v2 = vpop.f32.mrf.mxu0  ;;  %v702_v7 = vld [vmem:[#allocation2 + $0xe8] sm:$0xff] }
 0x1af   : > { %v1715_v10 = vpop.f32.mrf.mxu1 }
 0x1b0   : > { %1924 = vst [vmem:[#allocation2 + $0x60] sm:$0xff] %v1892_v8  ;;  %v1893_v11 = vadd.f32 %v1712_v9, %v705_v6  ;;  %v1716_v12 = vadd.f32 %v1715_v10, %v1642_v2  ;;  %v1644_v13 = vpop.f32.mrf.mxu0  ;;  %v703_v10 = vld [vmem:[#allocation2 + $0xb8] sm:$0xff] }
 0x1b1   : > { %v1717_v15 = vpop.f32.mrf.mxu1 }
 0x1b2   : > { %1925 = vst [vmem:[#allocation2 + $0xf0] sm:$0xff] %v1893_v11  ;;  %v1896_v16 = vadd.f32 %v1716_v12, %v708_v4  ;;  %v1718_v17 = vadd.f32 %v1717_v15, %v1644_v13  ;;  %v1646_v18 = vpop.f32.mrf.mxu0  ;;  %v706_v15 = vld [vmem:[#allocation2 + $0x8] sm:$0xff] }
 0x1b3   : > { %v1719_v20 = vpop.f32.mrf.mxu1 }
 0x1b4   : > { %1928 = vst [vmem:[#allocation2 + $0x38] sm:$0xff] %v1896_v16  ;;  %v1897_v23 = vadd.f32 %v1718_v17, %v709_v14  ;;  %v1720_v24 = vadd.f32 %v1719_v20, %v1646_v18  ;;  %v1648_v25 = vpop.f32.mrf.mxu0  ;;  %v707_v20 = vld [vmem:[#allocation2 + $0x78] sm:$0xff] }
 0x1b5   : > { %v1721_v27 = vpop.f32.mrf.mxu1 }
 0x1b6   : > { %1929 = vst [vmem:[#allocation2 + $0x58] sm:$0xff] %v1897_v23  ;;  %v1900_v28 = vadd.f32 %v1720_v24, %v712_v19  ;;  %v1722_v29 = vadd.f32 %v1721_v27, %v1648_v25  ;;  %v1652_v30 = vpop.f32.mrf.mxu0  ;;  %v710_v27 = vld [vmem:[#allocation2 + $0x40] sm:$0xff] }
 0x1b7   : > { %v1725_v32 = vpop.f32.mrf.mxu1 }
 0x1b8   : > { %1932 = vst [vmem:[#allocation2 + $0xe0] sm:$0xff] %v1900_v28  ;;  %v1901_v37 = vadd.f32 %v1722_v29, %v713_v26  ;;  %v1726_v38 = vadd.f32 %v1725_v32, %v1652_v30  ;;  %v1654_v21 = vpop.f32.mrf.mxu0  ;;  %v711_v32 = vld [vmem:[#allocation2 + $0xc8] sm:$0xff] }
 0x1b9   : > { %v1727_v33 = vpop.f32.mrf.mxu1 }
 0x1ba   : > { %1933 = vst [vmem:[#allocation2 + $0x90] sm:$0xff] %v1901_v37  ;;  %v1904_v34 = vadd.f32 %v1726_v38, %v716_v31  ;;  %v1728_v35 = vadd.f32 %v1727_v33, %v1654_v21  ;;  %v1656_v36 = vpop.f32.mrf.mxu0  ;;  %v714_v33 = vld [vmem:[#allocation2 + $0x70] sm:$0xff] }
 0x1bb   : > { %v1729_v40 = vpop.f32.mrf.mxu1 }
 0x1bc   : > { %1936 = vst [vmem:[#allocation2 + $0xa8] sm:$0xff] %v1904_v34  ;;  %v1905_v41 = vadd.f32 %v1728_v35, %v717_v22  ;;  %v1730_v42 = vadd.f32 %v1729_v40, %v1656_v36  ;;  %v1658_v43 = vpop.f32.mrf.mxu0  ;;  %v715_v40 = vld [vmem:[#allocation2 + $0xc0] sm:$0xff] }
 0x1bd   : > { %v1731_v45 = vpop.f32.mrf.mxu1 }
 0x1be   : > { %1937 = vst [vmem:[#allocation2 + $0xd0] sm:$0xff] %v1905_v41  ;;  %v1908_v46 = vadd.f32 %v1730_v42, %v720_v39  ;;  %v1732_v47 = vadd.f32 %v1731_v45, %v1658_v43  ;;  %v718_v45 = vld [vmem:[#allocation2 + $0x10] sm:$0xff] }
 0x1c0   : > { %1940 = vst [vmem:[#allocation2 + $0xa0] sm:$0xff] %v1908_v46  ;;  %v1909_v48 = vadd.f32 %v1732_v47, %v721_v44 }
 0x1c2   : > { %1941 = vst [vmem:[#allocation2 + $0xf8] sm:$0xff] %v1909_v48 }
 0x1de   : > { %v1768_v49 = vpop.f32.mrf.mxu0 }
 0x1df   : > { %v1841_v51 = vpop.f32.mrf.mxu1 }
 0x1e0   : > { %v1842_v52 = vadd.f32 %v1841_v51, %v1768_v49  ;;  %v1770_v53 = vpop.f32.mrf.mxu0 }
 0x1e1   : > { %v1843_v55 = vpop.f32.mrf.mxu1 }
 0x1e2   : > { %v1882_v56 = vadd.f32 %v1842_v52, %v694_v50  ;;  %v1844_v57 = vadd.f32 %v1843_v55, %v1770_v53  ;;  %v1772_v58 = vpop.f32.mrf.mxu0  ;;  %v719_v50 = vld [vmem:[#allocation2 + $0x28] sm:$0xff]  ;;  %v722_v55 = vld [vmem:[#allocation2 + $0x20] sm:$0xff] }
 0x1e3   : > { %v1845_v60 = vpop.f32.mrf.mxu1 }
 0x1e4   : > { %1914 = vst [vmem:[#allocation2 + $0xd8] sm:$0xff] %v1882_v56  ;;  %v1883_v61 = vadd.f32 %v1844_v57, %v695_v54  ;;  %v1846_v62 = vadd.f32 %v1845_v60, %v1772_v58  ;;  %v1774_v63 = vpop.f32.mrf.mxu0  ;;  %v723_v60 = vld [vmem:[#allocation2 + $0x98] sm:$0xff] }
 0x1e5   : > { %v1847_v1 = vpop.f32.mrf.mxu1 }
 0x1e6   : > { %1915 = vst [vmem:[#allocation2 + $0x18] sm:$0xff] %v1883_v61  ;;  %v1886_v3 = vadd.f32 %v1846_v62, %v698_v59  ;;  %v1848_v5 = vadd.f32 %v1847_v1, %v1774_v63  ;;  %v1778_v6 = vpop.f32.mrf.mxu0 }
 0x1e7   : > { %v1851_v8 = vpop.f32.mrf.mxu1 }
 0x1e8   : > { %1918 = vst [vmem:[#allocation2 + $0x30] sm:$0xff] %v1886_v3  ;;  %v1887_v9 = vadd.f32 %v1848_v5, %v699_v0  ;;  %v1852_v2 = vadd.f32 %v1851_v8, %v1778_v6  ;;  %v1780_v4 = vpop.f32.mrf.mxu0 }
 0x1e9   : > { %v1853_v11 = vpop.f32.mrf.mxu1 }
 0x1ea   : > { %1919 = vst [vmem:[#allocation2 + $0x48] sm:$0xff] %v1887_v9  ;;  %v1890_v12 = vadd.f32 %v1852_v2, %v702_v7  ;;  %v1854_v13 = vadd.f32 %v1853_v11, %v1780_v4  ;;  %v1782_v14 = vpop.f32.mrf.mxu0 }
 0x1eb   : > { %v1855_v16 = vpop.f32.mrf.mxu1 }
 0x1ec   : > { %1922 = vst [vmem:[#allocation2 + $0xe8] sm:$0xff] %v1890_v12  ;;  %v1891_v17 = vadd.f32 %v1854_v13, %v703_v10  ;;  %v1856_v18 = vadd.f32 %v1855_v16, %v1782_v14  ;;  %v1784_v19 = vpop.f32.mrf.mxu0 }
 0x1ed   : > { %v1857_v23 = vpop.f32.mrf.mxu1 }
 0x1ee   : > { %1923 = vst [vmem:[#allocation2 + $0xb8] sm:$0xff] %v1891_v17  ;;  %v1894_v24 = vadd.f32 %v1856_v18, %v706_v15  ;;  %v1858_v25 = vadd.f32 %v1857_v23, %v1784_v19  ;;  %v1788_v26 = vpop.f32.mrf.mxu0 }
 0x1ef   : > { %v1861_v28 = vpop.f32.mrf.mxu1 }
 0x1f0   : > { %1926 = vst [vmem:[#allocation2 + $0x8] sm:$0xff] %v1894_v24  ;;  %v1895_v29 = vadd.f32 %v1858_v25, %v707_v20  ;;  %v1862_v30 = vadd.f32 %v1861_v28, %v1788_v26  ;;  %v1790_v31 = vpop.f32.mrf.mxu0 }
 0x1f1   : > { %v1863_v37 = vpop.f32.mrf.mxu1 }
 0x1f2   : > { %1927 = vst [vmem:[#allocation2 + $0x78] sm:$0xff] %v1895_v29  ;;  %v1898_v38 = vadd.f32 %v1862_v30, %v710_v27  ;;  %v1864_v21 = vadd.f32 %v1863_v37, %v1790_v31  ;;  %v1792_v22 = vpop.f32.mrf.mxu0 }
 0x1f3   : > { %v1865_v34 = vpop.f32.mrf.mxu1 }
 0x1f4   : > { %1930 = vst [vmem:[#allocation2 + $0x40] sm:$0xff] %v1898_v38  ;;  %v1899_v35 = vadd.f32 %v1864_v21, %v711_v32  ;;  %v1866_v36 = vadd.f32 %v1865_v34, %v1792_v22  ;;  %v1794_v39 = vpop.f32.mrf.mxu0 }
 0x1f5   : > { %v1867_v41 = vpop.f32.mrf.mxu1 }
 0x1f6   : > { %1931 = vst [vmem:[#allocation2 + $0xc8] sm:$0xff] %v1899_v35  ;;  %v1902_v42 = vadd.f32 %v1866_v36, %v714_v33  ;;  %v1868_v43 = vadd.f32 %v1867_v41, %v1794_v39  ;;  %v1798_v44 = vpop.f32.mrf.mxu0 }
 0x1f7   : > { %v1871_v46 = vpop.f32.mrf.mxu1 }
 0x1f8   : > { %1934 = vst [vmem:[#allocation2 + $0x70] sm:$0xff] %v1902_v42  ;;  %v1903_v47 = vadd.f32 %v1868_v43, %v715_v40  ;;  %v1872_v48 = vadd.f32 %v1871_v46, %v1798_v44  ;;  %v1800_v49 = vpop.f32.mrf.mxu0 }
 0x1f9   : > { %v1873_v51 = vpop.f32.mrf.mxu1 }
 0x1fa   : > { %1935 = vst [vmem:[#allocation2 + $0xc0] sm:$0xff] %v1903_v47  ;;  %v1906_v52 = vadd.f32 %v1872_v48, %v718_v45  ;;  %v1874_v53 = vadd.f32 %v1873_v51, %v1800_v49  ;;  %v1802_v54 = vpop.f32.mrf.mxu0 }
 0x1fb   : > { %v1875_v56 = vpop.f32.mrf.mxu1 }
 0x1fc   : > { %1938 = vst [vmem:[#allocation2 + $0x10] sm:$0xff] %v1906_v52  ;;  %v1907_v57 = vadd.f32 %v1874_v53, %v719_v50  ;;  %v1876_v58 = vadd.f32 %v1875_v56, %v1802_v54  ;;  %v1804_v59 = vpop.f32.mrf.mxu0 }
 0x1fd   : > { %v1877_v61 = vpop.f32.mrf.mxu1 }
 0x1fe   : > { %1939 = vst [vmem:[#allocation2 + $0x28] sm:$0xff] %v1907_v57  ;;  %v1910_v62 = vadd.f32 %v1876_v58, %v722_v55  ;;  %v1878_v63 = vadd.f32 %v1877_v61, %v1804_v59  ;;  %1947 = sbr.rel (%p2594_p5) target bundleno = 556 (0x22c), region = 90 }
 0x200   : > { %1942 = vst [vmem:[#allocation2 + $0x20] sm:$0xff] %v1910_v62  ;;  %v1911_v0 = vadd.f32 %v1878_v63, %v723_v60 }
 0x202   : > { %1943 = vst [vmem:[#allocation2 + $0x98] sm:$0xff] %v1911_v0 }
 0x203   : > { %v1982_v1 = vlaneseq  ;;  %v1980_v5 = vld [vmem:[%s643_s6] sm:$0xf]  ;;  %v1948_v7 = vld [vmem:[#allocation2 + $0xb0] sm:$0xff]  ;;  %v1950_v11 = vld [vmem:[#allocation2 + $0xd8] sm:$0xff] }
 0x204   : > { %v2034_v6 = vld [vmem:[%s652_s1] sm:$0xf]  ;;  %v1952_v12 = vld [vmem:[#allocation2 + $0x50] sm:$0xff]  ;;  %v1953_v13 = vld [vmem:[#allocation2 + $0x68] sm:$0xff] }
 0x205   : > { %v1983_v3 = vshrl.u32 %v1982_v1, 7  ;;  %v1949_v8 = vld [vmem:[#allocation2] sm:$0xff]  ;;  %v1951_v18 = vld [vmem:[#allocation2 + $0x18] sm:$0xff]  ;;  %v1954_v19 = vld [vmem:[#allocation2 + $0x30] sm:$0xff] }
 0x206   : > { %v1955_v20 = vld [vmem:[#allocation2 + $0x48] sm:$0xff]  ;;  %v1956_v41 = vld [vmem:[#allocation2 + $0x80] sm:$0xff]  ;;  %v1959_v48 = vld [vmem:[#allocation2 + $0xb8] sm:$0xff] }
 0x207   : > { %v1984_v9 = vsub.s32 0, %v1983_v3  ;;  %v1988_v2 = vsub.s32 1, %v1983_v3  ;;  %v1992_v4 = vsub.s32 2, %v1983_v3  ;;  %v1996_v10 = vsub.s32 3, %v1983_v3  ;;  %v1957_v42 = vld [vmem:[#allocation2 + $0x88] sm:$0xff]  ;;  %v1960_v53 = vld [vmem:[#allocation2 + $0x60] sm:$0xff] }
 0x208   : > { %v1958_v47 = vld [vmem:[#allocation2 + $0xe8] sm:$0xff]  ;;  %v1961_v54 = vld [vmem:[#allocation2 + $0xf0] sm:$0xff]  ;;  %v1963_v60 = vld [vmem:[#allocation2 + $0x78] sm:$0xff] }
 0x209   : > { %v3688_v14 = vrot.slane %v1980_v5, %v1984_v9  ;;  %v3690_v15 = vrot.slane %v1980_v5, %v1988_v2  ;;  %v3692_v16 = vrot.slane %v2034_v6, %v1984_v9  ;;  %v3694_v17 = vrot.slane %v2034_v6, %v1988_v2  ;;  %v1962_v59 = vld [vmem:[#allocation2 + $0x8] sm:$0xff] }
 0x20a   : > { %v3696_v23 = vrot.slane %v1980_v5, %v1992_v4  ;;  %v3698_v24 = vrot.slane %v1980_v5, %v1996_v10  ;;  %v3700_v25 = vrot.slane %v2034_v6, %v1992_v4  ;;  %v3702_v26 = vrot.slane %v2034_v6, %v1996_v10  ;;  %v1964_v4 = vld [vmem:[#allocation2 + $0x38] sm:$0xff] }
 0x20b   : > { %v2002_v27 = vmul.f32 %v3688_v14, %v1948_v7  ;;  %v2003_v28 = vmul.f32 %v3690_v15, %v1949_v8  ;;  %v2006_v29 = vmul.f32 %v3688_v14, %v1952_v12  ;;  %v2007_v30 = vmul.f32 %v3690_v15, %v1953_v13 }
 0x20c   : > { %v2004_v31 = vmul.f32 %v3696_v23, %v1950_v11  ;;  %v2005_v32 = vmul.f32 %v3698_v24, %v1951_v18  ;;  %v2008_v37 = vmul.f32 %v3696_v23, %v1954_v19  ;;  %v2009_v38 = vmul.f32 %v3698_v24, %v1955_v20  ;;  %v1965_v18 = vld [vmem:[#allocation2 + $0x58] sm:$0xff] }
 0x20d   : > { %v2056_v21 = vadd.f32 %v3692_v16, %v2002_v27  ;;  %v2057_v22 = vadd.f32 %v3694_v17, %v2003_v28  ;;  %v2060_v33 = vadd.f32 %v3692_v16, %v2006_v29  ;;  %v2061_v34 = vadd.f32 %v3694_v17, %v2007_v30  ;;  %v1966_v29 = vld [vmem:[#allocation2 + $0x40] sm:$0xff]  ;;  %v1967_v30 = vld [vmem:[#allocation2 + $0xc8] sm:$0xff] }
 0x20e   : > { %v2058_v35 = vadd.f32 %v3700_v25, %v2004_v31  ;;  %v2059_v36 = vadd.f32 %v3702_v26, %v2005_v32  ;;  %v2062_v39 = vadd.f32 %v3700_v25, %v2008_v37  ;;  %v2063_v40 = vadd.f32 %v3702_v26, %v2009_v38 }
 0x20f   : > { %v2088_v43 = vmax.f32 %v2056_v21, 0.0  ;;  %v2089_v44 = vmax.f32 %v2057_v22, 0.0  ;;  %v2092_v45 = vmax.f32 %v2060_v33, 0.0  ;;  %v2093_v46 = vmax.f32 %v2061_v34, 0.0  ;;  %v1968_v21 = vld [vmem:[#allocation2 + $0xe0] sm:$0xff]  ;;  %v1969_v22 = vld [vmem:[#allocation2 + $0x90] sm:$0xff] }
 0x210   : > { %v2090_v49 = vmax.f32 %v2058_v35, 0.0  ;;  %v2091_v50 = vmax.f32 %v2059_v36, 0.0  ;;  %v2094_v51 = vmax.f32 %v2062_v39, 0.0  ;;  %v2095_v52 = vmax.f32 %v2063_v40, 0.0  ;;  %v1970_v39 = vld [vmem:[#allocation2 + $0x70] sm:$0xff] }
 0x211   : > { %v2618_v55 = vpack.c.bf16 %v2089_v44, %v2088_v43  ;;  %v2620_v56 = vpack.c.bf16 %v2093_v46, %v2092_v45  ;;  %v2010_v57 = vmul.f32 %v3688_v14, %v1956_v41  ;;  %v2011_v58 = vmul.f32 %v3690_v15, %v1957_v42  ;;  %v1971_v44 = vld [vmem:[#allocation2 + $0xc0] sm:$0xff] }
 0x212   : > { %v2619_v61 = vpack.c.bf16 %v2091_v50, %v2090_v49  ;;  %v2621_v62 = vpack.c.bf16 %v2095_v52, %v2094_v51  ;;  %v2012_v63 = vmul.f32 %v3696_v23, %v1958_v47  ;;  %v2013_v0 = vmul.f32 %v3698_v24, %v1959_v48  ;;  %v1972_v49 = vld [vmem:[#allocation2 + $0xa8] sm:$0xff] }
 0x213   : > { %2216 = vst [vmem:[%s3466_s15] sm:$0xff] %v2618_v55  ;;  %2218 = vst [vmem:[%s3466_s15 + $0x10] sm:$0xff] %v2620_v56  ;;  %v2064_v1 = vadd.f32 %v3692_v16, %v2010_v57  ;;  %v2065_v3 = vadd.f32 %v3694_v17, %v2011_v58  ;;  %v2014_v5 = vmul.f32 %v3688_v14, %v1960_v53  ;;  %v1973_v58 = vld [vmem:[#allocation2 + $0xd0] sm:$0xff] }
 0x214   : > { %v2015_v6 = vmul.f32 %v3690_v15, %v1961_v54  ;;  %2217 = vst [vmem:[%s3466_s15 + $0x8] sm:$0xff] %v2619_v61  ;;  %2219 = vst [vmem:[%s3466_s15 + $0x18] sm:$0xff] %v2621_v62  ;;  %v2066_v7 = vadd.f32 %v3700_v25, %v2012_v63  ;;  %v2067_v8 = vadd.f32 %v3702_v26, %v2013_v0  ;;  %v1974_v63 = vld [vmem:[#allocation2 + $0x10] sm:$0xff]  ;;  %v1975_v0 = vld [vmem:[#allocation2 + $0x28] sm:$0xff] }
 0x215   : > { %v2016_v9 = vmul.f32 %v3696_v23, %v1962_v59  ;;  %v2017_v2 = vmul.f32 %v3698_v24, %v1963_v60  ;;  %v2096_v10 = vmax.f32 %v2064_v1, 0.0  ;;  %v2097_v11 = vmax.f32 %v2065_v3, 0.0 }
 0x216   : > { %v2068_v12 = vadd.f32 %v3692_v16, %v2014_v5  ;;  %v2069_v13 = vadd.f32 %v3694_v17, %v2015_v6  ;;  %v2098_v19 = vmax.f32 %v2066_v7, 0.0  ;;  %v2099_v20 = vmax.f32 %v2067_v8, 0.0  ;;  %v1976_v7 = vld [vmem:[#allocation2 + $0xa0] sm:$0xff]  ;;  %v1977_v8 = vld [vmem:[#allocation2 + $0xf8] sm:$0xff] }
 0x217   : > { %v2070_v27 = vadd.f32 %v3700_v25, %v2016_v9  ;;  %v2071_v28 = vadd.f32 %v3702_v26, %v2017_v2  ;;  %v2622_v31 = vpack.c.bf16 %v2097_v11, %v2096_v10  ;;  %v2018_v38 = vmul.f32 %v3688_v14, %v1964_v4  ;;  %v1978_v11 = vld [vmem:[#allocation2 + $0x20] sm:$0xff] }
 0x218   : > { %v2100_v32 = vmax.f32 %v2068_v12, 0.0  ;;  %v2101_v37 = vmax.f32 %v2069_v13, 0.0  ;;  %v2623_v33 = vpack.c.bf16 %v2099_v20, %v2098_v19  ;;  %v2019_v36 = vmul.f32 %v3690_v15, %v1965_v18  ;;  %v1979_v20 = vld [vmem:[#allocation2 + $0x98] sm:$0xff] }
 0x219   : > { %v2102_v34 = vmax.f32 %v2070_v27, 0.0  ;;  %v2103_v35 = vmax.f32 %v2071_v28, 0.0  ;;  %2220 = vst [vmem:[%s3466_s15 + $0x20] sm:$0xff] %v2622_v31  ;;  %v2072_v41 = vadd.f32 %v3692_v16, %v2018_v38  ;;  %v2020_v42 = vmul.f32 %v3696_v23, %v1966_v29 }
 0x21a   : > { %v2624_v40 = vpack.c.bf16 %v2101_v37, %v2100_v32  ;;  %v2021_v43 = vmul.f32 %v3698_v24, %v1967_v30  ;;  %2221 = vst [vmem:[%s3466_s15 + $0x28] sm:$0xff] %v2623_v33  ;;  %v2073_v46 = vadd.f32 %v3694_v17, %v2019_v36  ;;  %v2022_v47 = vmul.f32 %v3688_v14, %v1968_v21 }
 0x21b   : > { %v2625_v45 = vpack.c.bf16 %v2103_v35, %v2102_v34  ;;  %v2023_v48 = vmul.f32 %v3690_v15, %v1969_v22  ;;  %v2104_v50 = vmax.f32 %v2072_v41, 0.0  ;;  %v2074_v51 = vadd.f32 %v3700_v25, %v2020_v42 }
 0x21c   : > { %2222 = vst [vmem:[%s3466_s15 + $0x30] sm:$0xff] %v2624_v40  ;;  %v2075_v52 = vadd.f32 %v3702_v26, %v2021_v43  ;;  %v2024_v53 = vmul.f32 %v3696_v23, %v1970_v39  ;;  %v2105_v54 = vmax.f32 %v2073_v46, 0.0  ;;  %v2076_v55 = vadd.f32 %v3692_v16, %v2022_v47 }
 0x21d   : > { %2223 = vst [vmem:[%s3466_s15 + $0x38] sm:$0xff] %v2625_v45  ;;  %v2077_v56 = vadd.f32 %v3694_v17, %v2023_v48  ;;  %v2025_v57 = vmul.f32 %v3698_v24, %v1971_v44  ;;  %v2106_v59 = vmax.f32 %v2074_v51, 0.0  ;;  %v2026_v62 = vmul.f32 %v3688_v14, %v1972_v49 }
 0x21e   : > { %v2107_v60 = vmax.f32 %v2075_v52, 0.0  ;;  %v2078_v61 = vadd.f32 %v3700_v25, %v2024_v53  ;;  %v2626_v1 = vpack.c.bf16 %v2105_v54, %v2104_v50  ;;  %v2108_v3 = vmax.f32 %v2076_v55, 0.0 }
 0x21f   : > { %v2109_v5 = vmax.f32 %v2077_v56, 0.0  ;;  %v2079_v6 = vadd.f32 %v3702_v26, %v2025_v57  ;;  %v2027_v4 = vmul.f32 %v3690_v15, %v1973_v58  ;;  %v2080_v10 = vadd.f32 %v3692_v16, %v2026_v62 }
 0x220   : > { %v2627_v9 = vpack.c.bf16 %v2107_v60, %v2106_v59  ;;  %v2110_v2 = vmax.f32 %v2078_v61, 0.0  ;;  %2224 = vst [vmem:[%s3466_s15 + $0x40] sm:$0xff] %v2626_v1  ;;  %v2028_v18 = vmul.f32 %v3696_v23, %v1974_v63  ;;  %v2029_v19 = vmul.f32 %v3698_v24, %v1975_v0 }
 0x221   : > { %v2628_v12 = vpack.c.bf16 %v2109_v5, %v2108_v3  ;;  %v2111_v13 = vmax.f32 %v2079_v6, 0.0  ;;  %v2081_v27 = vadd.f32 %v3694_v17, %v2027_v4  ;;  %v2112_v28 = vmax.f32 %v2080_v10, 0.0 }
 0x222   : > { %2225 = vst [vmem:[%s3466_s15 + $0x48] sm:$0xff] %v2627_v9  ;;  %v2030_v29 = vmul.f32 %v3688_v14, %v1976_v7  ;;  %v2031_v30 = vmul.f32 %v3690_v15, %v1977_v8  ;;  %v2082_v32 = vadd.f32 %v3700_v25, %v2028_v18  ;;  %v2083_v37 = vadd.f32 %v3702_v26, %v2029_v19 }
 0x223   : > { %2226 = vst [vmem:[%s3466_s15 + $0x50] sm:$0xff] %v2628_v12  ;;  %v2629_v31 = vpack.c.bf16 %v2111_v13, %v2110_v2  ;;  %v2032_v38 = vmul.f32 %v3696_v23, %v1978_v11  ;;  %v2113_v21 = vmax.f32 %v2081_v27, 0.0  ;;  %v2033_v14 = vmul.f32 %v3698_v24, %v1979_v20 }
 0x224   : > { %v2084_v22 = vadd.f32 %v3692_v16, %v2030_v29  ;;  %v2085_v33 = vadd.f32 %v3694_v17, %v2031_v30  ;;  %v2114_v15 = vmax.f32 %v2082_v32, 0.0  ;;  %v2115_v34 = vmax.f32 %v2083_v37, 0.0 }
 0x225   : > { %2227 = vst [vmem:[%s3466_s15 + $0x58] sm:$0xff] %v2629_v31  ;;  %v2086_v35 = vadd.f32 %v3700_v25, %v2032_v38  ;;  %v2630_v36 = vpack.c.bf16 %v2113_v21, %v2112_v28  ;;  %v2087_v23 = vadd.f32 %v3702_v26, %v2033_v14 }
 0x226   : > { %v2116_v39 = vmax.f32 %v2084_v22, 0.0  ;;  %v2117_v40 = vmax.f32 %v2085_v33, 0.0  ;;  %v2631_v41 = vpack.c.bf16 %v2115_v34, %v2114_v15 }
 0x227   : > { %v2118_v42 = vmax.f32 %v2086_v35, 0.0  ;;  %2228 = vst [vmem:[%s3466_s15 + $0x60] sm:$0xff] %v2630_v36  ;;  %v2119_v43 = vmax.f32 %v2087_v23, 0.0 }
 0x228   : > { %v2632_v16 = vpack.c.bf16 %v2117_v40, %v2116_v39  ;;  %2229 = vst [vmem:[%s3466_s15 + $0x68] sm:$0xff] %v2631_v41 }
 0x229   : > { %v2633_v17 = vpack.c.bf16 %v2119_v43, %v2118_v42 }
 0x22a   : > { %2230 = vst [vmem:[%s3466_s15 + $0x70] sm:$0xff] %v2632_v16 }
 0x22b   : > { %2231 = vst [vmem:[%s3466_s15 + $0x78] sm:$0xff] %v2633_v17 }
 0x22c PF: > { %2238 = sbr.rel (!%p3148_p12) target bundleno = 566 (0x236), region = 94  ;;  %s2634_s1 = sshll.u32 (%p3148_p12), %s3014_s22, 4  ;;  %v2259_v24 = vld [vmem:[%s3466_s15] sm:$0xff] (%p3148_p12)  ;;  %v2261_v25 = vld [vmem:[%s3466_s15 + $0x8] sm:$0xff] (%p3148_p12)  ;;  %v2263_v26 = vld [vmem:[%s3466_s15 + $0x10] sm:$0xff] (%p3148_p12) }
 0x22d   : > { %s2246_s27 = scalar_lea.vmem (%p3148_p12), %s3843_s4, %s2634_s1  ;;  %v2265_v44 = vld [vmem:[%s3466_s15 + $0x18] sm:$0xff] (%p3148_p12)  ;;  %v2267_v45 = vld [vmem:[%s3466_s15 + $0x20] sm:$0xff] (%p3148_p12)  ;;  %v2269_v46 = vld [vmem:[%s3466_s15 + $0x28] sm:$0xff] (%p3148_p12) }
 0x22e   : > { %2260 = vst [vmem:[%s2246_s27] sm:$0xff] (%p3148_p12), %v2259_v24  ;;  %2262 = vst [vmem:[%s2246_s27 + $0x8] sm:$0xff] (%p3148_p12), %v2261_v25  ;;  %v2271_v47 = vld [vmem:[%s3466_s15 + $0x30] sm:$0xff] (%p3148_p12)  ;;  %v2273_v48 = vld [vmem:[%s3466_s15 + $0x38] sm:$0xff] (%p3148_p12) }
 0x22f   : > { %2264 = vst [vmem:[%s2246_s27 + $0x40] sm:$0xff] (%p3148_p12), %v2263_v26  ;;  %2266 = vst [vmem:[%s2246_s27 + $0x48] sm:$0xff] (%p3148_p12), %v2265_v44  ;;  %v2275_v49 = vld [vmem:[%s3466_s15 + $0x40] sm:$0xff] (%p3148_p12)  ;;  %v2277_v50 = vld [vmem:[%s3466_s15 + $0x48] sm:$0xff] (%p3148_p12) }
 0x230   : > { %2268 = vst [vmem:[%s2246_s27 + $0x80] sm:$0xff] (%p3148_p12), %v2267_v45  ;;  %2270 = vst [vmem:[%s2246_s27 + $0x88] sm:$0xff] (%p3148_p12), %v2269_v46  ;;  %v2279_v51 = vld [vmem:[%s3466_s15 + $0x50] sm:$0xff] (%p3148_p12)  ;;  %v2281_v52 = vld [vmem:[%s3466_s15 + $0x58] sm:$0xff] (%p3148_p12) }
 0x231   : > { %2272 = vst [vmem:[%s2246_s27 + $0xc0] sm:$0xff] %v2271_v47  ;;  %2274 = vst [vmem:[%s2246_s27 + $0xc8] sm:$0xff] %v2273_v48  ;;  %v2283_v53 = vld [vmem:[%s3466_s15 + $0x60] sm:$0xff]  ;;  %v2285_v54 = vld [vmem:[%s3466_s15 + $0x68] sm:$0xff] }
 0x232   : > { %2276 = vst [vmem:[%s2246_s27 + $0x100] sm:$0xff] %v2275_v49  ;;  %2278 = vst [vmem:[%s2246_s27 + $0x108] sm:$0xff] %v2277_v50  ;;  %v2287_v55 = vld [vmem:[%s3466_s15 + $0x70] sm:$0xff]  ;;  %v2289_v56 = vld [vmem:[%s3466_s15 + $0x78] sm:$0xff] }
 0x233   : > { %2280 = vst [vmem:[%s2246_s27 + $0x140] sm:$0xff] %v2279_v51  ;;  %2282 = vst [vmem:[%s2246_s27 + $0x148] sm:$0xff] %v2281_v52 }
 0x234   : > { %2284 = vst [vmem:[%s2246_s27 + $0x180] sm:$0xff] %v2283_v53  ;;  %2286 = vst [vmem:[%s2246_s27 + $0x188] sm:$0xff] %v2285_v54 }
 0x235   : > { %2288 = vst [vmem:[%s2246_s27 + $0x1c0] sm:$0xff] %v2287_v55  ;;  %2290 = vst [vmem:[%s2246_s27 + $0x1c8] sm:$0xff] %v2289_v56 }
 0x236 PF: > { %s14_s25 = sadd.s32 1, %s3026_s25   ;;  %s3855_s14 = sld [smem:[#allocation6_spill]] }
 0x237   : > { %p11_p6 = scmp.ge.s32.totalorder %s14_s25, 10   ;;  %s3856_s29 = sld [smem:[#allocation7_spill]] }
 0x238   : > { %s3857_s15 = smov %s2990_s16  ;;  %s3858_s16 = smov %s3146_s13 }
 0x239   : > { %s3859_s17 = smov %s2998_s18  ;;  %s3860_s18 = smov %s3143_s12 }
 0x23a   : > { %s3861_s19 = smov %s3006_s20  ;;  %s3862_s20 = smov %s3129_s7 }
 0x23b   : > { %s3863_s21 = smov %s3018_s23  ;;  %s3864_s22 = smov %s3022_s24 }
 0x23c   : > { %s3865_s23 = smov %s3855_s14  ;;  %13 = sbr.rel (!%p11_p6) target bundleno = 9 (0x9), region = 162 }
 0x23d   : > { %s3866_s24 = smov %s3856_s29 }

// kernel: network_forward.13
= control target key start
LH: loop header
LB: loop body
LE: loop exit
PB: predicated region body
PF: predicated region fallthrough
CT: control target
= control target key end

     0   :  { %12 = vsyncpa [#allocation4], 0  ;;  %v1485_v25 = vlaneseq  ;;  %vm1305_vm0 = vcmask 1041409   ;;  %vm1307_vm1 = vcmask 1045509   ;;  %vm1310_vm2 = vcmask 1042434   ;;  %s4710_s0 = inlined_call_operand.vmem [shape: bf16[4,16,2048], index: 0, kind: input, shape index: {}]   ;;  %s4711_s1 = inlined_call_operand.vmem [shape: f32[1,2048], index: 1, kind: input, shape index: {}]   ;;  %s4712_s2 = inlined_call_operand.vmem [shape: f32[1,2048], index: 2, kind: input, shape index: {}]   ;;  %s4713_s3 = inlined_call_operand.vmem [shape: bf16[2048,128], index: 3, kind: input, shape index: {}]   ;;  %s4714_s4 = inlined_call_operand.hbm [shape: f32[4,128], index: 4, kind: output, shape index: {0}]   ;;  %s4715_s5 = inlined_call_operand.hbm [shape: f32[4,2048], index: 5, kind: output, shape index: {1}]   ;;  %s4716_s6 = inlined_call_operand.hbm [shape: f32[4,2048], index: 6, kind: output, shape index: {2}]  }
   0x1   :  { %v3499_v0 = vld [vmem:[%s4713_s3 + $0x78] sm:$0xff]   ;;  %v3503_v4 = vld [vmem:[%s4713_s3 + $0x70] sm:$0xff]   ;;  %v3507_v8 = vld [vmem:[%s4713_s3 + $0x68] sm:$0xff]   ;;  %vm1312_vm3 = vcmask 1046534   ;;  %vm1315_vm4 = vcmask 1043459   ;;  %vm1317_vm5 = vcmask 1047559  }
   0x2   :  { %v3500_v1 = vld [vmem:[%s4713_s3 + $0xf8] sm:$0xff]   ;;  %3319 = vmatprep.subr.bf16.mxu0 %v3499_v0  ;;  %v3504_v5 = vld [vmem:[%s4713_s3 + $0xf0] sm:$0xff]   ;;  %v3508_v9 = vld [vmem:[%s4713_s3 + $0xe8] sm:$0xff]   ;;  %v3861_v30 = vshrl.u32 %v1485_v25, 7 }
   0x3   :  { %v3501_v2 = vld [vmem:[%s4713_s3 + $0x38] sm:$0xff]   ;;  %3341 = vmatprep.subr.bf16.mxu1 %v3500_v1  ;;  %v3505_v6 = vld [vmem:[%s4713_s3 + $0x30] sm:$0xff]   ;;  %v3509_v10 = vld [vmem:[%s4713_s3 + $0x28] sm:$0xff]  }
   0x4   :  { %v3502_v3 = vld [vmem:[%s4713_s3 + $0xb8] sm:$0xff]   ;;  %3320 = vmatpush3.bf16.msra.mxu0 %v3501_v2  ;;  %v3506_v7 = vld [vmem:[%s4713_s3 + $0xb0] sm:$0xff]   ;;  %v3510_v11 = vld [vmem:[%s4713_s3 + $0xa8] sm:$0xff]   ;;  %v3882_v37 = vsub.s32 0, %v3861_v30  ;;  %v3885_v38 = vsub.s32 1, %v3861_v30  ;;  %v3897_v45 = vsub.s32 2, %v3861_v30 }
   0x5   :  { %3342 = vmatpush3.bf16.msra.mxu1 %v3502_v3  ;;  %3321 = vmatprep.subr.bf16.mxu0 %v3503_v4  ;;  %v3511_v12 = vld [vmem:[%s4713_s3 + $0x60] sm:$0xff]   ;;  %v3515_v16 = vld [vmem:[%s4713_s3 + $0x58] sm:$0xff]   ;;  %v3519_v20 = vld [vmem:[%s4713_s3 + $0x50] sm:$0xff]   ;;  %v3906_v51 = vsub.s32 3, %v3861_v30 }
   0x6   :  { %3343 = vmatprep.subr.bf16.mxu1 %v3504_v5  ;;  %v3512_v13 = vld [vmem:[%s4713_s3 + $0xe0] sm:$0xff]   ;;  %v3516_v17 = vld [vmem:[%s4713_s3 + $0xd8] sm:$0xff]   ;;  %v3520_v21 = vld [vmem:[%s4713_s3 + $0xd0] sm:$0xff]  }
   0x7   :  { %v3513_v14 = vld [vmem:[%s4713_s3 + $0x20] sm:$0xff]   ;;  %v3517_v18 = vld [vmem:[%s4713_s3 + $0x18] sm:$0xff]   ;;  %v3521_v22 = vld [vmem:[%s4713_s3 + $0x10] sm:$0xff]  }
   0x8   :  { %3322 = vmatpush3.bf16.msra.mxu0 %v3505_v6  ;;  %v3514_v15 = vld [vmem:[%s4713_s3 + $0xa0] sm:$0xff]   ;;  %v3518_v19 = vld [vmem:[%s4713_s3 + $0x98] sm:$0xff]   ;;  %v3522_v23 = vld [vmem:[%s4713_s3 + $0x90] sm:$0xff]  }
   0x9   :  { %3344 = vmatpush3.bf16.msra.mxu1 %v3506_v7  ;;  %3323 = vmatprep.subr.bf16.mxu0 %v3507_v8  ;;  %v3523_v24 = vld [vmem:[%s4713_s3 + $0x48] sm:$0xff]   ;;  %v3527_v29 = vld [vmem:[%s4713_s3 + $0x40] sm:$0xff]  }
   0xa   :  { %3345 = vmatprep.subr.bf16.mxu1 %v3508_v9  ;;  %v3524_v26 = vld [vmem:[%s4713_s3 + $0xc8] sm:$0xff]   ;;  %v3528_v31 = vld [vmem:[%s4713_s3 + $0xc0] sm:$0xff]  }
   0xb   :  { %v3525_v27 = vld [vmem:[%s4713_s3 + $0x8] sm:$0xff]   ;;  %v3529_v32 = vld [vmem:[%s4713_s3] sm:$0xff]  }
   0xc   :  { %3324 = vmatpush3.bf16.msra.mxu0 %v3509_v10  ;;  %v3526_v28 = vld [vmem:[%s4713_s3 + $0x88] sm:$0xff]   ;;  %v3530_v33 = vld [vmem:[%s4713_s3 + $0x80] sm:$0xff]  }
   0xd   :  { %3346 = vmatpush3.bf16.msra.mxu1 %v3510_v11  ;;  %3325 = vmatprep.subr.bf16.mxu0 %v3511_v12  ;;  %v35_v34 = vld [vmem:[%s4710_s0] sm:$0xff] }
   0xe   :  { %3347 = vmatprep.subr.bf16.mxu1 %v3512_v13  ;;  %v43_v35 = vld [vmem:[%s4710_s0 + $0x40] sm:$0xff]  ;;  %v99_v42 = vunpack.c.l.bf16 %v35_v34  ;;  %v100_v43 = vunpack.c.h.bf16 %v35_v34 }
   0xf   :  { %v51_v36 = vld [vmem:[%s4710_s0 + $0x80] sm:$0xff]  ;;  %v115_v44 = vunpack.c.l.bf16 %v43_v35  ;;  %v116_v48 = vunpack.c.h.bf16 %v43_v35 }
  0x10   :  { %3326 = vmatpush3.bf16.msra.mxu0 %v3513_v14  ;;  %v59_v39 = vld [vmem:[%s4710_s0 + $0xc0] sm:$0xff]  ;;  %v131_v49 = vunpack.c.l.bf16 %v51_v36  ;;  %v132_v50 = vunpack.c.h.bf16 %v51_v36  ;;  %v227_v61 = vmax.f32 %v99_v42, 1e-06  ;;  %v228_v62 = vmax.f32 %v100_v43, 1e-06 }
  0x11   :  { %3348 = vmatpush3.bf16.msra.mxu1 %v3514_v15  ;;  %3327 = vmatprep.subr.bf16.mxu0 %v3515_v16  ;;  %v67_v40 = vld [vmem:[%s4710_s0 + $0x100] sm:$0xff]  ;;  %v147_v52 = vunpack.c.l.bf16 %v59_v39  ;;  %v148_v53 = vunpack.c.h.bf16 %v59_v39  ;;  %v243_v63 = vmax.f32 %v115_v44, 1e-06  ;;  %v244_v1 = vmax.f32 %v116_v48, 1e-06 }
  0x12   :  { %3349 = vmatprep.subr.bf16.mxu1 %v3516_v17  ;;  %v75_v41 = vld [vmem:[%s4710_s0 + $0x140] sm:$0xff]  ;;  %v163_v54 = vunpack.c.l.bf16 %v67_v40  ;;  %v164_v55 = vunpack.c.h.bf16 %v67_v40  ;;  %v259_v2 = vmax.f32 %v131_v49, 1e-06  ;;  %v260_v3 = vmax.f32 %v132_v50, 1e-06 }
  0x13   :  { %v83_v46 = vld [vmem:[%s4710_s0 + $0x180] sm:$0xff]  ;;  %v179_v56 = vunpack.c.l.bf16 %v75_v41  ;;  %v180_v57 = vunpack.c.h.bf16 %v75_v41  ;;  %v275_v4 = vmax.f32 %v147_v52, 1e-06  ;;  %v276_v5 = vmax.f32 %v148_v53, 1e-06 }
  0x14   :  { %3328 = vmatpush3.bf16.msra.mxu0 %v3517_v18  ;;  %v91_v47 = vld [vmem:[%s4710_s0 + $0x1c0] sm:$0xff]  ;;  %v195_v58 = vunpack.c.l.bf16 %v83_v46  ;;  %v196_v59 = vunpack.c.h.bf16 %v83_v46  ;;  %v291_v6 = vmax.f32 %v163_v54, 1e-06  ;;  %v364_v7 = vmul.f32 %v227_v61, %v227_v61 }
  0x15   :  { %3350 = vmatpush3.bf16.msra.mxu1 %v3518_v19  ;;  %3329 = vmatprep.subr.bf16.mxu0 %v3519_v20  ;;  %v211_v60 = vunpack.c.l.bf16 %v91_v47  ;;  %v212_v0 = vunpack.c.h.bf16 %v91_v47  ;;  %v292_v8 = vmax.f32 %v164_v55, 1e-06  ;;  %v307_v9 = vmax.f32 %v179_v56, 1e-06 }
  0x16   :  { %3351 = vmatprep.subr.bf16.mxu1 %v3520_v21  ;;  %v308_v10 = vmax.f32 %v180_v57, 1e-06  ;;  %v365_v11 = vmul.f32 %v228_v62, %v228_v62  ;;  %v323_v12 = vmax.f32 %v195_v58, 1e-06  ;;  %v324_v13 = vmax.f32 %v196_v59, 1e-06 }
  0x17   :  { %v339_v14 = vmax.f32 %v211_v60, 1e-06  ;;  %v380_v15 = vmul.f32 %v243_v63, %v243_v63  ;;  %v340_v16 = vmax.f32 %v212_v0, 1e-06  ;;  %v381_v17 = vmul.f32 %v244_v1, %v244_v1 }
  0x18   :  { %3330 = vmatpush3.bf16.msra.mxu0 %v3521_v22  ;;  %v396_v18 = vmul.f32 %v259_v2, %v259_v2  ;;  %v397_v19 = vmul.f32 %v260_v3, %v260_v3  ;;  %v412_v20 = vmul.f32 %v275_v4, %v275_v4  ;;  %v413_v21 = vmul.f32 %v276_v5, %v276_v5 }
  0x19   :  { %3352 = vmatpush3.bf16.msra.mxu1 %v3522_v23  ;;  %3331 = vmatprep.subr.bf16.mxu0 %v3523_v24  ;;  %v428_v22 = vmul.f32 %v291_v6, %v291_v6  ;;  %v429_v23 = vmul.f32 %v292_v8, %v292_v8  ;;  %v3531_v24 = vld [vmem:[%s4713_s3 + $0x178] sm:$0xff]   ;;  %v444_v25 = vmul.f32 %v307_v9, %v307_v9 }
  0x1a   :  { %3353 = vmatprep.subr.bf16.mxu1 %v3524_v26  ;;  %v445_v26 = vmul.f32 %v308_v10, %v308_v10  ;;  %v493_v34 = vmul.f32 %v365_v11, %v228_v62  ;;  %v508_v35 = vmul.f32 %v380_v15, %v243_v63  ;;  %v509_v36 = vmul.f32 %v381_v17, %v244_v1 }
  0x1b   :  { %v524_v39 = vmul.f32 %v396_v18, %v259_v2  ;;  %v525_v40 = vmul.f32 %v397_v19, %v260_v3  ;;  %v540_v41 = vmul.f32 %v412_v20, %v275_v4  ;;  %v541_v42 = vmul.f32 %v413_v21, %v276_v5 }
  0x1c   :  { %3332 = vmatpush3.bf16.msra.mxu0 %v3525_v27  ;;  %v460_v27 = vmul.f32 %v323_v12, %v323_v12  ;;  %v556_v43 = vmul.f32 %v428_v22, %v291_v6  ;;  %v557_v44 = vmul.f32 %v429_v23, %v292_v8  ;;  %v572_v46 = vmul.f32 %v444_v25, %v307_v9 }
  0x1d   :  { %3354 = vmatpush3.bf16.msra.mxu1 %v3526_v28  ;;  %3333 = vmatprep.subr.bf16.mxu0 %v3527_v29  ;;  %v461_v28 = vmul.f32 %v324_v13, %v324_v13  ;;  %v3532_v29 = vld [vmem:[%s4713_s3 + $0x1f8] sm:$0xff]   ;;  %v573_v47 = vmul.f32 %v445_v26, %v308_v10  ;;  %v767_v54 = vadd.f32 %v509_v36, %v493_v34 }
  0x1e   :  { %3355 = vmatprep.subr.bf16.mxu1 %v3528_v31  ;;  %v476_v31 = vmul.f32 %v339_v14, %v339_v14  ;;  %v588_v48 = vmul.f32 %v460_v27, %v323_v12  ;;  %v872_v55 = vadd.f32 %v540_v41, %v524_v39  ;;  %v879_v56 = vadd.f32 %v541_v42, %v525_v40  ;;  %v3917_v27 = vld [vmem:[%s4711_s1] sm:$0xff]  ;;  %v36_v40 = vld [vmem:[%s4710_s0 + $0x8] sm:$0xff] }
  0x1f   :  { %v589_v49 = vmul.f32 %v461_v28, %v324_v13  ;;  %v984_v57 = vadd.f32 %v572_v46, %v556_v43  ;;  %v991_v58 = vadd.f32 %v573_v47, %v557_v44  ;;  %v768_v60 = vrot.slane %v767_v54, 4  ;;  %v3922_v39 = vld [vmem:[%s4712_s2] sm:$0xff]  ;;  %v44_v46 = vld [vmem:[%s4710_s0 + $0x48] sm:$0xff] }
  0x20   :  { %3334 = vmatpush3.bf16.msra.mxu0 %v3529_v32  ;;  %v477_v32 = vmul.f32 %v340_v16, %v340_v16  ;;  %v604_v50 = vmul.f32 %v476_v31, %v339_v14  ;;  %v873_v63 = vrot.slane %v872_v55, 4  ;;  %v880_v0 = vrot.slane %v879_v56, 4 }
  0x21   :  { %3356 = vmatpush3.bf16.msra.mxu1 %v3530_v33  ;;  %v492_v33 = vmul.f32 %v364_v7, %v227_v61  ;;  %3363 = vmatprep.subr.bf16.mxu0 %v3531_v24  ;;  %v985_v1 = vrot.slane %v984_v57, 4  ;;  %v992_v2 = vrot.slane %v991_v58, 4  ;;  %v769_v4 = vadd.f32 %v768_v60, %v767_v54 }
  0x22   :  { %3385 = vmatprep.subr.bf16.mxu1 %v3532_v29  ;;  %v605_v52 = vmul.f32 %v477_v32, %v340_v16  ;;  %v1096_v61 = vadd.f32 %v604_v50, %v588_v48  ;;  %v874_v7 = vadd.f32 %v873_v63, %v872_v55  ;;  %v881_v8 = vadd.f32 %v880_v0, %v879_v56  ;;  %v76_v63 = vld [vmem:[%s4710_s0 + $0x148] sm:$0xff] }
  0x23   :  { %v760_v53 = vadd.f32 %v508_v35, %v492_v33  ;;  %v986_v9 = vadd.f32 %v985_v1, %v984_v57  ;;  %v993_v10 = vadd.f32 %v992_v2, %v991_v58  ;;  %v770_v12 = vrot.slane %v769_v4, 2  ;;  %v68_v58 = vld [vmem:[%s4710_s0 + $0x108] sm:$0xff] }
  0x24   :  { %v1103_v62 = vadd.f32 %v605_v52, %v589_v49  ;;  %v1097_v5 = vrot.slane %v1096_v61, 4  ;;  %v875_v15 = vrot.slane %v874_v7, 2  ;;  %v882_v16 = vrot.slane %v881_v8, 2  ;;  %v52_v52 = vld [vmem:[%s4710_s0 + $0x88] sm:$0xff] }
  0x25   :  { %v761_v59 = vrot.slane %v760_v53, 4  ;;  %v987_v17 = vrot.slane %v986_v9, 2  ;;  %v994_v18 = vrot.slane %v993_v10, 2  ;;  %v771_v20 = vadd.f32 %v770_v12, %v769_v4  ;;  %v84_v2 = vld [vmem:[%s4710_s0 + $0x188] sm:$0xff] }
  0x26   :  { %v1104_v6 = vrot.slane %v1103_v62, 4  ;;  %v1098_v13 = vadd.f32 %v1097_v5, %v1096_v61  ;;  %v876_v23 = vadd.f32 %v875_v15, %v874_v7  ;;  %v883_v24 = vadd.f32 %v882_v16, %v881_v8 }
  0x27   :  { %v762_v3 = vadd.f32 %v761_v59, %v760_v53  ;;  %v988_v25 = vadd.f32 %v987_v17, %v986_v9  ;;  %v995_v26 = vadd.f32 %v994_v18, %v993_v10  ;;  %v772_v29 = vrot.slane %v771_v20, 1  ;;  %v60_v53 = vld [vmem:[%s4710_s0 + $0xc8] sm:$0xff] }
  0x28   :  { %v1105_v14 = vadd.f32 %v1104_v6, %v1103_v62  ;;  %v1099_v21 = vrot.slane %v1098_v13, 2  ;;  %v877_v33 = vrot.slane %v876_v23, 1  ;;  %v884_v34 = vrot.slane %v883_v24, 1  ;;  %v92_v10 = vld [vmem:[%s4710_s0 + $0x1c8] sm:$0xff] }
  0x29   :  { %v763_v11 = vrot.slane %v762_v3, 2  ;;  %v989_v35 = vrot.slane %v988_v25, 1  ;;  %v996_v36 = vrot.slane %v995_v26, 1  ;;  %v773_v42 = vadd.f32 %v772_v29, %v771_v20 }
  0x2a   :  { %v1106_v22 = vrot.slane %v1105_v14, 2  ;;  %v1100_v31 = vadd.f32 %v1099_v21, %v1098_v13  ;;  %v878_v47 = vadd.f32 %v877_v33, %v876_v23  ;;  %v885_v48 = vadd.f32 %v884_v34, %v883_v24 }
  0x2b   :  { %v764_v19 = vadd.f32 %v763_v11, %v762_v3  ;;  %v990_v49 = vadd.f32 %v989_v35, %v988_v25  ;;  %v997_v50 = vadd.f32 %v996_v36, %v995_v26  ;;  %v1488_v56 = vrot.slane %v3917_v27, %v3882_v37 }
  0x2c   :  { %v1107_v32 = vadd.f32 %v1106_v22, %v1105_v14  ;;  %v1101_v43 = vrot.slane %v1100_v31, 1  ;;  %v1492_v57 = vrot.slane %v3917_v27, %v3885_v38  ;;  %v1280_v60 = vcombine.low %v878_v47, %v885_v48 }
  0x2d   :  { %v765_v28 = vrot.slane %v764_v19, 1  ;;  %v1288_v61 = vcombine.low %v990_v49, %v997_v50  ;;  %v1580_v62 = vrot.slane %v3922_v39, %v3882_v37  ;;  %v1584_v1 = vrot.slane %v3922_v39, %v3885_v38 }
  0x2e   :  { %v1108_v44 = vrot.slane %v1107_v32, 1  ;;  %v1102_v54 = vadd.f32 %v1101_v43, %v1100_v31  ;;  %v101_v3 = vunpack.c.l.bf16 %v36_v40  ;;  %v102_v4 = vunpack.c.h.bf16 %v36_v40 }
  0x2f   :  { %v766_v41 = vadd.f32 %v765_v28, %v764_v19  ;;  %v1304_v5 = vrot.slane %v1280_v60, 7  ;;  %v1309_v6 = vrot.slane %v1288_v61, 6  ;;  %v117_v7 = vunpack.c.l.bf16 %v44_v46 }
  0x30   :  { %v1109_v55 = vadd.f32 %v1108_v44, %v1107_v32  ;;  %v118_v8 = vunpack.c.h.bf16 %v44_v46  ;;  %v133_v11 = vunpack.c.l.bf16 %v52_v52  ;;  %v134_v12 = vunpack.c.h.bf16 %v52_v52 }
  0x31   :  { %v1272_v59 = vcombine.low %v766_v41, %v773_v42  ;;  %v149_v13 = vunpack.c.l.bf16 %v60_v53  ;;  %v150_v15 = vunpack.c.h.bf16 %v60_v53  ;;  %v165_v16 = vunpack.c.l.bf16 %v68_v58 }
  0x32   :  { %v1296_v0 = vcombine.low %v1102_v54, %v1109_v55  ;;  %v166_v17 = vunpack.c.h.bf16 %v68_v58  ;;  %v181_v19 = vunpack.c.l.bf16 %v76_v63  ;;  %v182_v20 = vunpack.c.h.bf16 %v76_v63 }
  0x33   :  { %v1306_v14 = vsel %vm1305_vm0, %v1304_v5, %v1272_v59  ;;  %v197_v21 = vunpack.c.l.bf16 %v84_v2  ;;  %v198_v23 = vunpack.c.h.bf16 %v84_v2  ;;  %v213_v24 = vunpack.c.l.bf16 %v92_v10 }
  0x34   :  { %v1314_v9 = vrot.slane %v1296_v0, 5  ;;  %v1308_v18 = vsel %vm1307_vm1, %v1304_v5, %v1306_v14  ;;  %v214_v25 = vunpack.c.h.bf16 %v92_v10  ;;  %v229_v28 = vmax.f32 %v101_v3, 1e-06 }
  0x35   :  { %v1311_v22 = vsel %vm1310_vm2, %v1309_v6, %v1308_v18  ;;  %v230_v29 = vmax.f32 %v102_v4, 1e-06  ;;  %v245_v31 = vmax.f32 %v117_v7, 1e-06  ;;  %v246_v33 = vmax.f32 %v118_v8, 1e-06 }
  0x36   :  { %v1313_v26 = vsel %vm1312_vm3, %v1309_v6, %v1311_v22  ;;  %v261_v34 = vmax.f32 %v133_v11, 1e-06  ;;  %v262_v35 = vmax.f32 %v134_v12, 1e-06  ;;  %v277_v40 = vmax.f32 %v149_v13, 1e-06 }
  0x37   :  { %v1316_v32 = vsel %vm1315_vm4, %v1314_v9, %v1313_v26  ;;  %v278_v41 = vmax.f32 %v150_v15, 1e-06  ;;  %v293_v42 = vmax.f32 %v165_v16, 1e-06  ;;  %v294_v44 = vmax.f32 %v166_v17, 1e-06 }
  0x38   :  { %v1318_v36 = vsel %vm1317_vm5, %v1314_v9, %v1316_v32  ;;  %v309_v46 = vmax.f32 %v181_v19, 1e-06  ;;  %v366_v47 = vmul.f32 %v229_v28, %v229_v28  ;;  %v310_v48 = vmax.f32 %v182_v20, 1e-06 }
  0x39   :  { %v1417_v43 = vmul.f32 0.0625, %v1318_v36  ;;  %v325_v49 = vmax.f32 %v197_v21, 1e-06  ;;  %v326_v50 = vmax.f32 %v198_v23, 1e-06  ;;  %v367_v52 = vmul.f32 %v230_v29, %v230_v29 }
  0x3a   :  { %v341_v54 = vmax.f32 %v213_v24, 1e-06  ;;  %v342_v55 = vmax.f32 %v214_v25, 1e-06  ;;  %v382_v58 = vmul.f32 %v245_v31, %v245_v31  ;;  %v383_v59 = vmul.f32 %v246_v33, %v246_v33 }
  0x3b   :  { %v1425_v53 = vmax.f32 %v1417_v43, 1e-30  ;;  %v398_v60 = vmul.f32 %v261_v34, %v261_v34  ;;  %v399_v61 = vmul.f32 %v262_v35, %v262_v35  ;;  %v414_v63 = vmul.f32 %v277_v40, %v277_v40 }
  0x3c   :  { %v415_v0 = vmul.f32 %v278_v41, %v278_v41  ;;  %v430_v2 = vmul.f32 %v293_v42, %v293_v42  ;;  %v431_v3 = vmul.f32 %v294_v44, %v294_v44  ;;  %v446_v4 = vmul.f32 %v309_v46, %v309_v46 }
  0x3d   :  { %3627 = vlog2.f32 %v1425_v53  ;;  %v447_v5 = vmul.f32 %v310_v48, %v310_v48  ;;  %v462_v6 = vmul.f32 %v325_v49, %v325_v49  ;;  %v463_v7 = vmul.f32 %v326_v50, %v326_v50 }
  0x3e   :  { %v478_v8 = vmul.f32 %v341_v54, %v341_v54  ;;  %v479_v9 = vmul.f32 %v342_v55, %v342_v55  ;;  %v494_v10 = vmul.f32 %v366_v47, %v229_v28  ;;  %v495_v11 = vmul.f32 %v367_v52, %v230_v29 }
  0x3f   :  { %v510_v12 = vmul.f32 %v382_v58, %v245_v31  ;;  %v511_v13 = vmul.f32 %v383_v59, %v246_v33  ;;  %v526_v14 = vmul.f32 %v398_v60, %v261_v34  ;;  %v527_v15 = vmul.f32 %v399_v61, %v262_v35 }
  0x40   :  { %v542_v16 = vmul.f32 %v414_v63, %v277_v40  ;;  %v543_v17 = vmul.f32 %v415_v0, %v278_v41  ;;  %v558_v18 = vmul.f32 %v430_v2, %v293_v42  ;;  %v559_v19 = vmul.f32 %v431_v3, %v294_v44 }
  0x41   :  { %v574_v20 = vmul.f32 %v446_v4, %v309_v46  ;;  %v575_v21 = vmul.f32 %v447_v5, %v310_v48  ;;  %v590_v22 = vmul.f32 %v462_v6, %v325_v49  ;;  %v591_v23 = vmul.f32 %v463_v7, %v326_v50 }
  0x42   :  { %v606_v24 = vmul.f32 %v478_v8, %v341_v54  ;;  %v607_v25 = vmul.f32 %v479_v9, %v342_v55  ;;  %v774_v26 = vadd.f32 %v510_v12, %v494_v10  ;;  %v781_v32 = vadd.f32 %v511_v13, %v495_v11 }
  0x43   :  { %v886_v36 = vadd.f32 %v542_v16, %v526_v14  ;;  %v893_v43 = vadd.f32 %v543_v17, %v527_v15  ;;  %v998_v28 = vadd.f32 %v574_v20, %v558_v18  ;;  %v1005_v29 = vadd.f32 %v575_v21, %v559_v19 }
  0x44   :  { %v775_v31 = vrot.slane %v774_v26, 4  ;;  %v782_v33 = vrot.slane %v781_v32, 4  ;;  %v1110_v34 = vadd.f32 %v606_v24, %v590_v22  ;;  %v1117_v35 = vadd.f32 %v607_v25, %v591_v23  ;;  %v37_v24 = vld [vmem:[%s4710_s0 + $0x10] sm:$0xff] }
  0x45   :  { %v887_v40 = vrot.slane %v886_v36, 4  ;;  %v894_v41 = vrot.slane %v893_v43, 4  ;;  %v999_v42 = vrot.slane %v998_v28, 4  ;;  %v1006_v44 = vrot.slane %v1005_v29, 4 }
  0x46   :  { %v776_v46 = vadd.f32 %v775_v31, %v774_v26  ;;  %v783_v47 = vadd.f32 %v782_v33, %v781_v32  ;;  %v1111_v48 = vrot.slane %v1110_v34, 4  ;;  %v1118_v49 = vrot.slane %v1117_v35, 4  ;;  %v53_v33 = vld [vmem:[%s4710_s0 + $0x90] sm:$0xff] }
  0x47   :  { %v888_v50 = vadd.f32 %v887_v40, %v886_v36  ;;  %v895_v52 = vadd.f32 %v894_v41, %v893_v43  ;;  %v1000_v53 = vadd.f32 %v999_v42, %v998_v28  ;;  %v1007_v54 = vadd.f32 %v1006_v44, %v1005_v29  ;;  %v45_v43 = vld [vmem:[%s4710_s0 + $0x50] sm:$0xff] }
  0x48   :  { %v777_v55 = vrot.slane %v776_v46, 2  ;;  %v784_v58 = vrot.slane %v783_v47, 2  ;;  %v1112_v59 = vadd.f32 %v1111_v48, %v1110_v34  ;;  %v1119_v60 = vadd.f32 %v1118_v49, %v1117_v35  ;;  %v61_v34 = vld [vmem:[%s4710_s0 + $0xd0] sm:$0xff] }
  0x49   :  { %v889_v63 = vrot.slane %v888_v50, 2  ;;  %v896_v0 = vrot.slane %v895_v52, 2  ;;  %v1001_v2 = vrot.slane %v1000_v53, 2  ;;  %v1008_v3 = vrot.slane %v1007_v54, 2  ;;  %v69_v41 = vld [vmem:[%s4710_s0 + $0x110] sm:$0xff] }
  0x4a   :  { %v3628_v61 = vpop.eup %3627  ;;  %v778_v5 = vadd.f32 %v777_v55, %v776_v46  ;;  %v785_v6 = vadd.f32 %v784_v58, %v783_v47  ;;  %v1113_v7 = vrot.slane %v1112_v59, 2  ;;  %v1549_v28 = vcombine.low %v1488_v56, %v1492_v57  ;;  %v77_v46 = vld [vmem:[%s4710_s0 + $0x150] sm:$0xff] }
  0x4b   :  { %v1434_v4 = vmul.f32 0.6931472, %v3628_v61  ;;  %v890_v8 = vadd.f32 %v889_v63, %v888_v50  ;;  %v897_v9 = vadd.f32 %v896_v0, %v895_v52  ;;  %v1002_v10 = vadd.f32 %v1001_v2, %v1000_v53  ;;  %v85_v50 = vld [vmem:[%s4710_s0 + $0x190] sm:$0xff] }
  0x4c   :  { %v1009_v11 = vadd.f32 %v1008_v3, %v1007_v54  ;;  %v779_v13 = vrot.slane %v778_v5, 1  ;;  %v786_v14 = vrot.slane %v785_v6, 1  ;;  %v1114_v15 = vadd.f32 %v1113_v7, %v1112_v59  ;;  %v93_v54 = vld [vmem:[%s4710_s0 + $0x1d0] sm:$0xff] }
  0x4d   :  { %v1449_v12 = vmul.f32 0.33333334, %v1434_v4  ;;  %v891_v16 = vrot.slane %v890_v8, 1  ;;  %v898_v17 = vrot.slane %v897_v9, 1  ;;  %v1003_v18 = vrot.slane %v1002_v10, 1 }
  0x4e   :  { %v1010_v19 = vrot.slane %v1009_v11, 1  ;;  %v780_v21 = vadd.f32 %v779_v13, %v778_v5  ;;  %v787_v22 = vadd.f32 %v786_v14, %v785_v6  ;;  %v1115_v23 = vrot.slane %v1114_v15, 1 }
  0x4f   :  { %v1457_v20 = vmul.f32 1.442695, %v1449_v12  ;;  %v892_v25 = vadd.f32 %v891_v16, %v890_v8  ;;  %v899_v26 = vadd.f32 %v898_v17, %v897_v9  ;;  %v1004_v32 = vadd.f32 %v1003_v18, %v1002_v10 }
  0x50   :  { %v1011_v36 = vadd.f32 %v1010_v19, %v1009_v11  ;;  %v3980_v29 = vcombine.low %v1580_v62, %v1584_v1  ;;  %v1120_v31 = vrot.slane %v1119_v60, 2  ;;  %v1116_v35 = vadd.f32 %v1115_v23, %v1114_v15 }
  0x51   :  { %3629 = vpow2.f32 %v1457_v20  ;;  %v1273_v40 = vcombine.low %v780_v21, %v787_v22  ;;  %v1281_v56 = vcombine.low %v892_v25, %v899_v26  ;;  %v1496_v62 = vrot.slane %v3917_v27, %v3897_v45 }
  0x52   :  { %v1289_v57 = vcombine.low %v1004_v32, %v1011_v36  ;;  %v1121_v42 = vadd.f32 %v1120_v31, %v1119_v60  ;;  %v1500_v1 = vrot.slane %v3917_v27, %v3906_v51  ;;  %v1588_v44 = vrot.slane %v3922_v39, %v3897_v45 }
  0x53   :  { %v1319_v47 = vrot.slane %v1281_v56, 7  ;;  %v1592_v49 = vrot.slane %v3922_v39, %v3906_v51  ;;  %v103_v52 = vunpack.c.l.bf16 %v37_v24  ;;  %v104_v55 = vunpack.c.h.bf16 %v37_v24 }
  0x54   :  { %v1322_v48 = vrot.slane %v1289_v57, 6  ;;  %v1122_v53 = vrot.slane %v1121_v42, 1  ;;  %v119_v58 = vunpack.c.l.bf16 %v45_v43  ;;  %v120_v59 = vunpack.c.h.bf16 %v45_v43 }
  0x55   :  { %v1320_v60 = vsel %vm1305_vm0, %v1319_v47, %v1273_v40  ;;  %v135_v61 = vunpack.c.l.bf16 %v53_v33  ;;  %v136_v63 = vunpack.c.h.bf16 %v53_v33  ;;  %v151_v0 = vunpack.c.l.bf16 %v61_v34 }
  0x56   :  { %v1123_v2 = vadd.f32 %v1122_v53, %v1121_v42  ;;  %v1321_v3 = vsel %vm1307_vm1, %v1319_v47, %v1320_v60  ;;  %v152_v4 = vunpack.c.h.bf16 %v61_v34  ;;  %v167_v5 = vunpack.c.l.bf16 %v69_v41 }
  0x57   :  { %v1323_v6 = vsel %vm1310_vm2, %v1322_v48, %v1321_v3  ;;  %v168_v7 = vunpack.c.h.bf16 %v69_v41  ;;  %v183_v8 = vunpack.c.l.bf16 %v77_v46  ;;  %v184_v9 = vunpack.c.h.bf16 %v77_v46  ;;  %v3535_v3 = vld [vmem:[%s4713_s3 + $0x170] sm:$0xff]  }
  0x58   :  { %v1297_v10 = vcombine.low %v1116_v35, %v1123_v2  ;;  %v1324_v11 = vsel %vm1312_vm3, %v1322_v48, %v1323_v6  ;;  %v199_v12 = vunpack.c.l.bf16 %v85_v50  ;;  %v200_v13 = vunpack.c.h.bf16 %v85_v50  ;;  %v3533_v2 = vld [vmem:[%s4713_s3 + $0x138] sm:$0xff]  }
  0x59   :  { %v215_v14 = vunpack.c.l.bf16 %v93_v54  ;;  %v216_v15 = vunpack.c.h.bf16 %v93_v54  ;;  %v231_v16 = vmax.f32 %v103_v52, 1e-06  ;;  %v232_v17 = vmax.f32 %v104_v55, 1e-06 }
  0x5a   :  { %v1325_v18 = vrot.slane %v1297_v10, 5  ;;  %v247_v19 = vmax.f32 %v119_v58, 1e-06  ;;  %v248_v20 = vmax.f32 %v120_v59, 1e-06  ;;  %v4013_v21 = vsub.s32 4, %v3861_v30 }
  0x5b   :  { %v263_v22 = vmax.f32 %v135_v61, 1e-06  ;;  %v264_v23 = vmax.f32 %v136_v63, 1e-06  ;;  %v279_v24 = vmax.f32 %v151_v0, 1e-06  ;;  %v368_v25 = vmul.f32 %v231_v16, %v231_v16 }
  0x5c   :  { %v1326_v26 = vsel %vm1315_vm4, %v1325_v18, %v1324_v11  ;;  %v280_v32 = vmax.f32 %v152_v4, 1e-06  ;;  %v295_v36 = vmax.f32 %v167_v5, 1e-06  ;;  %v296_v43 = vmax.f32 %v168_v7, 1e-06 }
  0x5d   :  { %v1327_v33 = vsel %vm1317_vm5, %v1325_v18, %v1326_v26  ;;  %v311_v34 = vmax.f32 %v183_v8, 1e-06  ;;  %v312_v35 = vmax.f32 %v184_v9, 1e-06  ;;  %v327_v40 = vmax.f32 %v199_v12, 1e-06 }
  0x5e   :  { %v3630_v31 = vpop.eup %3629  ;;  %v1418_v57 = vmul.f32 0.0625, %v1327_v33  ;;  %v328_v41 = vmax.f32 %v200_v13, 1e-06  ;;  %v343_v42 = vmax.f32 %v215_v14, 1e-06  ;;  %v369_v47 = vmul.f32 %v232_v17, %v232_v17  ;;  %v3537_v33 = vld [vmem:[%s4713_s3 + $0x130] sm:$0xff]  }
  0x5f   :  { %v1565_v56 = vmul.f32 %v3630_v31, %v1549_v28  ;;  %1473 = vst [vmem:[#allocation5] sm:$0xff] %v3630_v31  ;;  %v344_v46 = vmax.f32 %v216_v15, 1e-06  ;;  %v384_v48 = vmul.f32 %v247_v19, %v247_v19  ;;  %v385_v50 = vmul.f32 %v248_v20, %v248_v20 }
  0x60   :  { %v1426_v53 = vmax.f32 %v1418_v57, 1e-30  ;;  %v400_v54 = vmul.f32 %v263_v22, %v263_v22  ;;  %v401_v55 = vmul.f32 %v264_v23, %v264_v23  ;;  %v416_v58 = vmul.f32 %v279_v24, %v279_v24 }
  0x61   :  { %v1657_v52 = vadd.f32 %v3980_v29, %v1565_v56  ;;  %v417_v59 = vmul.f32 %v280_v32, %v280_v32  ;;  %v432_v60 = vmul.f32 %v295_v36, %v295_v36  ;;  %v433_v61 = vmul.f32 %v296_v43, %v296_v43  ;;  %v3539_v56 = vld [vmem:[%s4713_s3 + $0x168] sm:$0xff]  }
  0x62   :  { %3631 = vlog2.f32 %v1426_v53  ;;  %v448_v0 = vmul.f32 %v311_v34, %v311_v34  ;;  %v449_v29 = vmul.f32 %v312_v35, %v312_v35  ;;  %v464_v4 = vmul.f32 %v327_v40, %v327_v40 }
  0x63   :  { %v1673_v63 = vcombine.high %v1657_v52, %v1657_v52  ;;  %v1689_v28 = vpack.c.bf16 %v1657_v52, %v1657_v52  ;;  %v465_v5 = vmul.f32 %v328_v41, %v328_v41  ;;  %v480_v6 = vmul.f32 %v343_v42, %v343_v42 }
  0x64   :  { %v481_v8 = vmul.f32 %v344_v46, %v344_v46  ;;  %v496_v9 = vmul.f32 %v368_v25, %v231_v16  ;;  %v497_v10 = vmul.f32 %v369_v47, %v232_v17  ;;  %v512_v11 = vmul.f32 %v384_v48, %v247_v19 }
  0x65   :  { %v1690_v7 = vpack.c.bf16 %v1673_v63, %v1673_v63  ;;  %v513_v12 = vmul.f32 %v385_v50, %v248_v20  ;;  %v528_v13 = vmul.f32 %v400_v54, %v263_v22  ;;  %v529_v14 = vmul.f32 %v401_v55, %v264_v23 }
  0x66   :  { %v544_v15 = vmul.f32 %v416_v58, %v279_v24  ;;  %v545_v18 = vmul.f32 %v417_v59, %v280_v32  ;;  %v560_v26 = vmul.f32 %v432_v60, %v295_v36  ;;  %v561_v31 = vmul.f32 %v433_v61, %v296_v43 }
  0x67   :  { %2761 = vmatprep.mubr.bf16.mxu0 %v1690_v7  ;;  %v576_v16 = vmul.f32 %v448_v0, %v311_v34  ;;  %v577_v17 = vmul.f32 %v449_v29, %v312_v35  ;;  %v592_v19 = vmul.f32 %v464_v4, %v327_v40  ;;  %v593_v20 = vmul.f32 %v465_v5, %v328_v41  ;;  %v3541_v34 = vld [vmem:[%s4713_s3 + $0x128] sm:$0xff]   ;;  %v3543_v35 = vld [vmem:[%s4713_s3 + $0x160] sm:$0xff]  }
  0x68   :  { %2762 = vmatmul.mubr.bf16.vlgmr.msra.gmra.mxu0 %v1689_v28  ;;  %v608_v22 = vmul.f32 %v480_v6, %v343_v42  ;;  %v609_v23 = vmul.f32 %v481_v8, %v344_v46  ;;  %v788_v24 = vadd.f32 %v512_v11, %v496_v9  ;;  %v795_v25 = vadd.f32 %v513_v12, %v497_v10  ;;  %v3545_v4 = vld [vmem:[%s4713_s3 + $0x120] sm:$0xff]   ;;  %v3547_v10 = vld [vmem:[%s4713_s3 + $0x158] sm:$0xff]  }
  0x69   :  { %3364 = vmatpush3.bf16.msra.mxu0 %v3533_v2  ;;  %v900_v32 = vadd.f32 %v544_v15, %v528_v13  ;;  %v907_v36 = vadd.f32 %v545_v18, %v529_v14  ;;  %v1012_v43 = vadd.f32 %v576_v16, %v560_v26  ;;  %v1019_v57 = vadd.f32 %v577_v17, %v561_v31 }
  0x6a   :  { %3365 = vmatprep.subr.bf16.mxu0 %v3535_v3  ;;  %v789_v47 = vrot.slane %v788_v24, 4  ;;  %v796_v48 = vrot.slane %v795_v25, 4  ;;  %v1124_v50 = vadd.f32 %v608_v22, %v592_v19  ;;  %v1131_v52 = vadd.f32 %v609_v23, %v593_v20 }
  0x6b   :  { %v901_v40 = vrot.slane %v900_v32, 4  ;;  %v908_v41 = vrot.slane %v907_v36, 4  ;;  %v1013_v42 = vrot.slane %v1012_v43, 4  ;;  %v1020_v46 = vrot.slane %v1019_v57, 4 }
  0x6c   :  { %v790_v53 = vadd.f32 %v789_v47, %v788_v24  ;;  %v797_v54 = vadd.f32 %v796_v48, %v795_v25  ;;  %v1125_v55 = vrot.slane %v1124_v50, 4  ;;  %v1132_v58 = vrot.slane %v1131_v52, 4  ;;  %v3549_v24 = vld [vmem:[%s4713_s3 + $0x118] sm:$0xff]  }
  0x6d   :  { %3366 = vmatpush3.bf16.msra.mxu0 %v3537_v33  ;;  %v902_v59 = vadd.f32 %v901_v40, %v900_v32  ;;  %v909_v60 = vadd.f32 %v908_v41, %v907_v36  ;;  %v1014_v61 = vadd.f32 %v1013_v42, %v1012_v43  ;;  %v1021_v63 = vadd.f32 %v1020_v46, %v1019_v57  ;;  %v3551_v43 = vld [vmem:[%s4713_s3 + $0x150] sm:$0xff]   ;;  %v38_v41 = vld [vmem:[%s4710_s0 + $0x18] sm:$0xff] }
  0x6e   :  { %3367 = vmatprep.subr.bf16.mxu0 %v3539_v56  ;;  %v791_v28 = vrot.slane %v790_v53, 2  ;;  %v798_v0 = vrot.slane %v797_v54, 2  ;;  %v1126_v2 = vadd.f32 %v1125_v55, %v1124_v50  ;;  %v1133_v3 = vadd.f32 %v1132_v58, %v1131_v52 }
  0x6f   :  { %v3632_v29 = vpop.eup %3631  ;;  %v903_v5 = vrot.slane %v902_v59, 2  ;;  %v910_v6 = vrot.slane %v909_v60, 2  ;;  %v1015_v7 = vrot.slane %v1014_v61, 2  ;;  %v1022_v8 = vrot.slane %v1021_v63, 2 }
  0x70   :  { %v1436_v9 = vmul.f32 0.6931472, %v3632_v29  ;;  %v792_v11 = vadd.f32 %v791_v28, %v790_v53  ;;  %v799_v12 = vadd.f32 %v798_v0, %v797_v54  ;;  %v1127_v13 = vrot.slane %v1126_v2, 2  ;;  %v62_v54 = vld [vmem:[%s4710_s0 + $0xd8] sm:$0xff] }
  0x71   :  { %3368 = vmatpush3.bf16.msra.mxu0 %v3541_v34  ;;  %v904_v14 = vadd.f32 %v903_v5, %v902_v59  ;;  %v911_v15 = vadd.f32 %v910_v6, %v909_v60  ;;  %v1016_v18 = vadd.f32 %v1015_v7, %v1014_v61  ;;  %v1023_v26 = vadd.f32 %v1022_v8, %v1021_v63  ;;  %v70_v61 = vld [vmem:[%s4710_s0 + $0x118] sm:$0xff] }
  0x72   :  { %3369 = vmatprep.subr.bf16.mxu0 %v3543_v35  ;;  %v1450_v31 = vmul.f32 0.33333334, %v1436_v9  ;;  %v793_v33 = vrot.slane %v792_v11, 1  ;;  %v800_v56 = vrot.slane %v799_v12, 1  ;;  %v1128_v16 = vadd.f32 %v1127_v13, %v1126_v2  ;;  %v3553_v35 = vld [vmem:[%s4713_s3 + $0x110] sm:$0xff]   ;;  %v78_v63 = vld [vmem:[%s4710_s0 + $0x158] sm:$0xff] }
  0x73   :  { %v905_v17 = vrot.slane %v904_v14, 1  ;;  %v912_v19 = vrot.slane %v911_v15, 1  ;;  %v1017_v20 = vrot.slane %v1016_v18, 1  ;;  %v1024_v22 = vrot.slane %v1023_v26, 1  ;;  %v86_v2 = vld [vmem:[%s4710_s0 + $0x198] sm:$0xff] }
  0x74   :  { %v1459_v23 = vmul.f32 1.442695, %v1450_v31  ;;  %v794_v25 = vadd.f32 %v793_v33, %v792_v11  ;;  %v801_v32 = vadd.f32 %v800_v56, %v799_v12  ;;  %v1129_v36 = vrot.slane %v1128_v16, 1  ;;  %v94_v8 = vld [vmem:[%s4710_s0 + $0x1d8] sm:$0xff] }
  0x75   :  { %3370 = vmatpush3.bf16.msra.mxu0 %v3545_v4  ;;  %v906_v57 = vadd.f32 %v905_v17, %v904_v14  ;;  %v913_v47 = vadd.f32 %v912_v19, %v911_v15  ;;  %v1018_v48 = vadd.f32 %v1017_v20, %v1016_v18  ;;  %v1025_v50 = vadd.f32 %v1024_v22, %v1023_v26  ;;  %v3557_v4 = vld [vmem:[%s4713_s3 + $0x108] sm:$0xff]   ;;  %v3561_v19 = vld [vmem:[%s4713_s3 + $0x100] sm:$0xff]  }
  0x76   :  { %3371 = vmatprep.subr.bf16.mxu0 %v3547_v10  ;;  %3633 = vpow2.f32 %v1459_v23  ;;  %v4054_v52 = vcombine.low %v1496_v62, %v1500_v1  ;;  %v4062_v34 = vcombine.low %v1588_v44, %v1592_v49  ;;  %v1134_v40 = vrot.slane %v1133_v3, 2  ;;  %v3555_v62 = vld [vmem:[%s4713_s3 + $0x148] sm:$0xff]   ;;  %v46_v44 = vld [vmem:[%s4710_s0 + $0x58] sm:$0xff]  ;;  %v3559_v10 = vld [vmem:[%s4713_s3 + $0x140] sm:$0xff]  }
  0x77   :  { %v1274_v1 = vcombine.low %v794_v25, %v801_v32  ;;  %v1282_v42 = vcombine.low %v906_v57, %v913_v47  ;;  %v1290_v46 = vcombine.low %v1018_v48, %v1025_v50  ;;  %v4074_v53 = vsub.s32 5, %v3861_v30  ;;  %v54_v49 = vld [vmem:[%s4710_s0 + $0x98] sm:$0xff] }
  0x78   :  { %v1130_v55 = vadd.f32 %v1129_v36, %v1128_v16  ;;  %v1135_v58 = vadd.f32 %v1134_v40, %v1133_v3  ;;  %v1504_v59 = vrot.slane %v3917_v27, %v4013_v21  ;;  %v1596_v60 = vrot.slane %v3922_v39, %v4013_v21  ;;  %v3563_v57 = vld [vmem:[%s4713_s3 + $0x278] sm:$0xff]  }
  0x79   :  { %3372 = vmatpush3.bf16.msra.mxu0 %v3549_v24  ;;  %v1328_v28 = vrot.slane %v1282_v42, 7  ;;  %v1331_v0 = vrot.slane %v1290_v46, 6  ;;  %v105_v3 = vunpack.c.l.bf16 %v38_v41  ;;  %v106_v29 = vunpack.c.h.bf16 %v38_v41 }
  0x7a   :  { %3373 = vmatprep.subr.bf16.mxu0 %v3551_v43  ;;  %v1136_v5 = vrot.slane %v1135_v58, 1  ;;  %v1508_v6 = vrot.slane %v3917_v27, %v4074_v53  ;;  %v1600_v7 = vrot.slane %v3922_v39, %v4074_v53  ;;  %v121_v9 = vunpack.c.l.bf16 %v46_v44 }
  0x7b   :  { %v1329_v11 = vsel %vm1305_vm0, %v1328_v28, %v1274_v1  ;;  %v122_v12 = vunpack.c.h.bf16 %v46_v44  ;;  %v137_v13 = vunpack.c.l.bf16 %v54_v49  ;;  %v138_v14 = vunpack.c.h.bf16 %v54_v49 }
  0x7c   :  { %v1137_v15 = vadd.f32 %v1136_v5, %v1135_v58  ;;  %v1330_v18 = vsel %vm1307_vm1, %v1328_v28, %v1329_v11  ;;  %v153_v26 = vunpack.c.l.bf16 %v62_v54  ;;  %v154_v31 = vunpack.c.h.bf16 %v62_v54 }
  0x7d   :  { %3374 = vmatpush3.bf16.msra.mxu0 %v3553_v35  ;;  %v1332_v33 = vsel %vm1310_vm2, %v1331_v0, %v1330_v18  ;;  %v169_v56 = vunpack.c.l.bf16 %v70_v61  ;;  %v170_v16 = vunpack.c.h.bf16 %v70_v61  ;;  %v185_v17 = vunpack.c.l.bf16 %v78_v63 }
  0x7e   :  { %3375 = vmatprep.subr.bf16.mxu0 %v3555_v62  ;;  %v1298_v20 = vcombine.low %v1130_v55, %v1137_v15  ;;  %v1333_v22 = vsel %vm1312_vm3, %v1331_v0, %v1332_v33  ;;  %v186_v23 = vunpack.c.h.bf16 %v78_v63  ;;  %v201_v24 = vunpack.c.l.bf16 %v86_v2 }
  0x7f   :  { %v202_v25 = vunpack.c.h.bf16 %v86_v2  ;;  %v217_v32 = vunpack.c.l.bf16 %v94_v8  ;;  %v218_v36 = vunpack.c.h.bf16 %v94_v8  ;;  %v233_v43 = vmax.f32 %v105_v3, 1e-06 }
  0x80   :  { %v1334_v47 = vrot.slane %v1298_v20, 5  ;;  %v234_v48 = vmax.f32 %v106_v29, 1e-06  ;;  %v249_v50 = vmax.f32 %v121_v9, 1e-06  ;;  %v4122_v35 = vsub.s32 6, %v3861_v30 }
  0x81   :  { %3376 = vmatpush3.bf16.msra.mxu0 %v3557_v4  ;;  %v250_v40 = vmax.f32 %v122_v12, 1e-06  ;;  %v265_v41 = vmax.f32 %v137_v13, 1e-06  ;;  %v266_v62 = vmax.f32 %v138_v14, 1e-06  ;;  %v370_v1 = vmul.f32 %v233_v43, %v233_v43 }
  0x82   :  { %3377 = vmatprep.subr.bf16.mxu0 %v3559_v10  ;;  %v1335_v42 = vsel %vm1315_vm4, %v1334_v47, %v1333_v22  ;;  %v281_v46 = vmax.f32 %v153_v26, 1e-06  ;;  %v282_v44 = vmax.f32 %v154_v31, 1e-06  ;;  %v297_v49 = vmax.f32 %v169_v56, 1e-06 }
  0x83   :  { %v3634_v54 = vpop.eup %3633  ;;  %v1336_v55 = vsel %vm1317_vm5, %v1334_v47, %v1335_v42  ;;  %v298_v58 = vmax.f32 %v170_v16, 1e-06  ;;  %v313_v61 = vmax.f32 %v185_v17, 1e-06  ;;  %v314_v63 = vmax.f32 %v186_v23, 1e-06 }
  0x84   :  { %v1566_v28 = vmul.f32 %v3634_v54, %v4054_v52  ;;  %1474 = vst [vmem:[#allocation5 + $0x8] sm:$0xff] %v3634_v54  ;;  %v1419_v0 = vmul.f32 0.0625, %v1336_v55  ;;  %v329_v2 = vmax.f32 %v201_v24, 1e-06  ;;  %v330_v3 = vmax.f32 %v202_v25, 1e-06 }
  0x85   :  { %3378 = vmatpush3.bf16.msra.mxu0 %v3561_v19  ;;  %v345_v29 = vmax.f32 %v217_v32, 1e-06  ;;  %v346_v4 = vmax.f32 %v218_v36, 1e-06  ;;  %v371_v5 = vmul.f32 %v234_v48, %v234_v48  ;;  %v386_v8 = vmul.f32 %v249_v50, %v249_v50  ;;  %v3534_v31 = vld [vmem:[%s4713_s3 + $0x1b8] sm:$0xff]   ;;  %v3536_v56 = vld [vmem:[%s4713_s3 + $0x1f0] sm:$0xff]  }
  0x86   :  { %3407 = vmatprep.subr.bf16.mxu0 %v3563_v57  ;;  %v1658_v9 = vadd.f32 %v4062_v34, %v1566_v28  ;;  %v1427_v10 = vmax.f32 %v1419_v0, 1e-30  ;;  %v387_v11 = vmul.f32 %v250_v40, %v250_v40  ;;  %v402_v12 = vmul.f32 %v265_v41, %v265_v41  ;;  %v3538_v47 = vld [vmem:[%s4713_s3 + $0x1b0] sm:$0xff]   ;;  %v3540_v0 = vld [vmem:[%s4713_s3 + $0x1e8] sm:$0xff]  }
  0x87   :  { %v403_v13 = vmul.f32 %v266_v62, %v266_v62  ;;  %v418_v14 = vmul.f32 %v281_v46, %v281_v46  ;;  %v419_v15 = vmul.f32 %v282_v44, %v282_v44  ;;  %v434_v18 = vmul.f32 %v297_v49, %v297_v49 }
  0x88   :  { %v1674_v52 = vcombine.high %v1658_v9, %v1658_v9  ;;  %v1691_v26 = vpack.c.bf16 %v1658_v9, %v1658_v9  ;;  %3635 = vlog2.f32 %v1427_v10  ;;  %v435_v33 = vmul.f32 %v298_v58, %v298_v58 }
  0x89   :  { %v450_v34 = vmul.f32 %v313_v61, %v313_v61  ;;  %v451_v16 = vmul.f32 %v314_v63, %v314_v63  ;;  %v466_v17 = vmul.f32 %v329_v2, %v329_v2  ;;  %v467_v19 = vmul.f32 %v330_v3, %v330_v3 }
  0x8a   :  { %v1692_v20 = vpack.c.bf16 %v1674_v52, %v1674_v52  ;;  %v482_v22 = vmul.f32 %v345_v29, %v345_v29  ;;  %v483_v23 = vmul.f32 %v346_v4, %v346_v4  ;;  %v498_v24 = vmul.f32 %v370_v1, %v233_v43 }
  0x8b   :  { %v499_v25 = vmul.f32 %v371_v5, %v234_v48  ;;  %v514_v32 = vmul.f32 %v386_v8, %v249_v50  ;;  %v515_v36 = vmul.f32 %v387_v11, %v250_v40  ;;  %v530_v57 = vmul.f32 %v402_v12, %v265_v41 }
  0x8c   :  { %2801 = vmatprep.mubr.bf16.mxu1 %v1692_v20  ;;  %v531_v42 = vmul.f32 %v403_v13, %v266_v62  ;;  %v546_v54 = vmul.f32 %v418_v14, %v281_v46  ;;  %v547_v55 = vmul.f32 %v419_v15, %v282_v44  ;;  %v562_v28 = vmul.f32 %v434_v18, %v297_v49  ;;  %v3542_v49 = vld [vmem:[%s4713_s3 + $0x1a8] sm:$0xff]   ;;  %v3548_v20 = vld [vmem:[%s4713_s3 + $0x1d8] sm:$0xff]  }
  0x8d   :  { %2802 = vmatmul.mubr.bf16.vlgmr.msra.gmra.mxu1 %v1691_v26  ;;  %v563_v9 = vmul.f32 %v435_v33, %v298_v58  ;;  %v578_v43 = vmul.f32 %v450_v34, %v313_v61  ;;  %v579_v48 = vmul.f32 %v451_v16, %v314_v63  ;;  %v594_v50 = vmul.f32 %v466_v17, %v329_v2  ;;  %v3546_v33 = vld [vmem:[%s4713_s3 + $0x1a0] sm:$0xff]  }
  0x8e   :  { %3386 = vmatpush3.bf16.msra.mxu1 %v3534_v31  ;;  %v595_v40 = vmul.f32 %v467_v19, %v330_v3  ;;  %v610_v41 = vmul.f32 %v482_v22, %v345_v29  ;;  %v611_v1 = vmul.f32 %v483_v23, %v346_v4  ;;  %v802_v5 = vadd.f32 %v514_v32, %v498_v24  ;;  %v3544_v29 = vld [vmem:[%s4713_s3 + $0x1e0] sm:$0xff]  }
  0x8f   :  { %3387 = vmatprep.subr.bf16.mxu1 %v3536_v56  ;;  %v809_v8 = vadd.f32 %v515_v36, %v499_v25  ;;  %v914_v62 = vadd.f32 %v546_v54, %v530_v57  ;;  %v921_v46 = vadd.f32 %v547_v55, %v531_v42  ;;  %v1026_v44 = vadd.f32 %v578_v43, %v562_v28 }
  0x90   :  { %v803_v10 = vrot.slane %v802_v5, 4  ;;  %v1033_v11 = vadd.f32 %v579_v48, %v563_v9  ;;  %v1138_v58 = vadd.f32 %v610_v41, %v594_v50  ;;  %v1145_v61 = vadd.f32 %v611_v1, %v595_v40 }
  0x91   :  { %v810_v63 = vrot.slane %v809_v8, 4  ;;  %v915_v2 = vrot.slane %v914_v62, 4  ;;  %v922_v12 = vrot.slane %v921_v46, 4  ;;  %v1027_v3 = vrot.slane %v1026_v44, 4 }
  0x92   :  { %3388 = vmatpush3.bf16.msra.mxu1 %v3538_v47  ;;  %v804_v4 = vadd.f32 %v803_v10, %v802_v5  ;;  %v1034_v13 = vrot.slane %v1033_v11, 4  ;;  %v1139_v14 = vrot.slane %v1138_v58, 4  ;;  %v1146_v15 = vrot.slane %v1145_v61, 4  ;;  %v3550_v5 = vld [vmem:[%s4713_s3 + $0x198] sm:$0xff]  }
  0x93   :  { %3389 = vmatprep.subr.bf16.mxu1 %v3540_v0  ;;  %v811_v18 = vadd.f32 %v810_v63, %v809_v8  ;;  %v916_v52 = vadd.f32 %v915_v2, %v914_v62  ;;  %v923_v26 = vadd.f32 %v922_v12, %v921_v46  ;;  %v1028_v31 = vadd.f32 %v1027_v3, %v1026_v44  ;;  %v39_v3 = vld [vmem:[%s4710_s0 + $0x20] sm:$0xff] }
  0x94   :  { %v805_v56 = vrot.slane %v804_v4, 2  ;;  %v1035_v34 = vadd.f32 %v1034_v13, %v1033_v11  ;;  %v1140_v16 = vadd.f32 %v1139_v14, %v1138_v58  ;;  %v1147_v17 = vadd.f32 %v1146_v15, %v1145_v61 }
  0x95   :  { %v3636_v19 = vpop.eup %3635  ;;  %v812_v22 = vrot.slane %v811_v18, 2  ;;  %v917_v23 = vrot.slane %v916_v52, 2  ;;  %v924_v24 = vrot.slane %v923_v26, 2  ;;  %v1029_v25 = vrot.slane %v1028_v31, 2 }
  0x96   :  { %3390 = vmatpush3.bf16.msra.mxu1 %v3542_v49  ;;  %v1438_v32 = vmul.f32 0.6931472, %v3636_v19  ;;  %v806_v36 = vadd.f32 %v805_v56, %v804_v4  ;;  %v1036_v57 = vrot.slane %v1035_v34, 2  ;;  %v1141_v47 = vrot.slane %v1140_v16, 2  ;;  %v3552_v49 = vld [vmem:[%s4713_s3 + $0x1d0] sm:$0xff]  }
  0x97   :  { %3391 = vmatprep.subr.bf16.mxu1 %v3544_v29  ;;  %v813_v42 = vadd.f32 %v812_v22, %v811_v18  ;;  %v918_v54 = vadd.f32 %v917_v23, %v916_v52  ;;  %v925_v55 = vadd.f32 %v924_v24, %v923_v26  ;;  %v1030_v28 = vadd.f32 %v1029_v25, %v1028_v31 }
  0x98   :  { %v1451_v0 = vmul.f32 0.33333334, %v1438_v32  ;;  %v807_v9 = vrot.slane %v806_v36, 1  ;;  %v1037_v43 = vadd.f32 %v1036_v57, %v1035_v34  ;;  %v1142_v48 = vadd.f32 %v1141_v47, %v1140_v16 }
  0x99   :  { %v814_v50 = vrot.slane %v813_v42, 1  ;;  %v919_v40 = vrot.slane %v918_v54, 1  ;;  %v926_v41 = vrot.slane %v925_v55, 1  ;;  %v1031_v1 = vrot.slane %v1030_v28, 1 }
  0x9a   :  { %3392 = vmatpush3.bf16.msra.mxu1 %v3546_v33  ;;  %v1461_v8 = vmul.f32 1.442695, %v1451_v0  ;;  %v808_v62 = vadd.f32 %v807_v9, %v806_v36  ;;  %v1038_v46 = vrot.slane %v1037_v43, 1  ;;  %v1143_v44 = vrot.slane %v1142_v48, 1 }
  0x9b   :  { %3393 = vmatprep.subr.bf16.mxu1 %v3548_v20  ;;  %v815_v10 = vadd.f32 %v814_v50, %v813_v42  ;;  %v920_v11 = vadd.f32 %v919_v40, %v918_v54  ;;  %v927_v58 = vadd.f32 %v926_v41, %v925_v55  ;;  %v1032_v61 = vadd.f32 %v1031_v1, %v1030_v28 }
  0x9c   :  { %3637 = vpow2.f32 %v1461_v8  ;;  %v4164_v63 = vcombine.low %v1504_v59, %v1508_v6  ;;  %v1039_v2 = vadd.f32 %v1038_v46, %v1037_v43  ;;  %v1148_v12 = vrot.slane %v1147_v17, 2 }
  0x9d   :  { %13 = vsyncpa [#allocation6], 0  ;;  %v4175_v29 = vcombine.low %v1596_v60, %v1600_v7  ;;  %v1275_v4 = vcombine.low %v808_v62, %v815_v10  ;;  %v1283_v13 = vcombine.low %v920_v11, %v927_v58  ;;  %v4178_v27 = vsub.s32 7, %v3861_v30  ;;  %v3554_v59 = vld [vmem:[%s4713_s3 + $0x190] sm:$0xff]   ;;  %v4186_v18 = vld [vmem:[%s4711_s1] sm:$0xff] }
  0x9e   :  { %3394 = vmatpush3.bf16.msra.mxu1 %v3550_v5  ;;  %v1144_v6 = vadd.f32 %v1143_v44, %v1142_v48  ;;  %v1149_v14 = vadd.f32 %v1148_v12, %v1147_v17  ;;  %v1291_v15 = vcombine.low %v1032_v61, %v1039_v2  ;;  %v1512_v39 = vrot.slane %v4186_v18, %v4122_v35  ;;  %v47_v60 = vld [vmem:[%s4710_s0 + $0x60] sm:$0xff]  ;;  %v3556_v52 = vld [vmem:[%s4713_s3 + $0x1c8] sm:$0xff]   ;;  %v3564_v2 = vld [vmem:[%s4713_s3 + $0x2f8] sm:$0xff]  }
  0x9f   :  { %v55_v7 = vld [vmem:[%s4710_s0 + $0xa0] sm:$0xff]  ;;  %3395 = vmatprep.subr.bf16.mxu1 %v3552_v49  ;;  %v1337_v26 = vrot.slane %v1283_v13, 7  ;;  %v1516_v31 = vrot.slane %v4186_v18, %v4178_v27  ;;  %v107_v16 = vunpack.c.l.bf16 %v39_v3  ;;  %v108_v23 = vunpack.c.h.bf16 %v39_v3  ;;  %v3558_v47 = vld [vmem:[%s4713_s3 + $0x188] sm:$0xff]   ;;  %v3585_v18 = vld [vmem:[%s4713_s3 + $0x210] sm:$0xff]  }
  0xa0   :  { %v4204_v33 = vld [vmem:[%s4712_s2] sm:$0xff]  ;;  %v1150_v17 = vrot.slane %v1149_v14, 1  ;;  %v1340_v19 = vrot.slane %v1291_v15, 6  ;;  %v123_v32 = vunpack.c.l.bf16 %v47_v60  ;;  %v124_v36 = vunpack.c.h.bf16 %v47_v60  ;;  %v4237_v1 = vld [vmem:[%s4711_s1 + $0x8] sm:$0xff] }
  0xa1   :  { %v63_v34 = vld [vmem:[%s4710_s0 + $0xe0] sm:$0xff]  ;;  %v1338_v24 = vsel %vm1305_vm0, %v1337_v26, %v1275_v4  ;;  %v139_v57 = vunpack.c.l.bf16 %v55_v7  ;;  %v140_v0 = vunpack.c.h.bf16 %v55_v7  ;;  %v235_v12 = vmax.f32 %v107_v16, 1e-06 }
  0xa2   :  { %v71_v22 = vld [vmem:[%s4710_s0 + $0x120] sm:$0xff]  ;;  %3396 = vmatpush3.bf16.msra.mxu1 %v3554_v59  ;;  %v1151_v42 = vadd.f32 %v1150_v17, %v1149_v14  ;;  %v1339_v54 = vsel %vm1307_vm1, %v1337_v26, %v1338_v24  ;;  %v155_v9 = vunpack.c.l.bf16 %v63_v34  ;;  %v156_v50 = vunpack.c.h.bf16 %v63_v34  ;;  %v3569_v14 = vld [vmem:[%s4713_s3 + $0x230] sm:$0xff]  }
  0xa3   :  { %v79_v25 = vld [vmem:[%s4710_s0 + $0x160] sm:$0xff]  ;;  %3397 = vmatprep.subr.bf16.mxu1 %v3556_v52  ;;  %v1341_v48 = vsel %vm1310_vm2, %v1340_v19, %v1339_v54  ;;  %v171_v40 = vunpack.c.l.bf16 %v71_v22  ;;  %v172_v41 = vunpack.c.h.bf16 %v71_v22  ;;  %v236_v3 = vmax.f32 %v108_v23, 1e-06 }
  0xa4   :  { %v87_v55 = vld [vmem:[%s4710_s0 + $0x1a0] sm:$0xff]  ;;  %v1299_v5 = vcombine.low %v1144_v6, %v1151_v42  ;;  %v1342_v8 = vsel %vm1312_vm3, %v1340_v19, %v1341_v48  ;;  %v187_v62 = vunpack.c.l.bf16 %v79_v25  ;;  %v188_v46 = vunpack.c.h.bf16 %v79_v25 }
  0xa5   :  { %v95_v28 = vld [vmem:[%s4710_s0 + $0x1e0] sm:$0xff]  ;;  %v203_v49 = vunpack.c.l.bf16 %v87_v55  ;;  %v204_v10 = vunpack.c.h.bf16 %v87_v55  ;;  %v251_v13 = vmax.f32 %v123_v32, 1e-06  ;;  %v252_v59 = vmax.f32 %v124_v36, 1e-06 }
  0xa6   :  { %v3560_v43 = vld [vmem:[%s4713_s3 + $0x1c0] sm:$0xff]   ;;  %v219_v11 = vunpack.c.l.bf16 %v95_v28  ;;  %v220_v58 = vunpack.c.h.bf16 %v95_v28  ;;  %3398 = vmatpush3.bf16.msra.mxu1 %v3558_v47  ;;  %v1343_v61 = vrot.slane %v1299_v5, 5  ;;  %v267_v6 = vmax.f32 %v139_v57, 1e-06 }
  0xa7   :  { %v3562_v44 = vld [vmem:[%s4713_s3 + $0x180] sm:$0xff]   ;;  %3399 = vmatprep.subr.bf16.mxu1 %v3560_v43  ;;  %v268_v60 = vmax.f32 %v140_v0, 1e-06  ;;  %v283_v7 = vmax.f32 %v155_v9, 1e-06  ;;  %v372_v47 = vmul.f32 %v235_v12, %v235_v12  ;;  %v373_v55 = vmul.f32 %v236_v3, %v236_v3 }
  0xa8   :  { %v1344_v15 = vsel %vm1315_vm4, %v1343_v61, %v1342_v8  ;;  %v284_v52 = vmax.f32 %v156_v50, 1e-06  ;;  %v299_v16 = vmax.f32 %v171_v40, 1e-06  ;;  %v300_v17 = vmax.f32 %v172_v41, 1e-06 }
  0xa9   :  { %v3638_v26 = vpop.eup %3637  ;;  %v1345_v34 = vsel %vm1317_vm5, %v1343_v61, %v1344_v15  ;;  %v315_v19 = vmax.f32 %v187_v62, 1e-06  ;;  %v316_v24 = vmax.f32 %v188_v46, 1e-06  ;;  %v331_v25 = vmax.f32 %v203_v49, 1e-06 }
  0xaa   :  { %3400 = vmatpush3.bf16.msra.mxu1 %v3562_v44  ;;  %v1567_v22 = vmul.f32 %v3638_v26, %v4164_v63  ;;  %1475 = vst [vmem:[#allocation5 + $0x10] sm:$0xff] %v3638_v26  ;;  %v1420_v23 = vmul.f32 0.0625, %v1345_v34  ;;  %v332_v32 = vmax.f32 %v204_v10, 1e-06  ;;  %v347_v36 = vmax.f32 %v219_v11, 1e-06 }
  0xab   :  { %3429 = vmatprep.subr.bf16.mxu1 %v3564_v2  ;;  %v348_v57 = vmax.f32 %v220_v58, 1e-06  ;;  %v388_v28 = vmul.f32 %v251_v13, %v251_v13  ;;  %v389_v0 = vmul.f32 %v252_v59, %v252_v59  ;;  %v404_v9 = vmul.f32 %v267_v6, %v267_v6  ;;  %v3567_v11 = vld [vmem:[%s4713_s3 + $0x270] sm:$0xff]  }
  0xac   :  { %v1659_v42 = vadd.f32 %v4175_v29, %v1567_v22  ;;  %v1428_v54 = vmax.f32 %v1420_v23, 1e-30  ;;  %v405_v43 = vmul.f32 %v268_v60, %v268_v60  ;;  %v420_v48 = vmul.f32 %v283_v7, %v283_v7  ;;  %v3565_v29 = vld [vmem:[%s4713_s3 + $0x238] sm:$0xff]  }
  0xad   :  { %v421_v40 = vmul.f32 %v284_v52, %v284_v52  ;;  %v436_v41 = vmul.f32 %v299_v16, %v299_v16  ;;  %v437_v5 = vmul.f32 %v300_v17, %v300_v17  ;;  %v452_v8 = vmul.f32 %v315_v19, %v315_v19 }
  0xae   :  { %v1675_v50 = vcombine.high %v1659_v42, %v1659_v42  ;;  %3639 = vlog2.f32 %v1428_v54  ;;  %v1693_v63 = vpack.c.bf16 %v1659_v42, %v1659_v42  ;;  %v453_v62 = vmul.f32 %v316_v24, %v316_v24 }
  0xaf   :  { %v468_v44 = vmul.f32 %v331_v25, %v331_v25  ;;  %v469_v49 = vmul.f32 %v332_v32, %v332_v32  ;;  %v484_v10 = vmul.f32 %v347_v36, %v347_v36  ;;  %v485_v58 = vmul.f32 %v348_v57, %v348_v57 }
  0xb0   :  { %v1694_v46 = vpack.c.bf16 %v1675_v50, %v1675_v50  ;;  %v500_v61 = vmul.f32 %v372_v47, %v235_v12  ;;  %v501_v2 = vmul.f32 %v373_v55, %v236_v3  ;;  %v516_v15 = vmul.f32 %v388_v28, %v251_v13  ;;  %v3571_v13 = vld [vmem:[%s4713_s3 + $0x268] sm:$0xff]  }
  0xb1   :  { %v517_v26 = vmul.f32 %v389_v0, %v252_v59  ;;  %v532_v34 = vmul.f32 %v404_v9, %v267_v6  ;;  %v533_v22 = vmul.f32 %v405_v43, %v268_v60  ;;  %v548_v23 = vmul.f32 %v420_v48, %v283_v7 }
  0xb2   :  { %2841 = vmatprep.mubr.bf16.mxu0 %v1694_v46  ;;  %v549_v42 = vmul.f32 %v421_v40, %v284_v52  ;;  %v564_v54 = vmul.f32 %v436_v41, %v299_v16  ;;  %v565_v50 = vmul.f32 %v437_v5, %v300_v17  ;;  %v580_v4 = vmul.f32 %v452_v8, %v315_v19 }
  0xb3   :  { %2842 = vmatmul.mubr.bf16.vlgmr.msra.gmra.mxu0 %v1693_v63  ;;  %v581_v56 = vmul.f32 %v453_v62, %v316_v24  ;;  %v596_v20 = vmul.f32 %v468_v44, %v331_v25  ;;  %v597_v12 = vmul.f32 %v469_v49, %v332_v32  ;;  %v612_v3 = vmul.f32 %v484_v10, %v347_v36  ;;  %v3573_v25 = vld [vmem:[%s4713_s3 + $0x228] sm:$0xff]   ;;  %v3577_v44 = vld [vmem:[%s4713_s3 + $0x220] sm:$0xff]  }
  0xb4   :  { %3408 = vmatpush3.bf16.msra.mxu0 %v3565_v29  ;;  %v613_v59 = vmul.f32 %v485_v58, %v348_v57  ;;  %v816_v6 = vadd.f32 %v516_v15, %v500_v61  ;;  %v823_v60 = vadd.f32 %v517_v26, %v501_v2  ;;  %v928_v7 = vadd.f32 %v548_v23, %v532_v34  ;;  %v3579_v58 = vld [vmem:[%s4713_s3 + $0x258] sm:$0xff]  }
  0xb5   :  { %3409 = vmatprep.subr.bf16.mxu0 %v3567_v11  ;;  %v935_v52 = vadd.f32 %v549_v42, %v533_v22  ;;  %v1040_v16 = vadd.f32 %v580_v4, %v564_v54  ;;  %v1047_v17 = vadd.f32 %v581_v56, %v565_v50  ;;  %v1152_v19 = vadd.f32 %v612_v3, %v596_v20  ;;  %v3575_v4 = vld [vmem:[%s4713_s3 + $0x260] sm:$0xff]  }
  0xb6   :  { %v817_v47 = vrot.slane %v816_v6, 4  ;;  %v824_v55 = vrot.slane %v823_v60, 4  ;;  %v929_v28 = vrot.slane %v928_v7, 4  ;;  %v1159_v24 = vadd.f32 %v613_v59, %v597_v12  ;;  %v3581_v59 = vld [vmem:[%s4713_s3 + $0x218] sm:$0xff]  }
  0xb7   :  { %v936_v32 = vrot.slane %v935_v52, 4  ;;  %v1041_v36 = vrot.slane %v1040_v16, 4  ;;  %v1048_v0 = vrot.slane %v1047_v17, 4  ;;  %v1153_v57 = vrot.slane %v1152_v19, 4 }
  0xb8   :  { %3410 = vmatpush3.bf16.msra.mxu0 %v3569_v14  ;;  %v818_v56 = vadd.f32 %v817_v47, %v816_v6  ;;  %v825_v20 = vadd.f32 %v824_v55, %v823_v60  ;;  %v930_v9 = vadd.f32 %v929_v28, %v928_v7  ;;  %v1160_v43 = vrot.slane %v1159_v24, 4 }
  0xb9   :  { %3411 = vmatprep.subr.bf16.mxu0 %v3571_v13  ;;  %v937_v48 = vadd.f32 %v936_v32, %v935_v52  ;;  %v1042_v63 = vadd.f32 %v1041_v36, %v1040_v16  ;;  %v1049_v14 = vadd.f32 %v1048_v0, %v1047_v17  ;;  %v1154_v40 = vadd.f32 %v1153_v57, %v1152_v19  ;;  %v3583_v52 = vld [vmem:[%s4713_s3 + $0x250] sm:$0xff]   ;;  %v40_v32 = vld [vmem:[%s4710_s0 + $0x28] sm:$0xff] }
  0xba   :  { %v819_v5 = vrot.slane %v818_v56, 2  ;;  %v826_v8 = vrot.slane %v825_v20, 2  ;;  %v931_v62 = vrot.slane %v930_v9, 2  ;;  %v1161_v46 = vadd.f32 %v1160_v43, %v1159_v24 }
  0xbb   :  { %v3640_v41 = vpop.eup %3639  ;;  %v938_v49 = vrot.slane %v937_v48, 2  ;;  %v1043_v10 = vrot.slane %v1042_v63, 2  ;;  %v1050_v11 = vrot.slane %v1049_v14, 2  ;;  %v1155_v26 = vrot.slane %v1154_v40, 2 }
  0xbc   :  { %v1440_v29 = vmul.f32 0.6931472, %v3640_v41  ;;  %3412 = vmatpush3.bf16.msra.mxu0 %v3573_v25  ;;  %v820_v61 = vadd.f32 %v819_v5, %v818_v56  ;;  %v827_v2 = vadd.f32 %v826_v8, %v825_v20  ;;  %v932_v15 = vadd.f32 %v931_v62, %v930_v9  ;;  %v4287_v25 = vld [vmem:[%s4712_s2 + $0x8] sm:$0xff] }
  0xbd   :  { %3413 = vmatprep.subr.bf16.mxu0 %v3575_v4  ;;  %v939_v22 = vadd.f32 %v938_v49, %v937_v48  ;;  %v1044_v23 = vadd.f32 %v1043_v10, %v1042_v63  ;;  %v1051_v42 = vadd.f32 %v1050_v11, %v1049_v14  ;;  %v1156_v3 = vadd.f32 %v1155_v26, %v1154_v40  ;;  %v48_v9 = vld [vmem:[%s4710_s0 + $0x68] sm:$0xff] }
  0xbe   :  { %v1452_v34 = vmul.f32 0.33333334, %v1440_v29  ;;  %v821_v54 = vrot.slane %v820_v61, 1  ;;  %v828_v50 = vrot.slane %v827_v2, 1  ;;  %v933_v12 = vrot.slane %v932_v15, 1  ;;  %v56_v14 = vld [vmem:[%s4710_s0 + $0xa8] sm:$0xff] }
  0xbf   :  { %v940_v6 = vrot.slane %v939_v22, 1  ;;  %v1045_v60 = vrot.slane %v1044_v23, 1  ;;  %v1052_v7 = vrot.slane %v1051_v42, 1  ;;  %v1157_v47 = vrot.slane %v1156_v3, 1  ;;  %v3587_v40 = vld [vmem:[%s4713_s3 + $0x248] sm:$0xff]  }
  0xc0   :  { %v1463_v13 = vmul.f32 1.442695, %v1452_v34  ;;  %3414 = vmatpush3.bf16.msra.mxu0 %v3577_v44  ;;  %v822_v16 = vadd.f32 %v821_v54, %v820_v61  ;;  %v829_v17 = vadd.f32 %v828_v50, %v827_v2  ;;  %v934_v19 = vadd.f32 %v933_v12, %v932_v15  ;;  %v64_v62 = vld [vmem:[%s4710_s0 + $0xe8] sm:$0xff] }
  0xc1   :  { %3415 = vmatprep.subr.bf16.mxu0 %v3579_v58  ;;  %v941_v55 = vadd.f32 %v940_v6, %v939_v22  ;;  %v1046_v28 = vadd.f32 %v1045_v60, %v1044_v23  ;;  %v1053_v24 = vadd.f32 %v1052_v7, %v1051_v42  ;;  %v4298_v36 = vcombine.low %v1512_v39, %v1516_v31  ;;  %v72_v29 = vld [vmem:[%s4710_s0 + $0x128] sm:$0xff] }
  0xc2   :  { %3641 = vpow2.f32 %v1463_v13  ;;  %v4717_v0 = vrot.slane %v4204_v33, %v4178_v27  ;;  %v4718_v57 = vrot.slane %v4204_v33, %v4122_v35  ;;  %v1158_v56 = vadd.f32 %v1157_v47, %v1156_v3  ;;  %v88_v2 = vld [vmem:[%s4710_s0 + $0x1a8] sm:$0xff]  ;;  %v3591_v3 = vld [vmem:[%s4713_s3 + $0x240] sm:$0xff]  }
  0xc3   :  { %v1162_v20 = vrot.slane %v1161_v46, 2  ;;  %v1276_v39 = vcombine.low %v822_v16, %v829_v17  ;;  %v1284_v31 = vcombine.low %v934_v19, %v941_v55  ;;  %v1292_v43 = vcombine.low %v1046_v28, %v1053_v24  ;;  %v3589_v22 = vld [vmem:[%s4713_s3 + $0x208] sm:$0xff]   ;;  %v3593_v19 = vld [vmem:[%s4713_s3 + $0x200] sm:$0xff]  }
  0xc4   :  { %v4306_v4 = vcombine.low %v4718_v57, %v4717_v0  ;;  %3416 = vmatpush3.bf16.msra.mxu0 %v3581_v59  ;;  %v4719_v48 = vrot.slane %v4237_v1, %v3885_v38  ;;  %v4720_v33 = vrot.slane %v4237_v1, %v3882_v37  ;;  %v1612_v5 = vrot.slane %v4287_v25, %v3882_v37  ;;  %v96_v42 = vld [vmem:[%s4710_s0 + $0x1e8] sm:$0xff]  ;;  %v3586_v37 = vld [vmem:[%s4713_s3 + $0x290] sm:$0xff]  }
  0xc5   :  { %3417 = vmatprep.subr.bf16.mxu0 %v3583_v52  ;;  %v1163_v41 = vadd.f32 %v1162_v20, %v1161_v46  ;;  %v1616_v8 = vrot.slane %v4287_v25, %v3885_v38  ;;  %v109_v44 = vunpack.c.l.bf16 %v40_v32  ;;  %v1346_v49 = vrot.slane %v1284_v31, 7  ;;  %v80_v46 = vld [vmem:[%s4710_s0 + $0x168] sm:$0xff]  ;;  %v49_v38 = vld [vmem:[%s4710_s0 + $0x70] sm:$0xff] }
  0xc6   :  { %v4320_v63 = vcombine.low %v4720_v33, %v4719_v48  ;;  %v1349_v10 = vrot.slane %v1292_v43, 6  ;;  %v110_v11 = vunpack.c.h.bf16 %v40_v32  ;;  %v125_v58 = vunpack.c.l.bf16 %v48_v9  ;;  %v3595_v43 = vld [vmem:[%s4713_s3 + $0x378] sm:$0xff]  }
  0xc7   :  { %v1164_v61 = vrot.slane %v1163_v41, 1  ;;  %v126_v15 = vunpack.c.h.bf16 %v48_v9  ;;  %v141_v26 = vunpack.c.l.bf16 %v56_v14  ;;  %v142_v34 = vunpack.c.h.bf16 %v56_v14 }
  0xc8   :  { %3418 = vmatpush3.bf16.msra.mxu0 %v3585_v18  ;;  %v1347_v23 = vsel %vm1305_vm0, %v1346_v49, %v1276_v39  ;;  %v157_v54 = vunpack.c.l.bf16 %v64_v62  ;;  %v158_v50 = vunpack.c.h.bf16 %v64_v62  ;;  %v173_v12 = vunpack.c.l.bf16 %v72_v29 }
  0xc9   :  { %3419 = vmatprep.subr.bf16.mxu0 %v3587_v40  ;;  %v1165_v13 = vadd.f32 %v1164_v61, %v1163_v41  ;;  %v1348_v59 = vsel %vm1307_vm1, %v1346_v49, %v1347_v23  ;;  %v174_v6 = vunpack.c.h.bf16 %v72_v29  ;;  %v189_v60 = vunpack.c.l.bf16 %v80_v46 }
  0xca   :  { %v1350_v7 = vsel %vm1310_vm2, %v1349_v10, %v1348_v59  ;;  %v190_v52 = vunpack.c.h.bf16 %v80_v46  ;;  %v205_v16 = vunpack.c.l.bf16 %v88_v2  ;;  %v206_v17 = vunpack.c.h.bf16 %v88_v2 }
  0xcb   :  { %v1300_v47 = vcombine.low %v1158_v56, %v1165_v13  ;;  %v1351_v55 = vsel %vm1312_vm3, %v1349_v10, %v1350_v7  ;;  %v221_v28 = vunpack.c.l.bf16 %v96_v42  ;;  %v237_v24 = vmax.f32 %v109_v44, 1e-06 }
  0xcc   :  { %3420 = vmatpush3.bf16.msra.mxu0 %v3589_v22  ;;  %v222_v32 = vunpack.c.h.bf16 %v96_v42  ;;  %v238_v0 = vmax.f32 %v110_v11, 1e-06  ;;  %v253_v57 = vmax.f32 %v125_v58, 1e-06  ;;  %v254_v20 = vmax.f32 %v126_v15, 1e-06 }
  0xcd   :  { %3421 = vmatprep.subr.bf16.mxu0 %v3591_v3  ;;  %v1352_v9 = vrot.slane %v1300_v47, 5  ;;  %v269_v18 = vmax.f32 %v141_v26, 1e-06  ;;  %v270_v39 = vmax.f32 %v142_v34, 1e-06  ;;  %v374_v31 = vmul.f32 %v237_v24, %v237_v24  ;;  %v3568_v47 = vld [vmem:[%s4713_s3 + $0x2f0] sm:$0xff]  }
  0xce   :  { %v285_v48 = vmax.f32 %v157_v54, 1e-06  ;;  %v286_v56 = vmax.f32 %v158_v50, 1e-06  ;;  %v301_v33 = vmax.f32 %v173_v12, 1e-06  ;;  %v375_v14 = vmul.f32 %v238_v0, %v238_v0 }
  0xcf   :  { %v3642_v40 = vpop.eup %3641  ;;  %v1353_v41 = vsel %vm1315_vm4, %v1352_v9, %v1351_v55  ;;  %v302_v62 = vmax.f32 %v174_v6, 1e-06  ;;  %v317_v29 = vmax.f32 %v189_v60, 1e-06  ;;  %v318_v44 = vmax.f32 %v190_v52, 1e-06 }
  0xd0   :  { %v1568_v49 = vmul.f32 %v3642_v40, %v4298_v36  ;;  %1476 = vst [vmem:[#allocation5 + $0x18] sm:$0xff] %v3642_v40  ;;  %3422 = vmatpush3.bf16.msra.mxu0 %v3593_v19  ;;  %v1354_v10 = vsel %vm1317_vm5, %v1352_v9, %v1353_v41  ;;  %v333_v46 = vmax.f32 %v205_v16, 1e-06  ;;  %v334_v11 = vmax.f32 %v206_v17, 1e-06 }
  0xd1   :  { %v1421_v58 = vmul.f32 0.0625, %v1354_v10  ;;  %v349_v61 = vmax.f32 %v221_v28, 1e-06  ;;  %v350_v2 = vmax.f32 %v222_v32, 1e-06  ;;  %v390_v15 = vmul.f32 %v253_v57, %v253_v57  ;;  %3451 = vmatprep.subr.bf16.mxu0 %v3595_v43 }
  0xd2   :  { %v1660_v26 = vadd.f32 %v4306_v4, %v1568_v49  ;;  %v391_v34 = vmul.f32 %v254_v20, %v254_v20  ;;  %v406_v22 = vmul.f32 %v269_v18, %v269_v18  ;;  %v407_v23 = vmul.f32 %v270_v39, %v270_v39  ;;  %v3566_v4 = vld [vmem:[%s4713_s3 + $0x2b8] sm:$0xff]  }
  0xd3   :  { %v1429_v42 = vmax.f32 %v1421_v58, 1e-30  ;;  %v422_v54 = vmul.f32 %v285_v48, %v285_v48  ;;  %v423_v50 = vmul.f32 %v286_v56, %v286_v56  ;;  %v438_v36 = vmul.f32 %v301_v33, %v301_v33 }
  0xd4   :  { %v1676_v12 = vcombine.high %v1660_v26, %v1660_v26  ;;  %v1695_v3 = vpack.c.bf16 %v1660_v26, %v1660_v26  ;;  %v439_v13 = vmul.f32 %v302_v62, %v302_v62  ;;  %v454_v59 = vmul.f32 %v317_v29, %v317_v29 }
  0xd5   :  { %3643 = vlog2.f32 %v1429_v42  ;;  %v455_v6 = vmul.f32 %v318_v44, %v318_v44  ;;  %v470_v60 = vmul.f32 %v333_v46, %v333_v46  ;;  %v471_v7 = vmul.f32 %v334_v11, %v334_v11 }
  0xd6   :  { %v1696_v52 = vpack.c.bf16 %v1676_v12, %v1676_v12  ;;  %v486_v16 = vmul.f32 %v349_v61, %v349_v61  ;;  %v487_v17 = vmul.f32 %v350_v2, %v350_v2  ;;  %v502_v19 = vmul.f32 %v374_v31, %v237_v24  ;;  %v3570_v24 = vld [vmem:[%s4713_s3 + $0x2b0] sm:$0xff]  }
  0xd7   :  { %v503_v55 = vmul.f32 %v375_v14, %v238_v0  ;;  %v518_v28 = vmul.f32 %v390_v15, %v253_v57  ;;  %v519_v32 = vmul.f32 %v391_v34, %v254_v20  ;;  %v534_v9 = vmul.f32 %v406_v22, %v269_v18  ;;  %v3572_v18 = vld [vmem:[%s4713_s3 + $0x2e8] sm:$0xff]  }
  0xd8   :  { %2881 = vmatprep.mubr.bf16.mxu1 %v1696_v52  ;;  %v535_v43 = vmul.f32 %v407_v23, %v270_v39  ;;  %v550_v40 = vmul.f32 %v422_v54, %v285_v48  ;;  %v551_v41 = vmul.f32 %v423_v50, %v286_v56  ;;  %v566_v49 = vmul.f32 %v438_v36, %v301_v33  ;;  %v3576_v50 = vld [vmem:[%s4713_s3 + $0x2e0] sm:$0xff]  }
  0xd9   :  { %2882 = vmatmul.mubr.bf16.vlgmr.msra.gmra.mxu1 %v1695_v3  ;;  %v567_v10 = vmul.f32 %v439_v13, %v302_v62  ;;  %v582_v58 = vmul.f32 %v454_v59, %v317_v29  ;;  %v583_v26 = vmul.f32 %v455_v6, %v318_v44  ;;  %v598_v42 = vmul.f32 %v470_v60, %v333_v46 }
  0xda   :  { %3430 = vmatpush3.bf16.msra.mxu1 %v3566_v4  ;;  %v599_v31 = vmul.f32 %v471_v7, %v334_v11  ;;  %v614_v0 = vmul.f32 %v486_v16, %v349_v61  ;;  %v615_v57 = vmul.f32 %v487_v17, %v350_v2  ;;  %v830_v20 = vadd.f32 %v518_v28, %v502_v19  ;;  %v3574_v61 = vld [vmem:[%s4713_s3 + $0x2a8] sm:$0xff]  }
  0xdb   :  { %3431 = vmatprep.subr.bf16.mxu1 %v3568_v47  ;;  %v837_v39 = vadd.f32 %v519_v32, %v503_v55  ;;  %v942_v48 = vadd.f32 %v550_v40, %v534_v9  ;;  %v949_v56 = vadd.f32 %v551_v41, %v535_v43  ;;  %v1054_v33 = vadd.f32 %v582_v58, %v566_v49  ;;  %v3578_v47 = vld [vmem:[%s4713_s3 + $0x2a0] sm:$0xff]   ;;  %v3580_v43 = vld [vmem:[%s4713_s3 + $0x2d8] sm:$0xff]  }
  0xdc   :  { %v831_v14 = vrot.slane %v830_v20, 4  ;;  %v1061_v62 = vadd.f32 %v583_v26, %v567_v10  ;;  %v1166_v29 = vadd.f32 %v614_v0, %v598_v42  ;;  %v1173_v44 = vadd.f32 %v615_v57, %v599_v31 }
  0xdd   :  { %v838_v46 = vrot.slane %v837_v39, 4  ;;  %v943_v15 = vrot.slane %v942_v48, 4  ;;  %v950_v34 = vrot.slane %v949_v56, 4  ;;  %v1055_v11 = vrot.slane %v1054_v33, 4 }
  0xde   :  { %3432 = vmatpush3.bf16.msra.mxu1 %v3570_v24  ;;  %v832_v2 = vadd.f32 %v831_v14, %v830_v20  ;;  %v1062_v22 = vrot.slane %v1061_v62, 4  ;;  %v1167_v23 = vrot.slane %v1166_v29, 4  ;;  %v1174_v54 = vrot.slane %v1173_v44, 4  ;;  %v3584_v14 = vld [vmem:[%s4713_s3 + $0x2d0] sm:$0xff]  }
  0xdf   :  { %3433 = vmatprep.subr.bf16.mxu1 %v3572_v18  ;;  %v839_v36 = vadd.f32 %v838_v46, %v837_v39  ;;  %v944_v12 = vadd.f32 %v943_v15, %v942_v48  ;;  %v951_v3 = vadd.f32 %v950_v34, %v949_v56  ;;  %v1056_v13 = vadd.f32 %v1055_v11, %v1054_v33  ;;  %v3582_v18 = vld [vmem:[%s4713_s3 + $0x298] sm:$0xff]  }
  0xe0   :  { %v833_v59 = vrot.slane %v832_v2, 2  ;;  %v1063_v6 = vadd.f32 %v1062_v22, %v1061_v62  ;;  %v1168_v60 = vadd.f32 %v1167_v23, %v1166_v29  ;;  %v1175_v7 = vadd.f32 %v1174_v54, %v1173_v44 }
  0xe1   :  { %v840_v52 = vrot.slane %v839_v36, 2  ;;  %v945_v4 = vrot.slane %v944_v12, 2  ;;  %v952_v16 = vrot.slane %v951_v3, 2  ;;  %v1057_v17 = vrot.slane %v1056_v13, 2 }
  0xe2   :  { %v3644_v19 = vpop.eup %3643  ;;  %3434 = vmatpush3.bf16.msra.mxu1 %v3574_v61  ;;  %v834_v55 = vadd.f32 %v833_v59, %v832_v2  ;;  %v1064_v28 = vrot.slane %v1063_v6, 2  ;;  %v1169_v32 = vrot.slane %v1168_v60, 2  ;;  %v1176_v9 = vrot.slane %v1175_v7, 2  ;;  %v41_v2 = vld [vmem:[%s4710_s0 + $0x30] sm:$0xff] }
  0xe3   :  { %3435 = vmatprep.subr.bf16.mxu1 %v3576_v50  ;;  %v1442_v40 = vmul.f32 0.6931472, %v3644_v19  ;;  %v841_v41 = vadd.f32 %v840_v52, %v839_v36  ;;  %v946_v49 = vadd.f32 %v945_v4, %v944_v12  ;;  %v953_v10 = vadd.f32 %v952_v16, %v951_v3  ;;  %v57_v12 = vld [vmem:[%s4710_s0 + $0xb0] sm:$0xff]  ;;  %v3588_v3 = vld [vmem:[%s4713_s3 + $0x2c8] sm:$0xff]  }
  0xe4   :  { %v835_v58 = vrot.slane %v834_v55, 1  ;;  %v1058_v26 = vadd.f32 %v1057_v17, %v1056_v13  ;;  %v1065_v42 = vadd.f32 %v1064_v28, %v1063_v6  ;;  %v1170_v24 = vadd.f32 %v1169_v32, %v1168_v60  ;;  %v65_v60 = vld [vmem:[%s4710_s0 + $0xf0] sm:$0xff] }
  0xe5   :  { %v1453_v31 = vmul.f32 0.33333334, %v1442_v40  ;;  %v842_v0 = vrot.slane %v841_v41, 1  ;;  %v947_v57 = vrot.slane %v946_v49, 1  ;;  %v954_v20 = vrot.slane %v953_v10, 1  ;;  %v73_v16 = vld [vmem:[%s4710_s0 + $0x130] sm:$0xff] }
  0xe6   :  { %3436 = vmatpush3.bf16.msra.mxu1 %v3578_v47  ;;  %v836_v39 = vadd.f32 %v835_v58, %v834_v55  ;;  %v1059_v48 = vrot.slane %v1058_v26, 1  ;;  %v1066_v56 = vrot.slane %v1065_v42, 1  ;;  %v1171_v33 = vrot.slane %v1170_v24, 1  ;;  %v81_v17 = vld [vmem:[%s4710_s0 + $0x170] sm:$0xff]  ;;  %v3590_v40 = vld [vmem:[%s4713_s3 + $0x288] sm:$0xff]  }
  0xe7   :  { %3437 = vmatprep.subr.bf16.mxu1 %v3580_v43  ;;  %v1465_v62 = vmul.f32 1.442695, %v1453_v31  ;;  %v843_v29 = vadd.f32 %v842_v0, %v841_v41  ;;  %v948_v44 = vadd.f32 %v947_v57, %v946_v49  ;;  %v955_v46 = vadd.f32 %v954_v20, %v953_v10  ;;  %v89_v28 = vld [vmem:[%s4710_s0 + $0x1b0] sm:$0xff] }
  0xe8   :  { %v4403_v15 = vcombine.low %v1612_v5, %v1616_v8  ;;  %v1060_v34 = vadd.f32 %v1059_v48, %v1058_v26  ;;  %v1067_v11 = vadd.f32 %v1066_v56, %v1065_v42  ;;  %v1177_v61 = vadd.f32 %v1176_v9, %v1175_v7  ;;  %v97_v10 = vld [vmem:[%s4710_s0 + $0x1f0] sm:$0xff]  ;;  %v3592_v42 = vld [vmem:[%s4713_s3 + $0x2c0] sm:$0xff]  }
  0xe9   :  { %3645 = vpow2.f32 %v1465_v62  ;;  %v1277_v22 = vcombine.low %v836_v39, %v843_v29  ;;  %v1285_v23 = vcombine.low %v948_v44, %v955_v46  ;;  %v1528_v54 = vrot.slane %v4237_v1, %v3897_v45  ;;  %v3594_v56 = vld [vmem:[%s4713_s3 + $0x280] sm:$0xff]  }
  0xea   :  { %3438 = vmatpush3.bf16.msra.mxu1 %v3582_v18  ;;  %v1172_v5 = vadd.f32 %v1171_v33, %v1170_v24  ;;  %v1178_v8 = vrot.slane %v1177_v61, 1  ;;  %v1293_v50 = vcombine.low %v1060_v34, %v1067_v11  ;;  %v1532_v36 = vrot.slane %v4237_v1, %v3906_v51  ;;  %v3596_v33 = vld [vmem:[%s4713_s3 + $0x3f8] sm:$0xff]   ;;  %v3617_v1 = vld [vmem:[%s4713_s3 + $0x310] sm:$0xff]  }
  0xeb   :  { %3439 = vmatprep.subr.bf16.mxu1 %v3584_v14  ;;  %v1355_v13 = vrot.slane %v1285_v23, 7  ;;  %v1620_v59 = vrot.slane %v4287_v25, %v3897_v45  ;;  %v1624_v6 = vrot.slane %v4287_v25, %v3906_v51  ;;  %v111_v7 = vunpack.c.l.bf16 %v41_v2  ;;  %v74_v51 = vld [vmem:[%s4710_s0 + $0x138] sm:$0xff] }
  0xec   :  { %v1179_v52 = vadd.f32 %v1178_v8, %v1177_v61  ;;  %v1358_v4 = vrot.slane %v1293_v50, 6  ;;  %v112_v19 = vunpack.c.h.bf16 %v41_v2  ;;  %v127_v47 = vunpack.c.l.bf16 %v49_v38 }
  0xed   :  { %v1356_v55 = vsel %vm1305_vm0, %v1355_v13, %v1277_v22  ;;  %v128_v32 = vunpack.c.h.bf16 %v49_v38  ;;  %v143_v9 = vunpack.c.l.bf16 %v57_v12  ;;  %v144_v43 = vunpack.c.h.bf16 %v57_v12 }
  0xee   :  { %3440 = vmatpush3.bf16.msra.mxu1 %v3586_v37  ;;  %v1301_v41 = vcombine.low %v1172_v5, %v1179_v52  ;;  %v1357_v49 = vsel %vm1307_vm1, %v1355_v13, %v1356_v55  ;;  %v159_v58 = vunpack.c.l.bf16 %v65_v60  ;;  %v160_v26 = vunpack.c.h.bf16 %v65_v60 }
  0xef   :  { %3441 = vmatprep.subr.bf16.mxu1 %v3588_v3  ;;  %v1359_v24 = vsel %vm1310_vm2, %v1358_v4, %v1357_v49  ;;  %v175_v31 = vunpack.c.l.bf16 %v73_v16  ;;  %v176_v0 = vunpack.c.h.bf16 %v73_v16  ;;  %v191_v57 = vunpack.c.l.bf16 %v81_v17 }
  0xf0   :  { %v1360_v20 = vsel %vm1312_vm3, %v1358_v4, %v1359_v24  ;;  %v1361_v18 = vrot.slane %v1301_v41, 5  ;;  %v192_v39 = vunpack.c.h.bf16 %v81_v17  ;;  %v207_v48 = vunpack.c.l.bf16 %v89_v28 }
  0xf1   :  { %v208_v14 = vunpack.c.h.bf16 %v89_v28  ;;  %v223_v62 = vunpack.c.l.bf16 %v97_v10  ;;  %v224_v29 = vunpack.c.h.bf16 %v97_v10  ;;  %v239_v44 = vmax.f32 %v111_v7, 1e-06 }
  0xf2   :  { %3442 = vmatpush3.bf16.msra.mxu1 %v3590_v40  ;;  %v1362_v46 = vsel %vm1315_vm4, %v1361_v18, %v1360_v20  ;;  %v240_v34 = vmax.f32 %v112_v19, 1e-06  ;;  %v255_v11 = vmax.f32 %v127_v47, 1e-06  ;;  %v256_v61 = vmax.f32 %v128_v32, 1e-06 }
  0xf3   :  { %3443 = vmatprep.subr.bf16.mxu1 %v3592_v42  ;;  %v1363_v2 = vsel %vm1317_vm5, %v1361_v18, %v1362_v46  ;;  %v271_v22 = vmax.f32 %v143_v9, 1e-06  ;;  %v272_v23 = vmax.f32 %v144_v43, 1e-06  ;;  %v287_v38 = vmax.f32 %v159_v58, 1e-06 }
  0xf4   :  { %v1422_v37 = vmul.f32 0.0625, %v1363_v2  ;;  %v288_v5 = vmax.f32 %v160_v26, 1e-06  ;;  %v303_v8 = vmax.f32 %v175_v31, 1e-06  ;;  %v376_v50 = vmul.f32 %v239_v44, %v239_v44 }
  0xf5   :  { %v304_v12 = vmax.f32 %v176_v0, 1e-06  ;;  %v319_v3 = vmax.f32 %v191_v57, 1e-06  ;;  %v320_v13 = vmax.f32 %v192_v39, 1e-06  ;;  %v377_v60 = vmul.f32 %v240_v34, %v240_v34 }
  0xf6   :  { %v4461_v7 = vpop.eup %3645  ;;  %3444 = vmatpush3.bf16.msra.mxu1 %v3594_v56  ;;  %v1430_v52 = vmax.f32 %v1422_v37, 1e-30  ;;  %v335_v4 = vmax.f32 %v207_v48, 1e-06  ;;  %v336_v16 = vmax.f32 %v208_v14, 1e-06  ;;  %v392_v17 = vmul.f32 %v255_v11, %v255_v11 }
  0xf7   :  { %v1569_v19 = vmul.f32 %v4461_v7, %v4320_v63  ;;  %1477 = vst [vmem:[#allocation5 + $0x20] sm:$0xff] %v4461_v7  ;;  %3473 = vmatprep.subr.bf16.mxu1 %v3596_v33  ;;  %v351_v47 = vmax.f32 %v223_v62, 1e-06  ;;  %v352_v55 = vmax.f32 %v224_v29, 1e-06  ;;  %v393_v28 = vmul.f32 %v256_v61, %v256_v61  ;;  %v3599_v29 = vld [vmem:[%s4713_s3 + $0x370] sm:$0xff]  }
  0xf8   :  { %3647 = vlog2.f32 %v1430_v52  ;;  %v408_v32 = vmul.f32 %v271_v22, %v271_v22  ;;  %v409_v9 = vmul.f32 %v272_v23, %v272_v23  ;;  %v424_v43 = vmul.f32 %v287_v38, %v287_v38 }
  0xf9   :  { %v1661_v40 = vadd.f32 %v4403_v15, %v1569_v19  ;;  %v425_v41 = vmul.f32 %v288_v5, %v288_v5  ;;  %v440_v49 = vmul.f32 %v303_v8, %v303_v8  ;;  %v441_v10 = vmul.f32 %v304_v12, %v304_v12  ;;  %v3597_v15 = vld [vmem:[%s4713_s3 + $0x338] sm:$0xff]  }
  0xfa   :  { %v456_v58 = vmul.f32 %v319_v3, %v319_v3  ;;  %v457_v26 = vmul.f32 %v320_v13, %v320_v13  ;;  %v472_v42 = vmul.f32 %v335_v4, %v335_v4  ;;  %v473_v24 = vmul.f32 %v336_v16, %v336_v16 }
  0xfb   :  { %v1677_v63 = vcombine.high %v1661_v40, %v1661_v40  ;;  %v1697_v31 = vpack.c.bf16 %v1661_v40, %v1661_v40  ;;  %v488_v0 = vmul.f32 %v351_v47, %v351_v47  ;;  %v489_v57 = vmul.f32 %v352_v55, %v352_v55 }
  0xfc   :  { %v504_v20 = vmul.f32 %v376_v50, %v239_v44  ;;  %v505_v18 = vmul.f32 %v377_v60, %v240_v34  ;;  %v520_v39 = vmul.f32 %v392_v17, %v255_v11  ;;  %v521_v48 = vmul.f32 %v393_v28, %v256_v61 }
  0xfd   :  { %v1698_v56 = vpack.c.bf16 %v1677_v63, %v1677_v63  ;;  %v536_v33 = vmul.f32 %v408_v32, %v271_v22  ;;  %v537_v14 = vmul.f32 %v409_v9, %v272_v23  ;;  %v552_v62 = vmul.f32 %v424_v43, %v287_v38  ;;  %v3601_v23 = vld [vmem:[%s4713_s3 + $0x330] sm:$0xff]  }
  0xfe   :  { %v553_v46 = vmul.f32 %v425_v41, %v288_v5  ;;  %v568_v2 = vmul.f32 %v440_v49, %v303_v8  ;;  %v569_v37 = vmul.f32 %v441_v10, %v304_v12  ;;  %v584_v52 = vmul.f32 %v456_v58, %v319_v3  ;;  %v3603_v3 = vld [vmem:[%s4713_s3 + $0x368] sm:$0xff]  }
  0xff   :  { %2921 = vmatprep.mubr.bf16.mxu0 %v1698_v56  ;;  %v585_v44 = vmul.f32 %v457_v26, %v320_v13  ;;  %v600_v34 = vmul.f32 %v472_v42, %v335_v4  ;;  %v601_v11 = vmul.f32 %v473_v24, %v336_v16  ;;  %v616_v61 = vmul.f32 %v488_v0, %v351_v47  ;;  %v3605_v10 = vld [vmem:[%s4713_s3 + $0x328] sm:$0xff]  }
 0x100   :  { %2922 = vmatmul.mubr.bf16.vlgmr.msra.gmra.mxu0 %v1697_v31  ;;  %v617_v50 = vmul.f32 %v489_v57, %v352_v55  ;;  %v844_v60 = vadd.f32 %v520_v39, %v504_v20  ;;  %v851_v17 = vadd.f32 %v521_v48, %v505_v18  ;;  %v956_v22 = vadd.f32 %v552_v62, %v536_v33  ;;  %v3607_v31 = vld [vmem:[%s4713_s3 + $0x360] sm:$0xff]  }
 0x101   :  { %3452 = vmatpush3.bf16.msra.mxu0 %v3597_v15  ;;  %v963_v38 = vadd.f32 %v553_v46, %v537_v14  ;;  %v1068_v5 = vadd.f32 %v584_v52, %v568_v2  ;;  %v1075_v8 = vadd.f32 %v585_v44, %v569_v37  ;;  %v1180_v12 = vadd.f32 %v616_v61, %v600_v34  ;;  %v3611_v34 = vld [vmem:[%s4713_s3 + $0x358] sm:$0xff]  }
 0x102   :  { %3453 = vmatprep.subr.bf16.mxu0 %v3599_v29  ;;  %v845_v13 = vrot.slane %v844_v60, 4  ;;  %v852_v4 = vrot.slane %v851_v17, 4  ;;  %v957_v16 = vrot.slane %v956_v22, 4  ;;  %v1187_v19 = vadd.f32 %v617_v50, %v601_v11  ;;  %v3609_v29 = vld [vmem:[%s4713_s3 + $0x320] sm:$0xff]  }
 0x103   :  { %v964_v47 = vrot.slane %v963_v38, 4  ;;  %v1069_v55 = vrot.slane %v1068_v5, 4  ;;  %v1076_v28 = vrot.slane %v1075_v8, 4  ;;  %v1181_v32 = vrot.slane %v1180_v12, 4 }
 0x104   :  { %v846_v9 = vadd.f32 %v845_v13, %v844_v60  ;;  %v853_v43 = vadd.f32 %v852_v4, %v851_v17  ;;  %v958_v40 = vadd.f32 %v957_v16, %v956_v22  ;;  %v1188_v41 = vrot.slane %v1187_v19, 4  ;;  %v3615_v16 = vld [vmem:[%s4713_s3 + $0x350] sm:$0xff]  }
 0x105   :  { %v3648_v49 = vpop.eup %3647  ;;  %3454 = vmatpush3.bf16.msra.mxu0 %v3601_v23  ;;  %v965_v58 = vadd.f32 %v964_v47, %v963_v38  ;;  %v1070_v26 = vadd.f32 %v1069_v55, %v1068_v5  ;;  %v1077_v42 = vadd.f32 %v1076_v28, %v1075_v8  ;;  %v1182_v24 = vadd.f32 %v1181_v32, %v1180_v12  ;;  %v3613_v12 = vld [vmem:[%s4713_s3 + $0x318] sm:$0xff]  }
 0x106   :  { %v1444_v63 = vmul.f32 0.6931472, %v3648_v49  ;;  %3455 = vmatprep.subr.bf16.mxu0 %v3603_v3  ;;  %v847_v0 = vrot.slane %v846_v9, 2  ;;  %v854_v57 = vrot.slane %v853_v43, 2  ;;  %v959_v20 = vrot.slane %v958_v40, 2  ;;  %v42_v55 = vld [vmem:[%s4710_s0 + $0x38] sm:$0xff] }
 0x107   :  { %v966_v18 = vrot.slane %v965_v58, 2  ;;  %v1071_v39 = vrot.slane %v1070_v26, 2  ;;  %v1078_v48 = vrot.slane %v1077_v42, 2  ;;  %v1183_v56 = vrot.slane %v1182_v24, 2 }
 0x108   :  { %v1454_v15 = vmul.f32 0.33333334, %v1444_v63  ;;  %v848_v33 = vadd.f32 %v847_v0, %v846_v9  ;;  %v855_v14 = vadd.f32 %v854_v57, %v853_v43  ;;  %v960_v62 = vadd.f32 %v959_v20, %v958_v40  ;;  %v50_v43 = vld [vmem:[%s4710_s0 + $0x78] sm:$0xff] }
 0x109   :  { %3456 = vmatpush3.bf16.msra.mxu0 %v3605_v10  ;;  %v967_v46 = vadd.f32 %v966_v18, %v965_v58  ;;  %v1072_v2 = vadd.f32 %v1071_v39, %v1070_v26  ;;  %v1079_v37 = vadd.f32 %v1078_v48, %v1077_v42  ;;  %v1184_v52 = vadd.f32 %v1183_v56, %v1182_v24  ;;  %v58_v40 = vld [vmem:[%s4710_s0 + $0xb8] sm:$0xff] }
 0x10a   :  { %v1467_v44 = vmul.f32 1.442695, %v1454_v15  ;;  %3457 = vmatprep.subr.bf16.mxu0 %v3607_v31  ;;  %v849_v11 = vrot.slane %v848_v33, 1  ;;  %v856_v61 = vrot.slane %v855_v14, 1  ;;  %v961_v50 = vrot.slane %v960_v62, 1  ;;  %v66_v58 = vld [vmem:[%s4710_s0 + $0xf8] sm:$0xff] }
 0x10b   :  { %v968_v60 = vrot.slane %v967_v46, 1  ;;  %v1073_v17 = vrot.slane %v1072_v2, 1  ;;  %v1080_v22 = vrot.slane %v1079_v37, 1  ;;  %v1185_v23 = vrot.slane %v1184_v52, 1  ;;  %v82_v26 = vld [vmem:[%s4710_s0 + $0x178] sm:$0xff] }
 0x10c   :  { %3649 = vpow2.f32 %v1467_v44  ;;  %v850_v38 = vadd.f32 %v849_v11, %v848_v33  ;;  %v857_v5 = vadd.f32 %v856_v61, %v855_v14  ;;  %v962_v8 = vadd.f32 %v961_v50, %v960_v62  ;;  %v90_v42 = vld [vmem:[%s4710_s0 + $0x1b8] sm:$0xff]  ;;  %v3621_v14 = vld [vmem:[%s4713_s3 + $0x308] sm:$0xff]   ;;  %v3625_v61 = vld [vmem:[%s4713_s3 + $0x300] sm:$0xff]  }
 0x10d   :  { %3458 = vmatpush3.bf16.msra.mxu0 %v3609_v29  ;;  %v969_v3 = vadd.f32 %v968_v60, %v967_v46  ;;  %v1074_v13 = vadd.f32 %v1073_v17, %v1072_v2  ;;  %v1081_v4 = vadd.f32 %v1080_v22, %v1079_v37  ;;  %v1189_v47 = vadd.f32 %v1188_v41, %v1187_v19  ;;  %v98_v57 = vld [vmem:[%s4710_s0 + $0x1f8] sm:$0xff]  ;;  %v3623_v37 = vld [vmem:[%s4713_s3 + $0x340] sm:$0xff]  }
 0x10e   :  { %3459 = vmatprep.subr.bf16.mxu0 %v3611_v34  ;;  %v1278_v28 = vcombine.low %v850_v38, %v857_v5  ;;  %v1554_v19 = vcombine.low %v1528_v54, %v1532_v36  ;;  %v4518_v41 = vcombine.low %v1620_v59, %v1624_v6  ;;  %v1186_v49 = vadd.f32 %v1185_v23, %v1184_v52  ;;  %v3619_v59 = vld [vmem:[%s4713_s3 + $0x348] sm:$0xff]  }
 0x10f   :  { %v1286_v32 = vcombine.low %v962_v8, %v969_v3  ;;  %v1294_v9 = vcombine.low %v1074_v13, %v1081_v4  ;;  %v1190_v10 = vrot.slane %v1189_v47, 2  ;;  %v113_v45 = vunpack.c.l.bf16 %v42_v55 }
 0x110   :  { %v114_v25 = vunpack.c.h.bf16 %v42_v55  ;;  %v129_v24 = vunpack.c.l.bf16 %v50_v43  ;;  %v130_v63 = vunpack.c.h.bf16 %v50_v43  ;;  %v145_v31 = vunpack.c.l.bf16 %v58_v40 }
 0x111   :  { %3460 = vmatpush3.bf16.msra.mxu0 %v3613_v12  ;;  %v1364_v54 = vrot.slane %v1286_v32, 7  ;;  %v1367_v36 = vrot.slane %v1294_v9, 6  ;;  %v1191_v6 = vadd.f32 %v1190_v10, %v1189_v47  ;;  %v146_v20 = vunpack.c.h.bf16 %v58_v40 }
 0x112   :  { %3461 = vmatprep.subr.bf16.mxu0 %v3615_v16  ;;  %v161_v18 = vunpack.c.l.bf16 %v66_v58  ;;  %v162_v39 = vunpack.c.h.bf16 %v66_v58  ;;  %v177_v15 = vunpack.c.l.bf16 %v74_v51  ;;  %v178_v33 = vunpack.c.h.bf16 %v74_v51 }
 0x113   :  { %v1365_v0 = vsel %vm1305_vm0, %v1364_v54, %v1278_v28  ;;  %v1192_v48 = vrot.slane %v1191_v6, 1  ;;  %v193_v29 = vunpack.c.l.bf16 %v82_v26  ;;  %v194_v46 = vunpack.c.h.bf16 %v82_v26 }
 0x114   :  { %v1366_v56 = vsel %vm1307_vm1, %v1364_v54, %v1365_v0  ;;  %v209_v2 = vunpack.c.l.bf16 %v90_v42  ;;  %v210_v34 = vunpack.c.h.bf16 %v90_v42  ;;  %v225_v11 = vunpack.c.l.bf16 %v98_v57 }
 0x115   :  { %3462 = vmatpush3.bf16.msra.mxu0 %v3617_v1  ;;  %v1368_v62 = vsel %vm1310_vm2, %v1367_v36, %v1366_v56  ;;  %v1193_v52 = vadd.f32 %v1192_v48, %v1191_v6  ;;  %v226_v50 = vunpack.c.h.bf16 %v98_v57  ;;  %v241_v60 = vmax.f32 %v113_v45, 1e-06 }
 0x116   :  { %3463 = vmatprep.subr.bf16.mxu0 %v3619_v59  ;;  %v1369_v44 = vsel %vm1312_vm3, %v1367_v36, %v1368_v62  ;;  %v242_v17 = vmax.f32 %v114_v25, 1e-06  ;;  %v257_v22 = vmax.f32 %v129_v24, 1e-06  ;;  %v258_v38 = vmax.f32 %v130_v63, 1e-06 }
 0x117   :  { %v1302_v23 = vcombine.low %v1186_v49, %v1193_v52  ;;  %v273_v5 = vmax.f32 %v145_v31, 1e-06  ;;  %v274_v8 = vmax.f32 %v146_v20, 1e-06  ;;  %v289_v3 = vmax.f32 %v161_v18, 1e-06 }
 0x118   :  { %v290_v13 = vmax.f32 %v162_v39, 1e-06  ;;  %v305_v4 = vmax.f32 %v177_v15, 1e-06  ;;  %v378_v16 = vmul.f32 %v241_v60, %v241_v60  ;;  %v306_v28 = vmax.f32 %v178_v33, 1e-06 }
 0x119   :  { %v4554_v12 = vpop.eup %3649  ;;  %3464 = vmatpush3.bf16.msra.mxu0 %v3621_v14  ;;  %v1370_v55 = vrot.slane %v1302_v23, 5  ;;  %v321_v32 = vmax.f32 %v193_v29, 1e-06  ;;  %v322_v9 = vmax.f32 %v194_v46, 1e-06  ;;  %v379_v49 = vmul.f32 %v242_v17, %v242_v17  ;;  %v3600_v39 = vld [vmem:[%s4713_s3 + $0x3f0] sm:$0xff]  }
 0x11a   :  { %v1570_v47 = vmul.f32 %v4554_v12, %v1554_v19  ;;  %1478 = vst [vmem:[#allocation5 + $0x28] sm:$0xff] %v4554_v12  ;;  %3465 = vmatprep.subr.bf16.mxu0 %v3623_v37  ;;  %v337_v43 = vmax.f32 %v209_v2, 1e-06  ;;  %v338_v40 = vmax.f32 %v210_v34, 1e-06  ;;  %v394_v19 = vmul.f32 %v257_v22, %v257_v22 }
 0x11b   :  { %v1371_v58 = vsel %vm1315_vm4, %v1370_v55, %v1369_v44  ;;  %v353_v1 = vmax.f32 %v225_v11, 1e-06  ;;  %v354_v54 = vmax.f32 %v226_v50, 1e-06  ;;  %v395_v51 = vmul.f32 %v258_v38, %v258_v38  ;;  %v3602_v44 = vld [vmem:[%s4713_s3 + $0x3b0] sm:$0xff]  }
 0x11c   :  { %v1662_v10 = vadd.f32 %v4518_v41, %v1570_v47  ;;  %v1372_v36 = vsel %vm1317_vm5, %v1370_v55, %v1371_v58  ;;  %v410_v45 = vmul.f32 %v273_v5, %v273_v5  ;;  %v411_v26 = vmul.f32 %v274_v8, %v274_v8  ;;  %v3598_v41 = vld [vmem:[%s4713_s3 + $0x3b8] sm:$0xff]  }
 0x11d   :  { %3466 = vmatpush3.bf16.msra.mxu0 %v3625_v61  ;;  %v1423_v6 = vmul.f32 0.0625, %v1372_v36  ;;  %v426_v42 = vmul.f32 %v289_v3, %v289_v3  ;;  %v427_v24 = vmul.f32 %v290_v13, %v290_v13  ;;  %v442_v63 = vmul.f32 %v305_v4, %v305_v4 }
 0x11e   :  { %v1678_v25 = vcombine.high %v1662_v10, %v1662_v10  ;;  %v1699_v59 = vpack.c.bf16 %v1662_v10, %v1662_v10  ;;  %v443_v31 = vmul.f32 %v306_v28, %v306_v28  ;;  %v458_v20 = vmul.f32 %v321_v32, %v321_v32  ;;  %v3608_v10 = vld [vmem:[%s4713_s3 + $0x3e0] sm:$0xff]  }
 0x11f   :  { %v1431_v57 = vmax.f32 %v1423_v6, 1e-30  ;;  %v459_v18 = vmul.f32 %v322_v9, %v322_v9  ;;  %v474_v48 = vmul.f32 %v337_v43, %v337_v43  ;;  %v475_v56 = vmul.f32 %v338_v40, %v338_v40 }
 0x120   :  { %v1700_v0 = vpack.c.bf16 %v1678_v25, %v1678_v25  ;;  %v490_v15 = vmul.f32 %v353_v1, %v353_v1  ;;  %v491_v33 = vmul.f32 %v354_v54, %v354_v54  ;;  %v506_v14 = vmul.f32 %v378_v16, %v241_v60  ;;  %v3604_v60 = vld [vmem:[%s4713_s3 + $0x3e8] sm:$0xff]  }
 0x121   :  { %3651 = vlog2.f32 %v1431_v57  ;;  %v507_v62 = vmul.f32 %v379_v49, %v242_v17  ;;  %v522_v29 = vmul.f32 %v394_v19, %v257_v22  ;;  %v523_v46 = vmul.f32 %v395_v51, %v258_v38 }
 0x122   :  { %2961 = vmatprep.mubr.bf16.mxu1 %v1700_v0  ;;  %v538_v2 = vmul.f32 %v410_v45, %v273_v5  ;;  %v539_v37 = vmul.f32 %v411_v26, %v274_v8  ;;  %v554_v52 = vmul.f32 %v426_v42, %v289_v3  ;;  %v555_v34 = vmul.f32 %v427_v24, %v290_v13 }
 0x123   :  { %2962 = vmatmul.mubr.bf16.vlgmr.msra.gmra.mxu1 %v1699_v59  ;;  %v570_v11 = vmul.f32 %v442_v63, %v305_v4  ;;  %v571_v61 = vmul.f32 %v443_v31, %v306_v28  ;;  %v586_v50 = vmul.f32 %v458_v20, %v321_v32  ;;  %v587_v17 = vmul.f32 %v459_v18, %v322_v9  ;;  %v3606_v28 = vld [vmem:[%s4713_s3 + $0x3a8] sm:$0xff]   ;;  %v3610_v31 = vld [vmem:[%s4713_s3 + $0x3a0] sm:$0xff]   ;;  %v3612_v18 = vld [vmem:[%s4713_s3 + $0x3d8] sm:$0xff]  }
 0x124   :  { %3474 = vmatpush3.bf16.msra.mxu1 %v3598_v41  ;;  %v602_v22 = vmul.f32 %v474_v48, %v337_v43  ;;  %v603_v23 = vmul.f32 %v475_v56, %v338_v40  ;;  %v618_v38 = vmul.f32 %v490_v15, %v353_v1  ;;  %v619_v5 = vmul.f32 %v491_v33, %v354_v54 }
 0x125   :  { %3475 = vmatprep.subr.bf16.mxu1 %v3600_v39  ;;  %v858_v8 = vadd.f32 %v522_v29, %v506_v14  ;;  %v865_v3 = vadd.f32 %v523_v46, %v507_v62  ;;  %v970_v16 = vadd.f32 %v554_v52, %v538_v2  ;;  %v977_v47 = vadd.f32 %v555_v34, %v539_v37 }
 0x126   :  { %v1082_v55 = vadd.f32 %v586_v50, %v570_v11  ;;  %v1089_v49 = vadd.f32 %v587_v17, %v571_v61  ;;  %v1194_v13 = vadd.f32 %v618_v38, %v602_v22  ;;  %v1201_v40 = vadd.f32 %v619_v5, %v603_v23  ;;  %v3614_v11 = vld [vmem:[%s4713_s3 + $0x398] sm:$0xff]   ;;  %v3616_v22 = vld [vmem:[%s4713_s3 + $0x3d0] sm:$0xff]  }
 0x127   :  { %v859_v32 = vrot.slane %v858_v8, 4  ;;  %v866_v9 = vrot.slane %v865_v3, 4  ;;  %v971_v43 = vrot.slane %v970_v16, 4  ;;  %v978_v58 = vrot.slane %v977_v47, 4 }
 0x128   :  { %v4573_v4 = vpop.f32.mrf.mxu0  ;;  %3476 = vmatpush3.bf16.msra.mxu1 %v3602_v44  ;;  %v1083_v1 = vrot.slane %v1082_v55, 4  ;;  %v1090_v54 = vrot.slane %v1089_v49, 4  ;;  %v1195_v36 = vrot.slane %v1194_v13, 4  ;;  %v1202_v59 = vrot.slane %v1201_v40, 4 }
 0x129   :  { %3477 = vmatprep.subr.bf16.mxu1 %v3604_v60  ;;  %v860_v51 = vadd.f32 %v859_v32, %v858_v8  ;;  %v867_v45 = vadd.f32 %v866_v9, %v865_v3  ;;  %v972_v25 = vadd.f32 %v971_v43, %v970_v16  ;;  %v979_v6 = vadd.f32 %v978_v58, %v977_v47  ;;  %v3618_v32 = vld [vmem:[%s4713_s3 + $0x390] sm:$0xff]  }
 0x12a   :  { %v4581_v19 = vpop.f32.mrf.mxu0  ;;  %v1084_v26 = vadd.f32 %v1083_v1, %v1082_v55  ;;  %v1091_v42 = vadd.f32 %v1090_v54, %v1089_v49  ;;  %v1196_v24 = vadd.f32 %v1195_v36, %v1194_v13  ;;  %v1203_v20 = vadd.f32 %v1202_v59, %v1201_v40  ;;  %v3620_v40 = vld [vmem:[%s4713_s3 + $0x3c8] sm:$0xff]  }
 0x12b   :  { %v861_v0 = vrot.slane %v860_v51, 2  ;;  %v868_v41 = vrot.slane %v867_v45, 2  ;;  %v973_v57 = vrot.slane %v972_v25, 2  ;;  %v980_v39 = vrot.slane %v979_v6, 2 }
 0x12c   :  { %v3338_v63 = vpop.f32.mrf.mxu0  ;;  %3478 = vmatpush3.bf16.msra.mxu1 %v3606_v28  ;;  %v1085_v48 = vrot.slane %v1084_v26, 2  ;;  %v1092_v56 = vrot.slane %v1091_v42, 2  ;;  %v1197_v15 = vrot.slane %v1196_v24, 2  ;;  %v1204_v46 = vrot.slane %v1203_v20, 2 }
 0x12d   :  { %3479 = vmatprep.subr.bf16.mxu1 %v3608_v10  ;;  %v862_v14 = vadd.f32 %v861_v0, %v860_v51  ;;  %v869_v62 = vadd.f32 %v868_v41, %v867_v45  ;;  %v974_v29 = vadd.f32 %v973_v57, %v972_v25  ;;  %v981_v37 = vadd.f32 %v980_v39, %v979_v6  ;;  %v4601_v51 = vld [vmem:[#allocation5] sm:$0xff]  ;;  %v4605_v6 = vld [vmem:[#allocation5 + $0x8] sm:$0xff] }
 0x12e   :  { %v3339_v33 = vpop.f32.mrf.mxu0  ;;  %v3652_v2 = vpop.eup %3651  ;;  %v1086_v52 = vadd.f32 %v1085_v48, %v1084_v26  ;;  %v1093_v44 = vadd.f32 %v1092_v56, %v1091_v42  ;;  %v1198_v34 = vadd.f32 %v1197_v15, %v1196_v24  ;;  %v1205_v43 = vadd.f32 %v1204_v46, %v1203_v20  ;;  %v3622_v42 = vld [vmem:[%s4713_s3 + $0x388] sm:$0xff]   ;;  %v3624_v63 = vld [vmem:[%s4713_s3 + $0x3c0] sm:$0xff]   ;;  %v4617_v20 = vld [vmem:[#allocation5 + $0x10] sm:$0xff] }
 0x12f   :  { %v1446_v61 = vmul.f32 0.6931472, %v3652_v2  ;;  %v863_v50 = vrot.slane %v862_v14, 1  ;;  %v870_v60 = vrot.slane %v869_v62, 1  ;;  %v975_v17 = vrot.slane %v974_v29, 1  ;;  %v4624_v48 = vld [vmem:[%s4711_s1 + $0x8] sm:$0xff] }
 0x130   :  { %3480 = vmatpush3.bf16.msra.mxu1 %v3610_v31  ;;  %v982_v23 = vrot.slane %v981_v37, 1  ;;  %v1087_v38 = vrot.slane %v1086_v52, 1  ;;  %v1094_v5 = vrot.slane %v1093_v44, 1  ;;  %v1199_v8 = vrot.slane %v1198_v34, 1 }
 0x131   :  { %3481 = vmatprep.subr.bf16.mxu1 %v3612_v18  ;;  %v1455_v3 = vmul.f32 0.33333334, %v1446_v61  ;;  %v864_v16 = vadd.f32 %v863_v50, %v862_v14  ;;  %v871_v47 = vadd.f32 %v870_v60, %v869_v62  ;;  %v976_v55 = vadd.f32 %v975_v17, %v974_v29  ;;  %v3626_v14 = vld [vmem:[%s4713_s3 + $0x380] sm:$0xff]  }
 0x132   :  { %v983_v49 = vadd.f32 %v982_v23, %v981_v37  ;;  %v1088_v13 = vadd.f32 %v1087_v38, %v1086_v52  ;;  %v1095_v28 = vadd.f32 %v1094_v5, %v1093_v44  ;;  %v1200_v54 = vadd.f32 %v1199_v8, %v1198_v34  ;;  %v4640_v37 = vld [vmem:[%s4712_s2 + $0x8] sm:$0xff]  ;;  %s3735_s2 = smov [#allocation5]  }
 0x133   :  { %v1469_v9 = vmul.f32 1.442695, %v1455_v3  ;;  %v1279_v10 = vcombine.low %v864_v16, %v871_v47  ;;  %v1206_v36 = vrot.slane %v1205_v43, 1  ;;  %v3050_v45 = vmul.f32 %v4601_v51, %v4601_v51  ;;  %s3166_s3 = sshll.u32 %s3735_s2, 4  ;;  %s3167_s3 = int_to_ptr.vmem [resolvable:$true] %s3166_s3 }
 0x134   :  { %3482 = vmatpush3.bf16.msra.mxu1 %v3614_v11  ;;  %v1287_v58 = vcombine.low %v976_v55, %v983_v49  ;;  %v1295_v1 = vcombine.low %v1088_v13, %v1095_v28  ;;  %v3051_v26 = vmul.f32 %v4605_v6, %v4605_v6  ;;  %v3052_v18 = vmul.f32 %v4617_v20, %v4617_v20  ;;  %s3671_s10 = scalar_lea.vmem %s3167_s3, 1024  ;;  %p3676_p1 = scmp.lt.s32.totalorder %s3167_s3, %s3167_s3 }
 0x135   :  { %3483 = vmatprep.subr.bf16.mxu1 %v3616_v22  ;;  %3653 = vpow2.f32 %v1469_v9  ;;  %v1207_v24 = vadd.f32 %v1206_v36, %v1205_v43  ;;  %v3066_v0 = vcombine.high %v3050_v45, %v3050_v45  ;;  %v1536_v56 = vrot.slane %v4624_v48, %v4013_v21  ;;  %p3672_p0 = scmp.ne.s32.totalorder %s3167_s3, %s3671_s10  ;;  %p3677_p2 = scmp.lt.s32.totalorder %s3671_s10, %s3671_s10 }
 0x136   :  { %v1373_v25 = vrot.slane %v1287_v58, 7  ;;  %v1376_v59 = vrot.slane %v1295_v1, 6  ;;  %v3067_v39 = vcombine.high %v3051_v26, %v3051_v26  ;;  %v1540_v15 = vrot.slane %v4624_v48, %v4074_v53 }
 0x137   :  { %v1303_v41 = vcombine.low %v1200_v54, %v1207_v24  ;;  %vm3082_vm6 = vcmask 1043456   ;;  %v1628_v52 = vrot.slane %v4640_v37, %v4013_v21  ;;  %v1632_v11 = vrot.slane %v4640_v37, %v4074_v53  ;;  %v4653_v53 = vld [vmem:[#allocation5 + $0x18] sm:$0xff]  ;;  %p3678_p3 = por %p3677_p2, %p3676_p1 }
 0x138   :  { %3484 = vmatpush3.bf16.msra.mxu1 %v3618_v32  ;;  %v1374_v31 = vsel %vm1305_vm0, %v1373_v25, %v1279_v10  ;;  %v3083_v46 = vsel %vm3082_vm6, %v3050_v45, 0.0  ;;  %v3084_v2 = vsel %vm3082_vm6, %v3066_v0, 0.0  ;;  %v3086_v34 = vsel %vm3082_vm6, %v3051_v26, 0.0 }
 0x139   :  { %3485 = vmatprep.subr.bf16.mxu1 %v3620_v40  ;;  %v1375_v57 = vsel %vm1307_vm1, %v1373_v25, %v1374_v31  ;;  %v1379_v29 = vrot.slane %v1303_v41, 5  ;;  %v3085_v44 = vadd.f32 %v3084_v2, %v3083_v46  ;;  %v3068_v50 = vcombine.high %v3052_v18, %v3052_v18  ;;  %p3679_p4 = pnand %p3678_p3, %p3672_p0 }
 0x13a   :  { %v1377_v33 = vsel %vm1310_vm2, %v1376_v59, %v1375_v57  ;;  %v3088_v60 = vsel %vm3082_vm6, %v3067_v39, 0.0  ;;  %v1555_v23 = vcombine.low %v1536_v56, %v1540_v15  ;;  %v3090_v5 = vsel %vm3082_vm6, %v3052_v18, 0.0 }
 0x13b   :  { %v1378_v62 = vsel %vm1312_vm3, %v1376_v59, %v1377_v33  ;;  %v3087_v22 = vadd.f32 %v3086_v34, %v3085_v44  ;;  %v3337_v21 = vadd.f32 %v4581_v19, %v4573_v4  ;;  %v1647_v3 = vcombine.low %v1628_v52, %v1632_v11 }
 0x13c   :  { %3486 = vmatpush3.bf16.msra.mxu1 %v3622_v42  ;;  %v1380_v61 = vsel %vm1315_vm4, %v1379_v29, %v1378_v62  ;;  %v3053_v47 = vmul.f32 %v4653_v53, %v4653_v53  ;;  %v3092_v55 = vsel %vm3082_vm6, %v3068_v50, 0.0  ;;  %v3054_v1 = vmul.f32 %v4461_v7, %v4461_v7 }
 0x13d   :  { %3487 = vmatprep.subr.bf16.mxu1 %v3624_v63  ;;  %v1381_v17 = vsel %vm1317_vm5, %v1379_v29, %v1380_v61  ;;  %v3089_v8 = vadd.f32 %v3088_v60, %v3087_v22  ;;  %v3055_v41 = vmul.f32 %v4554_v12, %v4554_v12  ;;  %v1544_v44 = vrot.slane %v4624_v48, %v4122_v35 }
 0x13e   :  { %v1424_v38 = vmul.f32 0.0625, %v1381_v17  ;;  %v3069_v19 = vcombine.high %v3053_v47, %v3053_v47  ;;  %v3094_v9 = vsel %vm3082_vm6, %v3053_v47, 0.0  ;;  %v3070_v25 = vcombine.high %v3054_v1, %v3054_v1 }
 0x13f   :  { %v3091_v13 = vadd.f32 %v3090_v5, %v3089_v8  ;;  %v3098_v59 = vsel %vm3082_vm6, %v3054_v1, 0.0  ;;  %v3102_v62 = vsel %vm3082_vm6, %v3055_v41, 0.0  ;;  %v1548_v34 = vrot.slane %v4624_v48, %v4178_v27 }
 0x140   :  { %3488 = vmatpush3.bf16.msra.mxu1 %v3626_v14  ;;  %v1432_v16 = vmax.f32 %v1424_v38, 1e-30  ;;  %v3096_v54 = vsel %vm3082_vm6, %v3069_v19, 0.0  ;;  %v3100_v57 = vsel %vm3082_vm6, %v3070_v25, 0.0  ;;  %v3071_v14 = vcombine.high %v3055_v41, %v3055_v41 }
 0x141   :  { %v3093_v32 = vadd.f32 %v3092_v55, %v3091_v13  ;;  %v1636_v50 = vrot.slane %v4640_v37, %v4122_v35  ;;  %v1640_v60 = vrot.slane %v4640_v37, %v4178_v27  ;;  %v1556_v22 = vcombine.low %v1544_v44, %v1548_v34 }
 0x142   :  { %v4658_v49 = vpop.eup %3653  ;;  %3655 = vlog2.f32 %v1432_v16  ;;  %v3104_v2 = vsel %vm3082_vm6, %v3071_v14, 0.0 }
 0x143   :  { %v1571_v28 = vmul.f32 %v4658_v49, %v1555_v23  ;;  %1479 = vst [vmem:[#allocation5 + $0x30] sm:$0xff] %v4658_v49  ;;  %v3095_v10 = vadd.f32 %v3094_v9, %v3093_v32  ;;  %v3056_v46 = vmul.f32 %v4658_v49, %v4658_v49  ;;  %v1648_v38 = vcombine.low %v1636_v50, %v1640_v60 }
 0x145   :  { %v1663_v4 = vadd.f32 %v1647_v3, %v1571_v28  ;;  %v3097_v36 = vadd.f32 %v3096_v54, %v3095_v10  ;;  %v3072_v11 = vcombine.high %v3056_v46, %v3056_v46  ;;  %v3106_v61 = vsel %vm3082_vm6, %v3056_v46, 0.0 }
 0x147   :  { %v1679_v43 = vcombine.high %v1663_v4, %v1663_v4  ;;  %v1701_v40 = vpack.c.bf16 %v1663_v4, %v1663_v4  ;;  %v3099_v63 = vadd.f32 %v3098_v59, %v3097_v36  ;;  %v3108_v23 = vsel %vm3082_vm6, %v3072_v11, 0.0 }
 0x149   :  { %v1702_v58 = vpack.c.bf16 %v1679_v43, %v1679_v43  ;;  %v3101_v15 = vadd.f32 %v3100_v57, %v3099_v63 }
 0x14b   :  { %3001 = vmatprep.mubr.bf16.mxu0 %v1702_v58  ;;  %v3103_v29 = vadd.f32 %v3102_v62, %v3101_v15 }
 0x14c   :  { %3002 = vmatmul.mubr.bf16.vlgmr.msra.gmra.mxu0 %v1701_v40 }
 0x14d   :  { %v3357_v45 = vpop.f32.mrf.mxu1  ;;  %v3105_v52 = vadd.f32 %v3104_v2, %v3103_v29 }
 0x14f   :  { %v3358_v26 = vpop.f32.mrf.mxu1  ;;  %v3656_v24 = vpop.eup %3655  ;;  %v3107_v17 = vadd.f32 %v3106_v61, %v3105_v52 }
 0x150   :  { %v3359_v42 = vadd.f32 %v3358_v26, %v3357_v45  ;;  %v1448_v0 = vmul.f32 0.6931472, %v3656_v24 }
 0x151   :  { %v3360_v31 = vpop.f32.mrf.mxu1 }
 0x152   :  { %v2804_v18 = vadd.f32 %v3359_v42, %v3337_v21  ;;  %v1456_v56 = vmul.f32 0.33333334, %v1448_v0  ;;  %v3109_v21 = vadd.f32 %v3108_v23, %v3107_v17 }
 0x153   :  { %v3361_v39 = vpop.f32.mrf.mxu1 }
 0x154   :  { %v1471_v33 = vmul.f32 1.442695, %v1456_v56 }
 0x156   :  { %3657 = vpow2.f32 %v1471_v33 }
 0x163   :  { %v4684_v5 = vpop.eup %3657 }
 0x164   :  { %v1572_v8 = vmul.f32 %v4684_v5, %v1556_v22  ;;  %1480 = vst [vmem:[#allocation5 + $0x38] sm:$0xff] %v4684_v5  ;;  %v3057_v48 = vmul.f32 %v4684_v5, %v4684_v5 }
 0x166   :  { %v1664_v3 = vadd.f32 %v1648_v38, %v1572_v8  ;;  %v3073_v35 = vcombine.high %v3057_v48, %v3057_v48  ;;  %v3110_v16 = vsel %vm3082_vm6, %v3057_v48, 0.0 }
 0x167   :  { %v3111_v27 = vadd.f32 %v3110_v16, %v3109_v21 }
 0x168   :  { %v1680_v37 = vcombine.high %v1664_v3, %v1664_v3  ;;  %v3112_v47 = vsel %vm3082_vm6, %v3073_v35, 0.0  ;;  %v1703_v55 = vpack.c.bf16 %v1664_v3, %v1664_v3 }
 0x169   :  { %v3113_v13 = vadd.f32 %v3112_v47, %v3111_v27 }
 0x16a   :  { %v1704_v28 = vpack.c.bf16 %v1680_v37, %v1680_v37 }
 0x16b   :  { %3114 = vadd.xlane.f32.xlu0 %v3113_v13 }
 0x16c   :  { %3041 = vmatprep.mubr.bf16.mxu1 %v1704_v28 }
 0x16d   :  { %3042 = vmatmul.mubr.bf16.vlgmr.msra.gmra.mxu1 %v1703_v55 }
 0x173   :  { %v3379_v32 = vpop.f32.mrf.mxu0 }
 0x175   :  { %v3380_v4 = vpop.f32.mrf.mxu0 }
 0x176   :  { %v3381_v19 = vadd.f32 %v3380_v4, %v3379_v32 }
 0x177   :  { %v3382_v9 = vpop.f32.mrf.mxu0 }
 0x178   :  { %v2844_v43 = vadd.f32 %v3381_v19, %v2804_v18 }
 0x179   :  { %v3383_v40 = vpop.f32.mrf.mxu0 }
 0x199   :  { %v3401_v10 = vpop.f32.mrf.mxu1 }
 0x19b   :  { %v3402_v58 = vpop.f32.mrf.mxu1 }
 0x19c   :  { %v3403_v1 = vadd.f32 %v3402_v58, %v3401_v10 }
 0x19d   :  { %v3404_v54 = vpop.f32.mrf.mxu1 }
 0x19e   :  { %v2884_v36 = vadd.f32 %v3403_v1, %v2844_v43 }
 0x19f   :  { %v3405_v45 = vpop.f32.mrf.mxu1 }
 0x1a0   :  { %3682 = shalt.err (!%p3679_p4)
}
 0x1a1   :  { %3169 = dma.vmem_to_hbm [thread:$0]  %s3167_s3, 1024, %s4715_s5, [#allocation6]   ;;  %v3736_v15 = vmov 839922192  }
 0x1a2   :  { %v3126_v33 = vunpack.c.l.s4 %v3736_v15  ;;  %s3737_s5 = smov [#allocation7]  }
 0x1a3   :  { %s3176_s13 = sshll.u32 %s3737_s5, 4  ;;  %s3177_s13 = int_to_ptr.vmem [resolvable:$true] %s3176_s13 }
 0x1a4   :  { %v3127_v14 = vunpack.c.0.s8 %v3126_v33  ;;  %s3691_s14 = scalar_lea.vmem %s3177_s13, 1024  ;;  %p3696_p6 = scmp.lt.s32.totalorder %s3177_s13, %s3177_s13 }
 0x1a5   :  { %p3692_p5 = scmp.ne.s32.totalorder %s3177_s13, %s3691_s14  ;;  %p3697_p7 = scmp.lt.s32.totalorder %s3691_s14, %s3691_s14 }
 0x1a6   :  { %v3130_v52 = vsub.s32 %v3127_v14, %v3861_v30 }
 0x1a7   :  { %p3698_p8 = por %p3697_p7, %p3696_p6 }
 0x1a9   :  { %p3699_p9 = pnand %p3698_p8, %p3692_p5 }
 0x1c0   :  { %v3423_v25 = vpop.f32.mrf.mxu0 }
 0x1c2   :  { %v3424_v59 = vpop.f32.mrf.mxu0 }
 0x1c3   :  { %v3425_v26 = vadd.f32 %v3424_v59, %v3423_v25 }
 0x1c4   :  { %v3426_v42 = vpop.f32.mrf.mxu0 }
 0x1c5   :  { %v2924_v24 = vadd.f32 %v3425_v26, %v2884_v36 }
 0x1c6   :  { %v3427_v63 = vpop.f32.mrf.mxu0 }
 0x1e3   :  { %v3445_v31 = vpop.f32.mrf.mxu1 }
 0x1e5   :  { %v3446_v0 = vpop.f32.mrf.mxu1 }
 0x1e6   :  { %v3447_v41 = vadd.f32 %v3446_v0, %v3445_v31 }
 0x1e7   :  { %v3448_v57 = vpop.f32.mrf.mxu1 }
 0x1e8   :  { %v2964_v18 = vadd.f32 %v3447_v41, %v2924_v24 }
 0x1e9   :  { %v3449_v39 = vpop.f32.mrf.mxu1 }
 0x1f4   :  { %v3115_v56 = vpop.xlane.xlu0 %3114 }
 0x1f5   :  { %3659 = vrsqrt.f32 %v3115_v56  ;;  %vm3118_vm7 = vcmp.eq.f32.partialorder %v3115_v56, inf  ;;  %v3121_v29 = vand.u32 2147483648, %v3115_v56  ;;  %vm3120_vm8 = vcmp.eq.f32.partialorder %v3115_v56, 0.0 }
 0x202   :  { %v3660_v62 = vpop.eup %3659 }
 0x203   :  { %v3117_v46 = vmul.f32 %v3660_v62, %v3115_v56 }
 0x205   :  { %v3119_v2 = vsel %vm3118_vm7, %v3115_v56, %v3117_v46 }
 0x206   :  { %v3122_v44 = vsel %vm3120_vm8, %v3121_v29, %v3119_v2 }
 0x207   :  { %v3123_v34 = vmax.f32 %v3122_v44, 1e-12 }
 0x209   :  { %v3131_v11 = vrot.slane %v3123_v34, %v3130_v52 }
 0x20b   :  { %3661 = vrcp.f32 %v3131_v11 }
 0x20c   :  { %v3467_v61 = vpop.f32.mrf.mxu0 }
 0x20e   :  { %v3468_v50 = vpop.f32.mrf.mxu0 }
 0x210   :  { %v3470_v60 = vpop.f32.mrf.mxu0 }
 0x212   :  { %v3471_v17 = vpop.f32.mrf.mxu0 }
 0x218   :  { %v3662_v22 = vpop.eup %3661 }
 0x219   :  { %v3134_v23 = vmul.f32 %v4601_v51, %v3662_v22  ;;  %v3135_v38 = vmul.f32 %v4605_v6, %v3662_v22  ;;  %v3136_v21 = vmul.f32 %v4617_v20, %v3662_v22  ;;  %v3137_v8 = vmul.f32 %v4653_v53, %v3662_v22 }
 0x21a   :  { %v3138_v30 = vmul.f32 %v3662_v22, %v4461_v7  ;;  %v3139_v48 = vmul.f32 %v3662_v22, %v4554_v12  ;;  %v3140_v3 = vmul.f32 %v3662_v22, %v4658_v49  ;;  %v3141_v35 = vmul.f32 %v3662_v22, %v4684_v5 }
 0x21b   :  { %3142 = vst [vmem:[#allocation7] sm:$0xff] %v3134_v23  ;;  %3143 = vst [vmem:[#allocation7 + $0x8] sm:$0xff] %v3135_v38 }
 0x21c   :  { %3144 = vst [vmem:[#allocation7 + $0x10] sm:$0xff] %v3136_v21  ;;  %3145 = vst [vmem:[#allocation7 + $0x18] sm:$0xff] %v3137_v8 }
 0x21d   :  { %3146 = vst [vmem:[#allocation7 + $0x20] sm:$0xff] %v3138_v30  ;;  %3147 = vst [vmem:[#allocation7 + $0x28] sm:$0xff] %v3139_v48 }
 0x21e   :  { %3148 = vst [vmem:[#allocation7 + $0x30] sm:$0xff] %v3140_v3  ;;  %3149 = vst [vmem:[#allocation7 + $0x38] sm:$0xff] %v3141_v35 }
 0x21f   :  { %3702 = shalt.err (!%p3699_p9)
}
 0x220   :  { %3179 = dma.vmem_to_hbm [thread:$0]  %s3177_s13, 1024, %s4716_s6, [#allocation6]   ;;  %v3469_v7 = vadd.f32 %v3468_v50, %v3467_v61 }
 0x221   :  { %s3738_s17 = smov [#allocation3]  }
 0x222   :  { %v3004_v51 = vadd.f32 %v3469_v7, %v2964_v18  ;;  %s3156_s18 = sshll.u32 %s3738_s17, 4  ;;  %s3157_s18 = int_to_ptr.vmem [resolvable:$true] %s3156_s18 }
 0x223   :  { %s3711_s19 = scalar_lea.vmem %s3157_s18, 64  ;;  %p3716_p11 = scmp.lt.s32.totalorder %s3157_s18, %s3157_s18 }
 0x224   :  { %p3712_p10 = scmp.ne.s32.totalorder %s3157_s18, %s3711_s19  ;;  %p3717_p12 = scmp.lt.s32.totalorder %s3711_s19, %s3711_s19 }
 0x226   :  { %p3718_p13 = por %p3717_p12, %p3716_p11 }
 0x228   :  { %p3719_p0 = pnand %p3718_p13, %p3712_p10 }
 0x22d   :  { %v3489_v12 = vpop.f32.mrf.mxu1 }
 0x22f   :  { %v3490_v6 = vpop.f32.mrf.mxu1 }
 0x230   :  { %v3491_v20 = vadd.f32 %v3490_v6, %v3489_v12 }
 0x231   :  { %v3492_v53 = vpop.f32.mrf.mxu1 }
 0x232   :  { %v3044_v49 = vadd.f32 %v3491_v20, %v3004_v51 }
 0x233   :  { %v3493_v5 = vpop.f32.mrf.mxu1 }
 0x234   :  { %3049 = vst [vmem:[#allocation3] sm:$0xf] %v3044_v49 }
 0x235   :  { %3722 = shalt.err (!%p3719_p0)
}
 0x236   :  { %3159 = dma.vmem_to_hbm [thread:$0]  %s3157_s18, 64, %s4714_s4, [#allocation4]  }
 0x237   :  { %3731 = dma.done.wait [#allocation4], 64  }
 0x238   :  { %3732 = vsyncadd [#allocation4], 4294967232 }
 0x239   :  { %3733 = dma.done.wait [#allocation6], 2048  }
 0x23a   :  { %3734 = vsyncadd [#allocation6], 4294965248 }
 0x23b   :  { %3189 = vsyncpa [#allocation4], 1 }
 0x23c   :  { %3190 = vsyncpa [#allocation6], 1 }

</bundles_post_ra>
